<compile_context>
chip_gen: v7x
topology: tpu7x:2x2x1
jax: 0.10.0
libtpu: 0.0.40
codegen_flags: <defaults>
</compile_context>

<pallas_src>
import numpy as np
import jax
import jax.numpy as jnp
from jax import lax
from jax.experimental import pallas as pl
from jax.experimental.pallas import tpu as pltpu


T_CHUNK = 8  # decode steps processed per grid iteration (amortizes per-step overhead)


# ----------------------------------------------------------------------------
# Pallas kernel: one TIME CHUNK (T_CHUNK decode steps) per grid iteration.
# Grid = (batch_tiles, time_chunks); LSTM state carried in VMEM scratch.
# ----------------------------------------------------------------------------
def decoder_chunk_kernel(
    bs_ref,            # SMEM (T_pad,) int32     batch_size_t per step (scalar prefetch)
    enc_ref,           # (BT, P, E)  bf16        sorted encoder output (resident)
    emb_ref,           # (T_CHUNK, BT, M) bf16   embeddings for this time chunk
    w_init, b_init,    # (E, 2D) bf16, (1, 2D) f32   fused [init_h | init_c]
    w_ea, b_ea,        # (E, A) bf16, (1, A) f32     encoder_att (bias includes b_da)
    w_hf, b_hf,        # (D, E+4D+A) bf16, (1, E+4D+A) f32  fused [f_beta | W_hh(ifgo) | decoder_att]
    w_fa,              # (1, A) f32                  full_att weight
    w_ie, w_ic,        # (M, 4D) bf16, (E, 4D) bf16  fused LSTM W_ih (embed / context)
    w_fc, b_fc,        # (D, V) bf16, (1, V) f32     fc
    preds_ref,         # out (T_CHUNK, BT, V) bf16
    alphas_ref,        # out (T_CHUNK, BT, P) f32
    h_scr, c_scr,      # scratch (BT, D) f32      LSTM state carried across time chunks
    att1_scr,          # scratch (BT, P, A) bf16  hoisted encoder_att projection
    hbuf_scr,          # scratch (T_CHUNK, BT, D) bf16  staged h_new for chunk-batched fc
    mask_scr,          # scratch (T_CHUNK, BT, 1) f32   per-step active-row mask
):
    bi = pl.program_id(0)                     # batch-tile index
    tc = pl.program_id(1)                     # time-chunk index
    BT, P, E = enc_ref.shape
    D = h_scr.shape[1]
    A = att1_scr.shape[2]
    n_chunk = emb_ref.shape[0]

    enc = enc_ref[...]                        # (BT, P, E) bf16

    # init_hidden_state + hoisted encoder attention projection (once per batch tile)
    @pl.when(tc == 0)
    def _init():
        mean_enc = jnp.mean(enc.astype(jnp.float32), axis=1).astype(jnp.bfloat16)
        hc0 = (jnp.dot(mean_enc, w_init[...],
                       preferred_element_type=jnp.float32) + b_init[...])
        h_scr[...] = hc0[:, :D]
        c_scr[...] = hc0[:, D:]
        att1_scr[...] = (jnp.dot(enc.reshape(BT * P, E), w_ea[...],
                                 preferred_element_type=jnp.float32)
                         .reshape(BT, P, A) + b_ea[...]).astype(jnp.bfloat16)

    att1 = att1_scr[...].astype(jnp.float32)  # (BT, P, A), loop-invariant
    t0 = tc * n_chunk
    row = bi * BT + lax.broadcasted_iota(jnp.int32, (BT, 1), 0)   # global row index

    def step(s, carry):
        h, c = carry                          # (BT, D) f32
        t = t0 + s
        bs_t = bs_ref[t]                      # rows sorted descending => first bs_t rows active
        active = row < bs_t                   # (BT, 1) bool

        h_bf = h.astype(jnp.bfloat16)

        # ---- all h-projections in one wide matmul (biases pre-fused) ----
        hproj = (jnp.dot(h_bf, w_hf[...], preferred_element_type=jnp.float32)
                 + b_hf[...])
        gate_pre = hproj[:, :E]                                  # f_beta pre-activation (+b_fb)
        h_gates = hproj[:, E:E + 4 * D]                          # LSTM h @ W_hh (ifgo) (+b_lstm)
        att2 = hproj[:, E + 4 * D:]                              # decoder_att (b_da folded into b_ea)

        # ---- Attention (softmax in f32) ----
        att_pre = jnp.maximum(att1 + att2[:, None, :], 0.0)      # ReLU, (BT, P, A)
        # full_att bias is softmax-shift-invariant -> dropped.
        att = jnp.sum(att_pre * w_fa[...], axis=-1)              # (BT, P)
        att = att - jnp.max(att, axis=1, keepdims=True)
        e = jnp.exp(att)
        alpha = e / jnp.sum(e, axis=1, keepdims=True)            # (BT, P)

        # attention-weighted encoding on the MXU
        awe = jnp.einsum("bqp,bpe->bqe",
                         alpha[:, None, :].astype(jnp.bfloat16), enc,
                         preferred_element_type=jnp.float32)[:, 0, :]   # (BT, E)

        # ---- Gate ----
        gate = jax.nn.sigmoid(gate_pre)
        awe = gate * awe

        # ---- LSTMCell (fused 4-gate matmuls) ----
        emb_t = emb_ref[s]                                       # (BT, M) bf16
        gates = (jnp.dot(emb_t, w_ie[...], preferred_element_type=jnp.float32)
                 + jnp.dot(awe.astype(jnp.bfloat16), w_ic[...],
                           preferred_element_type=jnp.float32)
                 + h_gates)                                      # (BT, 4D)
        i_g = jax.nn.sigmoid(gates[:, 0:D])
        f_g = jax.nn.sigmoid(gates[:, D:2 * D])
        g_g = jnp.tanh(gates[:, 2 * D:3 * D])
        o_g = jax.nn.sigmoid(gates[:, 3 * D:4 * D])
        c_new = f_g * c + i_g * g_g
        h_new = o_g * jnp.tanh(c_new)

        # Stage h_new / mask for the chunk-batched fc head; store masked alphas.
        hbuf_scr[s] = h_new.astype(jnp.bfloat16)
        mask_scr[s] = active.astype(jnp.float32)
        alphas_ref[s] = jnp.where(active, alpha, 0.0)            # (BT, P)

        # Active rows (sorted descending => reproduces `[:batch_size_t]` semantics)
        h = jnp.where(active, h_new, h)
        c = jnp.where(active, c_new, c)
        return h, c

    h_fin, c_fin = lax.fori_loop(0, n_chunk, step, (h_scr[...], c_scr[...]),
                                 unroll=True)
    h_scr[...] = h_fin
    c_scr[...] = c_fin

    # ---- chunk-batched fc head: one (T_CHUNK*BT, D) @ (D, V) matmul ----
    # TODO(synk): nn.Dropout(p=0.5) treated as identity (eval mode); stochastic
    # training-time dropout is not reproduced.
    h_all = hbuf_scr[...].reshape(n_chunk * BT, D)
    preds = (jnp.dot(h_all, w_fc[...], preferred_element_type=jnp.float32)
             + b_fc[...]).reshape(n_chunk, BT, -1)               # (T_CHUNK, BT, V) f32
    preds = jnp.where(mask_scr[...] > 0.0, preds, 0.0)
    preds_ref[...] = preds.astype(preds_ref.dtype)               # single lane-dense slab store


# ----------------------------------------------------------------------------
# Glue: sorting, embedding lookup, weight fusion, pallas_call wrapper.
# ----------------------------------------------------------------------------
def _prepare(params, encoder_out, encoded_captions, caption_lengths, t_chunk):
    B = encoder_out.shape[0]
    E = encoder_out.shape[-1]
    enc = encoder_out.reshape(B, -1, E)                    # (B, P, E)
    cl = np.asarray(caption_lengths).squeeze(1)
    sort_ind = np.argsort(-cl, kind="stable")              # descending sort
    cl_sorted = cl[sort_ind]
    enc_sorted = enc[jnp.asarray(sort_ind)]
    caps_sorted = encoded_captions[jnp.asarray(sort_ind)]
    decode_lengths = (cl_sorted - 1).tolist()
    T = int(max(decode_lengths))
    T_pad = ((T + t_chunk - 1) // t_chunk) * t_chunk
    emb = params["emb_table"][caps_sorted][:, :T, :]       # (B, T, M)
    if T_pad > T:
        emb = jnp.pad(emb, ((0, 0), (0, T_pad - T), (0, 0)))
    emb_tm = jnp.transpose(emb, (1, 0, 2))                 # (T_pad, B, M) time-major
    dl_np = np.asarray(decode_lengths, np.int32)
    # batch_size_t per step (PyTorch: sum([l > t for l in decode_lengths]))
    bs = (dl_np[None, :] > np.arange(T_pad)[:, None]).sum(axis=1).astype(np.int32)
    return enc_sorted, caps_sorted, emb_tm, bs, decode_lengths, T, T_pad, sort_ind


def _spec(shape, index_map, single_buffer=False):
    """BlockSpec; loop-invariant inputs get single buffering (halves VMEM)."""
    if single_buffer:
        try:
            return pl.BlockSpec(shape, index_map, pipeline_mode=pl.Buffered(1))
        except (TypeError, AttributeError):   # older jax without pipeline_mode
            pass
    return pl.BlockSpec(shape, index_map)


def decoder_forward(params, encoder_out, encoded_captions, caption_lengths,
                    t_chunk=T_CHUNK):
    (enc_sorted, caps_sorted, emb_tm, bs, decode_lengths, T, T_pad,
     sort_ind) = _prepare(params, encoder_out, encoded_captions,
                          caption_lengths, t_chunk)
    B, P, E = enc_sorted.shape
    M = emb_tm.shape[-1]
    D = params["w_hh"].shape[-1]
    A = params["w_ea"].shape[-1]
    V = params["w_fc"].shape[-1]
    BT = B   # one batch tile; use BT=B//2 on v7x so the "parallel" axis shards across TCs

    bf16 = lambda x: x.astype(jnp.bfloat16)

    # ---- fused weight layouts ----
    w_hh_flat = jnp.transpose(params["w_hh"], (1, 0, 2)).reshape(D, 4 * D)
    w_ie_flat = jnp.transpose(params["w_ih_e"], (1, 0, 2)).reshape(M, 4 * D)
    w_ic_flat = jnp.transpose(params["w_ih_c"], (1, 0, 2)).reshape(E, 4 * D)
    b_lstm_flat = jnp.transpose(params["b_lstm"], (1, 0, 2)).reshape(1, 4 * D)
    # init_h / init_c fused
    w_init = jnp.concatenate([params["w_ih0"], params["w_ic0"]], axis=1)   # (E, 2D)
    b_init = jnp.concatenate([params["b_ih0"], params["b_ic0"]], axis=1)   # (1, 2D)
    # decoder_att bias folded into encoder_att bias (they always sum)
    b_ea_c = params["b_ea"] + params["b_da"]                               # (1, A)
    # [f_beta | W_hh(ifgo) | decoder_att] with matching fused bias
    w_hf = jnp.concatenate([params["w_fb"], w_hh_flat, params["w_da"]], axis=1)
    b_hf = jnp.concatenate([params["b_fb"], b_lstm_flat,
                            jnp.zeros((1, A), jnp.float32)], axis=1)
    # full_att bias (b_fa) is shift-invariant under softmax -> dropped from kernel.

    weights = [
        bf16(w_init), b_init,
        bf16(params["w_ea"]), b_ea_c,
        bf16(w_hf), b_hf,
        params["w_fa"],
        bf16(w_ie_flat), bf16(w_ic_flat),
        bf16(params["w_fc"]), params["b_fc"],
    ]

    # index_maps receive the scalar-prefetch ref as a trailing positional arg.
    in_specs = (
        [_spec((BT, P, E), lambda bi, ti, bs_r: (bi, 0, 0), single_buffer=True),
         _spec((t_chunk, BT, M), lambda bi, ti, bs_r: (ti, bi, 0))]
        + [_spec(w.shape, lambda bi, ti, bs_r: (0, 0), single_buffer=True)
           for w in weights]
    )
    # NOTE: padding P to a multiple of 128 (masking padded pixels to -inf before
    # softmax) would make the alphas store lane-dense; left as-is for clarity.
    out_specs = [
        pl.BlockSpec((t_chunk, BT, V), lambda bi, ti, bs_r: (ti, bi, 0)),
        pl.BlockSpec((t_chunk, BT, P), lambda bi, ti, bs_r: (ti, bi, 0)),
    ]

    grid_spec = pltpu.PrefetchScalarGridSpec(
        num_scalar_prefetch=1,
        grid=(B // BT, T_pad // t_chunk),
        in_specs=in_specs,
        out_specs=out_specs,
        scratch_shapes=[pltpu.VMEM((BT, D), jnp.float32),          # h
                        pltpu.VMEM((BT, D), jnp.float32),          # c
                        pltpu.VMEM((BT, P, A), jnp.bfloat16),      # hoisted att1
                        pltpu.VMEM((t_chunk, BT, D), jnp.bfloat16),  # staged h_new
                        pltpu.VMEM((t_chunk, BT, 1), jnp.float32)],  # active mask
    )

    preds_tm, alphas_tm = pl.pallas_call(
        decoder_chunk_kernel,
        out_shape=(jax.ShapeDtypeStruct((T_pad, B, V), jnp.bfloat16),
                   jax.ShapeDtypeStruct((T_pad, B, P), jnp.float32)),
        grid_spec=grid_spec,
        compiler_params=pltpu.CompilerParams(
            dimension_semantics=("parallel", "arbitrary"),
            vmem_limit_bytes=64 * 1024 * 1024),
    )(jnp.asarray(bs, jnp.int32), bf16(enc_sorted), bf16(emb_tm), *weights)

    predictions = jnp.transpose(preds_tm.astype(jnp.float32), (1, 0, 2))[:, :T]  # (B, T, V)
    alphas = jnp.transpose(alphas_tm, (1, 0, 2))[:, :T]                          # (B, T, P)
    return predictions, caps_sorted, decode_lengths, alphas, jnp.asarray(sort_ind)


# ----------------------------------------------------------------------------
# Pure NumPy f32 reference (same math, same masking semantics).
# ----------------------------------------------------------------------------
def reference_forward(params, encoder_out, encoded_captions, caption_lengths):
    enc_sorted, _, emb_tm, _, decode_lengths, T, _, _ = _prepare(
        params, encoder_out, encoded_captions, caption_lengths, 1)
    p = {k: np.asarray(v) for k, v in params.items()}
    enc = np.asarray(enc_sorted)
    emb = np.asarray(emb_tm)                   # (T, B, M)
    dl = np.asarray(decode_lengths)
    B, P, E = enc.shape
    D = p["w_hh"].shape[-1]
    V = p["w_fc"].shape[-1]

    def sig(x):
        return 1.0 / (1.0 + np.exp(-x))

    mean_enc = enc.mean(axis=1)
    h = mean_enc @ p["w_ih0"] + p["b_ih0"][0]
    c = mean_enc @ p["w_ic0"] + p["b_ic0"][0]
    preds_all = np.zeros((B, T, V), np.float32)
    alphas_all = np.zeros((B, T, P), np.float32)
    for t in range(T):
        att1 = enc @ p["w_ea"] + p["b_ea"][0]
        att2 = h @ p["w_da"] + p["b_da"][0]
        att_pre = np.maximum(att1 + att2[:, None, :], 0.0)
        att = (att_pre * p["w_fa"]).sum(-1) + p["b_fa"][0, 0]
        att = att - att.max(axis=1, keepdims=True)
        e = np.exp(att)
        alpha = e / e.sum(axis=1, keepdims=True)
        awe = (enc * alpha[:, :, None]).sum(axis=1)
        gate = sig(h @ p["w_fb"] + p["b_fb"][0])
        awe = gate * awe
        emb_t = emb[t]
        gates = [emb_t @ p["w_ih_e"][k] + awe @ p["w_ih_c"][k]
                 + h @ p["w_hh"][k] + p["b_lstm"][k, 0] for k in range(4)]
        i_g, f_g, g_g, o_g = sig(gates[0]), sig(gates[1]), np.tanh(gates[2]), sig(gates[3])
        c_new = f_g * c + i_g * g_g
        h_new = o_g * np.tanh(c_new)
        active = (dl > t)[:, None]
        h = np.where(active, h_new, h)
        c = np.where(active, c_new, c)
        preds = h_new @ p["w_fc"] + p["b_fc"][0]
        preds_all[:, t] = np.where(active, preds, 0.0)
        alphas_all[:, t] = np.where(active, alpha, 0.0)
    return preds_all, alphas_all


# ----------------------------------------------------------------------------
if __name__ == "__main__":
    # Small deterministic config (128-aligned D/A/E/V for lane-aligned slices)
    B, IMG, E = 2, 4, 128            # batch, enc_image_size, encoder_dim -> P = 16
    D, A, M, V = 128, 128, 32, 128   # decoder_dim, attention_dim, embed_dim, vocab_size
    MAX_CAP = 17

    key = jax.random.PRNGKey(0)
    ks = jax.random.split(key, 24)
    u = lambda k, shape: jax.random.uniform(k, shape, jnp.float32, -0.1, 0.1)

    params = dict(
        emb_table=u(ks[0], (V, M)),              # embedding (init_weights: uniform(-0.1, 0.1))
        w_ih0=u(ks[1], (E, D)), b_ih0=u(ks[2], (1, D)),     # init_h
        w_ic0=u(ks[3], (E, D)), b_ic0=u(ks[4], (1, D)),     # init_c
        w_ea=u(ks[5], (E, A)), b_ea=u(ks[6], (1, A)),       # encoder_att
        w_da=u(ks[7], (D, A)), b_da=u(ks[8], (1, A)),       # decoder_att
        w_fa=u(ks[9], (1, A)), b_fa=u(ks[10], (1, 1)),      # full_att
        w_fb=u(ks[11], (D, E)), b_fb=u(ks[12], (1, E)),     # f_beta
        w_ih_e=u(ks[13], (4, M, D)),                        # LSTM W_ih (embedding part)
        w_ih_c=u(ks[14], (4, E, D)),                        # LSTM W_ih (context part)
        w_hh=u(ks[15], (4, D, D)),                          # LSTM W_hh
        b_lstm=u(ks[16], (4, 1, D)),                        # LSTM b_ih + b_hh combined
        w_fc=u(ks[17], (D, V)),                             # fc weight (uniform(-0.1, 0.1))
        b_fc=jnp.zeros((1, V), jnp.float32),                # fc bias (init_weights: 0)
    )

    encoder_out = jax.random.normal(ks[18], (B, IMG, IMG, E), jnp.float32)
    encoded_captions = jax.random.randint(ks[19], (B, MAX_CAP), 0, V, dtype=jnp.int32)
    caption_lengths = jnp.array([[10], [17]], jnp.int32)    # decode lengths 9, 16 -> T=16

    preds, caps_sorted, dec_lens, alphas, sort_ind = decoder_forward(
        params, encoder_out, encoded_captions, caption_lengths)
    jax.block_until_ready((preds, alphas))

    ref_preds, ref_alphas = reference_forward(
        params, encoder_out, encoded_captions, caption_lengths)

    np.testing.assert_allclose(np.asarray(preds), ref_preds, rtol=2e-2, atol=2e-2)
    np.testing.assert_allclose(np.asarray(alphas), ref_alphas, rtol=2e-2, atol=2e-2)

    print("KERNEL_OK")
</pallas_src>

<mosaic_0001>
module attributes {stable_mosaic.version = 11 : i64} {
  func.func @decoder_chunk_kernel(%arg0: i32, %arg1: i32, %arg2: memref<16xi32, #tpu.memory_space<smem>>, %arg3: memref<2x16x128xbf16, #tpu.memory_space<vmem>>, %arg4: memref<8x2x32xbf16, #tpu.memory_space<vmem>>, %arg5: memref<128x256xbf16, #tpu.memory_space<vmem>>, %arg6: memref<1x256xf32, #tpu.memory_space<vmem>>, %arg7: memref<128x128xbf16, #tpu.memory_space<vmem>>, %arg8: memref<1x128xf32, #tpu.memory_space<vmem>>, %arg9: memref<128x768xbf16, #tpu.memory_space<vmem>>, %arg10: memref<1x768xf32, #tpu.memory_space<vmem>>, %arg11: memref<1x128xf32, #tpu.memory_space<vmem>>, %arg12: memref<32x512xbf16, #tpu.memory_space<vmem>>, %arg13: memref<128x512xbf16, #tpu.memory_space<vmem>>, %arg14: memref<128x128xbf16, #tpu.memory_space<vmem>>, %arg15: memref<1x128xf32, #tpu.memory_space<vmem>>, %arg16: memref<8x2x128xbf16, #tpu.memory_space<vmem>>, %arg17: memref<8x2x16xf32, #tpu.memory_space<vmem>>, %arg18: memref<2x128xf32, #tpu.memory_space<vmem>>, %arg19: memref<2x128xf32, #tpu.memory_space<vmem>>, %arg20: memref<2x16x128xbf16, #tpu.memory_space<vmem>>, %arg21: memref<8x2x128xbf16, #tpu.memory_space<vmem>>, %arg22: memref<8x2x1xf32, #tpu.memory_space<vmem>>) attributes {dimension_semantics = [#tpu.dimension_semantics<parallel>, #tpu.dimension_semantics<arbitrary>], iteration_bounds = array<i64: 1, 2>, scalar_prefetch = 1 : i64, scratch_operands = 5 : i64, tpu.core_type = #tpu.core_type<tc>, window_params = [{pipeline_mode = #tpu.pipeline_mode<synchronous>, transform_indices = @transform_0, window_bounds = array<i64: 2, 16, 128>}, {transform_indices = @transform_1, window_bounds = array<i64: 8, 2, 32>}, {pipeline_mode = #tpu.pipeline_mode<synchronous>, transform_indices = @transform_2, window_bounds = array<i64: 128, 256>}, {pipeline_mode = #tpu.pipeline_mode<synchronous>, transform_indices = @transform_3, window_bounds = array<i64: 1, 256>}, {pipeline_mode = #tpu.pipeline_mode<synchronous>, transform_indices = @transform_4, window_bounds = array<i64: 128, 128>}, {pipeline_mode = #tpu.pipeline_mode<synchronous>, transform_indices = @transform_5, window_bounds = array<i64: 1, 128>}, {pipeline_mode = #tpu.pipeline_mode<synchronous>, transform_indices = @transform_6, window_bounds = array<i64: 128, 768>}, {pipeline_mode = #tpu.pipeline_mode<synchronous>, transform_indices = @transform_7, window_bounds = array<i64: 1, 768>}, {pipeline_mode = #tpu.pipeline_mode<synchronous>, transform_indices = @transform_8, window_bounds = array<i64: 1, 128>}, {pipeline_mode = #tpu.pipeline_mode<synchronous>, transform_indices = @transform_9, window_bounds = array<i64: 32, 512>}, {pipeline_mode = #tpu.pipeline_mode<synchronous>, transform_indices = @transform_10, window_bounds = array<i64: 128, 512>}, {pipeline_mode = #tpu.pipeline_mode<synchronous>, transform_indices = @transform_11, window_bounds = array<i64: 128, 128>}, {pipeline_mode = #tpu.pipeline_mode<synchronous>, transform_indices = @transform_12, window_bounds = array<i64: 1, 128>}, {transform_indices = @transform_13, window_bounds = array<i64: 8, 2, 128>}, {transform_indices = @transform_14, window_bounds = array<i64: 8, 2, 16>}]} {
    %c0 = arith.constant 0 : index
    %c0_0 = arith.constant 0 : index
    %c0_1 = arith.constant 0 : index
    %0 = vector.load %arg3[%c0, %c0_0, %c0_1] : memref<2x16x128xbf16, #tpu.memory_space<vmem>>, vector<2x16x128xbf16>
    %c0_i32 = arith.constant 0 : i32
    %1 = arith.cmpi eq, %arg1, %c0_i32 : i32
    %2 = arith.extui %1 : i1 to i32
    %c0_i32_2 = arith.constant 0 : i32
    %3 = arith.cmpi ne, %2, %c0_i32_2 : i32
    scf.if %3 {
      %856 = arith.extf %0 : vector<2x16x128xbf16> to vector<2x16x128xf32>
      %cst_280 = arith.constant dense<0.000000e+00> : vector<2x128xf32>
      %857 = vector.multi_reduction <add>, %856, %cst_280 [1] : vector<2x16x128xf32> to vector<2x128xf32>
      %cst_281 = arith.constant 1.600000e+01 : f32
      %858 = vector.broadcast %cst_281 : f32 to vector<2x128xf32>
      %859 = arith.divf %857, %858 : vector<2x128xf32>
      %860 = arith.truncf %859 : vector<2x128xf32> to vector<2x128xbf16>
      %c0_282 = arith.constant 0 : index
      %c0_283 = arith.constant 0 : index
      %861 = vector.load %arg5[%c0_282, %c0_283] : memref<128x256xbf16, #tpu.memory_space<vmem>>, vector<128x256xbf16>
      %cst_284 = arith.constant dense<0.000000e+00> : vector<2x256xf32>
      %862 = tpu.matmul %860, %861, %cst_284 {dimension_numbers = #tpu.dot_dimension_numbers<[1], [0], [0], [1], [0, 0, 1, 1], [], []>} : vector<2x128xbf16>, vector<128x256xbf16>, vector<2x256xf32> -> vector<2x256xf32>
      %c0_285 = arith.constant 0 : index
      %c0_286 = arith.constant 0 : index
      %863 = vector.load %arg6[%c0_285, %c0_286] : memref<1x256xf32, #tpu.memory_space<vmem>>, vector<1x256xf32>
      %864 = vector.broadcast %863 : vector<1x256xf32> to vector<2x256xf32>
      %865 = arith.addf %862, %864 : vector<2x256xf32>
      %866 = vector.extract_strided_slice %865 {offsets = [0, 0], sizes = [2, 128], strides = [1, 1]} : vector<2x256xf32> to vector<2x128xf32>
      %c0_287 = arith.constant 0 : index
      %c0_288 = arith.constant 0 : index
      %867 = vector.load %arg18[%c0_287, %c0_288] : memref<2x128xf32, #tpu.memory_space<vmem>>, vector<2x128xf32>
      tpu.vector_store %arg18[%c0_287, %c0_288], %866 {strides = array<i32>} : memref<2x128xf32, #tpu.memory_space<vmem>>, vector<2x128xf32>,
      %868 = vector.extract_strided_slice %865 {offsets = [0, 128], sizes = [2, 128], strides = [1, 1]} : vector<2x256xf32> to vector<2x128xf32>
      %c0_289 = arith.constant 0 : index
      %c0_290 = arith.constant 0 : index
      %869 = vector.load %arg19[%c0_289, %c0_290] : memref<2x128xf32, #tpu.memory_space<vmem>>, vector<2x128xf32>
      tpu.vector_store %arg19[%c0_289, %c0_290], %868 {strides = array<i32>} : memref<2x128xf32, #tpu.memory_space<vmem>>, vector<2x128xf32>,
      %870 = vector.shape_cast %0 : vector<2x16x128xbf16> to vector<32x128xbf16>
      %c0_291 = arith.constant 0 : index
      %c0_292 = arith.constant 0 : index
      %871 = vector.load %arg7[%c0_291, %c0_292] : memref<128x128xbf16, #tpu.memory_space<vmem>>, vector<128x128xbf16>
      %cst_293 = arith.constant dense<0.000000e+00> : vector<32x128xf32>
      %872 = tpu.matmul %870, %871, %cst_293 {dimension_numbers = #tpu.dot_dimension_numbers<[1], [0], [0], [1], [0, 0, 1, 1], [], []>} : vector<32x128xbf16>, vector<128x128xbf16>, vector<32x128xf32> -> vector<32x128xf32>
      %873 = vector.shape_cast %872 : vector<32x128xf32> to vector<2x16x128xf32>
      %c0_294 = arith.constant 0 : index
      %c0_295 = arith.constant 0 : index
      %874 = vector.load %arg8[%c0_294, %c0_295] : memref<1x128xf32, #tpu.memory_space<vmem>>, vector<1x128xf32>
      %875 = vector.shape_cast %874 : vector<1x128xf32> to vector<1x1x128xf32>
      %876 = vector.broadcast %875 : vector<1x1x128xf32> to vector<2x16x128xf32>
      %877 = arith.addf %873, %876 : vector<2x16x128xf32>
      %878 = arith.truncf %877 : vector<2x16x128xf32> to vector<2x16x128xbf16>
      %c0_296 = arith.constant 0 : index
      %c0_297 = arith.constant 0 : index
      %c0_298 = arith.constant 0 : index
      %879 = vector.load %arg20[%c0_296, %c0_297, %c0_298] : memref<2x16x128xbf16, #tpu.memory_space<vmem>>, vector<2x16x128xbf16>
      tpu.vector_store %arg20[%c0_296, %c0_297, %c0_298], %878 {strides = array<i32>} : memref<2x16x128xbf16, #tpu.memory_space<vmem>>, vector<2x16x128xbf16>,
    } else {
    }
    %c0_3 = arith.constant 0 : index
    %c0_4 = arith.constant 0 : index
    %c0_5 = arith.constant 0 : index
    %4 = vector.load %arg20[%c0_3, %c0_4, %c0_5] : memref<2x16x128xbf16, #tpu.memory_space<vmem>>, vector<2x16x128xbf16>
    %5 = arith.extf %4 : vector<2x16x128xbf16> to vector<2x16x128xf32>
    %c8_i32 = arith.constant 8 : i32
    %6 = arith.muli %arg1, %c8_i32 : i32
    %c2_i32 = arith.constant 2 : i32
    %7 = arith.muli %arg0, %c2_i32 : i32
    %8 = tpu.iota {dimensions = array<i32: 0>} : vector<2x1xi32>
    %9 = vector.broadcast %7 : i32 to vector<2x1xi32>
    %10 = arith.addi %9, %8 : vector<2x1xi32>
    %c0_6 = arith.constant 0 : index
    %c0_7 = arith.constant 0 : index
    %11 = vector.load %arg18[%c0_6, %c0_7] : memref<2x128xf32, #tpu.memory_space<vmem>>, vector<2x128xf32>
    %c0_8 = arith.constant 0 : index
    %c0_9 = arith.constant 0 : index
    %12 = vector.load %arg19[%c0_8, %c0_9] : memref<2x128xf32, #tpu.memory_space<vmem>>, vector<2x128xf32>
    %c0_i32_10 = arith.constant 0 : i32
    %13 = arith.addi %6, %c0_i32_10 : i32
    %14 = arith.index_cast %13 : i32 to index
    %15 = memref.load %arg2[%14] : memref<16xi32, #tpu.memory_space<smem>>
    %16 = vector.broadcast %15 : i32 to vector<2x1xi32>
    %17 = arith.cmpi slt, %10, %16 : vector<2x1xi32>
    %18 = arith.truncf %11 : vector<2x128xf32> to vector<2x128xbf16>
    %c0_11 = arith.constant 0 : index
    %c0_12 = arith.constant 0 : index
    %19 = vector.load %arg9[%c0_11, %c0_12] : memref<128x768xbf16, #tpu.memory_space<vmem>>, vector<128x768xbf16>
    %cst = arith.constant dense<0.000000e+00> : vector<2x768xf32>
    %20 = tpu.matmul %18, %19, %cst {dimension_numbers = #tpu.dot_dimension_numbers<[1], [0], [0], [1], [0, 0, 1, 1], [], []>} : vector<2x128xbf16>, vector<128x768xbf16>, vector<2x768xf32> -> vector<2x768xf32>
    %c0_13 = arith.constant 0 : index
    %c0_14 = arith.constant 0 : index
    %21 = vector.load %arg10[%c0_13, %c0_14] : memref<1x768xf32, #tpu.memory_space<vmem>>, vector<1x768xf32>
    %22 = vector.broadcast %21 : vector<1x768xf32> to vector<2x768xf32>
    %23 = arith.addf %20, %22 : vector<2x768xf32>
    %24 = vector.extract_strided_slice %23 {offsets = [0, 0], sizes = [2, 128], strides = [1, 1]} : vector<2x768xf32> to vector<2x128xf32>
    %25 = vector.extract_strided_slice %23 {offsets = [0, 128], sizes = [2, 512], strides = [1, 1]} : vector<2x768xf32> to vector<2x512xf32>
    %26 = vector.extract_strided_slice %23 {offsets = [0, 640], sizes = [2, 128], strides = [1, 1]} : vector<2x768xf32> to vector<2x128xf32>
    %27 = vector.shape_cast %26 : vector<2x128xf32> to vector<2x1x128xf32>
    %28 = vector.broadcast %27 : vector<2x1x128xf32> to vector<2x16x128xf32>
    %29 = arith.addf %5, %28 : vector<2x16x128xf32>
    %cst_15 = arith.constant 0.000000e+00 : f32
    %30 = vector.broadcast %cst_15 : f32 to vector<2x16x128xf32>
    %31 = arith.maximumf %29, %30 : vector<2x16x128xf32>
    %c0_16 = arith.constant 0 : index
    %c0_17 = arith.constant 0 : index
    %32 = vector.load %arg11[%c0_16, %c0_17] : memref<1x128xf32, #tpu.memory_space<vmem>>, vector<1x128xf32>
    %33 = vector.shape_cast %32 : vector<1x128xf32> to vector<1x1x128xf32>
    %34 = vector.broadcast %33 : vector<1x1x128xf32> to vector<2x16x128xf32>
    %35 = arith.mulf %31, %34 : vector<2x16x128xf32>
    %cst_18 = arith.constant dense<0.000000e+00> : vector<2x16xf32>
    %36 = vector.multi_reduction <add>, %35, %cst_18 [2] : vector<2x16x128xf32> to vector<2x16xf32>
    %cst_19 = arith.constant dense<0xFF800000> : vector<2xf32>
    %37 = vector.multi_reduction <maximumf>, %36, %cst_19 [1] : vector<2x16xf32> to vector<2xf32>
    %38 = vector.shape_cast %37 : vector<2xf32> to vector<2x1xf32>
    %39 = vector.broadcast %38 : vector<2x1xf32> to vector<2x16xf32>
    %40 = arith.subf %36, %39 : vector<2x16xf32>
    %41 = math.exp %40 : vector<2x16xf32>
    %cst_20 = arith.constant dense<0.000000e+00> : vector<2xf32>
    %42 = vector.multi_reduction <add>, %41, %cst_20 [1] : vector<2x16xf32> to vector<2xf32>
    %43 = vector.shape_cast %42 : vector<2xf32> to vector<2x1xf32>
    %44 = vector.broadcast %43 : vector<2x1xf32> to vector<2x16xf32>
    %45 = arith.divf %41, %44 : vector<2x16xf32>
    %46 = vector.shape_cast %45 : vector<2x16xf32> to vector<2x1x16xf32>
    %47 = arith.truncf %46 : vector<2x1x16xf32> to vector<2x1x16xbf16>
    "tpu.trace_start"() <{level = 10 : i32, message = "bqp,bpe->bqe"}> : () -> ()
    %cst_21 = arith.constant dense<0.000000e+00> : vector<2x1x128xf32>
    %48 = tpu.matmul %47, %0, %cst_21 {dimension_numbers = #tpu.dot_dimension_numbers<[2], [1], [1], [2], [0, 0, 0, 1, 1, 2], [0], [0]>} : vector<2x1x16xbf16>, vector<2x16x128xbf16>, vector<2x1x128xf32> -> vector<2x1x128xf32>
    "tpu.trace_stop"() : () -> ()
    %49 = vector.shape_cast %48 : vector<2x1x128xf32> to vector<2x128xf32>
    %50 = arith.negf %24 : vector<2x128xf32>
    %51 = math.exp %50 : vector<2x128xf32>
    %cst_22 = arith.constant 1.000000e+00 : f32
    %52 = vector.broadcast %cst_22 : f32 to vector<2x128xf32>
    %53 = arith.addf %52, %51 : vector<2x128xf32>
    %54 = arith.divf %52, %53 : vector<2x128xf32>
    %55 = arith.mulf %54, %49 : vector<2x128xf32>
    %56 = arith.index_cast %c0_i32_10 : i32 to index
    %c0_23 = arith.constant 0 : index
    %c0_24 = arith.constant 0 : index
    %57 = vector.load %arg4[%56, %c0_23, %c0_24] : memref<8x2x32xbf16, #tpu.memory_space<vmem>>, vector<1x2x32xbf16>
    %58 = vector.shape_cast %57 : vector<1x2x32xbf16> to vector<2x32xbf16>
    %c0_25 = arith.constant 0 : index
    %c0_26 = arith.constant 0 : index
    %59 = vector.load %arg12[%c0_25, %c0_26] : memref<32x512xbf16, #tpu.memory_space<vmem>>, vector<32x512xbf16>
    %cst_27 = arith.constant dense<0.000000e+00> : vector<2x512xf32>
    %60 = tpu.matmul %58, %59, %cst_27 {dimension_numbers = #tpu.dot_dimension_numbers<[1], [0], [0], [1], [0, 0, 1, 1], [], []>} : vector<2x32xbf16>, vector<32x512xbf16>, vector<2x512xf32> -> vector<2x512xf32>
    %61 = arith.truncf %55 : vector<2x128xf32> to vector<2x128xbf16>
    %c0_28 = arith.constant 0 : index
    %c0_29 = arith.constant 0 : index
    %62 = vector.load %arg13[%c0_28, %c0_29] : memref<128x512xbf16, #tpu.memory_space<vmem>>, vector<128x512xbf16>
    %cst_30 = arith.constant dense<0.000000e+00> : vector<2x512xf32>
    %63 = tpu.matmul %61, %62, %cst_30 {dimension_numbers = #tpu.dot_dimension_numbers<[1], [0], [0], [1], [0, 0, 1, 1], [], []>} : vector<2x128xbf16>, vector<128x512xbf16>, vector<2x512xf32> -> vector<2x512xf32>
    %64 = arith.addf %60, %63 : vector<2x512xf32>
    %65 = arith.addf %64, %25 : vector<2x512xf32>
    %66 = vector.extract_strided_slice %65 {offsets = [0, 0], sizes = [2, 128], strides = [1, 1]} : vector<2x512xf32> to vector<2x128xf32>
    %67 = arith.negf %66 : vector<2x128xf32>
    %68 = math.exp %67 : vector<2x128xf32>
    %cst_31 = arith.constant 1.000000e+00 : f32
    %69 = vector.broadcast %cst_31 : f32 to vector<2x128xf32>
    %70 = arith.addf %69, %68 : vector<2x128xf32>
    %71 = arith.divf %69, %70 : vector<2x128xf32>
    %72 = vector.extract_strided_slice %65 {offsets = [0, 128], sizes = [2, 128], strides = [1, 1]} : vector<2x512xf32> to vector<2x128xf32>
    %73 = arith.negf %72 : vector<2x128xf32>
    %74 = math.exp %73 : vector<2x128xf32>
    %cst_32 = arith.constant 1.000000e+00 : f32
    %75 = vector.broadcast %cst_32 : f32 to vector<2x128xf32>
    %76 = arith.addf %75, %74 : vector<2x128xf32>
    %77 = arith.divf %75, %76 : vector<2x128xf32>
    %78 = vector.extract_strided_slice %65 {offsets = [0, 256], sizes = [2, 128], strides = [1, 1]} : vector<2x512xf32> to vector<2x128xf32>
    %79 = math.tanh %78 : vector<2x128xf32>
    %80 = vector.extract_strided_slice %65 {offsets = [0, 384], sizes = [2, 128], strides = [1, 1]} : vector<2x512xf32> to vector<2x128xf32>
    %81 = arith.negf %80 : vector<2x128xf32>
    %82 = math.exp %81 : vector<2x128xf32>
    %cst_33 = arith.constant 1.000000e+00 : f32
    %83 = vector.broadcast %cst_33 : f32 to vector<2x128xf32>
    %84 = arith.addf %83, %82 : vector<2x128xf32>
    %85 = arith.divf %83, %84 : vector<2x128xf32>
    %86 = arith.mulf %77, %12 : vector<2x128xf32>
    %87 = arith.mulf %71, %79 : vector<2x128xf32>
    %88 = arith.addf %86, %87 : vector<2x128xf32>
    %89 = math.tanh %88 : vector<2x128xf32>
    %90 = arith.mulf %85, %89 : vector<2x128xf32>
    %91 = arith.truncf %90 : vector<2x128xf32> to vector<2x128xbf16>
    %92 = arith.index_cast %c0_i32_10 : i32 to index
    %c0_34 = arith.constant 0 : index
    %c0_35 = arith.constant 0 : index
    %93 = vector.load %arg21[%92, %c0_34, %c0_35] : memref<8x2x128xbf16, #tpu.memory_space<vmem>>, vector<1x2x128xbf16>
    %94 = vector.shape_cast %93 : vector<1x2x128xbf16> to vector<2x128xbf16>
    %95 = vector.shape_cast %91 : vector<2x128xbf16> to vector<1x2x128xbf16>
    tpu.vector_store %arg21[%92, %c0_34, %c0_35], %95 {strides = array<i32>} : memref<8x2x128xbf16, #tpu.memory_space<vmem>>, vector<1x2x128xbf16>,
    %96 = arith.extui %17 : vector<2x1xi1> to vector<2x1xi32>
    %97 = arith.sitofp %96 : vector<2x1xi32> to vector<2x1xf32>
    %98 = arith.index_cast %c0_i32_10 : i32 to index
    %c0_36 = arith.constant 0 : index
    %c0_37 = arith.constant 0 : index
    %99 = vector.load %arg22[%98, %c0_36, %c0_37] : memref<8x2x1xf32, #tpu.memory_space<vmem>>, vector<1x2x1xf32>
    %100 = vector.shape_cast %99 : vector<1x2x1xf32> to vector<2x1xf32>
    %101 = vector.shape_cast %97 : vector<2x1xf32> to vector<1x2x1xf32>
    tpu.vector_store %arg22[%98, %c0_36, %c0_37], %101 {strides = array<i32>} : memref<8x2x1xf32, #tpu.memory_space<vmem>>, vector<1x2x1xf32>,
    %cst_38 = arith.constant 0.000000e+00 : f32
    %102 = vector.shape_cast %17 : vector<2x1xi1> to vector<2x1xi1>
    %103 = vector.broadcast %102 : vector<2x1xi1> to vector<2x16xi1>
    %104 = vector.broadcast %cst_38 : f32 to vector<2x16xf32>
    %105 = arith.select %103, %45, %104 : vector<2x16xi1>, vector<2x16xf32>
    %106 = arith.index_cast %c0_i32_10 : i32 to index
    %c0_39 = arith.constant 0 : index
    %c0_40 = arith.constant 0 : index
    %107 = vector.load %arg17[%106, %c0_39, %c0_40] : memref<8x2x16xf32, #tpu.memory_space<vmem>>, vector<1x2x16xf32>
    %108 = vector.shape_cast %107 : vector<1x2x16xf32> to vector<2x16xf32>
    %109 = vector.shape_cast %105 : vector<2x16xf32> to vector<1x2x16xf32>
    tpu.vector_store %arg17[%106, %c0_39, %c0_40], %109 {strides = array<i32>} : memref<8x2x16xf32, #tpu.memory_space<vmem>>, vector<1x2x16xf32>,
    %110 = vector.shape_cast %17 : vector<2x1xi1> to vector<2x1xi1>
    %111 = vector.broadcast %110 : vector<2x1xi1> to vector<2x128xi1>
    %112 = arith.select %111, %90, %11 : vector<2x128xi1>, vector<2x128xf32>
    %113 = vector.shape_cast %17 : vector<2x1xi1> to vector<2x1xi1>
    %114 = vector.broadcast %113 : vector<2x1xi1> to vector<2x128xi1>
    %115 = arith.select %114, %88, %12 : vector<2x128xi1>, vector<2x128xf32>
    %c1_i32 = arith.constant 1 : i32
    %116 = arith.addi %6, %c1_i32 : i32
    %117 = arith.index_cast %116 : i32 to index
    %118 = memref.load %arg2[%117] : memref<16xi32, #tpu.memory_space<smem>>
    %119 = vector.broadcast %118 : i32 to vector<2x1xi32>
    %120 = arith.cmpi slt, %10, %119 : vector<2x1xi32>
    %121 = arith.truncf %112 : vector<2x128xf32> to vector<2x128xbf16>
    %c0_41 = arith.constant 0 : index
    %c0_42 = arith.constant 0 : index
    %122 = vector.load %arg9[%c0_41, %c0_42] : memref<128x768xbf16, #tpu.memory_space<vmem>>, vector<128x768xbf16>
    %cst_43 = arith.constant dense<0.000000e+00> : vector<2x768xf32>
    %123 = tpu.matmul %121, %122, %cst_43 {dimension_numbers = #tpu.dot_dimension_numbers<[1], [0], [0], [1], [0, 0, 1, 1], [], []>} : vector<2x128xbf16>, vector<128x768xbf16>, vector<2x768xf32> -> vector<2x768xf32>
    %c0_44 = arith.constant 0 : index
    %c0_45 = arith.constant 0 : index
    %124 = vector.load %arg10[%c0_44, %c0_45] : memref<1x768xf32, #tpu.memory_space<vmem>>, vector<1x768xf32>
    %125 = vector.broadcast %124 : vector<1x768xf32> to vector<2x768xf32>
    %126 = arith.addf %123, %125 : vector<2x768xf32>
    %127 = vector.extract_strided_slice %126 {offsets = [0, 0], sizes = [2, 128], strides = [1, 1]} : vector<2x768xf32> to vector<2x128xf32>
    %128 = vector.extract_strided_slice %126 {offsets = [0, 128], sizes = [2, 512], strides = [1, 1]} : vector<2x768xf32> to vector<2x512xf32>
    %129 = vector.extract_strided_slice %126 {offsets = [0, 640], sizes = [2, 128], strides = [1, 1]} : vector<2x768xf32> to vector<2x128xf32>
    %130 = vector.shape_cast %129 : vector<2x128xf32> to vector<2x1x128xf32>
    %131 = vector.broadcast %130 : vector<2x1x128xf32> to vector<2x16x128xf32>
    %132 = arith.addf %5, %131 : vector<2x16x128xf32>
    %cst_46 = arith.constant 0.000000e+00 : f32
    %133 = vector.broadcast %cst_46 : f32 to vector<2x16x128xf32>
    %134 = arith.maximumf %132, %133 : vector<2x16x128xf32>
    %c0_47 = arith.constant 0 : index
    %c0_48 = arith.constant 0 : index
    %135 = vector.load %arg11[%c0_47, %c0_48] : memref<1x128xf32, #tpu.memory_space<vmem>>, vector<1x128xf32>
    %136 = vector.shape_cast %135 : vector<1x128xf32> to vector<1x1x128xf32>
    %137 = vector.broadcast %136 : vector<1x1x128xf32> to vector<2x16x128xf32>
    %138 = arith.mulf %134, %137 : vector<2x16x128xf32>
    %cst_49 = arith.constant dense<0.000000e+00> : vector<2x16xf32>
    %139 = vector.multi_reduction <add>, %138, %cst_49 [2] : vector<2x16x128xf32> to vector<2x16xf32>
    %cst_50 = arith.constant dense<0xFF800000> : vector<2xf32>
    %140 = vector.multi_reduction <maximumf>, %139, %cst_50 [1] : vector<2x16xf32> to vector<2xf32>
    %141 = vector.shape_cast %140 : vector<2xf32> to vector<2x1xf32>
    %142 = vector.broadcast %141 : vector<2x1xf32> to vector<2x16xf32>
    %143 = arith.subf %139, %142 : vector<2x16xf32>
    %144 = math.exp %143 : vector<2x16xf32>
    %cst_51 = arith.constant dense<0.000000e+00> : vector<2xf32>
    %145 = vector.multi_reduction <add>, %144, %cst_51 [1] : vector<2x16xf32> to vector<2xf32>
    %146 = vector.shape_cast %145 : vector<2xf32> to vector<2x1xf32>
    %147 = vector.broadcast %146 : vector<2x1xf32> to vector<2x16xf32>
    %148 = arith.divf %144, %147 : vector<2x16xf32>
    %149 = vector.shape_cast %148 : vector<2x16xf32> to vector<2x1x16xf32>
    %150 = arith.truncf %149 : vector<2x1x16xf32> to vector<2x1x16xbf16>
    "tpu.trace_start"() <{level = 10 : i32, message = "bqp,bpe->bqe"}> : () -> ()
    %cst_52 = arith.constant dense<0.000000e+00> : vector<2x1x128xf32>
    %151 = tpu.matmul %150, %0, %cst_52 {dimension_numbers = #tpu.dot_dimension_numbers<[2], [1], [1], [2], [0, 0, 0, 1, 1, 2], [0], [0]>} : vector<2x1x16xbf16>, vector<2x16x128xbf16>, vector<2x1x128xf32> -> vector<2x1x128xf32>
    "tpu.trace_stop"() : () -> ()
    %152 = vector.shape_cast %151 : vector<2x1x128xf32> to vector<2x128xf32>
    %153 = arith.negf %127 : vector<2x128xf32>
    %154 = math.exp %153 : vector<2x128xf32>
    %cst_53 = arith.constant 1.000000e+00 : f32
    %155 = vector.broadcast %cst_53 : f32 to vector<2x128xf32>
    %156 = arith.addf %155, %154 : vector<2x128xf32>
    %157 = arith.divf %155, %156 : vector<2x128xf32>
    %158 = arith.mulf %157, %152 : vector<2x128xf32>
    %159 = arith.index_cast %c1_i32 : i32 to index
    %c0_54 = arith.constant 0 : index
    %c0_55 = arith.constant 0 : index
    %160 = vector.load %arg4[%159, %c0_54, %c0_55] : memref<8x2x32xbf16, #tpu.memory_space<vmem>>, vector<1x2x32xbf16>
    %161 = vector.shape_cast %160 : vector<1x2x32xbf16> to vector<2x32xbf16>
    %c0_56 = arith.constant 0 : index
    %c0_57 = arith.constant 0 : index
    %162 = vector.load %arg12[%c0_56, %c0_57] : memref<32x512xbf16, #tpu.memory_space<vmem>>, vector<32x512xbf16>
    %cst_58 = arith.constant dense<0.000000e+00> : vector<2x512xf32>
    %163 = tpu.matmul %161, %162, %cst_58 {dimension_numbers = #tpu.dot_dimension_numbers<[1], [0], [0], [1], [0, 0, 1, 1], [], []>} : vector<2x32xbf16>, vector<32x512xbf16>, vector<2x512xf32> -> vector<2x512xf32>
    %164 = arith.truncf %158 : vector<2x128xf32> to vector<2x128xbf16>
    %c0_59 = arith.constant 0 : index
    %c0_60 = arith.constant 0 : index
    %165 = vector.load %arg13[%c0_59, %c0_60] : memref<128x512xbf16, #tpu.memory_space<vmem>>, vector<128x512xbf16>
    %cst_61 = arith.constant dense<0.000000e+00> : vector<2x512xf32>
    %166 = tpu.matmul %164, %165, %cst_61 {dimension_numbers = #tpu.dot_dimension_numbers<[1], [0], [0], [1], [0, 0, 1, 1], [], []>} : vector<2x128xbf16>, vector<128x512xbf16>, vector<2x512xf32> -> vector<2x512xf32>
    %167 = arith.addf %163, %166 : vector<2x512xf32>
    %168 = arith.addf %167, %128 : vector<2x512xf32>
    %169 = vector.extract_strided_slice %168 {offsets = [0, 0], sizes = [2, 128], strides = [1, 1]} : vector<2x512xf32> to vector<2x128xf32>
    %170 = arith.negf %169 : vector<2x128xf32>
    %171 = math.exp %170 : vector<2x128xf32>
    %cst_62 = arith.constant 1.000000e+00 : f32
    %172 = vector.broadcast %cst_62 : f32 to vector<2x128xf32>
    %173 = arith.addf %172, %171 : vector<2x128xf32>
    %174 = arith.divf %172, %173 : vector<2x128xf32>
    %175 = vector.extract_strided_slice %168 {offsets = [0, 128], sizes = [2, 128], strides = [1, 1]} : vector<2x512xf32> to vector<2x128xf32>
    %176 = arith.negf %175 : vector<2x128xf32>
    %177 = math.exp %176 : vector<2x128xf32>
    %cst_63 = arith.constant 1.000000e+00 : f32
    %178 = vector.broadcast %cst_63 : f32 to vector<2x128xf32>
    %179 = arith.addf %178, %177 : vector<2x128xf32>
    %180 = arith.divf %178, %179 : vector<2x128xf32>
    %181 = vector.extract_strided_slice %168 {offsets = [0, 256], sizes = [2, 128], strides = [1, 1]} : vector<2x512xf32> to vector<2x128xf32>
    %182 = math.tanh %181 : vector<2x128xf32>
    %183 = vector.extract_strided_slice %168 {offsets = [0, 384], sizes = [2, 128], strides = [1, 1]} : vector<2x512xf32> to vector<2x128xf32>
    %184 = arith.negf %183 : vector<2x128xf32>
    %185 = math.exp %184 : vector<2x128xf32>
    %cst_64 = arith.constant 1.000000e+00 : f32
    %186 = vector.broadcast %cst_64 : f32 to vector<2x128xf32>
    %187 = arith.addf %186, %185 : vector<2x128xf32>
    %188 = arith.divf %186, %187 : vector<2x128xf32>
    %189 = arith.mulf %180, %115 : vector<2x128xf32>
    %190 = arith.mulf %174, %182 : vector<2x128xf32>
    %191 = arith.addf %189, %190 : vector<2x128xf32>
    %192 = math.tanh %191 : vector<2x128xf32>
    %193 = arith.mulf %188, %192 : vector<2x128xf32>
    %194 = arith.truncf %193 : vector<2x128xf32> to vector<2x128xbf16>
    %195 = arith.index_cast %c1_i32 : i32 to index
    %c0_65 = arith.constant 0 : index
    %c0_66 = arith.constant 0 : index
    %196 = vector.load %arg21[%195, %c0_65, %c0_66] : memref<8x2x128xbf16, #tpu.memory_space<vmem>>, vector<1x2x128xbf16>
    %197 = vector.shape_cast %196 : vector<1x2x128xbf16> to vector<2x128xbf16>
    %198 = vector.shape_cast %194 : vector<2x128xbf16> to vector<1x2x128xbf16>
    tpu.vector_store %arg21[%195, %c0_65, %c0_66], %198 {strides = array<i32>} : memref<8x2x128xbf16, #tpu.memory_space<vmem>>, vector<1x2x128xbf16>,
    %199 = arith.extui %120 : vector<2x1xi1> to vector<2x1xi32>
    %200 = arith.sitofp %199 : vector<2x1xi32> to vector<2x1xf32>
    %201 = arith.index_cast %c1_i32 : i32 to index
    %c0_67 = arith.constant 0 : index
    %c0_68 = arith.constant 0 : index
    %202 = vector.load %arg22[%201, %c0_67, %c0_68] : memref<8x2x1xf32, #tpu.memory_space<vmem>>, vector<1x2x1xf32>
    %203 = vector.shape_cast %202 : vector<1x2x1xf32> to vector<2x1xf32>
    %204 = vector.shape_cast %200 : vector<2x1xf32> to vector<1x2x1xf32>
    tpu.vector_store %arg22[%201, %c0_67, %c0_68], %204 {strides = array<i32>} : memref<8x2x1xf32, #tpu.memory_space<vmem>>, vector<1x2x1xf32>,
    %cst_69 = arith.constant 0.000000e+00 : f32
    %205 = vector.shape_cast %120 : vector<2x1xi1> to vector<2x1xi1>
    %206 = vector.broadcast %205 : vector<2x1xi1> to vector<2x16xi1>
    %207 = vector.broadcast %cst_69 : f32 to vector<2x16xf32>
    %208 = arith.select %206, %148, %207 : vector<2x16xi1>, vector<2x16xf32>
    %209 = arith.index_cast %c1_i32 : i32 to index
    %c0_70 = arith.constant 0 : index
    %c0_71 = arith.constant 0 : index
    %210 = vector.load %arg17[%209, %c0_70, %c0_71] : memref<8x2x16xf32, #tpu.memory_space<vmem>>, vector<1x2x16xf32>
    %211 = vector.shape_cast %210 : vector<1x2x16xf32> to vector<2x16xf32>
    %212 = vector.shape_cast %208 : vector<2x16xf32> to vector<1x2x16xf32>
    tpu.vector_store %arg17[%209, %c0_70, %c0_71], %212 {strides = array<i32>} : memref<8x2x16xf32, #tpu.memory_space<vmem>>, vector<1x2x16xf32>,
    %213 = vector.shape_cast %120 : vector<2x1xi1> to vector<2x1xi1>
    %214 = vector.broadcast %213 : vector<2x1xi1> to vector<2x128xi1>
    %215 = arith.select %214, %193, %112 : vector<2x128xi1>, vector<2x128xf32>
    %216 = vector.shape_cast %120 : vector<2x1xi1> to vector<2x1xi1>
    %217 = vector.broadcast %216 : vector<2x1xi1> to vector<2x128xi1>
    %218 = arith.select %217, %191, %115 : vector<2x128xi1>, vector<2x128xf32>
    %c2_i32_72 = arith.constant 2 : i32
    %219 = arith.addi %6, %c2_i32_72 : i32
    %220 = arith.index_cast %219 : i32 to index
    %221 = memref.load %arg2[%220] : memref<16xi32, #tpu.memory_space<smem>>
    %222 = vector.broadcast %221 : i32 to vector<2x1xi32>
    %223 = arith.cmpi slt, %10, %222 : vector<2x1xi32>
    %224 = arith.truncf %215 : vector<2x128xf32> to vector<2x128xbf16>
    %c0_73 = arith.constant 0 : index
    %c0_74 = arith.constant 0 : index
    %225 = vector.load %arg9[%c0_73, %c0_74] : memref<128x768xbf16, #tpu.memory_space<vmem>>, vector<128x768xbf16>
    %cst_75 = arith.constant dense<0.000000e+00> : vector<2x768xf32>
    %226 = tpu.matmul %224, %225, %cst_75 {dimension_numbers = #tpu.dot_dimension_numbers<[1], [0], [0], [1], [0, 0, 1, 1], [], []>} : vector<2x128xbf16>, vector<128x768xbf16>, vector<2x768xf32> -> vector<2x768xf32>
    %c0_76 = arith.constant 0 : index
    %c0_77 = arith.constant 0 : index
    %227 = vector.load %arg10[%c0_76, %c0_77] : memref<1x768xf32, #tpu.memory_space<vmem>>, vector<1x768xf32>
    %228 = vector.broadcast %227 : vector<1x768xf32> to vector<2x768xf32>
    %229 = arith.addf %226, %228 : vector<2x768xf32>
    %230 = vector.extract_strided_slice %229 {offsets = [0, 0], sizes = [2, 128], strides = [1, 1]} : vector<2x768xf32> to vector<2x128xf32>
    %231 = vector.extract_strided_slice %229 {offsets = [0, 128], sizes = [2, 512], strides = [1, 1]} : vector<2x768xf32> to vector<2x512xf32>
    %232 = vector.extract_strided_slice %229 {offsets = [0, 640], sizes = [2, 128], strides = [1, 1]} : vector<2x768xf32> to vector<2x128xf32>
    %233 = vector.shape_cast %232 : vector<2x128xf32> to vector<2x1x128xf32>
    %234 = vector.broadcast %233 : vector<2x1x128xf32> to vector<2x16x128xf32>
    %235 = arith.addf %5, %234 : vector<2x16x128xf32>
    %cst_78 = arith.constant 0.000000e+00 : f32
    %236 = vector.broadcast %cst_78 : f32 to vector<2x16x128xf32>
    %237 = arith.maximumf %235, %236 : vector<2x16x128xf32>
    %c0_79 = arith.constant 0 : index
    %c0_80 = arith.constant 0 : index
    %238 = vector.load %arg11[%c0_79, %c0_80] : memref<1x128xf32, #tpu.memory_space<vmem>>, vector<1x128xf32>
    %239 = vector.shape_cast %238 : vector<1x128xf32> to vector<1x1x128xf32>
    %240 = vector.broadcast %239 : vector<1x1x128xf32> to vector<2x16x128xf32>
    %241 = arith.mulf %237, %240 : vector<2x16x128xf32>
    %cst_81 = arith.constant dense<0.000000e+00> : vector<2x16xf32>
    %242 = vector.multi_reduction <add>, %241, %cst_81 [2] : vector<2x16x128xf32> to vector<2x16xf32>
    %cst_82 = arith.constant dense<0xFF800000> : vector<2xf32>
    %243 = vector.multi_reduction <maximumf>, %242, %cst_82 [1] : vector<2x16xf32> to vector<2xf32>
    %244 = vector.shape_cast %243 : vector<2xf32> to vector<2x1xf32>
    %245 = vector.broadcast %244 : vector<2x1xf32> to vector<2x16xf32>
    %246 = arith.subf %242, %245 : vector<2x16xf32>
    %247 = math.exp %246 : vector<2x16xf32>
    %cst_83 = arith.constant dense<0.000000e+00> : vector<2xf32>
    %248 = vector.multi_reduction <add>, %247, %cst_83 [1] : vector<2x16xf32> to vector<2xf32>
    %249 = vector.shape_cast %248 : vector<2xf32> to vector<2x1xf32>
    %250 = vector.broadcast %249 : vector<2x1xf32> to vector<2x16xf32>
    %251 = arith.divf %247, %250 : vector<2x16xf32>
    %252 = vector.shape_cast %251 : vector<2x16xf32> to vector<2x1x16xf32>
    %253 = arith.truncf %252 : vector<2x1x16xf32> to vector<2x1x16xbf16>
    "tpu.trace_start"() <{level = 10 : i32, message = "bqp,bpe->bqe"}> : () -> ()
    %cst_84 = arith.constant dense<0.000000e+00> : vector<2x1x128xf32>
    %254 = tpu.matmul %253, %0, %cst_84 {dimension_numbers = #tpu.dot_dimension_numbers<[2], [1], [1], [2], [0, 0, 0, 1, 1, 2], [0], [0]>} : vector<2x1x16xbf16>, vector<2x16x128xbf16>, vector<2x1x128xf32> -> vector<2x1x128xf32>
    "tpu.trace_stop"() : () -> ()
    %255 = vector.shape_cast %254 : vector<2x1x128xf32> to vector<2x128xf32>
    %256 = arith.negf %230 : vector<2x128xf32>
    %257 = math.exp %256 : vector<2x128xf32>
    %cst_85 = arith.constant 1.000000e+00 : f32
    %258 = vector.broadcast %cst_85 : f32 to vector<2x128xf32>
    %259 = arith.addf %258, %257 : vector<2x128xf32>
    %260 = arith.divf %258, %259 : vector<2x128xf32>
    %261 = arith.mulf %260, %255 : vector<2x128xf32>
    %262 = arith.index_cast %c2_i32_72 : i32 to index
    %c0_86 = arith.constant 0 : index
    %c0_87 = arith.constant 0 : index
    %263 = vector.load %arg4[%262, %c0_86, %c0_87] : memref<8x2x32xbf16, #tpu.memory_space<vmem>>, vector<1x2x32xbf16>
    %264 = vector.shape_cast %263 : vector<1x2x32xbf16> to vector<2x32xbf16>
    %c0_88 = arith.constant 0 : index
    %c0_89 = arith.constant 0 : index
    %265 = vector.load %arg12[%c0_88, %c0_89] : memref<32x512xbf16, #tpu.memory_space<vmem>>, vector<32x512xbf16>
    %cst_90 = arith.constant dense<0.000000e+00> : vector<2x512xf32>
    %266 = tpu.matmul %264, %265, %cst_90 {dimension_numbers = #tpu.dot_dimension_numbers<[1], [0], [0], [1], [0, 0, 1, 1], [], []>} : vector<2x32xbf16>, vector<32x512xbf16>, vector<2x512xf32> -> vector<2x512xf32>
    %267 = arith.truncf %261 : vector<2x128xf32> to vector<2x128xbf16>
    %c0_91 = arith.constant 0 : index
    %c0_92 = arith.constant 0 : index
    %268 = vector.load %arg13[%c0_91, %c0_92] : memref<128x512xbf16, #tpu.memory_space<vmem>>, vector<128x512xbf16>
    %cst_93 = arith.constant dense<0.000000e+00> : vector<2x512xf32>
    %269 = tpu.matmul %267, %268, %cst_93 {dimension_numbers = #tpu.dot_dimension_numbers<[1], [0], [0], [1], [0, 0, 1, 1], [], []>} : vector<2x128xbf16>, vector<128x512xbf16>, vector<2x512xf32> -> vector<2x512xf32>
    %270 = arith.addf %266, %269 : vector<2x512xf32>
    %271 = arith.addf %270, %231 : vector<2x512xf32>
    %272 = vector.extract_strided_slice %271 {offsets = [0, 0], sizes = [2, 128], strides = [1, 1]} : vector<2x512xf32> to vector<2x128xf32>
    %273 = arith.negf %272 : vector<2x128xf32>
    %274 = math.exp %273 : vector<2x128xf32>
    %cst_94 = arith.constant 1.000000e+00 : f32
    %275 = vector.broadcast %cst_94 : f32 to vector<2x128xf32>
    %276 = arith.addf %275, %274 : vector<2x128xf32>
    %277 = arith.divf %275, %276 : vector<2x128xf32>
    %278 = vector.extract_strided_slice %271 {offsets = [0, 128], sizes = [2, 128], strides = [1, 1]} : vector<2x512xf32> to vector<2x128xf32>
    %279 = arith.negf %278 : vector<2x128xf32>
    %280 = math.exp %279 : vector<2x128xf32>
    %cst_95 = arith.constant 1.000000e+00 : f32
    %281 = vector.broadcast %cst_95 : f32 to vector<2x128xf32>
    %282 = arith.addf %281, %280 : vector<2x128xf32>
    %283 = arith.divf %281, %282 : vector<2x128xf32>
    %284 = vector.extract_strided_slice %271 {offsets = [0, 256], sizes = [2, 128], strides = [1, 1]} : vector<2x512xf32> to vector<2x128xf32>
    %285 = math.tanh %284 : vector<2x128xf32>
    %286 = vector.extract_strided_slice %271 {offsets = [0, 384], sizes = [2, 128], strides = [1, 1]} : vector<2x512xf32> to vector<2x128xf32>
    %287 = arith.negf %286 : vector<2x128xf32>
    %288 = math.exp %287 : vector<2x128xf32>
    %cst_96 = arith.constant 1.000000e+00 : f32
    %289 = vector.broadcast %cst_96 : f32 to vector<2x128xf32>
    %290 = arith.addf %289, %288 : vector<2x128xf32>
    %291 = arith.divf %289, %290 : vector<2x128xf32>
    %292 = arith.mulf %283, %218 : vector<2x128xf32>
    %293 = arith.mulf %277, %285 : vector<2x128xf32>
    %294 = arith.addf %292, %293 : vector<2x128xf32>
    %295 = math.tanh %294 : vector<2x128xf32>
    %296 = arith.mulf %291, %295 : vector<2x128xf32>
    %297 = arith.truncf %296 : vector<2x128xf32> to vector<2x128xbf16>
    %298 = arith.index_cast %c2_i32_72 : i32 to index
    %c0_97 = arith.constant 0 : index
    %c0_98 = arith.constant 0 : index
    %299 = vector.load %arg21[%298, %c0_97, %c0_98] : memref<8x2x128xbf16, #tpu.memory_space<vmem>>, vector<1x2x128xbf16>
    %300 = vector.shape_cast %299 : vector<1x2x128xbf16> to vector<2x128xbf16>
    %301 = vector.shape_cast %297 : vector<2x128xbf16> to vector<1x2x128xbf16>
    tpu.vector_store %arg21[%298, %c0_97, %c0_98], %301 {strides = array<i32>} : memref<8x2x128xbf16, #tpu.memory_space<vmem>>, vector<1x2x128xbf16>,
    %302 = arith.extui %223 : vector<2x1xi1> to vector<2x1xi32>
    %303 = arith.sitofp %302 : vector<2x1xi32> to vector<2x1xf32>
    %304 = arith.index_cast %c2_i32_72 : i32 to index
    %c0_99 = arith.constant 0 : index
    %c0_100 = arith.constant 0 : index
    %305 = vector.load %arg22[%304, %c0_99, %c0_100] : memref<8x2x1xf32, #tpu.memory_space<vmem>>, vector<1x2x1xf32>
    %306 = vector.shape_cast %305 : vector<1x2x1xf32> to vector<2x1xf32>
    %307 = vector.shape_cast %303 : vector<2x1xf32> to vector<1x2x1xf32>
    tpu.vector_store %arg22[%304, %c0_99, %c0_100], %307 {strides = array<i32>} : memref<8x2x1xf32, #tpu.memory_space<vmem>>, vector<1x2x1xf32>,
    %cst_101 = arith.constant 0.000000e+00 : f32
    %308 = vector.shape_cast %223 : vector<2x1xi1> to vector<2x1xi1>
    %309 = vector.broadcast %308 : vector<2x1xi1> to vector<2x16xi1>
    %310 = vector.broadcast %cst_101 : f32 to vector<2x16xf32>
    %311 = arith.select %309, %251, %310 : vector<2x16xi1>, vector<2x16xf32>
    %312 = arith.index_cast %c2_i32_72 : i32 to index
    %c0_102 = arith.constant 0 : index
    %c0_103 = arith.constant 0 : index
    %313 = vector.load %arg17[%312, %c0_102, %c0_103] : memref<8x2x16xf32, #tpu.memory_space<vmem>>, vector<1x2x16xf32>
    %314 = vector.shape_cast %313 : vector<1x2x16xf32> to vector<2x16xf32>
    %315 = vector.shape_cast %311 : vector<2x16xf32> to vector<1x2x16xf32>
    tpu.vector_store %arg17[%312, %c0_102, %c0_103], %315 {strides = array<i32>} : memref<8x2x16xf32, #tpu.memory_space<vmem>>, vector<1x2x16xf32>,
    %316 = vector.shape_cast %223 : vector<2x1xi1> to vector<2x1xi1>
    %317 = vector.broadcast %316 : vector<2x1xi1> to vector<2x128xi1>
    %318 = arith.select %317, %296, %215 : vector<2x128xi1>, vector<2x128xf32>
    %319 = vector.shape_cast %223 : vector<2x1xi1> to vector<2x1xi1>
    %320 = vector.broadcast %319 : vector<2x1xi1> to vector<2x128xi1>
    %321 = arith.select %320, %294, %218 : vector<2x128xi1>, vector<2x128xf32>
    %c3_i32 = arith.constant 3 : i32
    %322 = arith.addi %6, %c3_i32 : i32
    %323 = arith.index_cast %322 : i32 to index
    %324 = memref.load %arg2[%323] : memref<16xi32, #tpu.memory_space<smem>>
    %325 = vector.broadcast %324 : i32 to vector<2x1xi32>
    %326 = arith.cmpi slt, %10, %325 : vector<2x1xi32>
    %327 = arith.truncf %318 : vector<2x128xf32> to vector<2x128xbf16>
    %c0_104 = arith.constant 0 : index
    %c0_105 = arith.constant 0 : index
    %328 = vector.load %arg9[%c0_104, %c0_105] : memref<128x768xbf16, #tpu.memory_space<vmem>>, vector<128x768xbf16>
    %cst_106 = arith.constant dense<0.000000e+00> : vector<2x768xf32>
    %329 = tpu.matmul %327, %328, %cst_106 {dimension_numbers = #tpu.dot_dimension_numbers<[1], [0], [0], [1], [0, 0, 1, 1], [], []>} : vector<2x128xbf16>, vector<128x768xbf16>, vector<2x768xf32> -> vector<2x768xf32>
    %c0_107 = arith.constant 0 : index
    %c0_108 = arith.constant 0 : index
    %330 = vector.load %arg10[%c0_107, %c0_108] : memref<1x768xf32, #tpu.memory_space<vmem>>, vector<1x768xf32>
    %331 = vector.broadcast %330 : vector<1x768xf32> to vector<2x768xf32>
    %332 = arith.addf %329, %331 : vector<2x768xf32>
    %333 = vector.extract_strided_slice %332 {offsets = [0, 0], sizes = [2, 128], strides = [1, 1]} : vector<2x768xf32> to vector<2x128xf32>
    %334 = vector.extract_strided_slice %332 {offsets = [0, 128], sizes = [2, 512], strides = [1, 1]} : vector<2x768xf32> to vector<2x512xf32>
    %335 = vector.extract_strided_slice %332 {offsets = [0, 640], sizes = [2, 128], strides = [1, 1]} : vector<2x768xf32> to vector<2x128xf32>
    %336 = vector.shape_cast %335 : vector<2x128xf32> to vector<2x1x128xf32>
    %337 = vector.broadcast %336 : vector<2x1x128xf32> to vector<2x16x128xf32>
    %338 = arith.addf %5, %337 : vector<2x16x128xf32>
    %cst_109 = arith.constant 0.000000e+00 : f32
    %339 = vector.broadcast %cst_109 : f32 to vector<2x16x128xf32>
    %340 = arith.maximumf %338, %339 : vector<2x16x128xf32>
    %c0_110 = arith.constant 0 : index
    %c0_111 = arith.constant 0 : index
    %341 = vector.load %arg11[%c0_110, %c0_111] : memref<1x128xf32, #tpu.memory_space<vmem>>, vector<1x128xf32>
    %342 = vector.shape_cast %341 : vector<1x128xf32> to vector<1x1x128xf32>
    %343 = vector.broadcast %342 : vector<1x1x128xf32> to vector<2x16x128xf32>
    %344 = arith.mulf %340, %343 : vector<2x16x128xf32>
    %cst_112 = arith.constant dense<0.000000e+00> : vector<2x16xf32>
    %345 = vector.multi_reduction <add>, %344, %cst_112 [2] : vector<2x16x128xf32> to vector<2x16xf32>
    %cst_113 = arith.constant dense<0xFF800000> : vector<2xf32>
    %346 = vector.multi_reduction <maximumf>, %345, %cst_113 [1] : vector<2x16xf32> to vector<2xf32>
    %347 = vector.shape_cast %346 : vector<2xf32> to vector<2x1xf32>
    %348 = vector.broadcast %347 : vector<2x1xf32> to vector<2x16xf32>
    %349 = arith.subf %345, %348 : vector<2x16xf32>
    %350 = math.exp %349 : vector<2x16xf32>
    %cst_114 = arith.constant dense<0.000000e+00> : vector<2xf32>
    %351 = vector.multi_reduction <add>, %350, %cst_114 [1] : vector<2x16xf32> to vector<2xf32>
    %352 = vector.shape_cast %351 : vector<2xf32> to vector<2x1xf32>
    %353 = vector.broadcast %352 : vector<2x1xf32> to vector<2x16xf32>
    %354 = arith.divf %350, %353 : vector<2x16xf32>
    %355 = vector.shape_cast %354 : vector<2x16xf32> to vector<2x1x16xf32>
    %356 = arith.truncf %355 : vector<2x1x16xf32> to vector<2x1x16xbf16>
    "tpu.trace_start"() <{level = 10 : i32, message = "bqp,bpe->bqe"}> : () -> ()
    %cst_115 = arith.constant dense<0.000000e+00> : vector<2x1x128xf32>
    %357 = tpu.matmul %356, %0, %cst_115 {dimension_numbers = #tpu.dot_dimension_numbers<[2], [1], [1], [2], [0, 0, 0, 1, 1, 2], [0], [0]>} : vector<2x1x16xbf16>, vector<2x16x128xbf16>, vector<2x1x128xf32> -> vector<2x1x128xf32>
    "tpu.trace_stop"() : () -> ()
    %358 = vector.shape_cast %357 : vector<2x1x128xf32> to vector<2x128xf32>
    %359 = arith.negf %333 : vector<2x128xf32>
    %360 = math.exp %359 : vector<2x128xf32>
    %cst_116 = arith.constant 1.000000e+00 : f32
    %361 = vector.broadcast %cst_116 : f32 to vector<2x128xf32>
    %362 = arith.addf %361, %360 : vector<2x128xf32>
    %363 = arith.divf %361, %362 : vector<2x128xf32>
    %364 = arith.mulf %363, %358 : vector<2x128xf32>
    %365 = arith.index_cast %c3_i32 : i32 to index
    %c0_117 = arith.constant 0 : index
    %c0_118 = arith.constant 0 : index
    %366 = vector.load %arg4[%365, %c0_117, %c0_118] : memref<8x2x32xbf16, #tpu.memory_space<vmem>>, vector<1x2x32xbf16>
    %367 = vector.shape_cast %366 : vector<1x2x32xbf16> to vector<2x32xbf16>
    %c0_119 = arith.constant 0 : index
    %c0_120 = arith.constant 0 : index
    %368 = vector.load %arg12[%c0_119, %c0_120] : memref<32x512xbf16, #tpu.memory_space<vmem>>, vector<32x512xbf16>
    %cst_121 = arith.constant dense<0.000000e+00> : vector<2x512xf32>
    %369 = tpu.matmul %367, %368, %cst_121 {dimension_numbers = #tpu.dot_dimension_numbers<[1], [0], [0], [1], [0, 0, 1, 1], [], []>} : vector<2x32xbf16>, vector<32x512xbf16>, vector<2x512xf32> -> vector<2x512xf32>
    %370 = arith.truncf %364 : vector<2x128xf32> to vector<2x128xbf16>
    %c0_122 = arith.constant 0 : index
    %c0_123 = arith.constant 0 : index
    %371 = vector.load %arg13[%c0_122, %c0_123] : memref<128x512xbf16, #tpu.memory_space<vmem>>, vector<128x512xbf16>
    %cst_124 = arith.constant dense<0.000000e+00> : vector<2x512xf32>
    %372 = tpu.matmul %370, %371, %cst_124 {dimension_numbers = #tpu.dot_dimension_numbers<[1], [0], [0], [1], [0, 0, 1, 1], [], []>} : vector<2x128xbf16>, vector<128x512xbf16>, vector<2x512xf32> -> vector<2x512xf32>
    %373 = arith.addf %369, %372 : vector<2x512xf32>
    %374 = arith.addf %373, %334 : vector<2x512xf32>
    %375 = vector.extract_strided_slice %374 {offsets = [0, 0], sizes = [2, 128], strides = [1, 1]} : vector<2x512xf32> to vector<2x128xf32>
    %376 = arith.negf %375 : vector<2x128xf32>
    %377 = math.exp %376 : vector<2x128xf32>
    %cst_125 = arith.constant 1.000000e+00 : f32
    %378 = vector.broadcast %cst_125 : f32 to vector<2x128xf32>
    %379 = arith.addf %378, %377 : vector<2x128xf32>
    %380 = arith.divf %378, %379 : vector<2x128xf32>
    %381 = vector.extract_strided_slice %374 {offsets = [0, 128], sizes = [2, 128], strides = [1, 1]} : vector<2x512xf32> to vector<2x128xf32>
    %382 = arith.negf %381 : vector<2x128xf32>
    %383 = math.exp %382 : vector<2x128xf32>
    %cst_126 = arith.constant 1.000000e+00 : f32
    %384 = vector.broadcast %cst_126 : f32 to vector<2x128xf32>
    %385 = arith.addf %384, %383 : vector<2x128xf32>
    %386 = arith.divf %384, %385 : vector<2x128xf32>
    %387 = vector.extract_strided_slice %374 {offsets = [0, 256], sizes = [2, 128], strides = [1, 1]} : vector<2x512xf32> to vector<2x128xf32>
    %388 = math.tanh %387 : vector<2x128xf32>
    %389 = vector.extract_strided_slice %374 {offsets = [0, 384], sizes = [2, 128], strides = [1, 1]} : vector<2x512xf32> to vector<2x128xf32>
    %390 = arith.negf %389 : vector<2x128xf32>
    %391 = math.exp %390 : vector<2x128xf32>
    %cst_127 = arith.constant 1.000000e+00 : f32
    %392 = vector.broadcast %cst_127 : f32 to vector<2x128xf32>
    %393 = arith.addf %392, %391 : vector<2x128xf32>
    %394 = arith.divf %392, %393 : vector<2x128xf32>
    %395 = arith.mulf %386, %321 : vector<2x128xf32>
    %396 = arith.mulf %380, %388 : vector<2x128xf32>
    %397 = arith.addf %395, %396 : vector<2x128xf32>
    %398 = math.tanh %397 : vector<2x128xf32>
    %399 = arith.mulf %394, %398 : vector<2x128xf32>
    %400 = arith.truncf %399 : vector<2x128xf32> to vector<2x128xbf16>
    %401 = arith.index_cast %c3_i32 : i32 to index
    %c0_128 = arith.constant 0 : index
    %c0_129 = arith.constant 0 : index
    %402 = vector.load %arg21[%401, %c0_128, %c0_129] : memref<8x2x128xbf16, #tpu.memory_space<vmem>>, vector<1x2x128xbf16>
    %403 = vector.shape_cast %402 : vector<1x2x128xbf16> to vector<2x128xbf16>
    %404 = vector.shape_cast %400 : vector<2x128xbf16> to vector<1x2x128xbf16>
    tpu.vector_store %arg21[%401, %c0_128, %c0_129], %404 {strides = array<i32>} : memref<8x2x128xbf16, #tpu.memory_space<vmem>>, vector<1x2x128xbf16>,
    %405 = arith.extui %326 : vector<2x1xi1> to vector<2x1xi32>
    %406 = arith.sitofp %405 : vector<2x1xi32> to vector<2x1xf32>
    %407 = arith.index_cast %c3_i32 : i32 to index
    %c0_130 = arith.constant 0 : index
    %c0_131 = arith.constant 0 : index
    %408 = vector.load %arg22[%407, %c0_130, %c0_131] : memref<8x2x1xf32, #tpu.memory_space<vmem>>, vector<1x2x1xf32>
    %409 = vector.shape_cast %408 : vector<1x2x1xf32> to vector<2x1xf32>
    %410 = vector.shape_cast %406 : vector<2x1xf32> to vector<1x2x1xf32>
    tpu.vector_store %arg22[%407, %c0_130, %c0_131], %410 {strides = array<i32>} : memref<8x2x1xf32, #tpu.memory_space<vmem>>, vector<1x2x1xf32>,
    %cst_132 = arith.constant 0.000000e+00 : f32
    %411 = vector.shape_cast %326 : vector<2x1xi1> to vector<2x1xi1>
    %412 = vector.broadcast %411 : vector<2x1xi1> to vector<2x16xi1>
    %413 = vector.broadcast %cst_132 : f32 to vector<2x16xf32>
    %414 = arith.select %412, %354, %413 : vector<2x16xi1>, vector<2x16xf32>
    %415 = arith.index_cast %c3_i32 : i32 to index
    %c0_133 = arith.constant 0 : index
    %c0_134 = arith.constant 0 : index
    %416 = vector.load %arg17[%415, %c0_133, %c0_134] : memref<8x2x16xf32, #tpu.memory_space<vmem>>, vector<1x2x16xf32>
    %417 = vector.shape_cast %416 : vector<1x2x16xf32> to vector<2x16xf32>
    %418 = vector.shape_cast %414 : vector<2x16xf32> to vector<1x2x16xf32>
    tpu.vector_store %arg17[%415, %c0_133, %c0_134], %418 {strides = array<i32>} : memref<8x2x16xf32, #tpu.memory_space<vmem>>, vector<1x2x16xf32>,
    %419 = vector.shape_cast %326 : vector<2x1xi1> to vector<2x1xi1>
    %420 = vector.broadcast %419 : vector<2x1xi1> to vector<2x128xi1>
    %421 = arith.select %420, %399, %318 : vector<2x128xi1>, vector<2x128xf32>
    %422 = vector.shape_cast %326 : vector<2x1xi1> to vector<2x1xi1>
    %423 = vector.broadcast %422 : vector<2x1xi1> to vector<2x128xi1>
    %424 = arith.select %423, %397, %321 : vector<2x128xi1>, vector<2x128xf32>
    %c4_i32 = arith.constant 4 : i32
    %425 = arith.addi %6, %c4_i32 : i32
    %426 = arith.index_cast %425 : i32 to index
    %427 = memref.load %arg2[%426] : memref<16xi32, #tpu.memory_space<smem>>
    %428 = vector.broadcast %427 : i32 to vector<2x1xi32>
    %429 = arith.cmpi slt, %10, %428 : vector<2x1xi32>
    %430 = arith.truncf %421 : vector<2x128xf32> to vector<2x128xbf16>
    %c0_135 = arith.constant 0 : index
    %c0_136 = arith.constant 0 : index
    %431 = vector.load %arg9[%c0_135, %c0_136] : memref<128x768xbf16, #tpu.memory_space<vmem>>, vector<128x768xbf16>
    %cst_137 = arith.constant dense<0.000000e+00> : vector<2x768xf32>
    %432 = tpu.matmul %430, %431, %cst_137 {dimension_numbers = #tpu.dot_dimension_numbers<[1], [0], [0], [1], [0, 0, 1, 1], [], []>} : vector<2x128xbf16>, vector<128x768xbf16>, vector<2x768xf32> -> vector<2x768xf32>
    %c0_138 = arith.constant 0 : index
    %c0_139 = arith.constant 0 : index
    %433 = vector.load %arg10[%c0_138, %c0_139] : memref<1x768xf32, #tpu.memory_space<vmem>>, vector<1x768xf32>
    %434 = vector.broadcast %433 : vector<1x768xf32> to vector<2x768xf32>
    %435 = arith.addf %432, %434 : vector<2x768xf32>
    %436 = vector.extract_strided_slice %435 {offsets = [0, 0], sizes = [2, 128], strides = [1, 1]} : vector<2x768xf32> to vector<2x128xf32>
    %437 = vector.extract_strided_slice %435 {offsets = [0, 128], sizes = [2, 512], strides = [1, 1]} : vector<2x768xf32> to vector<2x512xf32>
    %438 = vector.extract_strided_slice %435 {offsets = [0, 640], sizes = [2, 128], strides = [1, 1]} : vector<2x768xf32> to vector<2x128xf32>
    %439 = vector.shape_cast %438 : vector<2x128xf32> to vector<2x1x128xf32>
    %440 = vector.broadcast %439 : vector<2x1x128xf32> to vector<2x16x128xf32>
    %441 = arith.addf %5, %440 : vector<2x16x128xf32>
    %cst_140 = arith.constant 0.000000e+00 : f32
    %442 = vector.broadcast %cst_140 : f32 to vector<2x16x128xf32>
    %443 = arith.maximumf %441, %442 : vector<2x16x128xf32>
    %c0_141 = arith.constant 0 : index
    %c0_142 = arith.constant 0 : index
    %444 = vector.load %arg11[%c0_141, %c0_142] : memref<1x128xf32, #tpu.memory_space<vmem>>, vector<1x128xf32>
    %445 = vector.shape_cast %444 : vector<1x128xf32> to vector<1x1x128xf32>
    %446 = vector.broadcast %445 : vector<1x1x128xf32> to vector<2x16x128xf32>
    %447 = arith.mulf %443, %446 : vector<2x16x128xf32>
    %cst_143 = arith.constant dense<0.000000e+00> : vector<2x16xf32>
    %448 = vector.multi_reduction <add>, %447, %cst_143 [2] : vector<2x16x128xf32> to vector<2x16xf32>
    %cst_144 = arith.constant dense<0xFF800000> : vector<2xf32>
    %449 = vector.multi_reduction <maximumf>, %448, %cst_144 [1] : vector<2x16xf32> to vector<2xf32>
    %450 = vector.shape_cast %449 : vector<2xf32> to vector<2x1xf32>
    %451 = vector.broadcast %450 : vector<2x1xf32> to vector<2x16xf32>
    %452 = arith.subf %448, %451 : vector<2x16xf32>
    %453 = math.exp %452 : vector<2x16xf32>
    %cst_145 = arith.constant dense<0.000000e+00> : vector<2xf32>
    %454 = vector.multi_reduction <add>, %453, %cst_145 [1] : vector<2x16xf32> to vector<2xf32>
    %455 = vector.shape_cast %454 : vector<2xf32> to vector<2x1xf32>
    %456 = vector.broadcast %455 : vector<2x1xf32> to vector<2x16xf32>
    %457 = arith.divf %453, %456 : vector<2x16xf32>
    %458 = vector.shape_cast %457 : vector<2x16xf32> to vector<2x1x16xf32>
    %459 = arith.truncf %458 : vector<2x1x16xf32> to vector<2x1x16xbf16>
    "tpu.trace_start"() <{level = 10 : i32, message = "bqp,bpe->bqe"}> : () -> ()
    %cst_146 = arith.constant dense<0.000000e+00> : vector<2x1x128xf32>
    %460 = tpu.matmul %459, %0, %cst_146 {dimension_numbers = #tpu.dot_dimension_numbers<[2], [1], [1], [2], [0, 0, 0, 1, 1, 2], [0], [0]>} : vector<2x1x16xbf16>, vector<2x16x128xbf16>, vector<2x1x128xf32> -> vector<2x1x128xf32>
    "tpu.trace_stop"() : () -> ()
    %461 = vector.shape_cast %460 : vector<2x1x128xf32> to vector<2x128xf32>
    %462 = arith.negf %436 : vector<2x128xf32>
    %463 = math.exp %462 : vector<2x128xf32>
    %cst_147 = arith.constant 1.000000e+00 : f32
    %464 = vector.broadcast %cst_147 : f32 to vector<2x128xf32>
    %465 = arith.addf %464, %463 : vector<2x128xf32>
    %466 = arith.divf %464, %465 : vector<2x128xf32>
    %467 = arith.mulf %466, %461 : vector<2x128xf32>
    %468 = arith.index_cast %c4_i32 : i32 to index
    %c0_148 = arith.constant 0 : index
    %c0_149 = arith.constant 0 : index
    %469 = vector.load %arg4[%468, %c0_148, %c0_149] : memref<8x2x32xbf16, #tpu.memory_space<vmem>>, vector<1x2x32xbf16>
    %470 = vector.shape_cast %469 : vector<1x2x32xbf16> to vector<2x32xbf16>
    %c0_150 = arith.constant 0 : index
    %c0_151 = arith.constant 0 : index
    %471 = vector.load %arg12[%c0_150, %c0_151] : memref<32x512xbf16, #tpu.memory_space<vmem>>, vector<32x512xbf16>
    %cst_152 = arith.constant dense<0.000000e+00> : vector<2x512xf32>
    %472 = tpu.matmul %470, %471, %cst_152 {dimension_numbers = #tpu.dot_dimension_numbers<[1], [0], [0], [1], [0, 0, 1, 1], [], []>} : vector<2x32xbf16>, vector<32x512xbf16>, vector<2x512xf32> -> vector<2x512xf32>
    %473 = arith.truncf %467 : vector<2x128xf32> to vector<2x128xbf16>
    %c0_153 = arith.constant 0 : index
    %c0_154 = arith.constant 0 : index
    %474 = vector.load %arg13[%c0_153, %c0_154] : memref<128x512xbf16, #tpu.memory_space<vmem>>, vector<128x512xbf16>
    %cst_155 = arith.constant dense<0.000000e+00> : vector<2x512xf32>
    %475 = tpu.matmul %473, %474, %cst_155 {dimension_numbers = #tpu.dot_dimension_numbers<[1], [0], [0], [1], [0, 0, 1, 1], [], []>} : vector<2x128xbf16>, vector<128x512xbf16>, vector<2x512xf32> -> vector<2x512xf32>
    %476 = arith.addf %472, %475 : vector<2x512xf32>
    %477 = arith.addf %476, %437 : vector<2x512xf32>
    %478 = vector.extract_strided_slice %477 {offsets = [0, 0], sizes = [2, 128], strides = [1, 1]} : vector<2x512xf32> to vector<2x128xf32>
    %479 = arith.negf %478 : vector<2x128xf32>
    %480 = math.exp %479 : vector<2x128xf32>
    %cst_156 = arith.constant 1.000000e+00 : f32
    %481 = vector.broadcast %cst_156 : f32 to vector<2x128xf32>
    %482 = arith.addf %481, %480 : vector<2x128xf32>
    %483 = arith.divf %481, %482 : vector<2x128xf32>
    %484 = vector.extract_strided_slice %477 {offsets = [0, 128], sizes = [2, 128], strides = [1, 1]} : vector<2x512xf32> to vector<2x128xf32>
    %485 = arith.negf %484 : vector<2x128xf32>
    %486 = math.exp %485 : vector<2x128xf32>
    %cst_157 = arith.constant 1.000000e+00 : f32
    %487 = vector.broadcast %cst_157 : f32 to vector<2x128xf32>
    %488 = arith.addf %487, %486 : vector<2x128xf32>
    %489 = arith.divf %487, %488 : vector<2x128xf32>
    %490 = vector.extract_strided_slice %477 {offsets = [0, 256], sizes = [2, 128], strides = [1, 1]} : vector<2x512xf32> to vector<2x128xf32>
    %491 = math.tanh %490 : vector<2x128xf32>
    %492 = vector.extract_strided_slice %477 {offsets = [0, 384], sizes = [2, 128], strides = [1, 1]} : vector<2x512xf32> to vector<2x128xf32>
    %493 = arith.negf %492 : vector<2x128xf32>
    %494 = math.exp %493 : vector<2x128xf32>
    %cst_158 = arith.constant 1.000000e+00 : f32
    %495 = vector.broadcast %cst_158 : f32 to vector<2x128xf32>
    %496 = arith.addf %495, %494 : vector<2x128xf32>
    %497 = arith.divf %495, %496 : vector<2x128xf32>
    %498 = arith.mulf %489, %424 : vector<2x128xf32>
    %499 = arith.mulf %483, %491 : vector<2x128xf32>
    %500 = arith.addf %498, %499 : vector<2x128xf32>
    %501 = math.tanh %500 : vector<2x128xf32>
    %502 = arith.mulf %497, %501 : vector<2x128xf32>
    %503 = arith.truncf %502 : vector<2x128xf32> to vector<2x128xbf16>
    %504 = arith.index_cast %c4_i32 : i32 to index
    %c0_159 = arith.constant 0 : index
    %c0_160 = arith.constant 0 : index
    %505 = vector.load %arg21[%504, %c0_159, %c0_160] : memref<8x2x128xbf16, #tpu.memory_space<vmem>>, vector<1x2x128xbf16>
    %506 = vector.shape_cast %505 : vector<1x2x128xbf16> to vector<2x128xbf16>
    %507 = vector.shape_cast %503 : vector<2x128xbf16> to vector<1x2x128xbf16>
    tpu.vector_store %arg21[%504, %c0_159, %c0_160], %507 {strides = array<i32>} : memref<8x2x128xbf16, #tpu.memory_space<vmem>>, vector<1x2x128xbf16>,
    %508 = arith.extui %429 : vector<2x1xi1> to vector<2x1xi32>
    %509 = arith.sitofp %508 : vector<2x1xi32> to vector<2x1xf32>
    %510 = arith.index_cast %c4_i32 : i32 to index
    %c0_161 = arith.constant 0 : index
    %c0_162 = arith.constant 0 : index
    %511 = vector.load %arg22[%510, %c0_161, %c0_162] : memref<8x2x1xf32, #tpu.memory_space<vmem>>, vector<1x2x1xf32>
    %512 = vector.shape_cast %511 : vector<1x2x1xf32> to vector<2x1xf32>
    %513 = vector.shape_cast %509 : vector<2x1xf32> to vector<1x2x1xf32>
    tpu.vector_store %arg22[%510, %c0_161, %c0_162], %513 {strides = array<i32>} : memref<8x2x1xf32, #tpu.memory_space<vmem>>, vector<1x2x1xf32>,
    %cst_163 = arith.constant 0.000000e+00 : f32
    %514 = vector.shape_cast %429 : vector<2x1xi1> to vector<2x1xi1>
    %515 = vector.broadcast %514 : vector<2x1xi1> to vector<2x16xi1>
    %516 = vector.broadcast %cst_163 : f32 to vector<2x16xf32>
    %517 = arith.select %515, %457, %516 : vector<2x16xi1>, vector<2x16xf32>
    %518 = arith.index_cast %c4_i32 : i32 to index
    %c0_164 = arith.constant 0 : index
    %c0_165 = arith.constant 0 : index
    %519 = vector.load %arg17[%518, %c0_164, %c0_165] : memref<8x2x16xf32, #tpu.memory_space<vmem>>, vector<1x2x16xf32>
    %520 = vector.shape_cast %519 : vector<1x2x16xf32> to vector<2x16xf32>
    %521 = vector.shape_cast %517 : vector<2x16xf32> to vector<1x2x16xf32>
    tpu.vector_store %arg17[%518, %c0_164, %c0_165], %521 {strides = array<i32>} : memref<8x2x16xf32, #tpu.memory_space<vmem>>, vector<1x2x16xf32>,
    %522 = vector.shape_cast %429 : vector<2x1xi1> to vector<2x1xi1>
    %523 = vector.broadcast %522 : vector<2x1xi1> to vector<2x128xi1>
    %524 = arith.select %523, %502, %421 : vector<2x128xi1>, vector<2x128xf32>
    %525 = vector.shape_cast %429 : vector<2x1xi1> to vector<2x1xi1>
    %526 = vector.broadcast %525 : vector<2x1xi1> to vector<2x128xi1>
    %527 = arith.select %526, %500, %424 : vector<2x128xi1>, vector<2x128xf32>
    %c5_i32 = arith.constant 5 : i32
    %528 = arith.addi %6, %c5_i32 : i32
    %529 = arith.index_cast %528 : i32 to index
    %530 = memref.load %arg2[%529] : memref<16xi32, #tpu.memory_space<smem>>
    %531 = vector.broadcast %530 : i32 to vector<2x1xi32>
    %532 = arith.cmpi slt, %10, %531 : vector<2x1xi32>
    %533 = arith.truncf %524 : vector<2x128xf32> to vector<2x128xbf16>
    %c0_166 = arith.constant 0 : index
    %c0_167 = arith.constant 0 : index
    %534 = vector.load %arg9[%c0_166, %c0_167] : memref<128x768xbf16, #tpu.memory_space<vmem>>, vector<128x768xbf16>
    %cst_168 = arith.constant dense<0.000000e+00> : vector<2x768xf32>
    %535 = tpu.matmul %533, %534, %cst_168 {dimension_numbers = #tpu.dot_dimension_numbers<[1], [0], [0], [1], [0, 0, 1, 1], [], []>} : vector<2x128xbf16>, vector<128x768xbf16>, vector<2x768xf32> -> vector<2x768xf32>
    %c0_169 = arith.constant 0 : index
    %c0_170 = arith.constant 0 : index
    %536 = vector.load %arg10[%c0_169, %c0_170] : memref<1x768xf32, #tpu.memory_space<vmem>>, vector<1x768xf32>
    %537 = vector.broadcast %536 : vector<1x768xf32> to vector<2x768xf32>
    %538 = arith.addf %535, %537 : vector<2x768xf32>
    %539 = vector.extract_strided_slice %538 {offsets = [0, 0], sizes = [2, 128], strides = [1, 1]} : vector<2x768xf32> to vector<2x128xf32>
    %540 = vector.extract_strided_slice %538 {offsets = [0, 128], sizes = [2, 512], strides = [1, 1]} : vector<2x768xf32> to vector<2x512xf32>
    %541 = vector.extract_strided_slice %538 {offsets = [0, 640], sizes = [2, 128], strides = [1, 1]} : vector<2x768xf32> to vector<2x128xf32>
    %542 = vector.shape_cast %541 : vector<2x128xf32> to vector<2x1x128xf32>
    %543 = vector.broadcast %542 : vector<2x1x128xf32> to vector<2x16x128xf32>
    %544 = arith.addf %5, %543 : vector<2x16x128xf32>
    %cst_171 = arith.constant 0.000000e+00 : f32
    %545 = vector.broadcast %cst_171 : f32 to vector<2x16x128xf32>
    %546 = arith.maximumf %544, %545 : vector<2x16x128xf32>
    %c0_172 = arith.constant 0 : index
    %c0_173 = arith.constant 0 : index
    %547 = vector.load %arg11[%c0_172, %c0_173] : memref<1x128xf32, #tpu.memory_space<vmem>>, vector<1x128xf32>
    %548 = vector.shape_cast %547 : vector<1x128xf32> to vector<1x1x128xf32>
    %549 = vector.broadcast %548 : vector<1x1x128xf32> to vector<2x16x128xf32>
    %550 = arith.mulf %546, %549 : vector<2x16x128xf32>
    %cst_174 = arith.constant dense<0.000000e+00> : vector<2x16xf32>
    %551 = vector.multi_reduction <add>, %550, %cst_174 [2] : vector<2x16x128xf32> to vector<2x16xf32>
    %cst_175 = arith.constant dense<0xFF800000> : vector<2xf32>
    %552 = vector.multi_reduction <maximumf>, %551, %cst_175 [1] : vector<2x16xf32> to vector<2xf32>
    %553 = vector.shape_cast %552 : vector<2xf32> to vector<2x1xf32>
    %554 = vector.broadcast %553 : vector<2x1xf32> to vector<2x16xf32>
    %555 = arith.subf %551, %554 : vector<2x16xf32>
    %556 = math.exp %555 : vector<2x16xf32>
    %cst_176 = arith.constant dense<0.000000e+00> : vector<2xf32>
    %557 = vector.multi_reduction <add>, %556, %cst_176 [1] : vector<2x16xf32> to vector<2xf32>
    %558 = vector.shape_cast %557 : vector<2xf32> to vector<2x1xf32>
    %559 = vector.broadcast %558 : vector<2x1xf32> to vector<2x16xf32>
    %560 = arith.divf %556, %559 : vector<2x16xf32>
    %561 = vector.shape_cast %560 : vector<2x16xf32> to vector<2x1x16xf32>
    %562 = arith.truncf %561 : vector<2x1x16xf32> to vector<2x1x16xbf16>
    "tpu.trace_start"() <{level = 10 : i32, message = "bqp,bpe->bqe"}> : () -> ()
    %cst_177 = arith.constant dense<0.000000e+00> : vector<2x1x128xf32>
    %563 = tpu.matmul %562, %0, %cst_177 {dimension_numbers = #tpu.dot_dimension_numbers<[2], [1], [1], [2], [0, 0, 0, 1, 1, 2], [0], [0]>} : vector<2x1x16xbf16>, vector<2x16x128xbf16>, vector<2x1x128xf32> -> vector<2x1x128xf32>
    "tpu.trace_stop"() : () -> ()
    %564 = vector.shape_cast %563 : vector<2x1x128xf32> to vector<2x128xf32>
    %565 = arith.negf %539 : vector<2x128xf32>
    %566 = math.exp %565 : vector<2x128xf32>
    %cst_178 = arith.constant 1.000000e+00 : f32
    %567 = vector.broadcast %cst_178 : f32 to vector<2x128xf32>
    %568 = arith.addf %567, %566 : vector<2x128xf32>
    %569 = arith.divf %567, %568 : vector<2x128xf32>
    %570 = arith.mulf %569, %564 : vector<2x128xf32>
    %571 = arith.index_cast %c5_i32 : i32 to index
    %c0_179 = arith.constant 0 : index
    %c0_180 = arith.constant 0 : index
    %572 = vector.load %arg4[%571, %c0_179, %c0_180] : memref<8x2x32xbf16, #tpu.memory_space<vmem>>, vector<1x2x32xbf16>
    %573 = vector.shape_cast %572 : vector<1x2x32xbf16> to vector<2x32xbf16>
    %c0_181 = arith.constant 0 : index
    %c0_182 = arith.constant 0 : index
    %574 = vector.load %arg12[%c0_181, %c0_182] : memref<32x512xbf16, #tpu.memory_space<vmem>>, vector<32x512xbf16>
    %cst_183 = arith.constant dense<0.000000e+00> : vector<2x512xf32>
    %575 = tpu.matmul %573, %574, %cst_183 {dimension_numbers = #tpu.dot_dimension_numbers<[1], [0], [0], [1], [0, 0, 1, 1], [], []>} : vector<2x32xbf16>, vector<32x512xbf16>, vector<2x512xf32> -> vector<2x512xf32>
    %576 = arith.truncf %570 : vector<2x128xf32> to vector<2x128xbf16>
    %c0_184 = arith.constant 0 : index
    %c0_185 = arith.constant 0 : index
    %577 = vector.load %arg13[%c0_184, %c0_185] : memref<128x512xbf16, #tpu.memory_space<vmem>>, vector<128x512xbf16>
    %cst_186 = arith.constant dense<0.000000e+00> : vector<2x512xf32>
    %578 = tpu.matmul %576, %577, %cst_186 {dimension_numbers = #tpu.dot_dimension_numbers<[1], [0], [0], [1], [0, 0, 1, 1], [], []>} : vector<2x128xbf16>, vector<128x512xbf16>, vector<2x512xf32> -> vector<2x512xf32>
    %579 = arith.addf %575, %578 : vector<2x512xf32>
    %580 = arith.addf %579, %540 : vector<2x512xf32>
    %581 = vector.extract_strided_slice %580 {offsets = [0, 0], sizes = [2, 128], strides = [1, 1]} : vector<2x512xf32> to vector<2x128xf32>
    %582 = arith.negf %581 : vector<2x128xf32>
    %583 = math.exp %582 : vector<2x128xf32>
    %cst_187 = arith.constant 1.000000e+00 : f32
    %584 = vector.broadcast %cst_187 : f32 to vector<2x128xf32>
    %585 = arith.addf %584, %583 : vector<2x128xf32>
    %586 = arith.divf %584, %585 : vector<2x128xf32>
    %587 = vector.extract_strided_slice %580 {offsets = [0, 128], sizes = [2, 128], strides = [1, 1]} : vector<2x512xf32> to vector<2x128xf32>
    %588 = arith.negf %587 : vector<2x128xf32>
    %589 = math.exp %588 : vector<2x128xf32>
    %cst_188 = arith.constant 1.000000e+00 : f32
    %590 = vector.broadcast %cst_188 : f32 to vector<2x128xf32>
    %591 = arith.addf %590, %589 : vector<2x128xf32>
    %592 = arith.divf %590, %591 : vector<2x128xf32>
    %593 = vector.extract_strided_slice %580 {offsets = [0, 256], sizes = [2, 128], strides = [1, 1]} : vector<2x512xf32> to vector<2x128xf32>
    %594 = math.tanh %593 : vector<2x128xf32>
    %595 = vector.extract_strided_slice %580 {offsets = [0, 384], sizes = [2, 128], strides = [1, 1]} : vector<2x512xf32> to vector<2x128xf32>
    %596 = arith.negf %595 : vector<2x128xf32>
    %597 = math.exp %596 : vector<2x128xf32>
    %cst_189 = arith.constant 1.000000e+00 : f32
    %598 = vector.broadcast %cst_189 : f32 to vector<2x128xf32>
    %599 = arith.addf %598, %597 : vector<2x128xf32>
    %600 = arith.divf %598, %599 : vector<2x128xf32>
    %601 = arith.mulf %592, %527 : vector<2x128xf32>
    %602 = arith.mulf %586, %594 : vector<2x128xf32>
    %603 = arith.addf %601, %602 : vector<2x128xf32>
    %604 = math.tanh %603 : vector<2x128xf32>
    %605 = arith.mulf %600, %604 : vector<2x128xf32>
    %606 = arith.truncf %605 : vector<2x128xf32> to vector<2x128xbf16>
    %607 = arith.index_cast %c5_i32 : i32 to index
    %c0_190 = arith.constant 0 : index
    %c0_191 = arith.constant 0 : index
    %608 = vector.load %arg21[%607, %c0_190, %c0_191] : memref<8x2x128xbf16, #tpu.memory_space<vmem>>, vector<1x2x128xbf16>
    %609 = vector.shape_cast %608 : vector<1x2x128xbf16> to vector<2x128xbf16>
    %610 = vector.shape_cast %606 : vector<2x128xbf16> to vector<1x2x128xbf16>
    tpu.vector_store %arg21[%607, %c0_190, %c0_191], %610 {strides = array<i32>} : memref<8x2x128xbf16, #tpu.memory_space<vmem>>, vector<1x2x128xbf16>,
    %611 = arith.extui %532 : vector<2x1xi1> to vector<2x1xi32>
    %612 = arith.sitofp %611 : vector<2x1xi32> to vector<2x1xf32>
    %613 = arith.index_cast %c5_i32 : i32 to index
    %c0_192 = arith.constant 0 : index
    %c0_193 = arith.constant 0 : index
    %614 = vector.load %arg22[%613, %c0_192, %c0_193] : memref<8x2x1xf32, #tpu.memory_space<vmem>>, vector<1x2x1xf32>
    %615 = vector.shape_cast %614 : vector<1x2x1xf32> to vector<2x1xf32>
    %616 = vector.shape_cast %612 : vector<2x1xf32> to vector<1x2x1xf32>
    tpu.vector_store %arg22[%613, %c0_192, %c0_193], %616 {strides = array<i32>} : memref<8x2x1xf32, #tpu.memory_space<vmem>>, vector<1x2x1xf32>,
    %cst_194 = arith.constant 0.000000e+00 : f32
    %617 = vector.shape_cast %532 : vector<2x1xi1> to vector<2x1xi1>
    %618 = vector.broadcast %617 : vector<2x1xi1> to vector<2x16xi1>
    %619 = vector.broadcast %cst_194 : f32 to vector<2x16xf32>
    %620 = arith.select %618, %560, %619 : vector<2x16xi1>, vector<2x16xf32>
    %621 = arith.index_cast %c5_i32 : i32 to index
    %c0_195 = arith.constant 0 : index
    %c0_196 = arith.constant 0 : index
    %622 = vector.load %arg17[%621, %c0_195, %c0_196] : memref<8x2x16xf32, #tpu.memory_space<vmem>>, vector<1x2x16xf32>
    %623 = vector.shape_cast %622 : vector<1x2x16xf32> to vector<2x16xf32>
    %624 = vector.shape_cast %620 : vector<2x16xf32> to vector<1x2x16xf32>
    tpu.vector_store %arg17[%621, %c0_195, %c0_196], %624 {strides = array<i32>} : memref<8x2x16xf32, #tpu.memory_space<vmem>>, vector<1x2x16xf32>,
    %625 = vector.shape_cast %532 : vector<2x1xi1> to vector<2x1xi1>
    %626 = vector.broadcast %625 : vector<2x1xi1> to vector<2x128xi1>
    %627 = arith.select %626, %605, %524 : vector<2x128xi1>, vector<2x128xf32>
    %628 = vector.shape_cast %532 : vector<2x1xi1> to vector<2x1xi1>
    %629 = vector.broadcast %628 : vector<2x1xi1> to vector<2x128xi1>
    %630 = arith.select %629, %603, %527 : vector<2x128xi1>, vector<2x128xf32>
    %c6_i32 = arith.constant 6 : i32
    %631 = arith.addi %6, %c6_i32 : i32
    %632 = arith.index_cast %631 : i32 to index
    %633 = memref.load %arg2[%632] : memref<16xi32, #tpu.memory_space<smem>>
    %634 = vector.broadcast %633 : i32 to vector<2x1xi32>
    %635 = arith.cmpi slt, %10, %634 : vector<2x1xi32>
    %636 = arith.truncf %627 : vector<2x128xf32> to vector<2x128xbf16>
    %c0_197 = arith.constant 0 : index
    %c0_198 = arith.constant 0 : index
    %637 = vector.load %arg9[%c0_197, %c0_198] : memref<128x768xbf16, #tpu.memory_space<vmem>>, vector<128x768xbf16>
    %cst_199 = arith.constant dense<0.000000e+00> : vector<2x768xf32>
    %638 = tpu.matmul %636, %637, %cst_199 {dimension_numbers = #tpu.dot_dimension_numbers<[1], [0], [0], [1], [0, 0, 1, 1], [], []>} : vector<2x128xbf16>, vector<128x768xbf16>, vector<2x768xf32> -> vector<2x768xf32>
    %c0_200 = arith.constant 0 : index
    %c0_201 = arith.constant 0 : index
    %639 = vector.load %arg10[%c0_200, %c0_201] : memref<1x768xf32, #tpu.memory_space<vmem>>, vector<1x768xf32>
    %640 = vector.broadcast %639 : vector<1x768xf32> to vector<2x768xf32>
    %641 = arith.addf %638, %640 : vector<2x768xf32>
    %642 = vector.extract_strided_slice %641 {offsets = [0, 0], sizes = [2, 128], strides = [1, 1]} : vector<2x768xf32> to vector<2x128xf32>
    %643 = vector.extract_strided_slice %641 {offsets = [0, 128], sizes = [2, 512], strides = [1, 1]} : vector<2x768xf32> to vector<2x512xf32>
    %644 = vector.extract_strided_slice %641 {offsets = [0, 640], sizes = [2, 128], strides = [1, 1]} : vector<2x768xf32> to vector<2x128xf32>
    %645 = vector.shape_cast %644 : vector<2x128xf32> to vector<2x1x128xf32>
    %646 = vector.broadcast %645 : vector<2x1x128xf32> to vector<2x16x128xf32>
    %647 = arith.addf %5, %646 : vector<2x16x128xf32>
    %cst_202 = arith.constant 0.000000e+00 : f32
    %648 = vector.broadcast %cst_202 : f32 to vector<2x16x128xf32>
    %649 = arith.maximumf %647, %648 : vector<2x16x128xf32>
    %c0_203 = arith.constant 0 : index
    %c0_204 = arith.constant 0 : index
    %650 = vector.load %arg11[%c0_203, %c0_204] : memref<1x128xf32, #tpu.memory_space<vmem>>, vector<1x128xf32>
    %651 = vector.shape_cast %650 : vector<1x128xf32> to vector<1x1x128xf32>
    %652 = vector.broadcast %651 : vector<1x1x128xf32> to vector<2x16x128xf32>
    %653 = arith.mulf %649, %652 : vector<2x16x128xf32>
    %cst_205 = arith.constant dense<0.000000e+00> : vector<2x16xf32>
    %654 = vector.multi_reduction <add>, %653, %cst_205 [2] : vector<2x16x128xf32> to vector<2x16xf32>
    %cst_206 = arith.constant dense<0xFF800000> : vector<2xf32>
    %655 = vector.multi_reduction <maximumf>, %654, %cst_206 [1] : vector<2x16xf32> to vector<2xf32>
    %656 = vector.shape_cast %655 : vector<2xf32> to vector<2x1xf32>
    %657 = vector.broadcast %656 : vector<2x1xf32> to vector<2x16xf32>
    %658 = arith.subf %654, %657 : vector<2x16xf32>
    %659 = math.exp %658 : vector<2x16xf32>
    %cst_207 = arith.constant dense<0.000000e+00> : vector<2xf32>
    %660 = vector.multi_reduction <add>, %659, %cst_207 [1] : vector<2x16xf32> to vector<2xf32>
    %661 = vector.shape_cast %660 : vector<2xf32> to vector<2x1xf32>
    %662 = vector.broadcast %661 : vector<2x1xf32> to vector<2x16xf32>
    %663 = arith.divf %659, %662 : vector<2x16xf32>
    %664 = vector.shape_cast %663 : vector<2x16xf32> to vector<2x1x16xf32>
    %665 = arith.truncf %664 : vector<2x1x16xf32> to vector<2x1x16xbf16>
    "tpu.trace_start"() <{level = 10 : i32, message = "bqp,bpe->bqe"}> : () -> ()
    %cst_208 = arith.constant dense<0.000000e+00> : vector<2x1x128xf32>
    %666 = tpu.matmul %665, %0, %cst_208 {dimension_numbers = #tpu.dot_dimension_numbers<[2], [1], [1], [2], [0, 0, 0, 1, 1, 2], [0], [0]>} : vector<2x1x16xbf16>, vector<2x16x128xbf16>, vector<2x1x128xf32> -> vector<2x1x128xf32>
    "tpu.trace_stop"() : () -> ()
    %667 = vector.shape_cast %666 : vector<2x1x128xf32> to vector<2x128xf32>
    %668 = arith.negf %642 : vector<2x128xf32>
    %669 = math.exp %668 : vector<2x128xf32>
    %cst_209 = arith.constant 1.000000e+00 : f32
    %670 = vector.broadcast %cst_209 : f32 to vector<2x128xf32>
    %671 = arith.addf %670, %669 : vector<2x128xf32>
    %672 = arith.divf %670, %671 : vector<2x128xf32>
    %673 = arith.mulf %672, %667 : vector<2x128xf32>
    %674 = arith.index_cast %c6_i32 : i32 to index
    %c0_210 = arith.constant 0 : index
    %c0_211 = arith.constant 0 : index
    %675 = vector.load %arg4[%674, %c0_210, %c0_211] : memref<8x2x32xbf16, #tpu.memory_space<vmem>>, vector<1x2x32xbf16>
    %676 = vector.shape_cast %675 : vector<1x2x32xbf16> to vector<2x32xbf16>
    %c0_212 = arith.constant 0 : index
    %c0_213 = arith.constant 0 : index
    %677 = vector.load %arg12[%c0_212, %c0_213] : memref<32x512xbf16, #tpu.memory_space<vmem>>, vector<32x512xbf16>
    %cst_214 = arith.constant dense<0.000000e+00> : vector<2x512xf32>
    %678 = tpu.matmul %676, %677, %cst_214 {dimension_numbers = #tpu.dot_dimension_numbers<[1], [0], [0], [1], [0, 0, 1, 1], [], []>} : vector<2x32xbf16>, vector<32x512xbf16>, vector<2x512xf32> -> vector<2x512xf32>
    %679 = arith.truncf %673 : vector<2x128xf32> to vector<2x128xbf16>
    %c0_215 = arith.constant 0 : index
    %c0_216 = arith.constant 0 : index
    %680 = vector.load %arg13[%c0_215, %c0_216] : memref<128x512xbf16, #tpu.memory_space<vmem>>, vector<128x512xbf16>
    %cst_217 = arith.constant dense<0.000000e+00> : vector<2x512xf32>
    %681 = tpu.matmul %679, %680, %cst_217 {dimension_numbers = #tpu.dot_dimension_numbers<[1], [0], [0], [1], [0, 0, 1, 1], [], []>} : vector<2x128xbf16>, vector<128x512xbf16>, vector<2x512xf32> -> vector<2x512xf32>
    %682 = arith.addf %678, %681 : vector<2x512xf32>
    %683 = arith.addf %682, %643 : vector<2x512xf32>
    %684 = vector.extract_strided_slice %683 {offsets = [0, 0], sizes = [2, 128], strides = [1, 1]} : vector<2x512xf32> to vector<2x128xf32>
    %685 = arith.negf %684 : vector<2x128xf32>
    %686 = math.exp %685 : vector<2x128xf32>
    %cst_218 = arith.constant 1.000000e+00 : f32
    %687 = vector.broadcast %cst_218 : f32 to vector<2x128xf32>
    %688 = arith.addf %687, %686 : vector<2x128xf32>
    %689 = arith.divf %687, %688 : vector<2x128xf32>
    %690 = vector.extract_strided_slice %683 {offsets = [0, 128], sizes = [2, 128], strides = [1, 1]} : vector<2x512xf32> to vector<2x128xf32>
    %691 = arith.negf %690 : vector<2x128xf32>
    %692 = math.exp %691 : vector<2x128xf32>
    %cst_219 = arith.constant 1.000000e+00 : f32
    %693 = vector.broadcast %cst_219 : f32 to vector<2x128xf32>
    %694 = arith.addf %693, %692 : vector<2x128xf32>
    %695 = arith.divf %693, %694 : vector<2x128xf32>
    %696 = vector.extract_strided_slice %683 {offsets = [0, 256], sizes = [2, 128], strides = [1, 1]} : vector<2x512xf32> to vector<2x128xf32>
    %697 = math.tanh %696 : vector<2x128xf32>
    %698 = vector.extract_strided_slice %683 {offsets = [0, 384], sizes = [2, 128], strides = [1, 1]} : vector<2x512xf32> to vector<2x128xf32>
    %699 = arith.negf %698 : vector<2x128xf32>
    %700 = math.exp %699 : vector<2x128xf32>
    %cst_220 = arith.constant 1.000000e+00 : f32
    %701 = vector.broadcast %cst_220 : f32 to vector<2x128xf32>
    %702 = arith.addf %701, %700 : vector<2x128xf32>
    %703 = arith.divf %701, %702 : vector<2x128xf32>
    %704 = arith.mulf %695, %630 : vector<2x128xf32>
    %705 = arith.mulf %689, %697 : vector<2x128xf32>
    %706 = arith.addf %704, %705 : vector<2x128xf32>
    %707 = math.tanh %706 : vector<2x128xf32>
    %708 = arith.mulf %703, %707 : vector<2x128xf32>
    %709 = arith.truncf %708 : vector<2x128xf32> to vector<2x128xbf16>
    %710 = arith.index_cast %c6_i32 : i32 to index
    %c0_221 = arith.constant 0 : index
    %c0_222 = arith.constant 0 : index
    %711 = vector.load %arg21[%710, %c0_221, %c0_222] : memref<8x2x128xbf16, #tpu.memory_space<vmem>>, vector<1x2x128xbf16>
    %712 = vector.shape_cast %711 : vector<1x2x128xbf16> to vector<2x128xbf16>
    %713 = vector.shape_cast %709 : vector<2x128xbf16> to vector<1x2x128xbf16>
    tpu.vector_store %arg21[%710, %c0_221, %c0_222], %713 {strides = array<i32>} : memref<8x2x128xbf16, #tpu.memory_space<vmem>>, vector<1x2x128xbf16>,
    %714 = arith.extui %635 : vector<2x1xi1> to vector<2x1xi32>
    %715 = arith.sitofp %714 : vector<2x1xi32> to vector<2x1xf32>
    %716 = arith.index_cast %c6_i32 : i32 to index
    %c0_223 = arith.constant 0 : index
    %c0_224 = arith.constant 0 : index
    %717 = vector.load %arg22[%716, %c0_223, %c0_224] : memref<8x2x1xf32, #tpu.memory_space<vmem>>, vector<1x2x1xf32>
    %718 = vector.shape_cast %717 : vector<1x2x1xf32> to vector<2x1xf32>
    %719 = vector.shape_cast %715 : vector<2x1xf32> to vector<1x2x1xf32>
    tpu.vector_store %arg22[%716, %c0_223, %c0_224], %719 {strides = array<i32>} : memref<8x2x1xf32, #tpu.memory_space<vmem>>, vector<1x2x1xf32>,
    %cst_225 = arith.constant 0.000000e+00 : f32
    %720 = vector.shape_cast %635 : vector<2x1xi1> to vector<2x1xi1>
    %721 = vector.broadcast %720 : vector<2x1xi1> to vector<2x16xi1>
    %722 = vector.broadcast %cst_225 : f32 to vector<2x16xf32>
    %723 = arith.select %721, %663, %722 : vector<2x16xi1>, vector<2x16xf32>
    %724 = arith.index_cast %c6_i32 : i32 to index
    %c0_226 = arith.constant 0 : index
    %c0_227 = arith.constant 0 : index
    %725 = vector.load %arg17[%724, %c0_226, %c0_227] : memref<8x2x16xf32, #tpu.memory_space<vmem>>, vector<1x2x16xf32>
    %726 = vector.shape_cast %725 : vector<1x2x16xf32> to vector<2x16xf32>
    %727 = vector.shape_cast %723 : vector<2x16xf32> to vector<1x2x16xf32>
    tpu.vector_store %arg17[%724, %c0_226, %c0_227], %727 {strides = array<i32>} : memref<8x2x16xf32, #tpu.memory_space<vmem>>, vector<1x2x16xf32>,
    %728 = vector.shape_cast %635 : vector<2x1xi1> to vector<2x1xi1>
    %729 = vector.broadcast %728 : vector<2x1xi1> to vector<2x128xi1>
    %730 = arith.select %729, %708, %627 : vector<2x128xi1>, vector<2x128xf32>
    %731 = vector.shape_cast %635 : vector<2x1xi1> to vector<2x1xi1>
    %732 = vector.broadcast %731 : vector<2x1xi1> to vector<2x128xi1>
    %733 = arith.select %732, %706, %630 : vector<2x128xi1>, vector<2x128xf32>
    %c7_i32 = arith.constant 7 : i32
    %734 = arith.addi %6, %c7_i32 : i32
    %735 = arith.index_cast %734 : i32 to index
    %736 = memref.load %arg2[%735] : memref<16xi32, #tpu.memory_space<smem>>
    %737 = vector.broadcast %736 : i32 to vector<2x1xi32>
    %738 = arith.cmpi slt, %10, %737 : vector<2x1xi32>
    %739 = arith.truncf %730 : vector<2x128xf32> to vector<2x128xbf16>
    %c0_228 = arith.constant 0 : index
    %c0_229 = arith.constant 0 : index
    %740 = vector.load %arg9[%c0_228, %c0_229] : memref<128x768xbf16, #tpu.memory_space<vmem>>, vector<128x768xbf16>
    %cst_230 = arith.constant dense<0.000000e+00> : vector<2x768xf32>
    %741 = tpu.matmul %739, %740, %cst_230 {dimension_numbers = #tpu.dot_dimension_numbers<[1], [0], [0], [1], [0, 0, 1, 1], [], []>} : vector<2x128xbf16>, vector<128x768xbf16>, vector<2x768xf32> -> vector<2x768xf32>
    %c0_231 = arith.constant 0 : index
    %c0_232 = arith.constant 0 : index
    %742 = vector.load %arg10[%c0_231, %c0_232] : memref<1x768xf32, #tpu.memory_space<vmem>>, vector<1x768xf32>
    %743 = vector.broadcast %742 : vector<1x768xf32> to vector<2x768xf32>
    %744 = arith.addf %741, %743 : vector<2x768xf32>
    %745 = vector.extract_strided_slice %744 {offsets = [0, 0], sizes = [2, 128], strides = [1, 1]} : vector<2x768xf32> to vector<2x128xf32>
    %746 = vector.extract_strided_slice %744 {offsets = [0, 128], sizes = [2, 512], strides = [1, 1]} : vector<2x768xf32> to vector<2x512xf32>
    %747 = vector.extract_strided_slice %744 {offsets = [0, 640], sizes = [2, 128], strides = [1, 1]} : vector<2x768xf32> to vector<2x128xf32>
    %748 = vector.shape_cast %747 : vector<2x128xf32> to vector<2x1x128xf32>
    %749 = vector.broadcast %748 : vector<2x1x128xf32> to vector<2x16x128xf32>
    %750 = arith.addf %5, %749 : vector<2x16x128xf32>
    %cst_233 = arith.constant 0.000000e+00 : f32
    %751 = vector.broadcast %cst_233 : f32 to vector<2x16x128xf32>
    %752 = arith.maximumf %750, %751 : vector<2x16x128xf32>
    %c0_234 = arith.constant 0 : index
    %c0_235 = arith.constant 0 : index
    %753 = vector.load %arg11[%c0_234, %c0_235] : memref<1x128xf32, #tpu.memory_space<vmem>>, vector<1x128xf32>
    %754 = vector.shape_cast %753 : vector<1x128xf32> to vector<1x1x128xf32>
    %755 = vector.broadcast %754 : vector<1x1x128xf32> to vector<2x16x128xf32>
    %756 = arith.mulf %752, %755 : vector<2x16x128xf32>
    %cst_236 = arith.constant dense<0.000000e+00> : vector<2x16xf32>
    %757 = vector.multi_reduction <add>, %756, %cst_236 [2] : vector<2x16x128xf32> to vector<2x16xf32>
    %cst_237 = arith.constant dense<0xFF800000> : vector<2xf32>
    %758 = vector.multi_reduction <maximumf>, %757, %cst_237 [1] : vector<2x16xf32> to vector<2xf32>
    %759 = vector.shape_cast %758 : vector<2xf32> to vector<2x1xf32>
    %760 = vector.broadcast %759 : vector<2x1xf32> to vector<2x16xf32>
    %761 = arith.subf %757, %760 : vector<2x16xf32>
    %762 = math.exp %761 : vector<2x16xf32>
    %cst_238 = arith.constant dense<0.000000e+00> : vector<2xf32>
    %763 = vector.multi_reduction <add>, %762, %cst_238 [1] : vector<2x16xf32> to vector<2xf32>
    %764 = vector.shape_cast %763 : vector<2xf32> to vector<2x1xf32>
    %765 = vector.broadcast %764 : vector<2x1xf32> to vector<2x16xf32>
    %766 = arith.divf %762, %765 : vector<2x16xf32>
    %767 = vector.shape_cast %766 : vector<2x16xf32> to vector<2x1x16xf32>
    %768 = arith.truncf %767 : vector<2x1x16xf32> to vector<2x1x16xbf16>
    "tpu.trace_start"() <{level = 10 : i32, message = "bqp,bpe->bqe"}> : () -> ()
    %cst_239 = arith.constant dense<0.000000e+00> : vector<2x1x128xf32>
    %769 = tpu.matmul %768, %0, %cst_239 {dimension_numbers = #tpu.dot_dimension_numbers<[2], [1], [1], [2], [0, 0, 0, 1, 1, 2], [0], [0]>} : vector<2x1x16xbf16>, vector<2x16x128xbf16>, vector<2x1x128xf32> -> vector<2x1x128xf32>
    "tpu.trace_stop"() : () -> ()
    %770 = vector.shape_cast %769 : vector<2x1x128xf32> to vector<2x128xf32>
    %771 = arith.negf %745 : vector<2x128xf32>
    %772 = math.exp %771 : vector<2x128xf32>
    %cst_240 = arith.constant 1.000000e+00 : f32
    %773 = vector.broadcast %cst_240 : f32 to vector<2x128xf32>
    %774 = arith.addf %773, %772 : vector<2x128xf32>
    %775 = arith.divf %773, %774 : vector<2x128xf32>
    %776 = arith.mulf %775, %770 : vector<2x128xf32>
    %777 = arith.index_cast %c7_i32 : i32 to index
    %c0_241 = arith.constant 0 : index
    %c0_242 = arith.constant 0 : index
    %778 = vector.load %arg4[%777, %c0_241, %c0_242] : memref<8x2x32xbf16, #tpu.memory_space<vmem>>, vector<1x2x32xbf16>
    %779 = vector.shape_cast %778 : vector<1x2x32xbf16> to vector<2x32xbf16>
    %c0_243 = arith.constant 0 : index
    %c0_244 = arith.constant 0 : index
    %780 = vector.load %arg12[%c0_243, %c0_244] : memref<32x512xbf16, #tpu.memory_space<vmem>>, vector<32x512xbf16>
    %cst_245 = arith.constant dense<0.000000e+00> : vector<2x512xf32>
    %781 = tpu.matmul %779, %780, %cst_245 {dimension_numbers = #tpu.dot_dimension_numbers<[1], [0], [0], [1], [0, 0, 1, 1], [], []>} : vector<2x32xbf16>, vector<32x512xbf16>, vector<2x512xf32> -> vector<2x512xf32>
    %782 = arith.truncf %776 : vector<2x128xf32> to vector<2x128xbf16>
    %c0_246 = arith.constant 0 : index
    %c0_247 = arith.constant 0 : index
    %783 = vector.load %arg13[%c0_246, %c0_247] : memref<128x512xbf16, #tpu.memory_space<vmem>>, vector<128x512xbf16>
    %cst_248 = arith.constant dense<0.000000e+00> : vector<2x512xf32>
    %784 = tpu.matmul %782, %783, %cst_248 {dimension_numbers = #tpu.dot_dimension_numbers<[1], [0], [0], [1], [0, 0, 1, 1], [], []>} : vector<2x128xbf16>, vector<128x512xbf16>, vector<2x512xf32> -> vector<2x512xf32>
    %785 = arith.addf %781, %784 : vector<2x512xf32>
    %786 = arith.addf %785, %746 : vector<2x512xf32>
    %787 = vector.extract_strided_slice %786 {offsets = [0, 0], sizes = [2, 128], strides = [1, 1]} : vector<2x512xf32> to vector<2x128xf32>
    %788 = arith.negf %787 : vector<2x128xf32>
    %789 = math.exp %788 : vector<2x128xf32>
    %cst_249 = arith.constant 1.000000e+00 : f32
    %790 = vector.broadcast %cst_249 : f32 to vector<2x128xf32>
    %791 = arith.addf %790, %789 : vector<2x128xf32>
    %792 = arith.divf %790, %791 : vector<2x128xf32>
    %793 = vector.extract_strided_slice %786 {offsets = [0, 128], sizes = [2, 128], strides = [1, 1]} : vector<2x512xf32> to vector<2x128xf32>
    %794 = arith.negf %793 : vector<2x128xf32>
    %795 = math.exp %794 : vector<2x128xf32>
    %cst_250 = arith.constant 1.000000e+00 : f32
    %796 = vector.broadcast %cst_250 : f32 to vector<2x128xf32>
    %797 = arith.addf %796, %795 : vector<2x128xf32>
    %798 = arith.divf %796, %797 : vector<2x128xf32>
    %799 = vector.extract_strided_slice %786 {offsets = [0, 256], sizes = [2, 128], strides = [1, 1]} : vector<2x512xf32> to vector<2x128xf32>
    %800 = math.tanh %799 : vector<2x128xf32>
    %801 = vector.extract_strided_slice %786 {offsets = [0, 384], sizes = [2, 128], strides = [1, 1]} : vector<2x512xf32> to vector<2x128xf32>
    %802 = arith.negf %801 : vector<2x128xf32>
    %803 = math.exp %802 : vector<2x128xf32>
    %cst_251 = arith.constant 1.000000e+00 : f32
    %804 = vector.broadcast %cst_251 : f32 to vector<2x128xf32>
    %805 = arith.addf %804, %803 : vector<2x128xf32>
    %806 = arith.divf %804, %805 : vector<2x128xf32>
    %807 = arith.mulf %798, %733 : vector<2x128xf32>
    %808 = arith.mulf %792, %800 : vector<2x128xf32>
    %809 = arith.addf %807, %808 : vector<2x128xf32>
    %810 = math.tanh %809 : vector<2x128xf32>
    %811 = arith.mulf %806, %810 : vector<2x128xf32>
    %812 = arith.truncf %811 : vector<2x128xf32> to vector<2x128xbf16>
    %813 = arith.index_cast %c7_i32 : i32 to index
    %c0_252 = arith.constant 0 : index
    %c0_253 = arith.constant 0 : index
    %814 = vector.load %arg21[%813, %c0_252, %c0_253] : memref<8x2x128xbf16, #tpu.memory_space<vmem>>, vector<1x2x128xbf16>
    %815 = vector.shape_cast %814 : vector<1x2x128xbf16> to vector<2x128xbf16>
    %816 = vector.shape_cast %812 : vector<2x128xbf16> to vector<1x2x128xbf16>
    tpu.vector_store %arg21[%813, %c0_252, %c0_253], %816 {strides = array<i32>} : memref<8x2x128xbf16, #tpu.memory_space<vmem>>, vector<1x2x128xbf16>,
    %817 = arith.extui %738 : vector<2x1xi1> to vector<2x1xi32>
    %818 = arith.sitofp %817 : vector<2x1xi32> to vector<2x1xf32>
    %819 = arith.index_cast %c7_i32 : i32 to index
    %c0_254 = arith.constant 0 : index
    %c0_255 = arith.constant 0 : index
    %820 = vector.load %arg22[%819, %c0_254, %c0_255] : memref<8x2x1xf32, #tpu.memory_space<vmem>>, vector<1x2x1xf32>
    %821 = vector.shape_cast %820 : vector<1x2x1xf32> to vector<2x1xf32>
    %822 = vector.shape_cast %818 : vector<2x1xf32> to vector<1x2x1xf32>
    tpu.vector_store %arg22[%819, %c0_254, %c0_255], %822 {strides = array<i32>} : memref<8x2x1xf32, #tpu.memory_space<vmem>>, vector<1x2x1xf32>,
    %cst_256 = arith.constant 0.000000e+00 : f32
    %823 = vector.shape_cast %738 : vector<2x1xi1> to vector<2x1xi1>
    %824 = vector.broadcast %823 : vector<2x1xi1> to vector<2x16xi1>
    %825 = vector.broadcast %cst_256 : f32 to vector<2x16xf32>
    %826 = arith.select %824, %766, %825 : vector<2x16xi1>, vector<2x16xf32>
    %827 = arith.index_cast %c7_i32 : i32 to index
    %c0_257 = arith.constant 0 : index
    %c0_258 = arith.constant 0 : index
    %828 = vector.load %arg17[%827, %c0_257, %c0_258] : memref<8x2x16xf32, #tpu.memory_space<vmem>>, vector<1x2x16xf32>
    %829 = vector.shape_cast %828 : vector<1x2x16xf32> to vector<2x16xf32>
    %830 = vector.shape_cast %826 : vector<2x16xf32> to vector<1x2x16xf32>
    tpu.vector_store %arg17[%827, %c0_257, %c0_258], %830 {strides = array<i32>} : memref<8x2x16xf32, #tpu.memory_space<vmem>>, vector<1x2x16xf32>,
    %831 = vector.shape_cast %738 : vector<2x1xi1> to vector<2x1xi1>
    %832 = vector.broadcast %831 : vector<2x1xi1> to vector<2x128xi1>
    %833 = arith.select %832, %811, %730 : vector<2x128xi1>, vector<2x128xf32>
    %834 = vector.shape_cast %738 : vector<2x1xi1> to vector<2x1xi1>
    %835 = vector.broadcast %834 : vector<2x1xi1> to vector<2x128xi1>
    %836 = arith.select %835, %809, %733 : vector<2x128xi1>, vector<2x128xf32>
    %c8_i32_259 = arith.constant 8 : i32
    %c0_260 = arith.constant 0 : index
    %c0_261 = arith.constant 0 : index
    %837 = vector.load %arg18[%c0_260, %c0_261] : memref<2x128xf32, #tpu.memory_space<vmem>>, vector<2x128xf32>
    tpu.vector_store %arg18[%c0_260, %c0_261], %833 {strides = array<i32>} : memref<2x128xf32, #tpu.memory_space<vmem>>, vector<2x128xf32>,
    %c0_262 = arith.constant 0 : index
    %c0_263 = arith.constant 0 : index
    %838 = vector.load %arg19[%c0_262, %c0_263] : memref<2x128xf32, #tpu.memory_space<vmem>>, vector<2x128xf32>
    tpu.vector_store %arg19[%c0_262, %c0_263], %836 {strides = array<i32>} : memref<2x128xf32, #tpu.memory_space<vmem>>, vector<2x128xf32>,
    %c0_264 = arith.constant 0 : index
    %c0_265 = arith.constant 0 : index
    %c0_266 = arith.constant 0 : index
    %839 = vector.load %arg21[%c0_264, %c0_265, %c0_266] : memref<8x2x128xbf16, #tpu.memory_space<vmem>>, vector<8x2x128xbf16>
    %840 = vector.shape_cast %839 : vector<8x2x128xbf16> to vector<16x128xbf16>
    %c0_267 = arith.constant 0 : index
    %c0_268 = arith.constant 0 : index
    %841 = vector.load %arg14[%c0_267, %c0_268] : memref<128x128xbf16, #tpu.memory_space<vmem>>, vector<128x128xbf16>
    %cst_269 = arith.constant dense<0.000000e+00> : vector<16x128xf32>
    %842 = tpu.matmul %840, %841, %cst_269 {dimension_numbers = #tpu.dot_dimension_numbers<[1], [0], [0], [1], [0, 0, 1, 1], [], []>} : vector<16x128xbf16>, vector<128x128xbf16>, vector<16x128xf32> -> vector<16x128xf32>
    %c0_270 = arith.constant 0 : index
    %c0_271 = arith.constant 0 : index
    %843 = vector.load %arg15[%c0_270, %c0_271] : memref<1x128xf32, #tpu.memory_space<vmem>>, vector<1x128xf32>
    %844 = vector.broadcast %843 : vector<1x128xf32> to vector<16x128xf32>
    %845 = arith.addf %842, %844 : vector<16x128xf32>
    %846 = vector.shape_cast %845 : vector<16x128xf32> to vector<8x2x128xf32>
    %c0_272 = arith.constant 0 : index
    %c0_273 = arith.constant 0 : index
    %c0_274 = arith.constant 0 : index
    %847 = vector.load %arg22[%c0_272, %c0_273, %c0_274] : memref<8x2x1xf32, #tpu.memory_space<vmem>>, vector<8x2x1xf32>
    %cst_275 = arith.constant 0.000000e+00 : f32
    %848 = vector.broadcast %cst_275 : f32 to vector<8x2x1xf32>
    %849 = arith.cmpf ogt, %847, %848 : vector<8x2x1xf32>
    %cst_276 = arith.constant 0.000000e+00 : f32
    %850 = vector.shape_cast %849 : vector<8x2x1xi1> to vector<8x2x1xi1>
    %851 = vector.broadcast %850 : vector<8x2x1xi1> to vector<8x2x128xi1>
    %852 = vector.broadcast %cst_276 : f32 to vector<8x2x128xf32>
    %853 = arith.select %851, %846, %852 : vector<8x2x128xi1>, vector<8x2x128xf32>
    %854 = arith.truncf %853 : vector<8x2x128xf32> to vector<8x2x128xbf16>
    %c0_277 = arith.constant 0 : index
    %c0_278 = arith.constant 0 : index
    %c0_279 = arith.constant 0 : index
    %855 = vector.load %arg16[%c0_277, %c0_278, %c0_279] : memref<8x2x128xbf16, #tpu.memory_space<vmem>>, vector<8x2x128xbf16>
    tpu.vector_store %arg16[%c0_277, %c0_278, %c0_279], %854 {strides = array<i32>} : memref<8x2x128xbf16, #tpu.memory_space<vmem>>, vector<8x2x128xbf16>,
    return
  }
  func.func @transform_0(%arg0: i32, %arg1: i32, %arg2: memref<16xi32, #tpu.memory_space<smem>>) -> (i32, i32, i32) {
    %c0_i32 = arith.constant 0 : i32
    %c0_i32_0 = arith.constant 0 : i32
    %c0_i32_1 = arith.constant 0 : i32
    return %arg0, %c0_i32, %c0_i32_0 : i32, i32, i32
  }
  func.func @transform_1(%arg0: i32, %arg1: i32, %arg2: memref<16xi32, #tpu.memory_space<smem>>) -> (i32, i32, i32) {
    %c0_i32 = arith.constant 0 : i32
    %c0_i32_0 = arith.constant 0 : i32
    return %arg1, %arg0, %c0_i32 : i32, i32, i32
  }
  func.func @transform_2(%arg0: i32, %arg1: i32, %arg2: memref<16xi32, #tpu.memory_space<smem>>) -> (i32, i32) {
    %c0_i32 = arith.constant 0 : i32
    %c0_i32_0 = arith.constant 0 : i32
    %c0_i32_1 = arith.constant 0 : i32
    return %c0_i32, %c0_i32_0 : i32, i32
  }
  func.func @transform_3(%arg0: i32, %arg1: i32, %arg2: memref<16xi32, #tpu.memory_space<smem>>) -> (i32, i32) {
    %c0_i32 = arith.constant 0 : i32
    %c0_i32_0 = arith.constant 0 : i32
    %c0_i32_1 = arith.constant 0 : i32
    return %c0_i32, %c0_i32_0 : i32, i32
  }
  func.func @transform_4(%arg0: i32, %arg1: i32, %arg2: memref<16xi32, #tpu.memory_space<smem>>) -> (i32, i32) {
    %c0_i32 = arith.constant 0 : i32
    %c0_i32_0 = arith.constant 0 : i32
    %c0_i32_1 = arith.constant 0 : i32
    return %c0_i32, %c0_i32_0 : i32, i32
  }
  func.func @transform_5(%arg0: i32, %arg1: i32, %arg2: memref<16xi32, #tpu.memory_space<smem>>) -> (i32, i32) {
    %c0_i32 = arith.constant 0 : i32
    %c0_i32_0 = arith.constant 0 : i32
    %c0_i32_1 = arith.constant 0 : i32
    return %c0_i32, %c0_i32_0 : i32, i32
  }
  func.func @transform_6(%arg0: i32, %arg1: i32, %arg2: memref<16xi32, #tpu.memory_space<smem>>) -> (i32, i32) {
    %c0_i32 = arith.constant 0 : i32
    %c0_i32_0 = arith.constant 0 : i32
    %c0_i32_1 = arith.constant 0 : i32
    return %c0_i32, %c0_i32_0 : i32, i32
  }
  func.func @transform_7(%arg0: i32, %arg1: i32, %arg2: memref<16xi32, #tpu.memory_space<smem>>) -> (i32, i32) {
    %c0_i32 = arith.constant 0 : i32
    %c0_i32_0 = arith.constant 0 : i32
    %c0_i32_1 = arith.constant 0 : i32
    return %c0_i32, %c0_i32_0 : i32, i32
  }
  func.func @transform_8(%arg0: i32, %arg1: i32, %arg2: memref<16xi32, #tpu.memory_space<smem>>) -> (i32, i32) {
    %c0_i32 = arith.constant 0 : i32
    %c0_i32_0 = arith.constant 0 : i32
    %c0_i32_1 = arith.constant 0 : i32
    return %c0_i32, %c0_i32_0 : i32, i32
  }
  func.func @transform_9(%arg0: i32, %arg1: i32, %arg2: memref<16xi32, #tpu.memory_space<smem>>) -> (i32, i32) {
    %c0_i32 = arith.constant 0 : i32
    %c0_i32_0 = arith.constant 0 : i32
    %c0_i32_1 = arith.constant 0 : i32
    return %c0_i32, %c0_i32_0 : i32, i32
  }
  func.func @transform_10(%arg0: i32, %arg1: i32, %arg2: memref<16xi32, #tpu.memory_space<smem>>) -> (i32, i32) {
    %c0_i32 = arith.constant 0 : i32
    %c0_i32_0 = arith.constant 0 : i32
    %c0_i32_1 = arith.constant 0 : i32
    return %c0_i32, %c0_i32_0 : i32, i32
  }
  func.func @transform_11(%arg0: i32, %arg1: i32, %arg2: memref<16xi32, #tpu.memory_space<smem>>) -> (i32, i32) {
    %c0_i32 = arith.constant 0 : i32
    %c0_i32_0 = arith.constant 0 : i32
    %c0_i32_1 = arith.constant 0 : i32
    return %c0_i32, %c0_i32_0 : i32, i32
  }
  func.func @transform_12(%arg0: i32, %arg1: i32, %arg2: memref<16xi32, #tpu.memory_space<smem>>) -> (i32, i32) {
    %c0_i32 = arith.constant 0 : i32
    %c0_i32_0 = arith.constant 0 : i32
    %c0_i32_1 = arith.constant 0 : i32
    return %c0_i32, %c0_i32_0 : i32, i32
  }
  func.func @transform_13(%arg0: i32, %arg1: i32, %arg2: memref<16xi32, #tpu.memory_space<smem>>) -> (i32, i32, i32) {
    %c0_i32 = arith.constant 0 : i32
    %c0_i32_0 = arith.constant 0 : i32
    return %arg1, %arg0, %c0_i32 : i32, i32, i32
  }
  func.func @transform_14(%arg0: i32, %arg1: i32, %arg2: memref<16xi32, #tpu.memory_space<smem>>) -> (i32, i32, i32) {
    %c0_i32 = arith.constant 0 : i32
    %c0_i32_0 = arith.constant 0 : i32
    return %arg1, %arg0, %c0_i32 : i32, i32, i32
  }
}

</mosaic_0001>

<bundles_post_ra>
// kernel: tpu_custom_call.1
= control target key start
LH: loop header
LB: loop body
LE: loop exit
PB: predicated region body
PF: predicated region fallthrough
CT: control target
= control target key end

     0   :  { %s17320_s0 = inlined_call_operand.hbm [shape: s32[16], index: 0, kind: input, shape index: {}]   ;;  %s17321_s1 = inlined_call_operand.hbm [shape: bf16[2,16,128], index: 1, kind: input, shape index: {}]   ;;  %s17322_s2 = inlined_call_operand.hbm [shape: bf16[16,2,32], index: 2, kind: input, shape index: {}]   ;;  %s17323_s3 = inlined_call_operand.hbm [shape: bf16[128,256], index: 3, kind: input, shape index: {}]   ;;  %s17324_s4 = inlined_call_operand.hbm [shape: f32[1,256], index: 4, kind: input, shape index: {}]   ;;  %s17325_s5 = inlined_call_operand.hbm [shape: bf16[128,128], index: 5, kind: input, shape index: {}]   ;;  %s17326_s6 = inlined_call_operand.hbm [shape: f32[1,128], index: 6, kind: input, shape index: {}]   ;;  %s17327_s7 = inlined_call_operand.hbm [shape: bf16[128,768], index: 7, kind: input, shape index: {}]   ;;  %s17328_s8 = inlined_call_operand.hbm [shape: f32[1,768], index: 8, kind: input, shape index: {}]   ;;  %s17329_s9 = inlined_call_operand.hbm [shape: f32[1,128], index: 9, kind: input, shape index: {}]   ;;  %s17330_s10 = inlined_call_operand.hbm [shape: bf16[32,512], index: 10, kind: input, shape index: {}]   ;;  %s17331_s11 = inlined_call_operand.hbm [shape: bf16[128,512], index: 11, kind: input, shape index: {}]   ;;  %s17332_s12 = inlined_call_operand.hbm [shape: bf16[128,128], index: 12, kind: input, shape index: {}]   ;;  %s17333_s13 = inlined_call_operand.hbm [shape: f32[1,128], index: 13, kind: input, shape index: {}]   ;;  %s17334_s14 = inlined_call_operand.hbm [shape: bf16[16,2,128], index: 14, kind: output, shape index: {0}]   ;;  %s17335_s15 = inlined_call_operand.hbm [shape: f32[16,2,16], index: 15, kind: output, shape index: {1}]  }
   0x1   :  { %17537 = sst [smem:[#allocation115_spill]] %s17321_s1  ;;  %s13822_s20 = scalar_lea.hbm %s17320_s0, 16 }
   0x2   :  { %17538 = sst [smem:[#allocation116_spill]] %s17322_s2  ;;  %p13823_p0 = scmp.ne.s32.totalorder %s17320_s0, %s13822_s20 }
   0x3   :  { %17539 = sst [smem:[#allocation117_spill]] %s17323_s3  ;;  %p13826_p1 = scmp.lt.u32.totalorder %s13822_s20, %s17320_s0 }
   0x4   :  { %17540 = sst [smem:[#allocation118_spill]] %s17324_s4 }
   0x5   :  { %17541 = sst [smem:[#allocation119_spill]] %s17325_s5  ;;  %p13828_p2 = pnand %p13826_p1, %p13823_p0 }
   0x6   :  { %17542 = sst [smem:[#allocation120_spill]] %s17334_s14 }
   0x7   :  { %17543 = sst [smem:[#allocation121_spill]] %s17335_s15 }
   0x8   :  { %13831 = shalt.err (!%p13828_p2)  }
   0x9   :  { %s14344_s25 = smov [#allocation8]  }
   0xa   :  { %22 = dma.hbm_to_smem %s17320_s0, 16, %s14344_s25, [#allocation7] }
   0xb   :  { %14278 = dma.done.wait [#allocation7], 16 }
   0xc   :  { %14279 = vsyncadd [#allocation7], 4294967280 }
   0xd   :  { %24 = sfence }
   0xe   :  { %25 = vsyncpa [#allocation10], 0 }
   0xf   :  { %26 = vsyncpa [#allocation13], 0 }
  0x10   :  { %28 = vsyncpa [#allocation13 + $0x1], 0 }
  0x11   :  { %29 = vsyncpa [#allocation16], 0 }
  0x12   :  { %30 = vsyncpa [#allocation19], 0 }
  0x13   :  { %31 = vsyncpa [#allocation22], 0 }
  0x14   :  { %32 = vsyncpa [#allocation25], 0 }
  0x15   :  { %33 = vsyncpa [#allocation28], 0 }
  0x16   :  { %34 = vsyncpa [#allocation11], 0 }
  0x17   :  { %36 = vsyncpa [#allocation11 + $0x1], 0 }
  0x18   :  { %37 = vsyncpa [#allocation32], 0 }
  0x19   :  { %39 = vsyncpa [#allocation32 + $0x1], 0  ;;  %s14471_s28 = smov 0   ;;  %s14473_s29 = smov 0  }
  0x1a   :  { %s14475_s0 = smov 0   ;;  %s14477_s30 = smov 0  }
  0x1b   :  { %s14479_s16 = smov 0   ;;  %s14481_s17 = smov 0  }
  0x1c LB: > { %17544 = sst [smem:[#allocation44_spill]] %s14322_s28  ;;  %s14345_s18 = smov [#allocation14]   ;;  %s14342_s17 = sphi %s14481_s17, %s45_s17   ;;  %s14338_s16 = sphi %s14479_s16, %s17965_s16   ;;  %s14334_s30 = sphi %s14477_s30, %s17964_s30   ;;  %s14330_s0 = sphi %s14475_s0, %s17963_s0   ;;  %s14326_s29 = sphi %s14473_s29, %s17962_s29   ;;  %s14322_s28 = sphi %s14471_s28, %s17960_s28  }
  0x1d   : > { %17545 = sst [smem:[#allocation45_spill]] %s14326_s29  ;;  %s432_s19 = sshll.u32 %s14345_s18, 4  ;;  %s14507_s19 = int_to_ptr.vmem [resolvable:$true] %s432_s19 }
  0x1e   : > { %17546 = sst [smem:[#allocation46_spill]] %s14334_s30  ;;  %s14502_s20 = sadd.s32 4294967295, %s14342_s17  }
  0x1f   : > { %17547 = sst [smem:[#allocation47_spill]] %s14502_s20  ;;  %p11551_p3 = scmp.ge.s32.totalorder %s14342_s17, 1 }
  0x20   : > { %p17345_p4 = scmp.eq.s32.totalorder %s14502_s20, 0  ;;  %p403_p5 = scmp.lt.s32.totalorder %s14342_s17, 3 }
  0x21   : > { %s14346_s22 = smov [#allocation15]   ;;  %s14347_s25 = smov [#allocation18]  }
  0x22   : > { %p14509_p6 = pnand %p11551_p3, %p403_p5  ;;  %s446_s23 = sshll.u32 %s14346_s22, 4  ;;  %s14522_s23 = int_to_ptr.vmem [resolvable:$true] %s446_s23 }
  0x23   : > { %s470_s26 = sshll.u32 %s14347_s25, 4  ;;  %s17551_s3 = sld [smem:[#allocation117_spill]]  ;;  %s14524_s26 = int_to_ptr.vmem [resolvable:$true] %s470_s26 }
  0x24   : > { %s17548_s21 = scalar_select %p14509_p6, 1, 0 }
  0x25   : > { %p12736_p8 = pneg %p14509_p6 }
  0x26   : > { %17549 = sst [smem:[#allocation48_spill]] %s17548_s21 }
  0x27   : > { %p14518_p9 = pnand %p12736_p8, %p17345_p4 }
  0x29   : > { %s13832_s14 = scalar_lea.hbm %s17551_s3, 2048  ;;  %p14534_p11 = pneg %p14518_p9 }
  0x2a   : > { %p13833_p10 = scmp.ne.s32.totalorder %s17551_s3, %s13832_s14  ;;  %p13839_p0 = scmp.lt.u32.totalorder %s13832_s14, %s17551_s3 }
  0x2c   : > { %p13835_p12 = pnand %p14534_p11, %p13833_p10 }
  0x2e   : > { %p13836_p13 = pneg %p13835_p12 }
  0x30   : > { %p13841_p1 = pnand %p13839_p0, %p13836_p13 }
  0x32   : > { %13844 = shalt.err (!%p13841_p1)
}
  0x33   : > { %s13845_s15 = scalar_lea.vmem %s14507_s19, 2048  ;;  %p13853_p8 = scmp.lt.s32.totalorder %s14507_s19, %s14507_s19 }
  0x34   : > { %p13846_p2 = scmp.ne.s32.totalorder %s14507_s19, %s13845_s15  ;;  %p13854_p7 = scmp.lt.s32.totalorder %s13845_s15, %s13845_s15 }
  0x36   : > { %p13848_p3 = pnand %p13846_p2, %p14534_p11  ;;  %p13855_p10 = por %p13854_p7, %p13853_p8 }
  0x38   : > { %p13849_p5 = pneg %p13848_p3 }
  0x3a   : > { %p13856_p12 = pnand %p13855_p10, %p13849_p5 }
  0x3c   : > { %13859 = shalt.err (!%p13856_p12)
}
  0x3d   : > { %s14348_s30 = smov 128   ;;  %s14349_s14 = smov 8  }
  0x3e   : > { %12742 = dma.hbm_to_vmem [thread:$0]  (!%p14518_p9), %s17551_s3, 2048, %s14507_s19, [#allocation13], %s14348_s30, %s14348_s30, %s14349_s14  }
  0x3f   : > { %s17553_s4 = sld [smem:[#allocation118_spill]] }
  0x45   : > { %s13860_s2 = scalar_lea.hbm %s17553_s4, 32 }
  0x46   : > { %p13861_p7 = scmp.ne.s32.totalorder %s17553_s4, %s13860_s2  ;;  %p13867_p1 = scmp.lt.u32.totalorder %s13860_s2, %s17553_s4 }
  0x48   : > { %p13863_p13 = pnand %p13861_p7, %p14534_p11 }
  0x4a   : > { %p13864_p0 = pneg %p13863_p13 }
  0x4c   : > { %p13869_p2 = pnand %p13867_p1, %p13864_p0 }
  0x4e   : > { %13872 = shalt.err (!%p13869_p2)
}
  0x4f   : > { %s13873_s19 = scalar_lea.vmem %s14522_s23, 32  ;;  %p13881_p10 = scmp.lt.s32.totalorder %s14522_s23, %s14522_s23 }
  0x50   : > { %p13874_p3 = scmp.ne.s32.totalorder %s14522_s23, %s13873_s19  ;;  %p13882_p12 = scmp.lt.s32.totalorder %s13873_s19, %s13873_s19 }
  0x52   : > { %p13876_p5 = pnand %p13874_p3, %p14534_p11  ;;  %p13883_p7 = por %p13882_p12, %p13881_p10 }
  0x54   : > { %p13877_p8 = pneg %p13876_p5 }
  0x56   : > { %p13884_p13 = pnand %p13883_p7, %p13877_p8 }
  0x58   : > { %13887 = shalt.err (!%p13884_p13)
}
  0x59   : > { %12745 = dma.hbm_to_vmem [thread:$0]  (!%p14518_p9), %s17553_s4, 32, %s14522_s23, [#allocation16]  }
  0x5a   : > { %s13888_s30 = scalar_lea.hbm %s17326_s6, 16 }
  0x5b   : > { %p13889_p0 = scmp.ne.s32.totalorder %s17326_s6, %s13888_s30  ;;  %p13895_p3 = scmp.lt.u32.totalorder %s13888_s30, %s17326_s6 }
  0x5d   : > { %p13891_p1 = pnand %p13889_p0, %p14534_p11 }
  0x5f   : > { %p13892_p2 = pneg %p13891_p1 }
  0x61   : > { %p13897_p5 = pnand %p13895_p3, %p13892_p2 }
  0x63   : > { %13900 = shalt.err (!%p13897_p5)
}
  0x64   : > { %s13901_s23 = scalar_lea.vmem %s14524_s26, 16  ;;  %s13908_s25 = scalar_lea.vmem %s14524_s26, 32 }
  0x65   : > { %p13902_p8 = scmp.ne.s32.totalorder %s14524_s26, %s13901_s23  ;;  %p13909_p7 = scmp.lt.s32.totalorder %s14524_s26, %s14524_s26 }
  0x66   : > { %p13910_p13 = scmp.lt.s32.totalorder %s13908_s25, %s13901_s23 }
  0x67   : > { %p13904_p10 = pnand %p13902_p8, %p14534_p11 }
  0x68   : > { %p13911_p0 = por %p13910_p13, %p13909_p7 }
  0x69   : > { %p13905_p12 = pneg %p13904_p10 }
  0x6b   : > { %p13912_p1 = pnand %p13911_p0, %p13905_p12 }
  0x6d   : > { %13915 = shalt.err (!%p13912_p1)
}
  0x6e   : > { %12751 = dma.hbm_to_vmem [thread:$0]  (!%p14518_p9), %s17326_s6, 16, %s14524_s26, [#allocation19]  }
  0x6f   : > { %s14350_s2 = smov [#allocation21]   ;;  %s14351_s29 = smov [#allocation24]  }
  0x70   : > { %s494_s28 = sshll.u32 %s14350_s2, 4  ;;  %s515_s20 = sshll.u32 %s14351_s29, 4  ;;  %s495_s28 = int_to_ptr.vmem [resolvable:$true] %s494_s28  ;;  %s516_s20 = int_to_ptr.vmem [resolvable:$true] %s515_s20 }
  0x71   : > { %s13916_s21 = scalar_lea.hbm %s17328_s8, 96 }
  0x72   : > { %p13917_p2 = scmp.ne.s32.totalorder %s17328_s8, %s13916_s21  ;;  %p13923_p8 = scmp.lt.u32.totalorder %s13916_s21, %s17328_s8 }
  0x74   : > { %p13919_p3 = pnand %p13917_p2, %p14534_p11 }
  0x76   : > { %p13920_p5 = pneg %p13919_p3 }
  0x78   : > { %p13925_p10 = pnand %p13923_p8, %p13920_p5 }
  0x7a   : > { %13928 = shalt.err (!%p13925_p10)
}
  0x7b   : > { %s13929_s26 = scalar_lea.vmem %s495_s28, 96  ;;  %p13937_p0 = scmp.lt.s32.totalorder %s495_s28, %s495_s28 }
  0x7c   : > { %p13930_p12 = scmp.ne.s32.totalorder %s495_s28, %s13929_s26  ;;  %p13938_p1 = scmp.lt.s32.totalorder %s13929_s26, %s13929_s26 }
  0x7e   : > { %p13932_p7 = pnand %p13930_p12, %p14534_p11  ;;  %p13939_p4 = por %p13938_p1, %p13937_p0 }
  0x80   : > { %p13933_p13 = pneg %p13932_p7 }
  0x82   : > { %p13940_p6 = pnand %p13939_p4, %p13933_p13 }
  0x84   : > { %13943 = shalt.err (!%p13940_p6)
}
  0x85   : > { %12757 = dma.hbm_to_vmem [thread:$0]  (!%p14518_p9), %s17328_s8, 96, %s495_s28, [#allocation22]  }
  0x86   : > { %s13944_s30 = scalar_lea.hbm %s17330_s10, 1024 }
  0x87   : > { %p13945_p2 = scmp.ne.s32.totalorder %s17330_s10, %s13944_s30  ;;  %p13951_p6 = scmp.lt.u32.totalorder %s13944_s30, %s17330_s10 }
  0x89   : > { %p13947_p3 = pnand %p13945_p2, %p14534_p11 }
  0x8b   : > { %p13948_p4 = pneg %p13947_p3 }
  0x8d   : > { %p13953_p5 = pnand %p13951_p6, %p13948_p4 }
  0x8f   : > { %13956 = shalt.err (!%p13953_p5)
}
  0x90   : > { %s13957_s23 = scalar_lea.vmem %s516_s20, 1024  ;;  %p13965_p7 = scmp.lt.s32.totalorder %s516_s20, %s516_s20 }
  0x91   : > { %p13958_p8 = scmp.ne.s32.totalorder %s516_s20, %s13957_s23  ;;  %p13966_p13 = scmp.lt.s32.totalorder %s13957_s23, %s13957_s23 }
  0x93   : > { %p13960_p10 = pnand %p13958_p8, %p14534_p11  ;;  %p13967_p0 = por %p13966_p13, %p13965_p7 }
  0x95   : > { %p13961_p12 = pneg %p13960_p10 }
  0x97   : > { %p13968_p1 = pnand %p13967_p0, %p13961_p12 }
  0x99   : > { %13971 = shalt.err (!%p13968_p1)
}
  0x9a   : > { %s17347_s28 = smov 256   ;;  %s17348_s25 = smov 16  }
  0x9b   : > { %12763 = dma.hbm_to_vmem [thread:$0]  (!%p14518_p9), %s17330_s10, 1024, %s516_s20, [#allocation25], %s17347_s28, %s17347_s28, %s17348_s25  }
  0x9c   : > { %s14354_s19 = smov [#allocation27]   ;;  %s13972_s14 = scalar_lea.hbm %s17332_s12, 1024 }
  0x9d   : > { %s541_s2 = sshll.u32 %s14354_s19, 4  ;;  %p13973_p2 = scmp.ne.s32.totalorder %s17332_s12, %s13972_s14  ;;  %s542_s2 = int_to_ptr.vmem [resolvable:$true] %s541_s2 }
  0x9e   : > { %p13979_p6 = scmp.lt.u32.totalorder %s13972_s14, %s17332_s12 }
  0x9f   : > { %p13975_p3 = pnand %p13973_p2, %p14534_p11 }
  0xa1   : > { %p13976_p4 = pneg %p13975_p3 }
  0xa3   : > { %p13981_p5 = pnand %p13979_p6, %p13976_p4 }
  0xa5   : > { %13984 = shalt.err (!%p13981_p5)
}
  0xa6   : > { %s13985_s20 = scalar_lea.vmem %s542_s2, 1024  ;;  %p13993_p7 = scmp.lt.s32.totalorder %s542_s2, %s542_s2 }
  0xa7   : > { %p13986_p8 = scmp.ne.s32.totalorder %s542_s2, %s13985_s20  ;;  %p13994_p13 = scmp.lt.s32.totalorder %s13985_s20, %s13985_s20 }
  0xa9   : > { %p13988_p10 = pnand %p13986_p8, %p14534_p11  ;;  %p13995_p0 = por %p13994_p13, %p13993_p7 }
  0xab   : > { %p13989_p12 = pneg %p13988_p10 }
  0xad   : > { %p13996_p1 = pnand %p13995_p0, %p13989_p12 }
  0xaf   : > { %13999 = shalt.err (!%p13996_p1)
}
  0xb0   : > { %s14355_s26 = smov 64   ;;  %s14356_s15 = smov 4  }
  0xb1   : > { %12769 = dma.hbm_to_vmem [thread:$0]  (!%p14518_p9), %s17332_s12, 1024, %s542_s2, [#allocation28], %s14355_s26, %s14355_s26, %s14356_s15  }
  0xb2   : > { %s14357_s30 = smov [#allocation9]   ;;  %s14358_s21 = smov [#allocation17]  }
  0xb3   : > { %s419_s14 = sshll.u32 %s14357_s30, 4  ;;  %s456_s27 = sshll.u32 %s14358_s21, 4  ;;  %s420_s14 = int_to_ptr.vmem [resolvable:$true] %s419_s14  ;;  %s14662_s27 = int_to_ptr.vmem [resolvable:$true] %s456_s27 }
  0xb4   : > { %s17554_s1 = sld [smem:[#allocation115_spill]] }
  0xba   : > { %s14000_s20 = scalar_lea.hbm %s17554_s1, 256 }
  0xbb   : > { %p14001_p2 = scmp.ne.s32.totalorder %s17554_s1, %s14000_s20  ;;  %p14007_p6 = scmp.lt.u32.totalorder %s14000_s20, %s17554_s1 }
  0xbd   : > { %p14003_p3 = pnand %p14001_p2, %p14534_p11 }
  0xbf   : > { %p14004_p4 = pneg %p14003_p3 }
  0xc1   : > { %p14009_p5 = pnand %p14007_p6, %p14004_p4 }
  0xc3   : > { %14012 = shalt.err (!%p14009_p5)
}
  0xc4   : > { %s14013_s29 = scalar_lea.vmem %s420_s14, 256  ;;  %p14021_p7 = scmp.lt.s32.totalorder %s420_s14, %s420_s14 }
  0xc5   : > { %p14014_p8 = scmp.ne.s32.totalorder %s420_s14, %s14013_s29  ;;  %p14022_p13 = scmp.lt.s32.totalorder %s14013_s29, %s14013_s29 }
  0xc7   : > { %p14016_p10 = pnand %p14014_p8, %p14534_p11  ;;  %p14023_p0 = por %p14022_p13, %p14021_p7 }
  0xc9   : > { %p14017_p12 = pneg %p14016_p10 }
  0xcb   : > { %p14024_p1 = pnand %p14023_p0, %p14017_p12 }
  0xcd   : > { %14027 = shalt.err (!%p14024_p1)
}
  0xce   : > { %12739 = dma.hbm_to_vmem [thread:$0]  (!%p14518_p9), %s17554_s1, 256, %s420_s14, [#allocation10], %s14355_s26, %s14355_s26, %s14356_s15  }
  0xcf   : > { %s17555_s5 = sld [smem:[#allocation119_spill]] }
  0xd5   : > { %s14028_s18 = scalar_lea.hbm %s17555_s5, 1024 }
  0xd6   : > { %p14029_p2 = scmp.ne.s32.totalorder %s17555_s5, %s14028_s18  ;;  %p14035_p6 = scmp.lt.u32.totalorder %s14028_s18, %s17555_s5 }
  0xd8   : > { %p14031_p3 = pnand %p14029_p2, %p14534_p11 }
  0xda   : > { %p14032_p4 = pneg %p14031_p3 }
  0xdc   : > { %p14037_p5 = pnand %p14035_p6, %p14032_p4 }
  0xde   : > { %14040 = shalt.err (!%p14037_p5)
}
  0xdf   : > { %s14041_s14 = scalar_lea.vmem %s14662_s27, 1024  ;;  %p14049_p7 = scmp.lt.s32.totalorder %s14662_s27, %s14662_s27 }
  0xe0   : > { %p14042_p8 = scmp.ne.s32.totalorder %s14662_s27, %s14041_s14  ;;  %p14050_p13 = scmp.lt.s32.totalorder %s14041_s14, %s14041_s14 }
  0xe2   : > { %p14044_p10 = pnand %p14042_p8, %p14534_p11  ;;  %p14051_p0 = por %p14050_p13, %p14049_p7 }
  0xe4   : > { %p14045_p12 = pneg %p14044_p10 }
  0xe6   : > { %p14052_p1 = pnand %p14051_p0, %p14045_p12 }
  0xe8   : > { %14055 = shalt.err (!%p14052_p1)
}
  0xe9   : > { %12748 = dma.hbm_to_vmem [thread:$0]  (!%p14518_p9), %s17555_s5, 1024, %s14662_s27, [#allocation16], %s14355_s26, %s14355_s26, %s14356_s15  }
  0xea   : > { %s14359_s25 = smov [#allocation20]   ;;  %s14056_s23 = scalar_lea.hbm %s17327_s7, 6144 }
  0xeb   : > { %s480_s30 = sshll.u32 %s14359_s25, 4  ;;  %p14057_p2 = scmp.ne.s32.totalorder %s17327_s7, %s14056_s23  ;;  %s481_s30 = int_to_ptr.vmem [resolvable:$true] %s480_s30 }
  0xec   : > { %p14063_p6 = scmp.lt.u32.totalorder %s14056_s23, %s17327_s7 }
  0xed   : > { %p14059_p3 = pnand %p14057_p2, %p14534_p11 }
  0xef   : > { %p14060_p4 = pneg %p14059_p3 }
  0xf1   : > { %p14065_p5 = pnand %p14063_p6, %p14060_p4 }
  0xf3   : > { %14068 = shalt.err (!%p14065_p5)
}
  0xf4   : > { %s14069_s26 = scalar_lea.vmem %s481_s30, 6144  ;;  %p14077_p7 = scmp.lt.s32.totalorder %s481_s30, %s481_s30 }
  0xf5   : > { %p14070_p8 = scmp.ne.s32.totalorder %s481_s30, %s14069_s26  ;;  %p14078_p13 = scmp.lt.s32.totalorder %s14069_s26, %s14069_s26 }
  0xf7   : > { %p14072_p10 = pnand %p14070_p8, %p14534_p11  ;;  %p14079_p0 = por %p14078_p13, %p14077_p7 }
  0xf9   : > { %p14073_p12 = pneg %p14072_p10 }
  0xfb   : > { %p14080_p1 = pnand %p14079_p0, %p14073_p12 }
  0xfd   : > { %14083 = shalt.err (!%p14080_p1)
}
  0xfe   : > { %s14360_s15 = smov 384   ;;  %s14361_s27 = smov 24  }
  0xff   : > { %12754 = dma.hbm_to_vmem [thread:$0]  (!%p14518_p9), %s17327_s7, 6144, %s481_s30, [#allocation19], %s14360_s15, %s14360_s15, %s14361_s27  }
 0x100   : > { %s14362_s25 = smov [#allocation23]   ;;  %s14363_s18 = smov [#allocation26]  }
 0x101   : > { %s505_s21 = sshll.u32 %s14362_s25, 4  ;;  %s528_s23 = sshll.u32 %s14363_s18, 4  ;;  %s506_s21 = int_to_ptr.vmem [resolvable:$true] %s505_s21  ;;  %s529_s23 = int_to_ptr.vmem [resolvable:$true] %s528_s23 }
 0x102   : > { %s14084_s2 = scalar_lea.hbm %s17329_s9, 16 }
 0x103   : > { %p14085_p2 = scmp.ne.s32.totalorder %s17329_s9, %s14084_s2  ;;  %p14091_p6 = scmp.lt.u32.totalorder %s14084_s2, %s17329_s9 }
 0x105   : > { %p14087_p3 = pnand %p14085_p2, %p14534_p11 }
 0x107   : > { %p14088_p4 = pneg %p14087_p3 }
 0x109   : > { %p14093_p5 = pnand %p14091_p6, %p14088_p4 }
 0x10b   : > { %14096 = shalt.err (!%p14093_p5)
}
 0x10c   : > { %s14097_s30 = scalar_lea.vmem %s506_s21, 16  ;;  %s14104_s15 = scalar_lea.vmem %s506_s21, 32 }
 0x10d   : > { %p14098_p8 = scmp.ne.s32.totalorder %s506_s21, %s14097_s30  ;;  %p14105_p7 = scmp.lt.s32.totalorder %s506_s21, %s506_s21 }
 0x10e   : > { %p14106_p13 = scmp.lt.s32.totalorder %s14104_s15, %s14097_s30 }
 0x10f   : > { %p14100_p10 = pnand %p14098_p8, %p14534_p11 }
 0x110   : > { %p14107_p0 = por %p14106_p13, %p14105_p7 }
 0x111   : > { %p14101_p12 = pneg %p14100_p10 }
 0x113   : > { %p14108_p1 = pnand %p14107_p0, %p14101_p12 }
 0x115   : > { %14111 = shalt.err (!%p14108_p1)
}
 0x116   : > { %12760 = dma.hbm_to_vmem [thread:$0]  (!%p14518_p9), %s17329_s9, 16, %s506_s21, [#allocation22]  }
 0x117   : > { %s14112_s28 = scalar_lea.hbm %s17331_s11, 4096 }
 0x118   : > { %p14113_p2 = scmp.ne.s32.totalorder %s17331_s11, %s14112_s28  ;;  %p14119_p6 = scmp.lt.u32.totalorder %s14112_s28, %s17331_s11 }
 0x11a   : > { %p14115_p3 = pnand %p14113_p2, %p14534_p11 }
 0x11c   : > { %p14116_p4 = pneg %p14115_p3 }
 0x11e   : > { %p14121_p5 = pnand %p14119_p6, %p14116_p4 }
 0x120   : > { %14124 = shalt.err (!%p14121_p5)
}
 0x121   : > { %s14125_s2 = scalar_lea.vmem %s529_s23, 4096  ;;  %p14133_p7 = scmp.lt.s32.totalorder %s529_s23, %s529_s23 }
 0x122   : > { %p14126_p8 = scmp.ne.s32.totalorder %s529_s23, %s14125_s2  ;;  %p14134_p13 = scmp.lt.s32.totalorder %s14125_s2, %s14125_s2 }
 0x124   : > { %p14128_p10 = pnand %p14126_p8, %p14534_p11  ;;  %p14135_p0 = por %p14134_p13, %p14133_p7 }
 0x126   : > { %p14129_p12 = pneg %p14128_p10 }
 0x128   : > { %p14136_p1 = pnand %p14135_p0, %p14129_p12 }
 0x12a   : > { %14139 = shalt.err (!%p14136_p1)
}
 0x12b   : > { %s17556_s21 = smov 16   ;;  %s17557_s14 = smov 256  }
 0x12c   : > { %12766 = dma.hbm_to_vmem [thread:$0]  (!%p14518_p9), %s17331_s11, 4096, %s529_s23, [#allocation25], %s17557_s14, %s17557_s14, %s17556_s21  }
 0x12d   : > { %s14364_s15 = smov [#allocation29]   ;;  %s14140_s3 = scalar_lea.hbm %s17333_s13, 16 }
 0x12e   : > { %s555_s27 = sshll.u32 %s14364_s15, 4  ;;  %p14141_p2 = scmp.ne.s32.totalorder %s17333_s13, %s14140_s3  ;;  %s556_s27 = int_to_ptr.vmem [resolvable:$true] %s555_s27 }
 0x12f   : > { %p14147_p6 = scmp.lt.u32.totalorder %s14140_s3, %s17333_s13 }
 0x130   : > { %p14143_p3 = pnand %p14141_p2, %p14534_p11 }
 0x132   : > { %p14144_p4 = pneg %p14143_p3 }
 0x134   : > { %p14149_p5 = pnand %p14147_p6, %p14144_p4 }
 0x136   : > { %14152 = shalt.err (!%p14149_p5)
}
 0x137   : > { %s14153_s23 = scalar_lea.vmem %s556_s27, 16  ;;  %s14160_s19 = scalar_lea.vmem %s556_s27, 32 }
 0x138   : > { %p14154_p8 = scmp.ne.s32.totalorder %s556_s27, %s14153_s23  ;;  %p14161_p7 = scmp.lt.s32.totalorder %s556_s27, %s556_s27 }
 0x139   : > { %p14162_p13 = scmp.lt.s32.totalorder %s14160_s19, %s14153_s23 }
 0x13a   : > { %p14156_p10 = pnand %p14154_p8, %p14534_p11 }
 0x13b   : > { %p14163_p0 = por %p14162_p13, %p14161_p7 }
 0x13c   : > { %p14157_p12 = pneg %p14156_p10 }
 0x13e   : > { %p14164_p1 = pnand %p14163_p0, %p14157_p12 }
 0x140   : > { %14167 = shalt.err (!%p14164_p1)
}
 0x141   : > { %s17558_s26 = sld [smem:[#allocation45_spill]]  ;;  %s17559_s22 = sld [smem:[#allocation44_spill]] }
 0x142   : > { %s17560_s30 = sld [smem:[#allocation47_spill]]  ;;  %s11550_s15 = sadd.s32 4294967294, %s14342_s17  }
 0x143   : > { %12772 = dma.hbm_to_vmem [thread:$0]  (!%p14518_p9), %s17333_s13, 16, %s556_s27, [#allocation28]  }
 0x144   : > { %s54_s29 = sadd.s32 1, %s14338_s16  ;;  %s92_s24 = sadd.s32 1, %s14330_s0 }
 0x145   : > { %p55_p11 = scmp.ge.s32.totalorder %s54_s29, 2  ;;  %p100_p3 = scmp.eq.s32.totalorder %s14342_s17, 0 }
 0x146   : > { %p368_p7 = scmp.eq.s32.totalorder %s11550_s15, 1  ;;  %p12796_p0 = scmp.lt.s32.totalorder %s14342_s17, 2 }
 0x147   : > { %p99_p2 = scmp.ne.s32.totalorder %s14330_s0, %s17558_s26  ;;  %s17967_s29 = smov (%p55_p11, %s54_s29), 0 }
 0x148   : > { %p105_p6 = scmp.ne.s32.totalorder %s17558_s26, %s17559_s22  ;;  %s87_s27 = ssub.s32 %s14338_s16, %s17967_s29 }
 0x149   : > { %p14794_p4 = por %p100_p3, %p99_p2  ;;  %p362_p9 = scmp.eq.s32.totalorder %s17560_s30, 1 }
 0x14a   : > { %p90_p5 = scmp.eq.s32.totalorder %s87_s27, 0  ;;  %p17562_p8 = scmp.eq.s32.totalorder %s17560_s30, 0 }
 0x14b   : > { %p14809_p12 = por %p362_p9, %p99_p2  ;;  %p14816_p13 = por %p368_p7, %p105_p6 }
 0x14c   : > { %p14805_p10 = por %p17562_p8, %p105_p6  ;;  %s566_s20 = sand.u32 1, %s14342_s17  }
 0x14d   : > { %s17564_s28 = scalar_select %p14809_p12, 1, 0 }
 0x14e   : > { %s14814_s25 = scalar_select %p90_p5, %s14330_s0, %s92_s24  }
 0x14f   : > { %s17565_s18 = scalar_select %p14816_p13, 1, 0 }
 0x150   : > { %s568_s23 = sand.u32 1, %s14330_s0   ;;  %s12430_s2 = sshll.u32 %s14338_s16, 7 }
 0x151   : > { %s11565_s19 = sshll.u32 %s568_s23, 3  ;;  %s17566_s22 = sld [smem:[#allocation116_spill]] }
 0x152   : > { %s570_s15 = scalar_lea.vmem [#allocation12], %s11565_s19  ;;  %p14833_p1 = pnand %p12796_p0, %p14794_p4 }
 0x153   : > { %s578_s24 = sshll.u32 %s570_s15, 4  ;;  %s14837_s23 = scalar_lea.sflag [#allocation13], %s566_s20  ;;  %s14829_s24 = int_to_ptr.vmem [resolvable:$true] %s578_s24 }
 0x154   : > { %p14170_p2 = pneg %p14833_p1 }
 0x157   : > { %s14827_s30 = scalar_lea.hbm %s17566_s22, %s12430_s2  ;;  %s14173_s1 = scalar_lea.hbm %s17566_s22, 256 }
 0x158   : > { %s14168_s14 = scalar_lea.hbm %s14827_s30, 128  ;;  %p14174_p4 = scmp.lt.u32.totalorder %s14827_s30, %s17566_s22 }
 0x159   : > { %p14169_p11 = scmp.ne.s32.totalorder %s14827_s30, %s14168_s14  ;;  %p14175_p9 = scmp.lt.u32.totalorder %s14173_s1, %s14168_s14 }
 0x15a   : > { %p14177_p8 = scmp.lt.u32.totalorder %s14168_s14, %s14827_s30 }
 0x15b   : > { %p14171_p3 = pnand %p14170_p2, %p14169_p11  ;;  %p14176_p5 = por %p14175_p9, %p14174_p4 }
 0x15d   : > { %p14172_p6 = pneg %p14171_p3  ;;  %p14178_p7 = por %p14177_p8, %p14176_p5 }
 0x15f   : > { %p14179_p0 = pnand %p14178_p7, %p14172_p6 }
 0x161   : > { %14182 = shalt.err (!%p14179_p0)
}
 0x162   : > { %s14183_s20 = scalar_lea.vmem %s14829_s24, 128  ;;  %s14365_s19 = smov [#allocation12]  }
 0x163   : > { %p14184_p11 = scmp.ne.s32.totalorder %s14829_s24, %s14183_s20  ;;  %s14188_s2 = sshll.u32 %s14365_s19, 4  ;;  %s14189_s2 = int_to_ptr.vmem [resolvable:$false] %s14188_s2 }
 0x164   : > { %s14190_s26 = scalar_lea.vmem %s14189_s2, 256  ;;  %p14191_p12 = scmp.lt.s32.totalorder %s14829_s24, %s14189_s2 }
 0x165   : > { %p14186_p3 = pnand %p14184_p11, %p14170_p2  ;;  %p14192_p4 = scmp.lt.s32.totalorder %s14190_s26, %s14183_s20 }
 0x167   : > { %p14187_p13 = pneg %p14186_p3  ;;  %p14193_p9 = por %p14192_p4, %p14191_p12 }
 0x169   : > { %p14194_p5 = pnand %p14193_p9, %p14187_p13 }
 0x16b   : > { %14197 = shalt.err (!%p14194_p5)
}
 0x16c   : > { %s14366_s14 = smov 1   ;;  %s17568_s1 = sld [smem:[#allocation48_spill]] }
 0x16d   : > { %12776 = dma.hbm_to_vmem [thread:$0]  (!%p14833_p1), %s14827_s30, 128, %s14829_s24, %s14837_s23, %s17556_s21, %s17556_s21, %s14366_s14  }
 0x172   : > { %p17569_p2 = scmp.ne.s32.totalorder %s17568_s1, 0 }
 0x174   : > { %590 = sbr.rel (%p17569_p2) target bundleno = 13050 (0x32fa), region = 72 }
 0x17b   : > { %s17570_s15 = sld [smem:[#allocation47_spill]] }
 0x181   : > { %p17571_p6 = scmp.eq.s32.totalorder %s17570_s15, 0 }
 0x183   : > { %14281 = dma.done.wait (%p17571_p6), [#allocation10], 256   ;;  %p17572_p8 = pmov %p17571_p6 }
 0x184   : > { %s17573_s20 = sld [smem:[#allocation45_spill]]  ;;  %s596_s19 = sand.u32 1, %s17570_s15  }
 0x185   : > { %14283 = vsyncadd (%p17572_p8), [#allocation10], 4294967040  ;;  %s597_s26 = scalar_lea.sflag [#allocation13], %s596_s19 }
 0x18a   : > { %s14875_s27 = sand.u32 1, %s17573_s20  }
 0x18b   : > { %s11570_s2 = sshll.u32 %s14875_s27, 3 }
 0x18c   : > { %s14878_s4 = scalar_lea.vmem [#allocation12], %s11570_s2 }
 0x18d   : > { %14285 = dma.done.wait (%p14805_p10), %s597_s26, 128  }
 0x18e   : > { %14287 = vsyncadd (%p14805_p10), %s597_s26, 4294967168  ;;  %p17574_p12 = pmov %p17571_p6 }
 0x18f   : > { %p17575_p13 = pmov %p17571_p6 }
 0x190   : > { %14289 = dma.done.wait (%p17574_p12), [#allocation13], 2048  }
 0x191   : > { %14291 = vsyncadd (%p17575_p13), [#allocation13], 4294965248  ;;  %p17576_p1 = pmov %p17571_p6 }
 0x193   : > { %14293 = dma.done.wait (%p17576_p1), [#allocation16], 1056   ;;  %p17577_p7 = pmov %p17576_p1 }
 0x194   : > { %p17578_p0 = pmov %p17576_p1 }
 0x195   : > { %14295 = vsyncadd (%p17577_p7), [#allocation16], 4294966240 }
 0x196   : > { %14297 = dma.done.wait (%p17578_p0), [#allocation19], 6160   ;;  %p17579_p11 = pmov %p17578_p0 }
 0x197   : > { %p17580_p10 = pmov %p17578_p0 }
 0x198   : > { %14299 = vsyncadd (%p17579_p11), [#allocation19], 4294961136 }
 0x199   : > { %14301 = dma.done.wait (%p17580_p10), [#allocation22], 112   ;;  %p17581_p3 = pmov %p17578_p0 }
 0x19a   : > { %p17582_p4 = pmov %p17578_p0 }
 0x19b   : > { %14303 = vsyncadd (%p17581_p3), [#allocation22], 4294967184 }
 0x19c   : > { %14305 = dma.done.wait (%p17582_p4), [#allocation25], 5120   ;;  %p17583_p9 = pmov %p17578_p0 }
 0x19d   : > { %p17584_p5 = pmov %p17578_p0 }
 0x19e   : > { %14307 = vsyncadd (%p17583_p9), [#allocation25], 4294962176 }
 0x19f   : > { %14309 = dma.done.wait (%p17584_p5), [#allocation28], 1040   ;;  %p17585_p2 = pmov %p17578_p0 }
 0x1a0   : > { %s11583_s21 = sshll.u32 %s14875_s27, 4  ;;  %v14909_v0 = vld [vmem:[#allocation9] sm:$0xf]  ;;  %v14911_v1 = vld [vmem:[#allocation9 + $0x4] sm:$0xf]  ;;  %s14917_s3 = scalar_lea.vmem [#allocation30], %s11570_s2 }
 0x1a1   : > { %14311 = vsyncadd (%p17585_p2), [#allocation28], 4294966256  ;;  %v14913_v2 = vld [vmem:[#allocation9 + $0x8] sm:$0xf]  ;;  %v14915_v3 = vld [vmem:[#allocation9 + $0xc] sm:$0xf] }
 0x1a2   : > { %s14919_s30 = scalar_lea.vmem [#allocation31], %s11583_s21  ;;  %s17586_s24 = sld [smem:[#allocation46_spill]] }
 0x1a8   : > { %p11584_p6 = scmp.ne.s32.totalorder %s17586_s24, 0 }
 0x1a9   : > { %v12890_v4 = vld [vmem:[#allocation17] sm:$0xff] (!%p11584_p6)   ;;  %v11601_v5 = vcombine.low (!%p11584_p6), %v14909_v0, %v14911_v1  ;;  %v707_v6 = vunpack.c.l.bf16 (!%p11584_p6), %v14909_v0  ;;  %v14367_v8 = vmov (!%p11584_p6), 0   ;;  %v708_v9 = vunpack.c.l.bf16 (!%p11584_p6), %v14911_v1  ;;  %v12894_v13 = vld [vmem:[#allocation17 + $0x8] sm:$0xff] (!%p11584_p6)   ;;  %v12895_v16 = vld [vmem:[#allocation14 + $0x14] ss:$8 sps:$4 sm:$0xff] (!%p11584_p6)  }
 0x1aa   : > { %706 = sbr.rel (%p11584_p6) target bundleno = 679 (0x2a7), region = 128  ;;  %v12891_v7 = vld [vmem:[#allocation14 + $0x4] ss:$8 sps:$4 sm:$0xff] (!%p11584_p6)   ;;  %878 = vmatprep.mubr.bf16.mxu0 (!%p11584_p6), %v14367_v8  ;;  %v709_v10 = vunpack.c.l.bf16 (!%p11584_p6), %v14913_v2  ;;  %v710_v11 = vunpack.c.l.bf16 (!%p11584_p6), %v14915_v3  ;;  %12484 = vmatprep.subr.bf16.mxu1 (!%p11584_p6), %v12890_v4  ;;  %v12893_v12 = vld [vmem:[#allocation14] ss:$8 sps:$4 sm:$0xff] (!%p11584_p6)   ;;  %v12898_v18 = vld [vmem:[#allocation17 + $0x10] sm:$0xff] (!%p11584_p6)   ;;  %v11602_v55 = vcombine.low (!%p11584_p6), %v14913_v2, %v14915_v3  ;;  %v748_v57 = vlaneseq (!%p11584_p6) }
 0x1ab   : > { %12500 = vmatprep.mubr.bf16.mxu1 (!%p11584_p6), %v11601_v5  ;;  %846 = vmatprep.subr.bf16.mxu0 (!%p11584_p6), %v12891_v7  ;;  %v711_v14 = vadd.f32 (!%p11584_p6), %v708_v9, %v707_v6  ;;  %v12897_v17 = vld [vmem:[#allocation14 + $0x10] ss:$8 sps:$4 sm:$0xff] (!%p11584_p6)   ;;  %v12899_v21 = vld [vmem:[#allocation14 + $0x24] ss:$8 sps:$4 sm:$0xff] (!%p11584_p6)   ;;  %v12901_v22 = vld [vmem:[#allocation14 + $0x20] ss:$8 sps:$4 sm:$0xff] (!%p11584_p6)  }
 0x1ac   : > { %12485 = vmatpush3.bf16.msra.mxu1 (!%p11584_p6), %v12890_v4  ;;  %v718_v15 = vadd.f32 (!%p11584_p6), %v710_v11, %v709_v10  ;;  %847 = vmatpush1.bf16.msra.mxu0 (!%p11584_p6), %v12893_v12  ;;  %v12902_v25 = vld [vmem:[#allocation17 + $0x18] sm:$0xff] (!%p11584_p6)   ;;  %v12906_v30 = vld [vmem:[#allocation17 + $0x20] sm:$0xff] (!%p11584_p6)   ;;  %v12910_v37 = vld [vmem:[#allocation17 + $0x28] sm:$0xff] (!%p11584_p6)   ;;  %vm762_vm0 = vcmask (!%p11584_p6), 1041409   ;;  %v749_v58 = vshrl.u32 (!%p11584_p6), %v748_v57, 7 }
 0x1ad   : > { %12486 = vmatprep.subr.bf16.mxu1 (!%p11584_p6), %v12894_v13  ;;  %v712_v19 = vrot.slane (!%p11584_p6), %v711_v14, 4  ;;  %848 = vmatprep.subr.bf16.mxu0 (!%p11584_p6), %v12895_v16  ;;  %v12903_v26 = vld [vmem:[#allocation14 + $0x34] ss:$8 sps:$4 sm:$0xff] (!%p11584_p6)   ;;  %v12905_v29 = vld [vmem:[#allocation14 + $0x30] ss:$8 sps:$4 sm:$0xff] (!%p11584_p6)  }
 0x1ae   : > { %v719_v20 = vrot.slane (!%p11584_p6), %v718_v15, 4  ;;  %v12907_v33 = vld [vmem:[#allocation14 + $0x44] ss:$8 sps:$4 sm:$0xff] (!%p11584_p6)   ;;  %v12909_v35 = vld [vmem:[#allocation14 + $0x40] ss:$8 sps:$4 sm:$0xff] (!%p11584_p6)   ;;  %v12914_v44 = vld [vmem:[#allocation17 + $0x30] sm:$0xff] (!%p11584_p6)  }
 0x1af   : > { %v713_v23 = vadd.f32 (!%p11584_p6), %v712_v19, %v711_v14  ;;  %v12911_v39 = vld [vmem:[#allocation14 + $0x54] ss:$8 sps:$4 sm:$0xff] (!%p11584_p6)   ;;  %v12913_v43 = vld [vmem:[#allocation14 + $0x50] ss:$8 sps:$4 sm:$0xff] (!%p11584_p6)   ;;  %v12915_v46 = vld [vmem:[#allocation14 + $0x64] ss:$8 sps:$4 sm:$0xff] (!%p11584_p6)  }
 0x1b0   : > { %12487 = vmatpush3.bf16.msra.mxu1 (!%p11584_p6), %v12894_v13  ;;  %v720_v24 = vadd.f32 (!%p11584_p6), %v719_v20, %v718_v15  ;;  %849 = vmatpush1.bf16.msra.mxu0 (!%p11584_p6), %v12897_v17  ;;  %v12917_v48 = vld [vmem:[#allocation14 + $0x60] ss:$8 sps:$4 sm:$0xff] (!%p11584_p6)   ;;  %v12919_v52 = vld [vmem:[#allocation14 + $0x74] ss:$8 sps:$4 sm:$0xff] (!%p11584_p6)   ;;  %v12921_v53 = vld [vmem:[#allocation14 + $0x70] ss:$8 sps:$4 sm:$0xff] (!%p11584_p6)  }
 0x1b1   : > { %12488 = vmatprep.subr.bf16.mxu1 %v12898_v18  ;;  %850 = vmatprep.subr.bf16.mxu0 %v12899_v21  ;;  %v714_v27 = vrot.slane %v713_v23, 2  ;;  %v12918_v49 = vld [vmem:[#allocation17 + $0x38] sm:$0xff]   ;;  %v750_v59 = vsub.s32 0, %v749_v58  ;;  %v754_v61 = vsub.s32 1, %v749_v58  ;;  %v11611_v5 = vld [vmem:[#allocation18] ss:$0 sm:$0xff] }
 0x1b2   : > { %v721_v28 = vrot.slane %v720_v24, 2  ;;  %v746_v60 = vld [vmem:[#allocation15] sm:$0x3] }
 0x1b3   : > { %v715_v31 = vadd.f32 %v714_v27, %v713_v23  ;;  %v751_v62 = vrot.slane %v746_v60, %v750_v59  ;;  %v755_v63 = vrot.slane %v746_v60, %v754_v61 }
 0x1b4   : > { %12489 = vmatpush3.bf16.msra.mxu1 %v12898_v18  ;;  %851 = vmatpush1.bf16.msra.mxu0 %v12901_v22  ;;  %v722_v32 = vadd.f32 %v721_v28, %v720_v24 }
 0x1b5   : > { %12490 = vmatprep.subr.bf16.mxu1 %v12902_v25  ;;  %852 = vmatprep.subr.bf16.mxu0 %v12903_v26  ;;  %v716_v34 = vrot.slane %v715_v31, 1 }
 0x1b6   : > { %v723_v36 = vrot.slane %v722_v32, 1 }
 0x1b7   : > { %v717_v38 = vadd.f32 %v716_v34, %v715_v31 }
 0x1b8   : > { %12491 = vmatpush3.bf16.msra.mxu1 %v12902_v25  ;;  %853 = vmatpush1.bf16.msra.mxu0 %v12905_v29  ;;  %v724_v40 = vadd.f32 %v723_v36, %v722_v32 }
 0x1b9   : > { %12492 = vmatprep.subr.bf16.mxu1 %v12906_v30  ;;  %854 = vmatprep.subr.bf16.mxu0 %v12907_v33  ;;  %v726_v41 = vmul.f32 0.0625, %v717_v38 }
 0x1ba   : > { %v727_v42 = vmul.f32 0.0625, %v724_v40 }
 0x1bb   : > { %v728_v45 = vpack.c.bf16 %v726_v41, %v726_v41 }
 0x1bc   : > { %12493 = vmatpush3.bf16.msra.mxu1 %v12906_v30  ;;  %855 = vmatpush1.bf16.msra.mxu0 %v12909_v35  ;;  %v729_v47 = vpack.c.bf16 %v727_v42, %v727_v42 }
 0x1bd   : > { %12494 = vmatprep.subr.bf16.mxu1 %v12910_v37  ;;  %856 = vmatprep.subr.bf16.mxu0 %v12911_v39  ;;  %v760_v50 = vunpack.c.l.b16 %v728_v45 }
 0x1be   : > { %v761_v51 = vunpack.c.l.b16 %v729_v47 }
 0x1c0   : > { %12495 = vmatpush3.bf16.msra.mxu1 %v12910_v37  ;;  %857 = vmatpush1.bf16.msra.mxu0 %v12913_v43  ;;  %v763_v54 = vsel %vm762_vm0, %v761_v51, %v760_v50 }
 0x1c1   : > { %12496 = vmatprep.subr.bf16.mxu1 %v12914_v44  ;;  %858 = vmatprep.subr.bf16.mxu0 %v12915_v46  ;;  %v764_v56 = vpack.c.b16 %v763_v54, %v763_v54 }
 0x1c4   : > { %12497 = vmatpush3.bf16.msra.mxu1 %v12914_v44  ;;  %859 = vmatpush1.bf16.msra.mxu0 %v12917_v48 }
 0x1c5   : > { %12498 = vmatprep.subr.bf16.mxu1 %v12918_v49  ;;  %860 = vmatprep.subr.bf16.mxu0 %v12919_v52 }
 0x1c8   : > { %12499 = vmatpush3.bf16.msra.mxu1 %v12918_v49  ;;  %861 = vmatpush1.bf16.msra.mxu0 %v12921_v53 }
 0x1cb   : > { %12501 = vmatmul.mubr.bf16.vlgmr.msra.gmra.mrb[0].mxu1 %v11602_v55  ;;  %879 = vmatmul.mubr.bf16.vlgmr.msra.gmra.mrb[0].mxu0 %v764_v56 }
 0x29e   : > { %v12502_v4 = vpop.f32.mrb[0].mxu1  ;;  %v880_v6 = vpop.f32.mrb[0].mxu0 }
 0x29f   : > { %v999_v7 = vpop.f32.mrb[1].mxu1  ;;  %v881_v8 = vadd.f32 %v880_v6, %v751_v62  ;;  %v882_v9 = vpop.f32.mrb[1].mxu0  ;;  %v1023_v11 = vadd.f32 %v12502_v4, %v11611_v5 }
 0x2a0   : > { %v12503_v10 = vpop.f32.mrb[2].mxu1  ;;  %v883_v12 = vadd.f32 %v882_v9, %v755_v63  ;;  %v884_v14 = vpop.f32.mrb[2].mxu0  ;;  %v1021_v16 = vadd.f32 %v11611_v5, %v999_v7 }
 0x2a1   : > { %v1024_v13 = vadd.f32 %v12503_v10, %v11611_v5  ;;  %v1002_v15 = vpop.f32.mrb[3].mxu1  ;;  %887 = vst [vmem:[#allocation2] sm:$0x3] %v881_v8  ;;  %v885_v18 = vpop.f32.mrb[3].mxu0 }
 0x2a2   : > { %v1022_v17 = vadd.f32 %v11611_v5, %v1002_v15  ;;  %888 = vst [vmem:[#allocation3] sm:$0x3] %v883_v12 }
 0x2a3   : > { %v1026_v19 = vpack.c.bf16 %v1024_v13, %v1023_v11 }
 0x2a4   : > { %v1025_v20 = vpack.c.bf16 %v1022_v17, %v1021_v16 }
 0x2a5   : > { %1028 = vst [vmem:[#allocation4 + $0x8] sm:$0xff] %v1026_v19 }
 0x2a6   : > { %1027 = vst [vmem:[#allocation4] sm:$0xff] %v1025_v20 }
 0x2a7 PF: > { %v12924_v21 = vld [vmem:[#allocation20 + $0x4] ss:$24 sps:$4 sm:$0xff]   ;;  %v12926_v22 = vld [vmem:[#allocation20] ss:$24 sps:$4 sm:$0xff]   ;;  %v17353_v23 = vmov 0   ;;  %v1037_v60 = vlaneseq  ;;  %vm1565_vm1 = vcmask 130112  }
 0x2a8   : > { %1399 = vmatprep.mubr.bf16.mxu0 %v17353_v23  ;;  %12923 = vset.pattern.permute.xlu0 %v17353_v23  ;;  %v12927_v24 = vld [vmem:[#allocation20 + $0x34] ss:$24 sps:$4 sm:$0xff]   ;;  %v12929_v25 = vld [vmem:[#allocation20 + $0x30] ss:$24 sps:$4 sm:$0xff]   ;;  %v12930_v26 = vld [vmem:[#allocation20 + $0x64] ss:$24 sps:$4 sm:$0xff]  }
 0x2a9   : > { %1367 = vmatprep.subr.bf16.mxu0 %v12924_v21  ;;  %12922 = vset.pattern.permute.xlu1 %v17353_v23  ;;  %v12932_v27 = vld [vmem:[#allocation20 + $0x60] ss:$24 sps:$4 sm:$0xff]   ;;  %v12933_v28 = vld [vmem:[#allocation20 + $0x94] ss:$24 sps:$4 sm:$0xff]   ;;  %v12935_v29 = vld [vmem:[#allocation20 + $0x90] ss:$24 sps:$4 sm:$0xff]  }
 0x2aa   : > { %1368 = vmatpush1.bf16.msra.mxu0 %v12926_v22  ;;  %1440 = vmatprep.mubr.bf16.mxu1 %v17353_v23  ;;  %v12936_v30 = vld [vmem:[#allocation20 + $0xc4] ss:$24 sps:$4 sm:$0xff]   ;;  %v12938_v31 = vld [vmem:[#allocation20 + $0xc0] ss:$24 sps:$4 sm:$0xff]   ;;  %v12939_v32 = vld [vmem:[#allocation20 + $0xf4] ss:$24 sps:$4 sm:$0xff]  }
 0x2ab   : > { %1369 = vmatprep.subr.bf16.mxu0 %v12927_v24  ;;  %v12941_v33 = vld [vmem:[#allocation20 + $0xf0] ss:$24 sps:$4 sm:$0xff]   ;;  %v12942_v34 = vld [vmem:[#allocation20 + $0x124] ss:$24 sps:$4 sm:$0xff]   ;;  %v12944_v35 = vld [vmem:[#allocation20 + $0x120] ss:$24 sps:$4 sm:$0xff]  }
 0x2ac   : > { %v12945_v36 = vld [vmem:[#allocation20 + $0x154] ss:$24 sps:$4 sm:$0xff]   ;;  %v12947_v37 = vld [vmem:[#allocation20 + $0x150] ss:$24 sps:$4 sm:$0xff]   ;;  %v12953_v42 = vld [vmem:[#allocation20 + $0x44] ss:$24 sps:$4 sm:$0xff]  }
 0x2ad   : > { %v1041_v38 = vld [vmem:[#allocation2] sm:$0x3]  ;;  %v12950_v39 = vld [vmem:[#allocation20 + $0x14] ss:$24 sps:$4 sm:$0xff]   ;;  %v12951_v43 = vld [vmem:[#allocation20 + $0x40] ss:$24 sps:$4 sm:$0xff]  }
 0x2ae   : > { %1370 = vmatpush1.bf16.msra.mxu0 %v12929_v25  ;;  %v12948_v40 = vld [vmem:[#allocation20 + $0x10] ss:$24 sps:$4 sm:$0xff]   ;;  %v14934_v41 = vpack.c.bf16 %v1041_v38, %v1041_v38  ;;  %v12956_v44 = vld [vmem:[#allocation20 + $0x74] ss:$24 sps:$4 sm:$0xff]   ;;  %v12959_v46 = vld [vmem:[#allocation20 + $0xa4] ss:$24 sps:$4 sm:$0xff]  }
 0x2af   : > { %1371 = vmatprep.subr.bf16.mxu0 %v12930_v26  ;;  %v12954_v45 = vld [vmem:[#allocation20 + $0x70] ss:$24 sps:$4 sm:$0xff]   ;;  %v12957_v47 = vld [vmem:[#allocation20 + $0xa0] ss:$24 sps:$4 sm:$0xff]   ;;  %v12962_v48 = vld [vmem:[#allocation20 + $0xd4] ss:$24 sps:$4 sm:$0xff]  }
 0x2b0   : > { %v12960_v49 = vld [vmem:[#allocation20 + $0xd0] ss:$24 sps:$4 sm:$0xff]   ;;  %v12965_v50 = vld [vmem:[#allocation20 + $0x104] ss:$24 sps:$4 sm:$0xff]   ;;  %v12963_v51 = vld [vmem:[#allocation20 + $0x100] ss:$24 sps:$4 sm:$0xff]  }
 0x2b1   : > { %v12968_v52 = vld [vmem:[#allocation20 + $0x134] ss:$24 sps:$4 sm:$0xff]   ;;  %v12966_v53 = vld [vmem:[#allocation20 + $0x130] ss:$24 sps:$4 sm:$0xff]   ;;  %v12971_v54 = vld [vmem:[#allocation20 + $0x164] ss:$24 sps:$4 sm:$0xff]  }
 0x2b2   : > { %1372 = vmatpush1.bf16.msra.mxu0 %v12932_v27  ;;  %v12969_v55 = vld [vmem:[#allocation20 + $0x160] ss:$24 sps:$4 sm:$0xff]   ;;  %v14944_v61 = vshrl.u32 %v1037_v60, 7  ;;  %v14369_v62 = vmov 1966171168   ;;  %vm1576_vm2 = vcmask 1041409  }
 0x2b3   : > { %1373 = vmatprep.subr.bf16.mxu0 %v12933_v28  ;;  %v1492_v63 = vunpack.c.l.s4 %v14369_v62  ;;  %v14949_v6 = vld [vmem:[#allocation21] sm:$0x3f]  ;;  %v1029_v14 = vld [vmem:[#allocation4] sm:$0xff]  ;;  %vm17536_vm3 = vcmask 123904   ;;  %vm14371_vm4 = vmmov 0   ;;  %vm1689_vm5 = vcmask 130048  }
 0x2b4   : > { %17587 = vst [vmem:[#allocation49_spill] sm:$0xff] %v14944_v61  ;;  %v14947_v4 = vsub.s32 5, %v14944_v61  ;;  %v14960_v16 = vsub.s32 0, %v14944_v61  ;;  %v1030_v17 = vld [vmem:[#allocation4 + $0x8] sm:$0xff]  ;;  %v14963_v20 = vunpack.c.l.bf16 %v1029_v14  ;;  %v14965_v21 = vunpack.c.h.bf16 %v1029_v14  ;;  %s17624_s23 = sld [smem:[#allocation46_spill]]  ;;  %p17954_p12 = scmp.ne.s32.totalorder %s17564_s28, 0 }
 0x2b5   : > { %v1493_v5 = vunpack.c.0.s8 %v1492_v63  ;;  %v14968_v24 = vunpack.c.l.bf16 %v1030_v17  ;;  %v14971_v26 = vunpack.c.h.bf16 %v1030_v17  ;;  %vm17535_vm6 = vcmask 261120  }
 0x2b6   : > { %1374 = vmatpush1.bf16.msra.mxu0 %v12935_v29  ;;  %17588 = vst [vmem:[#allocation50_spill] sm:$0xff] %v14947_v4  ;;  %v1120_v7 = vrot.slane %v14949_v6, %v14947_v4  ;;  %17590 = vst [vmem:[#allocation52_spill] sm:$0xff] %v14960_v16  ;;  %vm2255_vm8 = vcmask 1024  }
 0x2b7   : > { %1375 = vmatprep.subr.bf16.mxu0 %v12936_v30  ;;  %v14956_v9 = vsub.s32 %v1493_v5, %v14944_v61  ;;  %17591 = vst [vmem:[#allocation53_spill] sm:$0xff] %v14963_v20  ;;  %17592 = vst [vmem:[#allocation54_spill] sm:$0xff] %v14965_v21  ;;  %v11661_v30 = vld [vmem:[#allocation23] ss:$0 sm:$0xff] }
 0x2b8   : > { %17593 = vst [vmem:[#allocation55_spill] sm:$0xff] %v14968_v24  ;;  %17594 = vst [vmem:[#allocation56_spill] sm:$0xff] %v14971_v26 }
 0x2b9   : > { %17589 = vst [vmem:[#allocation51_spill] sm:$0xff] %v14956_v9 }
 0x2ba   : > { %1376 = vmatpush1.bf16.msra.mxu0 %v12938_v31  ;;  %s15256_s14 = sshll.u32 %s17624_s23, 3 }
 0x2bb   : > { %1377 = vmatprep.subr.bf16.mxu0 %v12939_v32  ;;  %s1043_s1 = sld [smem:[#allocation8 + %s15256_s14]]  ;;  %s2298_s15 = sadd.s32 1, %s15256_s14 }
 0x2bc   : > { %s2299_s20 = sld [smem:[#allocation8 + %s2298_s15]]  ;;  %s3537_s19 = sadd.s32 2, %s15256_s14 }
 0x2bd   : > { %s3538_s2 = sld [smem:[#allocation8 + %s3537_s19]]  ;;  %s4776_s26 = sadd.s32 3, %s15256_s14 }
 0x2be   : > { %1378 = vmatpush1.bf16.msra.mxu0 %v12941_v33  ;;  %s4777_s21 = sld [smem:[#allocation8 + %s4776_s26]]  ;;  %s6015_s24 = sadd.s32 4, %s15256_s14 }
 0x2bf   : > { %1379 = vmatprep.subr.bf16.mxu0 %v12942_v34  ;;  %s7254_s15 = sadd.s32 5, %s15256_s14  ;;  %s8493_s19 = sadd.s32 6, %s15256_s14 }
 0x2c0   : > { %s9732_s26 = sadd.s32 7, %s15256_s14  ;;  %s11312_s14 = sshll.u32 %s14919_s30, 4  ;;  %s17225_s14 = int_to_ptr.vmem [resolvable:$true] %s11312_s14 }
 0x2c2   : > { %1380 = vmatpush1.bf16.msra.mxu0 %v12944_v35 }
 0x2c3   : > { %1381 = vmatprep.subr.bf16.mxu0 %v12945_v36 }
 0x2c6   : > { %1382 = vmatpush1.bf16.msra.mxu0 %v12947_v37 }
 0x2c7   : > { %1449 = vmatprep.subr.bf16.mxu0 %v12950_v39 }
 0x2c9   : > { %1400 = vmatmul.mubr.bf16.vlgmr.msra.gmra.mrb[0].mxu0 %v14934_v41 }
 0x2ca   : > { %1450 = vmatpush1.bf16.msra.mxu0 %v12948_v40  ;;  %1481 = vmatprep.mubr.bf16.mxu0 %v17353_v23 }
 0x2cb   : > { %1451 = vmatprep.subr.bf16.mxu0 %v12953_v42  ;;  %v1555_v42 = vand.u32 127, %v1037_v60  ;;  %v14993_v60 = vsub.s32 1, %v14944_v61 }
 0x2ce   : > { %1452 = vmatpush1.bf16.msra.mxu0 %v12951_v43  ;;  %v1560_v43 = vadd.s32 4294967288, %v1555_v42 }
 0x2cf   : > { %1453 = vmatprep.subr.bf16.mxu0 %v12956_v44 }
 0x2d2   : > { %1454 = vmatpush1.bf16.msra.mxu0 %v12954_v45  ;;  %v14979_v45 = vsub.s32 %v1560_v43, %v14944_v61  ;;  %v15013_v43 = vld [vmem:[#allocation20 + $0x38] ss:$24 sps:$4 sm:$0xff]  }
 0x2d3   : > { %1455 = vmatprep.subr.bf16.mxu0 %v12959_v46 }
 0x2d4   : > { %17595 = vst [vmem:[#allocation57_spill] sm:$0xff] %v14979_v45 }
 0x2d6   : > { %1456 = vmatpush1.bf16.msra.mxu0 %v12957_v47  ;;  %v14982_v47 = vsub.s32 %v1555_v42, %v14944_v61  ;;  %v15009_v42 = vld [vmem:[#allocation20 + $0x3c] ss:$24 sps:$4 sm:$0xff]  }
 0x2d7   : > { %1457 = vmatprep.subr.bf16.mxu0 %v12962_v48 }
 0x2d8   : > { %17596 = vst [vmem:[#allocation58_spill] sm:$0xff] %v14982_v47 }
 0x2da   : > { %1458 = vmatpush1.bf16.msra.mxu0 %v12960_v49 }
 0x2db   : > { %1459 = vmatprep.subr.bf16.mxu0 %v12965_v50 }
 0x2de   : > { %1460 = vmatpush1.bf16.msra.mxu0 %v12963_v51 }
 0x2df   : > { %1461 = vmatprep.subr.bf16.mxu0 %v12968_v52 }
 0x2e2   : > { %1462 = vmatpush1.bf16.msra.mxu0 %v12966_v53 }
 0x2e3   : > { %1463 = vmatprep.subr.bf16.mxu0 %v12971_v54 }
 0x2e6   : > { %1464 = vmatpush1.bf16.msra.mxu0 %v12969_v55 }
 0x2e9   : > { %1482 = vmatmul.mubr.bf16.vlgmr.msra.gmra.mrb[4].mxu0 %v14934_v41 }
 0x2ea   : > { %2088 = vmatprep.mubr.bf16.mxu0 %v17353_v23 }
 0x39c   : > { %v14940_v56 = vpop.f32.mrb[0].mxu0 }
 0x39d   : > { %v14942_v57 = vpop.f32.mrb[1].mxu0 }
 0x39e   : > { %v1405_v58 = vpop.f32.mrb[2].mxu0 }
 0x39f   : > { %v1406_v59 = vpop.f32.mrb[3].mxu0 }
 0x3bc   : > { %v14953_v8 = vpop.f32.mrb[4].mxu0 }
 0x3bd   : > { %v1485_v10 = vpop.f32.mrb[5].mxu0 }
 0x3be   : > { %v1486_v11 = vadd.f32 %v1485_v10, %v1120_v7  ;;  %v1487_v12 = vpop.f32.mrb[6].mxu0 }
 0x3bf   : > { %v1488_v13 = vpop.f32.mrb[7].mxu0 }
 0x3c0   : > { %v1497_v15 = vrot.slane %v1486_v11, %v14956_v9 }
 0x3c2   : > { %v1498_v18 = vcombine.high %v1497_v15, %v1497_v15  ;;  %v1505_v19 = vrot.slane %v1497_v15, %v14956_v9 }
 0x3c4   : > { %v1516_v22 = vrot.slane %v1505_v19, %v14960_v16  ;;  %v1512_v25 = vrot.slane %v1498_v18, %v14956_v9 }
 0x3c6   : > { %v1523_v27 = vadd.f32 %v1516_v22, %v14963_v20  ;;  %v1520_v28 = vrot.slane %v1512_v25, %v14960_v16  ;;  %v1524_v29 = vadd.f32 %v1516_v22, %v14965_v21 }
 0x3c8   : > { %v1527_v31 = vmax.f32 %v1523_v27, 0.0  ;;  %v1525_v32 = vadd.f32 %v1520_v28, %v14968_v24  ;;  %v1526_v33 = vadd.f32 %v1520_v28, %v14971_v26  ;;  %v1528_v36 = vmax.f32 %v1524_v29, 0.0 }
 0x3ca   : > { %v1538_v34 = vmul.f32 %v11661_v30, %v1527_v31  ;;  %v1529_v35 = vmax.f32 %v1525_v32, 0.0  ;;  %v1530_v38 = vmax.f32 %v1526_v33, 0.0  ;;  %v1539_v39 = vmul.f32 %v11661_v30, %v1528_v36 }
 0x3cc   : > { %1542 = vadd.xlane.f32.xlu0 %v1538_v34  ;;  %v1540_v37 = vmul.f32 %v11661_v30, %v1529_v35  ;;  %v1541_v40 = vmul.f32 %v11661_v30, %v1530_v38 }
 0x3ce   : > { %1546 = vadd.xlane.f32.xlu1 %v1540_v37 }
 0x3d0   : > { %1544 = vadd.xlane.f32.xlu0 %v1539_v39  ;;  %v15005_v39 = vld [vmem:[#allocation20 + $0xc] ss:$24 sps:$4 sm:$0xff]  }
 0x3d1   : > { %1408 = vmatprep.subr.bf16.mxu1 %v15005_v39 }
 0x3d2   : > { %1548 = vadd.xlane.f32.xlu1 %v1541_v40  ;;  %v15007_v40 = vld [vmem:[#allocation20 + $0x8] ss:$24 sps:$4 sm:$0xff]  }
 0x3d3   : > { %1409 = vmatpush1.bf16.msra.mxu1 %v15007_v40 }
 0x3d4   : > { %1410 = vmatprep.subr.bf16.mxu1 %v15009_v42 }
 0x3d7   : > { %1411 = vmatpush1.bf16.msra.mxu1 %v15013_v43 }
 0x459   : > { %v1543_v44 = vpop.xlane.xlu0 %1542 }
 0x45a   : > { %v1559_v51 = vrot.slane %v1543_v44, %v14982_v47 }
 0x45b   : > { %v1547_v46 = vpop.xlane.xlu1 %1546 }
 0x45c   : > { %v1570_v52 = vrot.slane %v1547_v46, %v14982_v47 }
 0x45d   : > { %v1545_v48 = vpop.xlane.xlu0 %1544 }
 0x45e   : > { %v1564_v49 = vrot.slane %v1545_v48, %v14979_v45 }
 0x45f   : > { %v1549_v50 = vpop.xlane.xlu1 %1548 }
 0x460   : > { %v1574_v53 = vrot.slane %v1549_v50, %v14979_v45  ;;  %v1566_v54 = vsel %vm1565_vm1, %v1564_v49, %v1559_v51  ;;  %v15025_v49 = vld [vmem:[#allocation20 + $0x98] ss:$24 sps:$4 sm:$0xff]   ;;  %v15031_v51 = vld [vmem:[#allocation20 + $0xc8] ss:$24 sps:$4 sm:$0xff]  }
 0x462   : > { %v1575_v55 = vsel %vm1565_vm1, %v1574_v53, %v1570_v52  ;;  %v15034_v52 = vld [vmem:[#allocation20 + $0xfc] ss:$24 sps:$4 sm:$0xff]   ;;  %v15037_v53 = vld [vmem:[#allocation20 + $0xf8] ss:$24 sps:$4 sm:$0xff]  }
 0x463   : > { %v1577_v58 = vsel %vm1576_vm2, %v1575_v55, %v1566_v54  ;;  %v15040_v54 = vld [vmem:[#allocation20 + $0x12c] ss:$24 sps:$4 sm:$0xff]   ;;  %v15043_v55 = vld [vmem:[#allocation20 + $0x128] ss:$24 sps:$4 sm:$0xff]  }
 0x464   : > { %v1580_v59 = vsel %vm17536_vm3, %v1577_v58, -inf  ;;  %v15046_v58 = vld [vmem:[#allocation20 + $0x15c] ss:$24 sps:$4 sm:$0xff]  }
 0x465   : > { %1581 = vmax.xlane.f32.xlu0 %v1580_v59  ;;  %v15049_v59 = vld [vmem:[#allocation20 + $0x158] ss:$24 sps:$4 sm:$0xff]  }
 0x4f2   : > { %v1582_v62 = vpop.xlane.xlu0 %1581 }
 0x4f3   : > { %v1587_v63 = vrot.slane %v1582_v62, %v14960_v16  ;;  %v1591_v5 = vrot.slane %v1582_v62, %v14993_v60 }
 0x4f5   : > { %v1594_v7 = vsub.f32 %v1543_v44, %v1587_v63  ;;  %v1595_v10 = vsub.f32 %v1545_v48, %v1587_v63  ;;  %v1596_v11 = vsub.f32 %v1547_v46, %v1591_v5  ;;  %v1597_v14 = vsub.f32 %v1549_v50, %v1591_v5  ;;  %v15016_v44 = vld [vmem:[#allocation20 + $0x6c] ss:$24 sps:$4 sm:$0xff]   ;;  %v15019_v46 = vld [vmem:[#allocation20 + $0x68] ss:$24 sps:$4 sm:$0xff]   ;;  %v15022_v48 = vld [vmem:[#allocation20 + $0x9c] ss:$24 sps:$4 sm:$0xff]  }
 0x4f6   : > { %1412 = vmatprep.subr.bf16.mxu1 %v15016_v44  ;;  %v15028_v50 = vld [vmem:[#allocation20 + $0xcc] ss:$24 sps:$4 sm:$0xff]  }
 0x4f7   : > { %v1598_v12 = vmul.f32 1.442695, %v1594_v7  ;;  %v1600_v13 = vmul.f32 1.442695, %v1595_v10  ;;  %v1602_v15 = vmul.f32 1.442695, %v1596_v11  ;;  %1413 = vmatpush1.bf16.msra.mxu1 %v15019_v46 }
 0x4f8   : > { %v1604_v17 = vmul.f32 1.442695, %v1597_v14  ;;  %1414 = vmatprep.subr.bf16.mxu1 %v15022_v48 }
 0x4f9   : > { %13559 = vpow2.f32 %v1598_v12 }
 0x4fa   : > { %13561 = vpow2.f32 %v1600_v13 }
 0x4fb   : > { %13563 = vpow2.f32 %v1602_v15  ;;  %1415 = vmatpush1.bf16.msra.mxu1 %v15025_v49 }
 0x4fc   : > { %13565 = vpow2.f32 %v1604_v17  ;;  %1416 = vmatprep.subr.bf16.mxu1 %v15028_v50  ;;  %v15068_v17 = vcombine.low %v14909_v0, %v14911_v1  ;;  %v15077_v1 = vld [vmem:[#allocation26 + $0x8] ss:$16 sps:$4 sm:$0xff]  }
 0x4ff   : > { %1417 = vmatpush1.bf16.msra.mxu1 %v15031_v51 }
 0x500   : > { %1418 = vmatprep.subr.bf16.mxu1 %v15034_v52 }
 0x503   : > { %v13560_v18 = vpop.eup %13559  ;;  %1419 = vmatpush1.bf16.msra.mxu1 %v15037_v53 }
 0x504   : > { %v13562_v19 = vpop.eup %13561  ;;  %1611 = vperm.xlu1 %12922, %v13560_v18   ;;  %1420 = vmatprep.subr.bf16.mxu1 %v15040_v54 }
 0x505   : > { %1614 = vperm.xlu0 %12923, %v13562_v19   ;;  %v13564_v22 = vpop.eup %13563 }
 0x506   : > { %v13566_v25 = vpop.eup %13565 }
 0x507   : > { %1421 = vmatpush1.bf16.msra.mxu1 %v15043_v55 }
 0x508   : > { %1617 = vperm.xlu1 %12922, %v13564_v22   ;;  %1422 = vmatprep.subr.bf16.mxu1 %v15046_v58 }
 0x50b   : > { %1423 = vmatpush1.bf16.msra.mxu1 %v15049_v59 }
 0x50c   : > { %1620 = vperm.xlu1 %12922, %v13566_v25  }
 0x50e   : > { %1441 = vmatmul.mubr.bf16.vlgmr.msra.gmra.mrb[0].mxu1 %v14934_v41 }
 0x583   : > { %v1612_v27 = vpop.permute.xlu1 %1611 }
 0x584   : > { %v1615_v28 = vpop.permute.xlu0 %1614  ;;  %v1625_v31 = vrot.slane %v1612_v27, %v14982_v47  ;;  %v17351_v27 = vmov 0.0  }
 0x585   : > { %v1629_v30 = vrot.slane %v1615_v28, %v14979_v45  ;;  %12504 = vmatprep.subr.bf16.mxu1 %v17351_v27  ;;  %12506 = vmatprep.mubr.msk.bf16.mxu1 %vm14371_vm4, %v17351_v27  ;;  %v15083_v28 = vld [vmem:[#allocation26 + $0x28] ss:$16 sps:$4 sm:$0xff]  }
 0x586   : > { %12505 = vmatpush3.bf16.msra.mxu1 %v15068_v17 }
 0x587   : > { %v1618_v29 = vpop.permute.xlu1 %1617  ;;  %v1630_v35 = vsel %vm1565_vm1, %v1629_v30, %v1625_v31  ;;  %12510 = vmatprep.subr.bf16.mxu1 %v17351_v27  ;;  %v15089_v30 = vld [vmem:[#allocation26 + $0x48] ss:$16 sps:$4 sm:$0xff]   ;;  %v15091_v31 = vld [vmem:[#allocation26 + $0x4c] ss:$16 sps:$4 sm:$0xff]  }
 0x588   : > { %v1634_v33 = vrot.slane %v1618_v29, %v14982_v47  ;;  %v15085_v29 = vld [vmem:[#allocation26 + $0x2c] ss:$16 sps:$4 sm:$0xff]   ;;  %17601 = vst [vmem:[#allocation63_spill] sm:$0xff] %v15089_v30  ;;  %17602 = vst [vmem:[#allocation64_spill] sm:$0xff] %v15091_v31 }
 0x58b   : > { %v1621_v32 = vpop.permute.xlu1 %1620 }
 0x58c   : > { %v1638_v34 = vrot.slane %v1621_v32, %v14979_v45  ;;  %v15095_v32 = vld [vmem:[#allocation26 + $0x68] ss:$16 sps:$4 sm:$0xff]  }
 0x58d   : > { %17603 = vst [vmem:[#allocation65_spill] sm:$0xff] %v15095_v32 }
 0x58e   : > { %v1639_v36 = vsel %vm1565_vm1, %v1638_v34, %v1634_v33  ;;  %v15097_v33 = vld [vmem:[#allocation26 + $0x6c] ss:$16 sps:$4 sm:$0xff]  }
 0x58f   : > { %v1640_v37 = vsel %vm1576_vm2, %v1639_v36, %v1630_v35  ;;  %17604 = vst [vmem:[#allocation66_spill] sm:$0xff] %v15097_v33 }
 0x590   : > { %v1642_v38 = vsel %vm17536_vm3, %v1640_v37, 0.0 }
 0x591   : > { %1643 = vadd.xlane.f32.xlu1 %v1642_v38 }
 0x5e1   : > { %v15101_v35 = vpop.f32.mrb[0].mxu1 }
 0x5e2   : > { %v15103_v36 = vpop.f32.mrb[1].mxu1 }
 0x5e3   : > { %v1446_v38 = vpop.f32.mrb[2].mxu1 }
 0x5e4   : > { %v15128_v38 = vld [vmem:[#allocation26 + $0x20] ss:$16 sps:$4 sm:$0xff]  }
 0x61e   : > { %v1644_v62 = vpop.xlane.xlu1 %1643 }
 0x61f   : > { %v1649_v63 = vrot.slane %v1644_v62, %v14960_v16  ;;  %v1653_v5 = vrot.slane %v1644_v62, %v14993_v60 }
 0x621   : > { %13567 = vrcp.f32 %v1649_v63 }
 0x622   : > { %13569 = vrcp.f32 %v1653_v5  ;;  %v1447_v5 = vpop.f32.mrb[3].mxu1 }
 0x623   : > { %v15138_v5 = vld [vmem:[#allocation26 + $0x64] ss:$16 sps:$4 sm:$0xff]  }
 0x62b   : > { %v13568_v7 = vpop.eup %13567 }
 0x62c   : > { %v15056_v10 = vmul.f32 %v13568_v7, %v13560_v18  ;;  %v15058_v11 = vmul.f32 %v13568_v7, %v13562_v19  ;;  %v13570_v12 = vpop.eup %13569 }
 0x62d   : > { %v15062_v15 = vmul.f32 %v13570_v12, %v13564_v22  ;;  %v15064_v41 = vmul.f32 %v13570_v12, %v13566_v25  ;;  %v15079_v25 = vld [vmem:[#allocation26 + $0xc] ss:$16 sps:$4 sm:$0xff]   ;;  %v15110_v12 = vcombine.low %v14913_v2, %v14915_v3  ;;  %v15122_v3 = vld [vmem:[#allocation26] ss:$16 sps:$4 sm:$0xff]  }
 0x62e   : > { %17597 = vst [vmem:[#allocation59_spill] sm:$0xff] %v15056_v10  ;;  %17598 = vst [vmem:[#allocation60_spill] sm:$0xff] %v15058_v11  ;;  %v1662_v13 = vpack.c.bf16 %v15058_v11, %v15056_v10  ;;  %2056 = vmatprep.subr.bf16.mxu0 %v15079_v25  ;;  %v15177_v11 = vld [vmem:[#allocation26 + $0xc8] ss:$16 sps:$4 sm:$0xff]   ;;  %v15181_v10 = vld [vmem:[#allocation26 + $0xe4] ss:$16 sps:$4 sm:$0xff]  }
 0x62f   : > { %17599 = vst [vmem:[#allocation61_spill] sm:$0xff] %v15062_v15  ;;  %17600 = vst [vmem:[#allocation62_spill] sm:$0xff] %v15064_v41  ;;  %v1663_v19 = vpack.c.bf16 %v15064_v41, %v15062_v15  ;;  %2057 = vmatpush1.bf16.msra.mxu0 %v15077_v1  ;;  %v15170_v41 = vld [vmem:[#allocation26 + $0xc0] ss:$16 sps:$4 sm:$0xff]   ;;  %v15174_v15 = vld [vmem:[#allocation26 + $0xcc] ss:$16 sps:$4 sm:$0xff]  }
 0x630   : > { %v1665_v14 = vunpack.c.l.b16 %v1662_v13  ;;  %v1666_v18 = vunpack.c.h.b16 %v1662_v13  ;;  %2058 = vmatprep.subr.bf16.mxu0 %v15085_v29  ;;  %17605 = vst [vmem:[#allocation67_spill] sm:$0xff] %v15110_v12  ;;  %17615 = vst [vmem:[#allocation77_spill] sm:$0xff] %v15170_v41 }
 0x631   : > { %v1734_v22 = vunpack.c.l.b16 %v1663_v19  ;;  %v1735_v0 = vunpack.c.h.b16 %v1663_v19  ;;  %17616 = vst [vmem:[#allocation78_spill] sm:$0xff] %v15174_v15  ;;  %17617 = vst [vmem:[#allocation79_spill] sm:$0xff] %v15177_v11 }
 0x632   : > { %1668 = vperm.xlu0 %12923, %v1665_v14   ;;  %17618 = vst [vmem:[#allocation80_spill] sm:$0xff] %v15181_v10 }
 0x633   : > { %2059 = vmatpush1.bf16.msra.mxu0 %v15083_v28 }
 0x634   : > { %2060 = vmatprep.subr.bf16.mxu0 %v15091_v31  ;;  %v15201_v31 = vld [vmem:[#allocation24] ss:$16 sps:$4 sm:$0xff]  }
 0x636   : > { %1671 = vperm.xlu0 %12923, %v1666_v18   ;;  %v15112_v18 = vld [vmem:[#allocation26 + $0x4] ss:$16 sps:$4 sm:$0xff]  }
 0x637   : > { %2061 = vmatpush1.bf16.msra.mxu0 %v15089_v30 }
 0x638   : > { %2062 = vmatprep.subr.bf16.mxu0 %v15097_v33 }
 0x63a   : > { %1737 = vperm.xlu0 %12923, %v1734_v22  }
 0x63b   : > { %2063 = vmatpush1.bf16.msra.mxu0 %v15095_v32 }
 0x63e   : > { %1740 = vperm.xlu0 %12923, %v1735_v0  }
 0x6b1   : > { %v1669_v34 = vpop.permute.xlu0 %1668 }
 0x6b2   : > { %v1676_v62 = vrot.slane %v1669_v34, %v14982_v47 }
 0x6b5   : > { %v1672_v37 = vpop.permute.xlu0 %1671 }
 0x6b6   : > { %v1680_v63 = vrot.slane %v1672_v37, %v14979_v45  ;;  %v15124_v37 = vld [vmem:[#allocation26 + $0x24] ss:$16 sps:$4 sm:$0xff]  }
 0x6b8   : > { %v1681_v7 = vsel %vm1565_vm1, %v1680_v63, %v1676_v62  ;;  %v15132_v62 = vld [vmem:[#allocation26 + $0x44] ss:$16 sps:$4 sm:$0xff]   ;;  %v15135_v63 = vld [vmem:[#allocation26 + $0x40] ss:$16 sps:$4 sm:$0xff]  }
 0x6b9   : > { %v1682_v13 = vpack.c.b16 %v1681_v7, %v1681_v7  ;;  %v1738_v14 = vpop.permute.xlu0 %1737  ;;  %v15141_v7 = vld [vmem:[#allocation26 + $0x60] ss:$16 sps:$4 sm:$0xff]  }
 0x6ba   : > { %v1745_v22 = vrot.slane %v1738_v14, %v14982_v47  ;;  %v15147_v14 = vld [vmem:[#allocation26 + $0x80] ss:$16 sps:$4 sm:$0xff]  }
 0x6bb   : > { %12507 = vmatmul.mubr.msk.bf16.vlgmr.msra.gmra.mrb[4].mxu1 %vm1689_vm5, %v1682_v13  ;;  %v15144_v13 = vld [vmem:[#allocation26 + $0x84] ss:$16 sps:$4 sm:$0xff]   ;;  %17607 = vst [vmem:[#allocation69_spill] sm:$0xff] %v15147_v14 }
 0x6bc   : > { %12511 = vmatpush3.bf16.msra.mxu1 %v15110_v12  ;;  %12512 = vmatprep.mubr.msk.bf16.mxu1 %vm14371_vm4, %v17351_v27  ;;  %17606 = vst [vmem:[#allocation68_spill] sm:$0xff] %v15144_v13  ;;  %v15163_v27 = vld [vmem:[#allocation26 + $0xac] ss:$16 sps:$4 sm:$0xff]  }
 0x6bd   : > { %v1741_v19 = vpop.permute.xlu0 %1740  ;;  %2015 = vmatprep.subr.bf16.mxu1 %v15112_v18  ;;  %17613 = vst [vmem:[#allocation75_spill] sm:$0xff] %v15163_v27 }
 0x6be   : > { %v1749_v0 = vrot.slane %v1741_v19, %v14979_v45  ;;  %v15151_v19 = vld [vmem:[#allocation26 + $0x88] ss:$16 sps:$4 sm:$0xff]  }
 0x6bf   : > { %17608 = vst [vmem:[#allocation70_spill] sm:$0xff] %v15151_v19 }
 0x6c0   : > { %v1750_v2 = vsel %vm1565_vm1, %v1749_v0, %v1745_v22  ;;  %v15153_v22 = vld [vmem:[#allocation26 + $0x8c] ss:$16 sps:$4 sm:$0xff]   ;;  %v15157_v0 = vld [vmem:[#allocation26 + $0xa0] ss:$16 sps:$4 sm:$0xff]  }
 0x6c1   : > { %v1751_v34 = vpack.c.b16 %v1750_v2, %v1750_v2  ;;  %17609 = vst [vmem:[#allocation71_spill] sm:$0xff] %v15153_v22  ;;  %2064 = vmatprep.subr.bf16.mxu0 %v15153_v22  ;;  %17610 = vst [vmem:[#allocation72_spill] sm:$0xff] %v15157_v0  ;;  %v15159_v2 = vld [vmem:[#allocation26 + $0xa4] ss:$16 sps:$4 sm:$0xff]   ;;  %v15187_v22 = vld [vmem:[#allocation26 + $0xe8] ss:$16 sps:$4 sm:$0xff]  }
 0x6c2   : > { %2065 = vmatpush1.bf16.msra.mxu0 %v15151_v19  ;;  %17611 = vst [vmem:[#allocation73_spill] sm:$0xff] %v15159_v2  ;;  %v15183_v19 = vld [vmem:[#allocation26 + $0xec] ss:$16 sps:$4 sm:$0xff]   ;;  %17621 = vst [vmem:[#allocation83_spill] sm:$0xff] %v15187_v22 }
 0x6c3   : > { %12513 = vmatmul.mubr.msk.bf16.vlgmr.msra.gmra.mrb[8].mxu1 %vm1689_vm5, %v1751_v34  ;;  %v15161_v34 = vld [vmem:[#allocation26 + $0xa8] ss:$16 sps:$4 sm:$0xff]   ;;  %2066 = vmatprep.subr.bf16.mxu0 %v15163_v27  ;;  %17619 = vst [vmem:[#allocation81_spill] sm:$0xff] %v15183_v19  ;;  %v15185_v27 = vld [vmem:[#allocation26 + $0xe0] ss:$16 sps:$4 sm:$0xff]  }
 0x6c4   : > { %2016 = vmatpush1.bf16.msra.mxu1 %v15122_v3  ;;  %2047 = vmatprep.mubr.bf16.mxu1 %v17353_v23  ;;  %17612 = vst [vmem:[#allocation74_spill] sm:$0xff] %v15161_v34  ;;  %v15165_v23 = vld [vmem:[#allocation26 + $0xc4] ss:$16 sps:$4 sm:$0xff]   ;;  %17620 = vst [vmem:[#allocation82_spill] sm:$0xff] %v15185_v27 }
 0x6c5   : > { %2017 = vmatprep.subr.bf16.mxu1 %v15124_v37  ;;  %17614 = vst [vmem:[#allocation76_spill] sm:$0xff] %v15165_v23 }
 0x6c6   : > { %2067 = vmatpush1.bf16.msra.mxu0 %v15161_v34  ;;  %v15191_v34 = vld [vmem:[#allocation24 + $0x4] ss:$16 sps:$4 sm:$0xff]  }
 0x6c7   : > { %2068 = vmatprep.subr.bf16.mxu0 %v15174_v15  ;;  %17622 = vst [vmem:[#allocation84_spill] sm:$0xff] %v15191_v34 }
 0x6c8   : > { %2018 = vmatpush1.bf16.msra.mxu1 %v15128_v38 }
 0x6c9   : > { %2019 = vmatprep.subr.bf16.mxu1 %v15132_v62 }
 0x6ca   : > { %2069 = vmatpush1.bf16.msra.mxu0 %v15177_v11  ;;  %v1100_v11 = vrot.slane %v14949_v6, %v14960_v16 }
 0x6cb   : > { %2070 = vmatprep.subr.bf16.mxu0 %v15183_v19 }
 0x6cc   : > { %2020 = vmatpush1.bf16.msra.mxu1 %v15135_v63  ;;  %v1402_v15 = vadd.f32 %v14940_v56, %v1100_v11  ;;  %v15203_v11 = vld [vmem:[#allocation24 + $0x24] ss:$16 sps:$4 sm:$0xff]  }
 0x6cd   : > { %2021 = vmatprep.subr.bf16.mxu1 %v15138_v5 }
 0x6ce   : > { %2071 = vmatpush1.bf16.msra.mxu0 %v15187_v22 }
 0x6cf   : > { %2664 = vmatprep.subr.bf16.mxu0 %v15005_v39 }
 0x6d0   : > { %2022 = vmatpush1.bf16.msra.mxu1 %v15141_v7 }
 0x6d1   : > { %2023 = vmatprep.subr.bf16.mxu1 %v15144_v13 }
 0x6d4   : > { %2024 = vmatpush1.bf16.msra.mxu1 %v15147_v14 }
 0x6d5   : > { %2025 = vmatprep.subr.bf16.mxu1 %v15159_v2 }
 0x6d8   : > { %2026 = vmatpush1.bf16.msra.mxu1 %v15157_v0 }
 0x6d9   : > { %2027 = vmatprep.subr.bf16.mxu1 %v15165_v23 }
 0x6dc   : > { %2028 = vmatpush1.bf16.msra.mxu1 %v15170_v41  ;;  %v11666_v41 = vmul.f32 -1.442695, %v1402_v15  ;;  %v15210_v15 = vld [vmem:[#allocation24 + $0xc] ss:$16 sps:$4 sm:$0xff]  }
 0x6dd   : > { %2029 = vmatprep.subr.bf16.mxu1 %v15181_v10 }
 0x6de   : > { %13571 = vpow2.f32 %v11666_v41  ;;  %v1813_v41 = vld [vmem:[%s14878_s4] sm:$0x1] }
 0x6e0   : > { %2030 = vmatpush1.bf16.msra.mxu1 %v15185_v27 }
 0x6e1   : > { %2141 = vmatprep.subr.bf16.mxu1 %v15191_v34 }
 0x6e8   : > { %v13572_v10 = vpop.eup %13571 }
 0x6e9   : > { %v1804_v23 = vadd.f32 1.0, %v13572_v10  ;;  %v17623_v10 = vmov 0  }
 0x6eb   : > { %13573 = vrcp.f32 %v1804_v23  ;;  %v15206_v23 = vld [vmem:[#allocation24 + $0x20] ss:$16 sps:$4 sm:$0xff]  }
 0x6f5   : > { %v13574_v14 = vpop.eup %13573 }
 0x78e   : > { %v1727_v19 = vpop.f32.mrb[4].mxu1 }
 0x78f   : > { %v12508_v0 = vpop.f32.mrb[5].mxu1 }
 0x790   : > { %v1730_v32 = vpop.f32.mrb[6].mxu1 }
 0x791   : > { %v12509_v27 = vpop.f32.mrb[7].mxu1  ;;  %v15269_v32 = vld [vmem:[#allocation20 + $0x120] ss:$24 sps:$4 sm:$0xff]  }
 0x792   : > { %v15220_v27 = vld [vmem:[#allocation24 + $0x8] ss:$16 sps:$4 sm:$0xff]   ;;  %17627 = vst [vmem:[#allocation86_spill] sm:$0xff] %v15269_v32 }
 0x796   : > { %v1795_v2 = vpop.f32.mrb[8].mxu1 }
 0x797   : > { %v1809_v22 = vrot.slane %v1795_v2, 7  ;;  %v12514_v33 = vpop.f32.mrb[9].mxu1 }
 0x798   : > { %v1798_v34 = vpop.f32.mrb[10].mxu1  ;;  %v15272_v33 = vld [vmem:[#allocation20 + $0x154] ss:$24 sps:$4 sm:$0xff]  }
 0x799   : > { %v1810_v39 = vsel %vm1576_vm2, %v1809_v22, %v1727_v19  ;;  %v12515_v30 = vpop.f32.mrb[11].mxu1  ;;  %17628 = vst [vmem:[#allocation87_spill] sm:$0xff] %v15272_v33  ;;  %v15278_v19 = vld [vmem:[#allocation20 + $0x14] ss:$24 sps:$4 sm:$0xff]   ;;  %v17631_v22 = vmov 0 }
 0x79a   : > { %v1812_v13 = vmul.f32 %v13574_v14, %v1810_v39  ;;  %v15222_v30 = vld [vmem:[#allocation24 + $0x2c] ss:$16 sps:$4 sm:$0xff]   ;;  %v1044_v14 = vstv %s1043_s1  ;;  %17630 = vst [vmem:[#allocation89_spill] sm:$0xff] %v15278_v19  ;;  %s6016_s1 = sld [smem:[#allocation8 + %s6015_s24]] }
 0x79b   : > { %vm15281_vm7 = vcmp.lt.s32.totalorder %v14944_v61, %v1044_v14 }
 0x79c   : > { %v1822_v56 = vpack.c.bf16 %v1812_v13, %v1812_v13  ;;  %v15275_v13 = vld [vmem:[#allocation20 + $0x150] ss:$24 sps:$4 sm:$0xff]   ;;  %v17632_v22 = vsel %vm15281_vm7, 4294967295, %v17631_v22 }
 0x79d   : > { %17629 = vst [vmem:[#allocation88_spill] sm:$0xff] %v15275_v13  ;;  %17633 = vst [vmem:[#allocation90_spill] sm:$0xff] %v17632_v22 }
 0x79e   : > { %2048 = vmatmul.mubr.bf16.vlgmr.msra.gmra.mrb[12].mxu1 %v1822_v56  ;;  %2089 = vmatmul.mubr.bf16.vlgmr.msra.gmra.mrb[8].mxu0 %v1822_v56 }
 0x79f   : > { %2142 = vmatpush1.bf16.msra.mxu1 %v15201_v31  ;;  %2173 = vmatprep.mubr.bf16.mxu1 %v17623_v10 }
 0x7a0   : > { %2143 = vmatprep.subr.bf16.mxu1 %v15203_v11  ;;  %2665 = vmatpush1.bf16.msra.mxu0 %v15007_v40  ;;  %v15228_v40 = vld [vmem:[#allocation24 + $0x28] ss:$16 sps:$4 sm:$0xff]  }
 0x7a1   : > { %2666 = vmatprep.subr.bf16.mxu0 %v15009_v42  ;;  %2696 = vmatprep.mubr.bf16.mxu0 %v17623_v10  ;;  %v13815_v42 = vld [vmem:[#allocation20 + $0x4] ss:$24 sps:$4 sm:$0xff]  }
 0x7a3   : > { %2144 = vmatpush1.bf16.msra.mxu1 %v15206_v23 }
 0x7a4   : > { %2182 = vmatprep.subr.bf16.mxu1 %v15210_v15  ;;  %2667 = vmatpush1.bf16.msra.mxu0 %v15013_v43  ;;  %v13816_v43 = vld [vmem:[#allocation20] ss:$24 sps:$4 sm:$0xff]  }
 0x7a5   : > { %2668 = vmatprep.subr.bf16.mxu0 %v15016_v44  ;;  %v13817_v44 = vld [vmem:[#allocation20 + $0x34] ss:$24 sps:$4 sm:$0xff]  }
 0x7a8   : > { %2669 = vmatpush1.bf16.msra.mxu0 %v15019_v46  ;;  %v13818_v46 = vld [vmem:[#allocation20 + $0x30] ss:$24 sps:$4 sm:$0xff]  }
 0x7a9   : > { %2670 = vmatprep.subr.bf16.mxu0 %v15022_v48  ;;  %v13819_v48 = vld [vmem:[#allocation20 + $0x64] ss:$24 sps:$4 sm:$0xff]  }
 0x7aa   : > { %11707 = vmatmul.mubr.msk.bf16.vlgmr.msra.gmra.mrb[12].mxu1 %vm17535_vm6, %v1813_v41 }
 0x7ab   : > { %2183 = vmatpush1.bf16.msra.mxu1 %v15220_v27  ;;  %2214 = vmatprep.mubr.bf16.mxu1 %v17623_v10 }
 0x7ac   : > { %2184 = vmatprep.subr.bf16.mxu1 %v15222_v30  ;;  %2671 = vmatpush1.bf16.msra.mxu0 %v15025_v49  ;;  %v13820_v49 = vld [vmem:[#allocation20 + $0x60] ss:$24 sps:$4 sm:$0xff]  }
 0x7ad   : > { %2672 = vmatprep.subr.bf16.mxu0 %v15028_v50  ;;  %v17625_v50 = vmov 0.0  }
 0x7ae   : > { %v11712_v0 = vsel %vm15281_vm7, 1.0, %v17625_v50 }
 0x7af   : > { %2185 = vmatpush1.bf16.msra.mxu1 %v15228_v40  ;;  %2256 = vst.msk [vmem:[#allocation6] sm:$0x3] %vm2255_vm8, %v11712_v0 }
 0x7b0   : > { %2623 = vmatprep.subr.bf16.mxu1 %v13815_v42  ;;  %2673 = vmatpush1.bf16.msra.mxu0 %v15031_v51  ;;  %v15245_v51 = vld [vmem:[#allocation20 + $0x94] ss:$24 sps:$4 sm:$0xff]   ;;  %v1104_v42 = vrot.slane %v14949_v6, %v14993_v60 }
 0x7b1   : > { %2674 = vmatprep.subr.bf16.mxu0 %v15034_v52  ;;  %v15247_v52 = vld [vmem:[#allocation20 + $0x90] ss:$24 sps:$4 sm:$0xff]  }
 0x7b2   : > { %11708 = vmatmul.mubr.msk.bf16.vlgmr.msra.gmra.mrb[16].mxu1 %vm17535_vm6, %v1813_v41  ;;  %v15292_v41 = vsub.s32 2, %v14944_v61 }
 0x7b3   : > { %2624 = vmatpush1.bf16.msra.mxu1 %v13816_v43  ;;  %2655 = vmatprep.mubr.bf16.mxu1 %v17623_v10 }
 0x7b4   : > { %2625 = vmatprep.subr.bf16.mxu1 %v13817_v44  ;;  %2675 = vmatpush1.bf16.msra.mxu0 %v15037_v53  ;;  %v15251_v53 = vld [vmem:[#allocation20 + $0xc0] ss:$24 sps:$4 sm:$0xff]   ;;  %17634 = vst [vmem:[#allocation91_spill] sm:$0xff] %v15292_v41  ;;  %v1108_v43 = vrot.slane %v14949_v6, %v15292_v41  ;;  %v1404_v44 = vadd.f32 %v14942_v57, %v1104_v42 }
 0x7b5   : > { %2676 = vmatprep.subr.bf16.mxu0 %v15040_v54  ;;  %v15253_v54 = vld [vmem:[#allocation20 + $0xc4] ss:$24 sps:$4 sm:$0xff]  }
 0x7b7   : > { %2626 = vmatpush1.bf16.msra.mxu1 %v13818_v46  ;;  %v1443_v46 = vadd.f32 %v15101_v35, %v1108_v43 }
 0x7b8   : > { %2627 = vmatprep.subr.bf16.mxu1 %v13819_v48  ;;  %2677 = vmatpush1.bf16.msra.mxu0 %v15043_v55  ;;  %v15258_v55 = vld [vmem:[#allocation20 + $0xf4] ss:$24 sps:$4 sm:$0xff]  }
 0x7b9   : > { %2678 = vmatprep.subr.bf16.mxu0 %v15046_v58  ;;  %v15262_v58 = vld [vmem:[#allocation20 + $0xf0] ss:$24 sps:$4 sm:$0xff]  }
 0x7bb   : > { %2628 = vmatpush1.bf16.msra.mxu1 %v13820_v49  ;;  %v15301_v49 = vsub.s32 3, %v14944_v61 }
 0x7bc   : > { %2679 = vmatpush1.bf16.msra.mxu0 %v15049_v59  ;;  %2629 = vmatprep.subr.bf16.mxu1 %v15245_v51  ;;  %v15266_v59 = vld [vmem:[#allocation20 + $0x124] ss:$24 sps:$4 sm:$0xff]  }
 0x7bd   : > { %12522 = vmatprep.subr.bf16.mxu0 %v17625_v50  ;;  %17626 = vst [vmem:[#allocation85_spill] sm:$0xff] %v15266_v59  ;;  %17635 = vst [vmem:[#allocation92_spill] sm:$0xff] %v15301_v49  ;;  %v1112_v41 = vrot.slane %v14949_v6, %v15301_v49 }
 0x7bf   : > { %2630 = vmatpush1.bf16.msra.mxu1 %v15247_v52  ;;  %v1445_v42 = vadd.f32 %v15103_v36, %v1112_v41 }
 0x7c0   : > { %2631 = vmatprep.subr.bf16.mxu1 %v15253_v54 }
 0x7c3   : > { %2632 = vmatpush1.bf16.msra.mxu1 %v15251_v53 }
 0x7c4   : > { %2633 = vmatprep.subr.bf16.mxu1 %v15258_v55 }
 0x7c7   : > { %2634 = vmatpush1.bf16.msra.mxu1 %v15262_v58 }
 0x7c8   : > { %2635 = vmatprep.subr.bf16.mxu1 %v15266_v59 }
 0x7cb   : > { %2636 = vmatpush1.bf16.msra.mxu1 %v15269_v32 }
 0x7cc   : > { %2637 = vmatprep.subr.bf16.mxu1 %v15272_v33 }
 0x7cf   : > { %2638 = vmatpush1.bf16.msra.mxu1 %v15275_v13 }
 0x7d0   : > { %2705 = vmatprep.subr.bf16.mxu1 %v15278_v19 }
 0x871   : > { %v2090_v2 = vpop.f32.mrb[8].mxu0 }
 0x872   : > { %v2092_v34 = vpop.f32.mrb[9].mxu0 }
 0x873   : > { %v2094_v39 = vpop.f32.mrb[10].mxu0 }
 0x874   : > { %v2095_v56 = vpop.f32.mrb[11].mxu0  ;;  %v15304_v39 = vsub.s32 4, %v14944_v61 }
 0x876   : > { %17636 = vst [vmem:[#allocation93_spill] sm:$0xff] %v15304_v39  ;;  %v1116_v57 = vrot.slane %v14949_v6, %v15304_v39 }
 0x87d   : > { %v2175_v48 = vpop.f32.mrb[12].mxu1 }
 0x87e   : > { %v2223_v14 = vadd.f32 %v2175_v48, %v1404_v44  ;;  %v2177_v0 = vpop.f32.mrb[13].mxu1  ;;  %v1484_v48 = vadd.f32 %v14953_v8, %v1116_v57 }
 0x87f   : > { %v2224_v56 = vadd.f32 %v2177_v0, %v1443_v46  ;;  %v2179_v19 = vpop.f32.mrb[14].mxu1 }
 0x880   : > { %v11709_v13 = vmul.f32 -1.442695, %v2223_v14  ;;  %v2180_v33 = vpop.f32.mrb[15].mxu1 }
 0x881   : > { %v11710_v32 = vmul.f32 -1.442695, %v2224_v56 }
 0x882   : > { %13575 = vpow2.f32 %v11709_v13 }
 0x883   : > { %13577 = vpow2.f32 %v11710_v32  ;;  %v15312_v32 = vld [vmem:[#allocation3] sm:$0x3] }
 0x885   : > { %v2216_v35 = vpop.f32.mrb[16].mxu1 }
 0x886   : > { %v2217_v43 = vadd.f32 %v2216_v35, %v2090_v2  ;;  %v2218_v44 = vpop.f32.mrb[17].mxu1 }
 0x887   : > { %v2219_v46 = vadd.f32 %v2218_v44, %v2092_v34  ;;  %v2220_v19 = vpop.f32.mrb[18].mxu1  ;;  %v13821_v44 = vld [vmem:[#allocation2] sm:$0x3] }
 0x888   : > { %v2225_v14 = vadd.f32 %v2217_v43, %v1445_v42  ;;  %v2221_v33 = vpop.f32.mrb[19].mxu1  ;;  %v15318_v43 = vld [vmem:[#allocation20 + $0x10] ss:$24 sps:$4 sm:$0xff]   ;;  %v15326_v19 = vld [vmem:[#allocation20 + $0x44] ss:$24 sps:$4 sm:$0xff]  }
 0x889   : > { %v2226_v0 = vadd.f32 %v2219_v46, %v1484_v48  ;;  %v15333_v33 = vld [vmem:[#allocation20 + $0x74] ss:$24 sps:$4 sm:$0xff]  }
 0x88a   : > { %17638 = vst [vmem:[#allocation95_spill] sm:$0xff] %v15333_v33 }
 0x88b   : > { %v11711_v56 = vmul.f32 -1.442695, %v2226_v0  ;;  %v15340_v0 = vld [vmem:[#allocation20 + $0x70] ss:$24 sps:$4 sm:$0xff]  }
 0x88c   : > { %v13576_v61 = vpop.eup %13575  ;;  %17639 = vst [vmem:[#allocation96_spill] sm:$0xff] %v15340_v0 }
 0x88d   : > { %v13578_v49 = vpop.eup %13577  ;;  %v2230_v13 = vadd.f32 1.0, %v13576_v61  ;;  %13579 = vpow2.f32 %v11711_v56  ;;  %v15343_v56 = vld [vmem:[#allocation20 + $0xa4] ss:$24 sps:$4 sm:$0xff]  }
 0x88e   : > { %v2236_v59 = vadd.f32 1.0, %v13578_v49  ;;  %13581 = vtanh.f32 %v2225_v14  ;;  %v15329_v14 = vld [vmem:[#allocation20 + $0x40] ss:$24 sps:$4 sm:$0xff]   ;;  %17640 = vst [vmem:[#allocation97_spill] sm:$0xff] %v15343_v56 }
 0x88f   : > { %13583 = vrcp.f32 %v2230_v13  ;;  %17637 = vst [vmem:[#allocation94_spill] sm:$0xff] %v15329_v14  ;;  %v15346_v13 = vld [vmem:[#allocation20 + $0xa0] ss:$24 sps:$4 sm:$0xff]  }
 0x890   : > { %13585 = vrcp.f32 %v2236_v59  ;;  %17641 = vst [vmem:[#allocation98_spill] sm:$0xff] %v15346_v13 }
 0x897   : > { %v13580_v6 = vpop.eup %13579 }
 0x898   : > { %v13582_v36 = vpop.eup %13581  ;;  %v2243_v41 = vadd.f32 1.0, %v13580_v6  ;;  %v15349_v6 = vld [vmem:[#allocation20 + $0xd4] ss:$24 sps:$4 sm:$0xff]  }
 0x899   : > { %v13584_v2 = vpop.eup %13583  ;;  %17642 = vst [vmem:[#allocation99_spill] sm:$0xff] %v15349_v6 }
 0x89a   : > { %v13586_v8 = vpop.eup %13585  ;;  %v2247_v34 = vmul.f32 %v13584_v2, %v13582_v36  ;;  %13587 = vrcp.f32 %v2243_v41  ;;  %v15352_v36 = vld [vmem:[#allocation20 + $0xd0] ss:$24 sps:$4 sm:$0xff]   ;;  %v15358_v2 = vld [vmem:[#allocation20 + $0x100] ss:$24 sps:$4 sm:$0xff]   ;;  %v15367_v41 = vld [vmem:[#allocation20 + $0x164] ss:$24 sps:$4 sm:$0xff]  }
 0x89b   : > { %v2246_v57 = vmul.f32 %v13586_v8, %v15312_v32  ;;  %17643 = vst [vmem:[#allocation100_spill] sm:$0xff] %v15352_v36  ;;  %17645 = vst [vmem:[#allocation102_spill] sm:$0xff] %v15358_v2  ;;  %v15361_v8 = vld [vmem:[#allocation20 + $0x134] ss:$24 sps:$4 sm:$0xff]  }
 0x89c   : > { %17646 = vst [vmem:[#allocation103_spill] sm:$0xff] %v15361_v8  ;;  %17648 = vst [vmem:[#allocation105_spill] sm:$0xff] %v15367_v41 }
 0x89d   : > { %v15315_v35 = vadd.f32 %v2247_v34, %v2246_v57  ;;  %v15364_v34 = vld [vmem:[#allocation20 + $0x130] ss:$24 sps:$4 sm:$0xff]   ;;  %v15370_v57 = vld [vmem:[#allocation20 + $0x160] ss:$24 sps:$4 sm:$0xff]  }
 0x89e   : > { %17647 = vst [vmem:[#allocation104_spill] sm:$0xff] %v15364_v34  ;;  %17649 = vst [vmem:[#allocation106_spill] sm:$0xff] %v15370_v57 }
 0x89f   : > { %13589 = vtanh.f32 %v15315_v35 }
 0x8a4   : > { %v13588_v61 = vpop.eup %13587 }
 0x8a9   : > { %v13590_v49 = vpop.eup %13589 }
 0x8aa   : > { %v2250_v42 = vmul.f32 %v13590_v49, %v13588_v61 }
 0x8ac   : > { %v2251_v59 = vpack.c.bf16 %v2250_v42, %v2250_v42  ;;  %v15322_v48 = vsel %vm15281_vm7, %v2250_v42, %v13821_v44 }
 0x8ad   : > { %v2302_v46 = vpack.c.bf16 %v15322_v48, %v15322_v48 }
 0x8ae   : > { %2252 = vst [vmem:[#allocation5] sm:$0x1] %v2251_v59 }
 0x8af   : > { %2656 = vmatmul.mubr.bf16.vlgmr.msra.gmra.mrb[20].mxu1 %v2302_v46  ;;  %2697 = vmatmul.mubr.bf16.vlgmr.msra.gmra.mrb[12].mxu0 %v2302_v46 }
 0x8b0   : > { %2706 = vmatpush1.bf16.msra.mxu1 %v15318_v43  ;;  %2737 = vmatprep.mubr.bf16.mxu1 %v17623_v10 }
 0x8b1   : > { %2707 = vmatprep.subr.bf16.mxu1 %v15326_v19  ;;  %12523 = vmatpush3.bf16.msra.mxu0 %v15110_v12 }
 0x8b2   : > { %12524 = vmatprep.mubr.msk.bf16.mxu0 %vm14371_vm4, %v17625_v50  ;;  %3253 = vmatprep.subr.bf16.mxu0 %v15112_v18  ;;  %v15355_v18 = vld [vmem:[#allocation20 + $0x104] ss:$24 sps:$4 sm:$0xff]  }
 0x8b3   : > { %17644 = vst [vmem:[#allocation101_spill] sm:$0xff] %v15355_v18 }
 0x8b4   : > { %2708 = vmatpush1.bf16.msra.mxu1 %v15329_v14 }
 0x8b5   : > { %2709 = vmatprep.subr.bf16.mxu1 %v15333_v33 }
 0x8b8   : > { %2710 = vmatpush1.bf16.msra.mxu1 %v15340_v0  ;;  %v15400_v0 = vld [vmem:[#allocation23] ss:$0 sm:$0xff] }
 0x8b9   : > { %2711 = vmatprep.subr.bf16.mxu1 %v15343_v56  ;;  %17650 = vst [vmem:[#allocation107_spill] sm:$0xff] %v15400_v0 }
 0x8bc   : > { %2712 = vmatpush1.bf16.msra.mxu1 %v15346_v13 }
 0x8bd   : > { %2713 = vmatprep.subr.bf16.mxu1 %v15349_v6 }
 0x8c0   : > { %2714 = vmatpush1.bf16.msra.mxu1 %v15352_v36 }
 0x8c1   : > { %2715 = vmatprep.subr.bf16.mxu1 %v15355_v18 }
 0x8c4   : > { %2716 = vmatpush1.bf16.msra.mxu1 %v15358_v2 }
 0x8c5   : > { %2717 = vmatprep.subr.bf16.mxu1 %v15361_v8 }
 0x8c8   : > { %2718 = vmatpush1.bf16.msra.mxu1 %v15364_v34 }
 0x8c9   : > { %2719 = vmatprep.subr.bf16.mxu1 %v15367_v41 }
 0x8cc   : > { %2720 = vmatpush1.bf16.msra.mxu1 %v15370_v57 }
 0x8cd   : > { %12516 = vmatprep.subr.bf16.mxu1 %v17625_v50 }
 0x8cf   : > { %2738 = vmatmul.mubr.bf16.vlgmr.msra.gmra.mrb[24].mxu1 %v2302_v46  ;;  %v15387_v46 = vld [vmem:[#allocation21] sm:$0x3f] }
 0x8d0   : > { %12517 = vmatpush3.bf16.msra.mxu1 %v15068_v17  ;;  %12518 = vmatprep.mubr.msk.bf16.mxu1 %vm14371_vm4, %v17625_v50  ;;  %v2376_v34 = vrot.slane %v15387_v46, %v14947_v4 }
 0x8d1   : > { %3294 = vmatprep.subr.bf16.mxu1 %v15079_v25 }
 0x982   : > { %v15379_v61 = vpop.f32.mrb[20].mxu1  ;;  %v15381_v49 = vpop.f32.mrb[12].mxu0 }
 0x983   : > { %v15383_v42 = vpop.f32.mrb[21].mxu1  ;;  %v15385_v59 = vpop.f32.mrb[13].mxu0 }
 0x984   : > { %v2661_v44 = vpop.f32.mrb[22].mxu1  ;;  %v2702_v12 = vpop.f32.mrb[14].mxu0 }
 0x985   : > { %v2662_v57 = vpop.f32.mrb[23].mxu1  ;;  %v2703_v41 = vpop.f32.mrb[15].mxu0 }
 0x9a2   : > { %v15391_v8 = vpop.f32.mrb[24].mxu1 }
 0x9a3   : > { %v2741_v25 = vpop.f32.mrb[25].mxu1 }
 0x9a4   : > { %v2742_v2 = vadd.f32 %v2741_v25, %v2376_v34  ;;  %v2743_v18 = vpop.f32.mrb[26].mxu1 }
 0x9a5   : > { %v2744_v36 = vpop.f32.mrb[27].mxu1 }
 0x9a6   : > { %v2753_v6 = vrot.slane %v2742_v2, %v14956_v9 }
 0x9a8   : > { %v2754_v13 = vcombine.high %v2753_v6, %v2753_v6  ;;  %v2761_v56 = vrot.slane %v2753_v6, %v14956_v9 }
 0x9aa   : > { %v2768_v12 = vrot.slane %v2754_v13, %v14956_v9  ;;  %v2772_v41 = vrot.slane %v2761_v56, %v14960_v16 }
 0x9ac   : > { %v2780_v57 = vadd.f32 %v2772_v41, %v14965_v21  ;;  %v2779_v44 = vadd.f32 %v2772_v41, %v14963_v20  ;;  %v2776_v4 = vrot.slane %v2768_v12, %v14960_v16 }
 0x9ae   : > { %v2784_v34 = vmax.f32 %v2780_v57, 0.0  ;;  %v2783_v18 = vmax.f32 %v2779_v44, 0.0  ;;  %v2781_v36 = vadd.f32 %v2776_v4, %v14968_v24  ;;  %v2782_v13 = vadd.f32 %v2776_v4, %v14971_v26 }
 0x9b0   : > { %v2795_v2 = vmul.f32 %v15400_v0, %v2784_v34  ;;  %v2794_v6 = vmul.f32 %v15400_v0, %v2783_v18  ;;  %v2785_v25 = vmax.f32 %v2781_v36, 0.0  ;;  %v2786_v41 = vmax.f32 %v2782_v13, 0.0 }
 0x9b2   : > { %2800 = vadd.xlane.f32.xlu0 %v2795_v2  ;;  %2798 = vadd.xlane.f32.xlu1 %v2794_v6  ;;  %v2796_v56 = vmul.f32 %v15400_v0, %v2785_v25  ;;  %v2797_v12 = vmul.f32 %v15400_v0, %v2786_v41 }
 0x9b6   : > { %2802 = vadd.xlane.f32.xlu1 %v2796_v56 }
 0x9ba   : > { %2804 = vadd.xlane.f32.xlu1 %v2797_v12 }
 0xa3f   : > { %v2799_v57 = vpop.xlane.xlu1 %2798  ;;  %v2801_v44 = vpop.xlane.xlu0 %2800 }
 0xa40   : > { %v2817_v24 = vrot.slane %v2801_v44, %v14979_v45  ;;  %v2813_v34 = vrot.slane %v2799_v57, %v14982_v47 }
 0xa42   : > { %v2818_v2 = vsel %vm1565_vm1, %v2817_v24, %v2813_v34 }
 0xa43   : > { %v2803_v20 = vpop.xlane.xlu1 %2802 }
 0xa44   : > { %v2822_v36 = vrot.slane %v2803_v20, %v14982_v47 }
 0xa47   : > { %v2805_v18 = vpop.xlane.xlu1 %2804 }
 0xa48   : > { %v2826_v4 = vrot.slane %v2805_v18, %v14979_v45 }
 0xa4a   : > { %v2827_v6 = vsel %vm1565_vm1, %v2826_v4, %v2822_v36 }
 0xa4b   : > { %v2828_v25 = vsel %vm1576_vm2, %v2827_v6, %v2818_v2 }
 0xa4c   : > { %v2830_v13 = vsel %vm17536_vm3, %v2828_v25, -inf }
 0xa4d   : > { %2831 = vmax.xlane.f32.xlu1 %v2830_v13 }
 0xada   : > { %v2832_v56 = vpop.xlane.xlu1 %2831 }
 0xadb   : > { %v2837_v41 = vrot.slane %v2832_v56, %v14960_v16  ;;  %v2841_v12 = vrot.slane %v2832_v56, %v14993_v60 }
 0xadd   : > { %v2844_v26 = vsub.f32 %v2799_v57, %v2837_v41  ;;  %v2845_v0 = vsub.f32 %v2801_v44, %v2837_v41  ;;  %v2846_v21 = vsub.f32 %v2803_v20, %v2841_v12  ;;  %v2847_v14 = vsub.f32 %v2805_v18, %v2841_v12 }
 0xadf   : > { %v2848_v9 = vmul.f32 1.442695, %v2844_v26  ;;  %v2852_v33 = vmul.f32 1.442695, %v2846_v21  ;;  %v2850_v24 = vmul.f32 1.442695, %v2845_v0 }
 0xae0   : > { %v2854_v34 = vmul.f32 1.442695, %v2847_v14 }
 0xae1   : > { %13591 = vpow2.f32 %v2848_v9 }
 0xae2   : > { %13593 = vpow2.f32 %v2852_v33 }
 0xae3   : > { %13595 = vpow2.f32 %v2850_v24 }
 0xae4   : > { %13597 = vpow2.f32 %v2854_v34 }
 0xaeb   : > { %v13592_v36 = vpop.eup %13591 }
 0xaec   : > { %2861 = vperm.xlu1 %12922, %v13592_v36   ;;  %v13594_v4 = vpop.eup %13593 }
 0xaed   : > { %2867 = vperm.xlu0 %12923, %v13594_v4   ;;  %v13596_v2 = vpop.eup %13595 }
 0xaee   : > { %v13598_v6 = vpop.eup %13597 }
 0xaf0   : > { %2864 = vperm.xlu1 %12922, %v13596_v2  }
 0xaf4   : > { %2870 = vperm.xlu1 %12922, %v13598_v6  }
 0xb6b   : > { %v2862_v57 = vpop.permute.xlu1 %2861 }
 0xb6c   : > { %v2868_v20 = vpop.permute.xlu0 %2867  ;;  %v2875_v33 = vrot.slane %v2862_v57, %v14982_v47 }
 0xb6d   : > { %v2884_v9 = vrot.slane %v2868_v20, %v14982_v47 }
 0xb6f   : > { %v2865_v44 = vpop.permute.xlu1 %2864 }
 0xb70   : > { %v2879_v21 = vrot.slane %v2865_v44, %v14979_v45 }
 0xb72   : > { %v2880_v0 = vsel %vm1565_vm1, %v2879_v21, %v2875_v33 }
 0xb73   : > { %v2871_v26 = vpop.permute.xlu1 %2870 }
 0xb74   : > { %v2888_v14 = vrot.slane %v2871_v26, %v14979_v45 }
 0xb76   : > { %v2889_v18 = vsel %vm1565_vm1, %v2888_v14, %v2884_v9 }
 0xb77   : > { %v2890_v25 = vsel %vm1576_vm2, %v2889_v18, %v2880_v0 }
 0xb78   : > { %v2892_v13 = vsel %vm17536_vm3, %v2890_v25, 0.0 }
 0xb79   : > { %2893 = vadd.xlane.f32.xlu1 %v2892_v13 }
 0xc06   : > { %v2894_v56 = vpop.xlane.xlu1 %2893 }
 0xc07   : > { %v2903_v41 = vrot.slane %v2894_v56, %v14993_v60  ;;  %v2899_v12 = vrot.slane %v2894_v56, %v14960_v16 }
 0xc09   : > { %13599 = vrcp.f32 %v2903_v41 }
 0xc0a   : > { %13601 = vrcp.f32 %v2899_v12 }
 0xc13   : > { %v13600_v24 = vpop.eup %13599 }
 0xc14   : > { %v15428_v34 = vmul.f32 %v13600_v24, %v13594_v4  ;;  %v15430_v57 = vmul.f32 %v13600_v24, %v13598_v6  ;;  %v13602_v44 = vpop.eup %13601 }
 0xc15   : > { %v15434_v26 = vmul.f32 %v13602_v44, %v13592_v36  ;;  %v15436_v9 = vmul.f32 %v13602_v44, %v13596_v2 }
 0xc16   : > { %17651 = vst [vmem:[#allocation108_spill] sm:$0xff] %v15428_v34  ;;  %17652 = vst [vmem:[#allocation109_spill] sm:$0xff] %v15430_v57  ;;  %v2913_v20 = vpack.c.bf16 %v15430_v57, %v15428_v34 }
 0xc17   : > { %17653 = vst [vmem:[#allocation110_spill] sm:$0xff] %v15434_v26  ;;  %17654 = vst [vmem:[#allocation111_spill] sm:$0xff] %v15436_v9  ;;  %v2912_v14 = vpack.c.bf16 %v15436_v9, %v15434_v26 }
 0xc18   : > { %v2977_v21 = vunpack.c.l.b16 %v2913_v20  ;;  %v2978_v33 = vunpack.c.h.b16 %v2913_v20 }
 0xc19   : > { %v2915_v0 = vunpack.c.l.b16 %v2912_v14  ;;  %v2916_v4 = vunpack.c.h.b16 %v2912_v14  ;;  %v17667_v14 = vld [vmem:[#allocation75_spill] sm:$0xff] }
 0xc1a   : > { %2980 = vperm.xlu0 %12923, %v2977_v21   ;;  %v17663_v21 = vld [vmem:[#allocation71_spill] sm:$0xff] }
 0xc1e   : > { %2983 = vperm.xlu0 %12923, %v2978_v33   ;;  %v17666_v33 = vld [vmem:[#allocation77_spill] sm:$0xff] }
 0xc22   : > { %2918 = vperm.xlu0 %12923, %v2915_v0   ;;  %v17668_v0 = vld [vmem:[#allocation80_spill] sm:$0xff] }
 0xc26   : > { %2921 = vperm.xlu0 %12923, %v2916_v4   ;;  %v17669_v4 = vld [vmem:[#allocation74_spill] sm:$0xff] }
 0xc99   : > { %v2981_v6 = vpop.permute.xlu0 %2980 }
 0xc9a   : > { %v2988_v25 = vrot.slane %v2981_v6, %v14982_v47  ;;  %v17670_v6 = vld [vmem:[#allocation82_spill] sm:$0xff] }
 0xc9d   : > { %v2984_v18 = vpop.permute.xlu0 %2983 }
 0xc9e   : > { %v2992_v13 = vrot.slane %v2984_v18, %v14979_v45  ;;  %v17671_v18 = vld [vmem:[#allocation78_spill] sm:$0xff] }
 0xca0   : > { %v2993_v36 = vsel %vm1565_vm1, %v2992_v13, %v2988_v25  ;;  %v17672_v25 = vld [vmem:[#allocation84_spill] sm:$0xff]  ;;  %v17673_v13 = vld [vmem:[#allocation79_spill] sm:$0xff] }
 0xca1   : > { %v2994_v2 = vpack.c.b16 %v2993_v36, %v2993_v36  ;;  %v2919_v56 = vpop.permute.xlu0 %2918  ;;  %v17674_v36 = vld [vmem:[#allocation81_spill] sm:$0xff] }
 0xca2   : > { %v2926_v12 = vrot.slane %v2919_v56, %v14982_v47  ;;  %v2356_v56 = vrot.slane %v15387_v46, %v14960_v16 }
 0xca3   : > { %12525 = vmatmul.mubr.msk.bf16.vlgmr.msra.gmra.mrb[16].mxu0 %vm1689_vm5, %v2994_v2  ;;  %v17675_v2 = vld [vmem:[#allocation83_spill] sm:$0xff] }
 0xca4   : > { %3254 = vmatpush1.bf16.msra.mxu0 %v15122_v3  ;;  %3285 = vmatprep.mubr.bf16.mxu0 %v17623_v10  ;;  %v17655_v3 = vld [vmem:[#allocation64_spill] sm:$0xff] }
 0xca5   : > { %v2922_v41 = vpop.permute.xlu0 %2921  ;;  %3255 = vmatprep.subr.bf16.mxu0 %v15124_v37  ;;  %v17656_v37 = vld [vmem:[#allocation68_spill] sm:$0xff] }
 0xca6   : > { %v2930_v24 = vrot.slane %v2922_v41, %v14979_v45  ;;  %v2658_v41 = vadd.f32 %v15379_v61, %v2356_v56  ;;  %v15549_v56 = vld [vmem:[#allocation20 + $0xfc] ss:$24 sps:$4 sm:$0xff]  }
 0xca8   : > { %v2931_v44 = vsel %vm1565_vm1, %v2930_v24, %v2926_v12  ;;  %3256 = vmatpush1.bf16.msra.mxu0 %v15128_v38  ;;  %v17657_v38 = vld [vmem:[#allocation63_spill] sm:$0xff]  ;;  %v11764_v12 = vmul.f32 -1.442695, %v2658_v41  ;;  %v15566_v41 = vld [vmem:[#allocation20 + $0x15c] ss:$24 sps:$4 sm:$0xff]  }
 0xca9   : > { %v2932_v20 = vpack.c.b16 %v2931_v44, %v2931_v44  ;;  %3257 = vmatprep.subr.bf16.mxu0 %v15132_v62  ;;  %v17658_v62 = vld [vmem:[#allocation69_spill] sm:$0xff] }
 0xcaa   : > { %13603 = vpow2.f32 %v11764_v12  ;;  %v17678_v12 = vld [vmem:[#allocation87_spill] sm:$0xff] }
 0xcab   : > { %12519 = vmatmul.mubr.msk.bf16.vlgmr.msra.gmra.mrb[28].mxu1 %vm1689_vm5, %v2932_v20 }
 0xcac   : > { %3295 = vmatpush1.bf16.msra.mxu1 %v15077_v1  ;;  %3258 = vmatpush1.bf16.msra.mxu0 %v15135_v63  ;;  %v17659_v1 = vld [vmem:[#allocation66_spill] sm:$0xff]  ;;  %v17660_v63 = vld [vmem:[#allocation73_spill] sm:$0xff] }
 0xcad   : > { %3296 = vmatprep.subr.bf16.mxu1 %v15085_v29  ;;  %3259 = vmatprep.subr.bf16.mxu0 %v15138_v5  ;;  %v17661_v29 = vld [vmem:[#allocation65_spill] sm:$0xff]  ;;  %v17662_v5 = vld [vmem:[#allocation72_spill] sm:$0xff] }
 0xcae   : > { %3326 = vmatprep.mubr.bf16.mxu1 %v17623_v10 }
 0xcb0   : > { %3297 = vmatpush1.bf16.msra.mxu1 %v15083_v28  ;;  %3260 = vmatpush1.bf16.msra.mxu0 %v15141_v7  ;;  %v17664_v28 = vld [vmem:[#allocation76_spill] sm:$0xff]  ;;  %v17665_v7 = vld [vmem:[#allocation70_spill] sm:$0xff] }
 0xcb1   : > { %3298 = vmatprep.subr.bf16.mxu1 %v17655_v3  ;;  %3261 = vmatprep.subr.bf16.mxu0 %v17656_v37 }
 0xcb4   : > { %3299 = vmatpush1.bf16.msra.mxu1 %v17657_v38  ;;  %3262 = vmatpush1.bf16.msra.mxu0 %v17658_v62  ;;  %v13604_v24 = vpop.eup %13603 }
 0xcb5   : > { %3300 = vmatprep.subr.bf16.mxu1 %v17659_v1  ;;  %3263 = vmatprep.subr.bf16.mxu0 %v17660_v63  ;;  %v3041_v44 = vadd.f32 1.0, %v13604_v24  ;;  %v15571_v24 = vld [vmem:[#allocation20 + $0x158] ss:$24 sps:$4 sm:$0xff]  }
 0xcb7   : > { %13605 = vrcp.f32 %v3041_v44  ;;  %v2300_v44 = vstv %s2299_s20  ;;  %s7255_s20 = sld [smem:[#allocation8 + %s7254_s15]] }
 0xcb8   : > { %3301 = vmatpush1.bf16.msra.mxu1 %v17661_v29  ;;  %3264 = vmatpush1.bf16.msra.mxu0 %v17662_v5  ;;  %s17953_s15 = sld [smem:[#allocation121_spill]] }
 0xcb9   : > { %3302 = vmatprep.subr.bf16.mxu1 %v17663_v21  ;;  %3265 = vmatprep.subr.bf16.mxu0 %v17664_v28 }
 0xcbc   : > { %3303 = vmatpush1.bf16.msra.mxu1 %v17665_v7  ;;  %3266 = vmatpush1.bf16.msra.mxu0 %v17666_v33  ;;  %v11765_v7 = vld [vmem:[%s14878_s4 + $0x1] sm:$0x1] }
 0xcbd   : > { %3304 = vmatprep.subr.bf16.mxu1 %v17667_v14  ;;  %3267 = vmatprep.subr.bf16.mxu0 %v17668_v0  ;;  %v15515_v33 = vld [vmem:[#allocation20 + $0x3c] ss:$24 sps:$4 sm:$0xff]   ;;  %v15518_v14 = vld [vmem:[#allocation20 + $0x38] ss:$24 sps:$4 sm:$0xff]  }
 0xcbe   : > { %v15523_v0 = vld [vmem:[#allocation20 + $0x64] ss:$24 sps:$4 sm:$0xff]  }
 0xcc0   : > { %3305 = vmatpush1.bf16.msra.mxu1 %v17669_v4  ;;  %3268 = vmatpush1.bf16.msra.mxu0 %v17670_v6  ;;  %v15525_v4 = vld [vmem:[#allocation20 + $0x60] ss:$24 sps:$4 sm:$0xff]   ;;  %v15527_v6 = vld [vmem:[#allocation20 + $0x6c] ss:$24 sps:$4 sm:$0xff]  }
 0xcc1   : > { %3306 = vmatprep.subr.bf16.mxu1 %v17671_v18  ;;  %3378 = vmatprep.subr.bf16.mxu0 %v17672_v25  ;;  %v13606_v63 = vpop.eup %13605  ;;  %v15530_v18 = vld [vmem:[#allocation20 + $0x68] ss:$24 sps:$4 sm:$0xff]   ;;  %v15536_v25 = vld [vmem:[#allocation20 + $0x9c] ss:$24 sps:$4 sm:$0xff]  }
 0xcc4   : > { %3307 = vmatpush1.bf16.msra.mxu1 %v17673_v13  ;;  %v15538_v13 = vld [vmem:[#allocation20 + $0x98] ss:$24 sps:$4 sm:$0xff]  }
 0xcc5   : > { %3308 = vmatprep.subr.bf16.mxu1 %v17674_v36  ;;  %v15544_v36 = vld [vmem:[#allocation20 + $0xc8] ss:$24 sps:$4 sm:$0xff]  }
 0xcc8   : > { %3309 = vmatpush1.bf16.msra.mxu1 %v17675_v2  ;;  %v15546_v2 = vld [vmem:[#allocation20 + $0xcc] ss:$24 sps:$4 sm:$0xff]  }
 0xcc9   : > { %3419 = vmatprep.subr.bf16.mxu1 %v15210_v15 }
 0xd76   : > { %v3032_v20 = vpop.f32.mrb[16].mxu0 }
 0xd77   : > { %v12526_v3 = vpop.f32.mrb[17].mxu0  ;;  %v3046_v62 = vrot.slane %v3032_v20, 7  ;;  %v17680_v20 = vld [vmem:[#allocation49_spill] sm:$0xff] }
 0xd78   : > { %v3035_v37 = vpop.f32.mrb[18].mxu0  ;;  %vm15576_vm9 = vcmp.lt.s32.totalorder %v17680_v20, %v2300_v44  ;;  %v17681_v3 = vmov 0 }
 0xd79   : > { %v12527_v38 = vpop.f32.mrb[19].mxu0  ;;  %v17682_v3 = vsel %vm15576_vm9, 4294967295, %v17681_v3  ;;  %v17684_v37 = vld [vmem:[#allocation89_spill] sm:$0xff] }
 0xd7a   : > { %17683 = vst [vmem:[#allocation64_spill] sm:$0xff] %v17682_v3  ;;  %v11811_v38 = vsel %vm15576_vm9, 1.0, %v17625_v50 }
 0xd7b   : > { %3494 = vst.msk [vmem:[#allocation6 + $0x2] sm:$0x3] %vm2255_vm8, %v11811_v38 }
 0xd7e   : > { %v2970_v1 = vpop.f32.mrb[28].mxu1 }
 0xd7f   : > { %v3047_v29 = vsel %vm1576_vm2, %v3046_v62, %v2970_v1  ;;  %v12520_v15 = vpop.f32.mrb[29].mxu1  ;;  %v2360_v62 = vrot.slane %v15387_v46, %v14993_v60  ;;  %v17685_v1 = vld [vmem:[#allocation92_spill] sm:$0xff] }
 0xd80   : > { %v3049_v5 = vmul.f32 %v13606_v63, %v3047_v29  ;;  %v2973_v21 = vpop.f32.mrb[30].mxu1  ;;  %v2368_v63 = vrot.slane %v15387_v46, %v17685_v1  ;;  %v17686_v29 = vld [vmem:[#allocation91_spill] sm:$0xff] }
 0xd81   : > { %v12521_v28 = vpop.f32.mrb[31].mxu1  ;;  %v2364_v15 = vrot.slane %v15387_v46, %v17686_v29  ;;  %v2660_v21 = vadd.f32 %v15383_v42, %v2360_v62 }
 0xd82   : > { %v3060_v61 = vpack.c.bf16 %v3049_v5, %v3049_v5  ;;  %v2372_v5 = vrot.slane %v15387_v46, %v15304_v39  ;;  %v2701_v28 = vadd.f32 %v15385_v59, %v2368_v63 }
 0xd84   : > { %3286 = vmatmul.mubr.bf16.vlgmr.msra.gmra.mrb[20].mxu0 %v3060_v61  ;;  %3327 = vmatmul.mubr.bf16.vlgmr.msra.gmra.mrb[32].mxu1 %v3060_v61  ;;  %v2699_v61 = vadd.f32 %v15381_v49, %v2364_v15 }
 0xd85   : > { %3379 = vmatpush1.bf16.msra.mxu0 %v15201_v31  ;;  %3420 = vmatpush1.bf16.msra.mxu1 %v15220_v27  ;;  %v15499_v31 = vld [vmem:[#allocation20 + $0x4] ss:$24 sps:$4 sm:$0xff]  }
 0xd86   : > { %3380 = vmatprep.subr.bf16.mxu0 %v15203_v11  ;;  %3421 = vmatprep.subr.bf16.mxu1 %v15222_v30  ;;  %v15501_v11 = vld [vmem:[#allocation20] ss:$24 sps:$4 sm:$0xff]   ;;  %v15503_v27 = vld [vmem:[#allocation20 + $0xc] ss:$24 sps:$4 sm:$0xff]  }
 0xd87   : > { %3410 = vmatprep.mubr.bf16.mxu0 %v17623_v10  ;;  %3451 = vmatprep.mubr.bf16.mxu1 %v17623_v10  ;;  %v15511_v30 = vld [vmem:[#allocation20 + $0x34] ss:$24 sps:$4 sm:$0xff]  }
 0xd89   : > { %3381 = vmatpush1.bf16.msra.mxu0 %v15206_v23  ;;  %3422 = vmatpush1.bf16.msra.mxu1 %v15228_v40  ;;  %v15506_v23 = vld [vmem:[#allocation20 + $0x8] ss:$24 sps:$4 sm:$0xff]  }
 0xd8a   : > { %3862 = vmatprep.subr.bf16.mxu0 %v15499_v31  ;;  %3903 = vmatprep.subr.bf16.mxu1 %v15503_v27  ;;  %v15513_v40 = vld [vmem:[#allocation20 + $0x30] ss:$24 sps:$4 sm:$0xff]  }
 0xd90   : > { %11806 = vmatmul.mubr.msk.bf16.vlgmr.msra.gmra.mrb[20].mxu0 %vm17535_vm6, %v11765_v7  ;;  %11807 = vmatmul.mubr.msk.bf16.vlgmr.msra.gmra.mrb[32].mxu1 %vm17535_vm6, %v11765_v7  ;;  %v2740_v7 = vadd.f32 %v15391_v8, %v2372_v5 }
 0xd91   : > { %3894 = vmatprep.mubr.bf16.mxu0 %v17623_v10  ;;  %3935 = vmatprep.mubr.bf16.mxu1 %v17623_v10 }
 0xd92   : > { %3863 = vmatpush1.bf16.msra.mxu0 %v15501_v11  ;;  %3904 = vmatpush1.bf16.msra.mxu1 %v15506_v23 }
 0xd93   : > { %3864 = vmatprep.subr.bf16.mxu0 %v15511_v30  ;;  %3905 = vmatprep.subr.bf16.mxu1 %v15515_v33 }
 0xd96   : > { %3865 = vmatpush1.bf16.msra.mxu0 %v15513_v40  ;;  %3906 = vmatpush1.bf16.msra.mxu1 %v15518_v14 }
 0xd97   : > { %3866 = vmatprep.subr.bf16.mxu0 %v15523_v0  ;;  %3907 = vmatprep.subr.bf16.mxu1 %v15527_v6 }
 0xd9a   : > { %3867 = vmatpush1.bf16.msra.mxu0 %v15525_v4  ;;  %3908 = vmatpush1.bf16.msra.mxu1 %v15530_v18 }
 0xd9b   : > { %3868 = vmatprep.subr.bf16.mxu0 %v15245_v51  ;;  %3909 = vmatprep.subr.bf16.mxu1 %v15536_v25  ;;  %v15555_v51 = vld [vmem:[#allocation20 + $0xf8] ss:$24 sps:$4 sm:$0xff]  }
 0xd9e   : > { %3869 = vmatpush1.bf16.msra.mxu0 %v15247_v52  ;;  %3910 = vmatpush1.bf16.msra.mxu1 %v15538_v13  ;;  %v15558_v52 = vld [vmem:[#allocation20 + $0x12c] ss:$24 sps:$4 sm:$0xff]  }
 0xd9f   : > { %3870 = vmatprep.subr.bf16.mxu0 %v15253_v54  ;;  %3911 = vmatprep.subr.bf16.mxu1 %v15546_v2  ;;  %v17676_v54 = vld [vmem:[#allocation85_spill] sm:$0xff] }
 0xda2   : > { %3871 = vmatpush1.bf16.msra.mxu0 %v15251_v53  ;;  %3912 = vmatpush1.bf16.msra.mxu1 %v15544_v36  ;;  %v15563_v53 = vld [vmem:[#allocation20 + $0x128] ss:$24 sps:$4 sm:$0xff]  }
 0xda3   : > { %3872 = vmatprep.subr.bf16.mxu0 %v15258_v55  ;;  %3913 = vmatprep.subr.bf16.mxu1 %v15549_v56  ;;  %v17677_v55 = vld [vmem:[#allocation86_spill] sm:$0xff] }
 0xda6   : > { %3873 = vmatpush1.bf16.msra.mxu0 %v15262_v58  ;;  %3914 = vmatpush1.bf16.msra.mxu1 %v15555_v51  ;;  %v17679_v58 = vld [vmem:[#allocation88_spill] sm:$0xff] }
 0xda7   : > { %3874 = vmatprep.subr.bf16.mxu0 %v17676_v54  ;;  %3915 = vmatprep.subr.bf16.mxu1 %v15558_v52 }
 0xdaa   : > { %3875 = vmatpush1.bf16.msra.mxu0 %v17677_v55  ;;  %3916 = vmatpush1.bf16.msra.mxu1 %v15563_v53 }
 0xdab   : > { %3876 = vmatprep.subr.bf16.mxu0 %v17678_v12  ;;  %3917 = vmatprep.subr.bf16.mxu1 %v15566_v41 }
 0xdae   : > { %3877 = vmatpush1.bf16.msra.mxu0 %v17679_v58  ;;  %3918 = vmatpush1.bf16.msra.mxu1 %v15571_v24 }
 0xdaf   : > { %3944 = vmatprep.subr.bf16.mxu0 %v17684_v37  ;;  %12528 = vmatprep.subr.bf16.mxu1 %v17625_v50 }
 0xe63   : > { %v3412_v54 = vpop.f32.mrb[20].mxu0  ;;  %v3453_v55 = vpop.f32.mrb[32].mxu1 }
 0xe64   : > { %v3460_v12 = vadd.f32 %v3412_v54, %v2660_v21  ;;  %v3462_v44 = vadd.f32 %v3453_v55, %v2701_v28  ;;  %v3414_v58 = vpop.f32.mrb[21].mxu0  ;;  %v3455_v37 = vpop.f32.mrb[33].mxu1 }
 0xe65   : > { %v3461_v38 = vadd.f32 %v3414_v58, %v2699_v61  ;;  %v3463_v57 = vadd.f32 %v3455_v37, %v2740_v7  ;;  %v3416_v34 = vpop.f32.mrb[22].mxu0  ;;  %v3457_v9 = vpop.f32.mrb[34].mxu1  ;;  %v17689_v58 = vld [vmem:[#allocation96_spill] sm:$0xff]  ;;  %v17690_v37 = vld [vmem:[#allocation97_spill] sm:$0xff] }
 0xe66   : > { %v11808_v26 = vmul.f32 -1.442695, %v3460_v12  ;;  %v3417_v46 = vpop.f32.mrb[23].mxu0  ;;  %v3458_v39 = vpop.f32.mrb[35].mxu1 }
 0xe67   : > { %v11809_v42 = vmul.f32 -1.442695, %v3461_v38  ;;  %v11810_v59 = vmul.f32 -1.442695, %v3463_v57  ;;  %v2297_v39 = vsel %vm15281_vm7, %v15315_v35, %v15312_v32  ;;  %v17687_v35 = vld [vmem:[#allocation94_spill] sm:$0xff]  ;;  %v17692_v38 = vld [vmem:[#allocation99_spill] sm:$0xff] }
 0xe68   : > { %13607 = vpow2.f32 %v11808_v26  ;;  %v17694_v46 = vld [vmem:[#allocation101_spill] sm:$0xff] }
 0xe69   : > { %13609 = vpow2.f32 %v11809_v42  ;;  %v17695_v42 = vld [vmem:[#allocation102_spill] sm:$0xff] }
 0xe6a   : > { %13611 = vpow2.f32 %v11810_v59  ;;  %v17696_v59 = vld [vmem:[#allocation103_spill] sm:$0xff] }
 0xe6b   : > { %13613 = vtanh.f32 %v3462_v44 }
 0xe72   : > { %v13608_v49 = vpop.eup %13607 }
 0xe73   : > { %v13610_v62 = vpop.eup %13609  ;;  %v3467_v8 = vadd.f32 1.0, %v13608_v49  ;;  %v17697_v49 = vld [vmem:[#allocation104_spill] sm:$0xff] }
 0xe74   : > { %v3473_v63 = vadd.f32 1.0, %v13610_v62  ;;  %v13612_v15 = vpop.eup %13611  ;;  %v17698_v62 = vld [vmem:[#allocation105_spill] sm:$0xff] }
 0xe75   : > { %13615 = vrcp.f32 %v3467_v8  ;;  %v13614_v5 = vpop.eup %13613  ;;  %v3480_v9 = vadd.f32 1.0, %v13612_v15  ;;  %v17699_v8 = vld [vmem:[#allocation106_spill] sm:$0xff] }
 0xe76   : > { %13617 = vrcp.f32 %v3473_v63 }
 0xe77   : > { %13619 = vrcp.f32 %v3480_v9 }
 0xe7f   : > { %v13616_v21 = vpop.eup %13615 }
 0xe80   : > { %v13618_v34 = vpop.eup %13617  ;;  %v3484_v26 = vmul.f32 %v13616_v21, %v13614_v5 }
 0xe81   : > { %v3483_v57 = vmul.f32 %v13618_v34, %v2297_v39  ;;  %v13620_v7 = vpop.eup %13619 }
 0xe83   : > { %v3485_v28 = vadd.f32 %v3484_v26, %v3483_v57  ;;  %v15643_v57 = vld [vmem:[#allocation21] sm:$0x3f] }
 0xe85   : > { %13621 = vtanh.f32 %v3485_v28  ;;  %v15605_v61 = vsel %vm15576_vm9, %v3485_v28, %v2297_v39  ;;  %v17700_v28 = vld [vmem:[#allocation50_spill] sm:$0xff] }
 0xe8f   : > { %v13622_v54 = vpop.eup %13621 }
 0xe90   : > { %v3487_v55 = vmul.f32 %v13622_v54, %v13620_v7  ;;  %v3615_v7 = vrot.slane %v15643_v57, %v17700_v28 }
 0xe92   : > { %v3488_v12 = vpack.c.bf16 %v3487_v55, %v3487_v55  ;;  %v15610_v44 = vsel %vm15576_vm9, %v3487_v55, %v15322_v48  ;;  %v17688_v48 = vld [vmem:[#allocation95_spill] sm:$0xff] }
 0xe93   : > { %v3541_v32 = vpack.c.bf16 %v15610_v44, %v15610_v44 }
 0xe94   : > { %3490 = vst [vmem:[#allocation5 + $0x1] sm:$0x1] %v3488_v12 }
 0xe95   : > { %3895 = vmatmul.mubr.bf16.vlgmr.msra.gmra.mrb[24].mxu0 %v3541_v32  ;;  %3936 = vmatmul.mubr.bf16.vlgmr.msra.gmra.mrb[36].mxu1 %v3541_v32 }
 0xe96   : > { %3945 = vmatpush1.bf16.msra.mxu0 %v15318_v43  ;;  %3976 = vmatprep.mubr.bf16.mxu0 %v17623_v10  ;;  %v17691_v43 = vld [vmem:[#allocation98_spill] sm:$0xff] }
 0xe97   : > { %3946 = vmatprep.subr.bf16.mxu0 %v15326_v19  ;;  %12529 = vmatpush3.bf16.msra.mxu1 %v15068_v17  ;;  %v17693_v19 = vld [vmem:[#allocation100_spill] sm:$0xff] }
 0xe98   : > { %12530 = vmatprep.mubr.msk.bf16.mxu1 %vm14371_vm4, %v17625_v50  ;;  %12534 = vmatprep.subr.bf16.mxu1 %v17625_v50 }
 0xe9a   : > { %3947 = vmatpush1.bf16.msra.mxu0 %v17687_v35 }
 0xe9b   : > { %3948 = vmatprep.subr.bf16.mxu0 %v17688_v48  ;;  %v17701_v48 = vld [vmem:[#allocation51_spill] sm:$0xff] }
 0xe9e   : > { %3949 = vmatpush1.bf16.msra.mxu0 %v17689_v58 }
 0xe9f   : > { %3950 = vmatprep.subr.bf16.mxu0 %v17690_v37 }
 0xea2   : > { %3951 = vmatpush1.bf16.msra.mxu0 %v17691_v43 }
 0xea3   : > { %3952 = vmatprep.subr.bf16.mxu0 %v17692_v38 }
 0xea6   : > { %3953 = vmatpush1.bf16.msra.mxu0 %v17693_v19 }
 0xea7   : > { %3954 = vmatprep.subr.bf16.mxu0 %v17694_v46  ;;  %v17702_v46 = vld [vmem:[#allocation54_spill] sm:$0xff] }
 0xeaa   : > { %3955 = vmatpush1.bf16.msra.mxu0 %v17695_v42 }
 0xeab   : > { %3956 = vmatprep.subr.bf16.mxu0 %v17696_v59  ;;  %v17703_v59 = vld [vmem:[#allocation53_spill] sm:$0xff] }
 0xeae   : > { %3957 = vmatpush1.bf16.msra.mxu0 %v17697_v49 }
 0xeaf   : > { %3958 = vmatprep.subr.bf16.mxu0 %v17698_v62 }
 0xeb2   : > { %3959 = vmatpush1.bf16.msra.mxu0 %v17699_v8 }
 0xeb5   : > { %3977 = vmatmul.mubr.bf16.vlgmr.msra.gmra.mrb[28].mxu0 %v3541_v32 }
 0xeb6   : > { %4565 = vmatprep.mubr.bf16.mxu0 %v17623_v10 }
 0xf68   : > { %v15635_v63 = vpop.f32.mrb[24].mxu0  ;;  %v15637_v15 = vpop.f32.mrb[36].mxu1 }
 0xf69   : > { %v15639_v5 = vpop.f32.mrb[25].mxu0  ;;  %v15641_v21 = vpop.f32.mrb[37].mxu1 }
 0xf6a   : > { %v3900_v34 = vpop.f32.mrb[26].mxu0  ;;  %v3941_v39 = vpop.f32.mrb[38].mxu1 }
 0xf6b   : > { %v3901_v26 = vpop.f32.mrb[27].mxu0  ;;  %v3942_v9 = vpop.f32.mrb[39].mxu1  ;;  %v17704_v39 = vld [vmem:[#allocation55_spill] sm:$0xff] }
 0xf6c   : > { %v17705_v9 = vld [vmem:[#allocation107_spill] sm:$0xff] }
 0xf88   : > { %v15647_v54 = vpop.f32.mrb[28].mxu0 }
 0xf89   : > { %v3980_v55 = vpop.f32.mrb[29].mxu0 }
 0xf8a   : > { %v3981_v12 = vadd.f32 %v3980_v55, %v3615_v7  ;;  %v3982_v32 = vpop.f32.mrb[30].mxu0 }
 0xf8b   : > { %v3983_v35 = vpop.f32.mrb[31].mxu0  ;;  %v17706_v32 = vld [vmem:[#allocation56_spill] sm:$0xff] }
 0xf8c   : > { %v3992_v58 = vrot.slane %v3981_v12, %v17701_v48 }
 0xf8e   : > { %v3993_v37 = vcombine.high %v3992_v58, %v3992_v58  ;;  %v4000_v43 = vrot.slane %v3992_v58, %v17701_v48 }
 0xf90   : > { %v4007_v38 = vrot.slane %v3993_v37, %v17701_v48  ;;  %v4011_v19 = vrot.slane %v4000_v43, %v14960_v16 }
 0xf92   : > { %v4019_v42 = vadd.f32 %v4011_v19, %v17702_v46  ;;  %v4018_v49 = vadd.f32 %v4011_v19, %v17703_v59  ;;  %v4015_v62 = vrot.slane %v4007_v38, %v14960_v16 }
 0xf94   : > { %v4023_v8 = vmax.f32 %v4019_v42, 0.0  ;;  %v4022_v34 = vmax.f32 %v4018_v49, 0.0  ;;  %v4020_v26 = vadd.f32 %v4015_v62, %v17704_v39  ;;  %v4021_v35 = vadd.f32 %v4015_v62, %v17706_v32 }
 0xf96   : > { %v4034_v7 = vmul.f32 %v17705_v9, %v4023_v8  ;;  %v4033_v55 = vmul.f32 %v17705_v9, %v4022_v34  ;;  %v4024_v12 = vmax.f32 %v4020_v26, 0.0  ;;  %v4025_v37 = vmax.f32 %v4021_v35, 0.0 }
 0xf98   : > { %4039 = vadd.xlane.f32.xlu1 %v4034_v7  ;;  %4037 = vadd.xlane.f32.xlu0 %v4033_v55  ;;  %v4035_v58 = vmul.f32 %v17705_v9, %v4024_v12  ;;  %v4036_v43 = vmul.f32 %v17705_v9, %v4025_v37 }
 0xf9c   : > { %4041 = vadd.xlane.f32.xlu1 %v4035_v58 }
 0xfa0   : > { %4043 = vadd.xlane.f32.xlu1 %v4036_v43 }
0x1025   : > { %v4040_v38 = vpop.xlane.xlu1 %4039  ;;  %v4038_v19 = vpop.xlane.xlu0 %4037 }
0x1026   : > { %v4056_v49 = vrot.slane %v4040_v38, %v14979_v45  ;;  %v4052_v8 = vrot.slane %v4038_v19, %v14982_v47 }
0x1028   : > { %v4057_v7 = vsel %vm1565_vm1, %v4056_v49, %v4052_v8 }
0x1029   : > { %v4042_v42 = vpop.xlane.xlu1 %4041 }
0x102a   : > { %v4061_v26 = vrot.slane %v4042_v42, %v14982_v47 }
0x102d   : > { %v4044_v34 = vpop.xlane.xlu1 %4043 }
0x102e   : > { %v4065_v62 = vrot.slane %v4044_v34, %v14979_v45 }
0x1030   : > { %v4066_v55 = vsel %vm1565_vm1, %v4065_v62, %v4061_v26 }
0x1031   : > { %v4067_v12 = vsel %vm1576_vm2, %v4066_v55, %v4057_v7 }
0x1032   : > { %v4069_v9 = vsel %vm17536_vm3, %v4067_v12, -inf }
0x1033   : > { %4070 = vmax.xlane.f32.xlu1 %v4069_v9 }
0x10c0   : > { %v4071_v35 = vpop.xlane.xlu1 %4070 }
0x10c1   : > { %v4076_v58 = vrot.slane %v4071_v35, %v14960_v16  ;;  %v4080_v37 = vrot.slane %v4071_v35, %v14993_v60 }
0x10c3   : > { %v4083_v43 = vsub.f32 %v4038_v19, %v4076_v58  ;;  %v4084_v3 = vsub.f32 %v4040_v38, %v4076_v58  ;;  %v4085_v22 = vsub.f32 %v4042_v42, %v4080_v37  ;;  %v4086_v59 = vsub.f32 %v4044_v34, %v4080_v37 }
0x10c5   : > { %v4087_v32 = vmul.f32 1.442695, %v4083_v43  ;;  %v4089_v39 = vmul.f32 1.442695, %v4084_v3  ;;  %v4091_v49 = vmul.f32 1.442695, %v4085_v22 }
0x10c6   : > { %v4093_v8 = vmul.f32 1.442695, %v4086_v59 }
0x10c7   : > { %13623 = vpow2.f32 %v4087_v32 }
0x10c8   : > { %13625 = vpow2.f32 %v4089_v39 }
0x10c9   : > { %13627 = vpow2.f32 %v4091_v49 }
0x10ca   : > { %13629 = vpow2.f32 %v4093_v8 }
0x10d1   : > { %v13624_v26 = vpop.eup %13623 }
0x10d2   : > { %v13626_v62 = vpop.eup %13625  ;;  %4100 = vperm.xlu1 %12922, %v13624_v26  }
0x10d3   : > { %4103 = vperm.xlu0 %12923, %v13626_v62   ;;  %v13628_v7 = vpop.eup %13627 }
0x10d4   : > { %v13630_v55 = vpop.eup %13629 }
0x10d6   : > { %4106 = vperm.xlu1 %12922, %v13628_v7  }
0x10da   : > { %4109 = vperm.xlu1 %12922, %v13630_v55  }
0x1151   : > { %v4101_v19 = vpop.permute.xlu1 %4100 }
0x1152   : > { %v4104_v38 = vpop.permute.xlu0 %4103  ;;  %v4114_v32 = vrot.slane %v4101_v19, %v14982_v47 }
0x1153   : > { %v4118_v3 = vrot.slane %v4104_v38, %v14979_v45 }
0x1155   : > { %v4107_v42 = vpop.permute.xlu1 %4106  ;;  %v4119_v34 = vsel %vm1565_vm1, %v4118_v3, %v4114_v32 }
0x1156   : > { %v4123_v39 = vrot.slane %v4107_v42, %v14982_v47 }
0x1159   : > { %v4110_v22 = vpop.permute.xlu1 %4109 }
0x115a   : > { %v4127_v59 = vrot.slane %v4110_v22, %v14979_v45 }
0x115c   : > { %v4128_v12 = vsel %vm1565_vm1, %v4127_v59, %v4123_v39 }
0x115d   : > { %v4129_v9 = vsel %vm1576_vm2, %v4128_v12, %v4119_v34  ;;  %v15696_v12 = vld [vmem:[#allocation26 + $0xc] ss:$16 sps:$4 sm:$0xff]  }
0x115e   : > { %v4131_v35 = vsel %vm17536_vm3, %v4129_v9, 0.0  ;;  %4533 = vmatprep.subr.bf16.mxu0 %v15696_v12  ;;  %v15706_v9 = vld [vmem:[#allocation26 + $0x48] ss:$16 sps:$4 sm:$0xff]  }
0x115f   : > { %4132 = vadd.xlane.f32.xlu1 %v4131_v35  ;;  %v15708_v35 = vld [vmem:[#allocation26 + $0x4c] ss:$16 sps:$4 sm:$0xff]  }
0x11ec   : > { %v4133_v58 = vpop.xlane.xlu1 %4132 }
0x11ed   : > { %v4138_v37 = vrot.slane %v4133_v58, %v14960_v16  ;;  %v4142_v43 = vrot.slane %v4133_v58, %v14993_v60  ;;  %v15712_v58 = vld [vmem:[#allocation26 + $0x68] ss:$16 sps:$4 sm:$0xff]  }
0x11ef   : > { %13631 = vrcp.f32 %v4138_v37  ;;  %v15714_v37 = vld [vmem:[#allocation26 + $0x6c] ss:$16 sps:$4 sm:$0xff]  }
0x11f0   : > { %13633 = vrcp.f32 %v4142_v43 }
0x11f9   : > { %v13632_v49 = vpop.eup %13631 }
0x11fa   : > { %v15682_v8 = vmul.f32 %v13632_v49, %v13624_v26  ;;  %v15684_v19 = vmul.f32 %v13632_v49, %v13626_v62  ;;  %v13634_v38 = vpop.eup %13633  ;;  %v15694_v62 = vld [vmem:[#allocation26 + $0x8] ss:$16 sps:$4 sm:$0xff]  }
0x11fb   : > { %v15688_v32 = vmul.f32 %v13634_v38, %v13628_v7  ;;  %v15690_v22 = vmul.f32 %v13634_v38, %v13630_v55  ;;  %4534 = vmatpush1.bf16.msra.mxu0 %v15694_v62  ;;  %v15700_v7 = vld [vmem:[#allocation26 + $0x28] ss:$16 sps:$4 sm:$0xff]   ;;  %v15702_v55 = vld [vmem:[#allocation26 + $0x2c] ss:$16 sps:$4 sm:$0xff]  }
0x11fc   : > { %17707 = vst [vmem:[#allocation68_spill] sm:$0xff] %v15682_v8  ;;  %17708 = vst [vmem:[#allocation63_spill] sm:$0xff] %v15684_v19  ;;  %v4151_v42 = vpack.c.bf16 %v15684_v19, %v15682_v8  ;;  %4535 = vmatprep.subr.bf16.mxu0 %v15702_v55  ;;  %v15733_v19 = vld [vmem:[#allocation26 + $0x24] ss:$16 sps:$4 sm:$0xff]   ;;  %v15760_v8 = vld [vmem:[#allocation26 + $0x88] ss:$16 sps:$4 sm:$0xff]  }
0x11fd   : > { %17709 = vst [vmem:[#allocation69_spill] sm:$0xff] %v15688_v32  ;;  %17710 = vst [vmem:[#allocation66_spill] sm:$0xff] %v15690_v22  ;;  %v4152_v59 = vpack.c.bf16 %v15690_v22, %v15688_v32  ;;  %v15762_v32 = vld [vmem:[#allocation26 + $0x8c] ss:$16 sps:$4 sm:$0xff]  }
0x11fe   : > { %v4154_v3 = vunpack.c.l.b16 %v4151_v42  ;;  %v4155_v39 = vunpack.c.h.b16 %v4151_v42  ;;  %17714 = vst [vmem:[#allocation72_spill] sm:$0xff] %v15733_v19  ;;  %17722 = vst [vmem:[#allocation82_spill] sm:$0xff] %v15760_v8 }
0x11ff   : > { %v4216_v34 = vunpack.c.l.b16 %v4152_v59  ;;  %v4217_v26 = vunpack.c.h.b16 %v4152_v59  ;;  %4536 = vmatpush1.bf16.msra.mxu0 %v15700_v7 }
0x1200   : > { %4157 = vperm.xlu0 %12923, %v4154_v3   ;;  %4537 = vmatprep.subr.bf16.mxu0 %v15708_v35 }
0x1203   : > { %4538 = vmatpush1.bf16.msra.mxu0 %v15706_v9 }
0x1204   : > { %4160 = vperm.xlu0 %12923, %v4155_v39   ;;  %4539 = vmatprep.subr.bf16.mxu0 %v15714_v37 }
0x1207   : > { %4540 = vmatpush1.bf16.msra.mxu0 %v15712_v58 }
0x1208   : > { %4219 = vperm.xlu0 %12923, %v4216_v34   ;;  %v15721_v34 = vld [vmem:[#allocation26 + $0x4] ss:$16 sps:$4 sm:$0xff]   ;;  %4541 = vmatprep.subr.bf16.mxu0 %v15762_v32 }
0x1209   : > { %17711 = vst [vmem:[#allocation73_spill] sm:$0xff] %v15721_v34 }
0x120b   : > { %4542 = vmatpush1.bf16.msra.mxu0 %v15760_v8  ;;  %v15812_v8 = vld [vmem:[#allocation24] ss:$16 sps:$4 sm:$0xff]  }
0x120c   : > { %4222 = vperm.xlu0 %12923, %v4217_v26   ;;  %v17712_v26 = vld [vmem:[#allocation67_spill] sm:$0xff] }
0x127f   : > { %v4158_v43 = vpop.permute.xlu0 %4157 }
0x1280   : > { %v4165_v38 = vrot.slane %v4158_v43, %v14982_v47 }
0x1283   : > { %v4161_v49 = vpop.permute.xlu0 %4160 }
0x1284   : > { %v4169_v42 = vrot.slane %v4161_v49, %v14979_v45 }
0x1286   : > { %v4170_v3 = vsel %vm1565_vm1, %v4169_v42, %v4165_v38  ;;  %v15731_v42 = vld [vmem:[#allocation26] ss:$16 sps:$4 sm:$0xff]  }
0x1287   : > { %v4171_v39 = vpack.c.b16 %v4170_v3, %v4170_v3  ;;  %v4220_v59 = vpop.permute.xlu0 %4219  ;;  %17713 = vst [vmem:[#allocation65_spill] sm:$0xff] %v15731_v42 }
0x1288   : > { %v4227_v43 = vrot.slane %v4220_v59, %v14982_v47  ;;  %v15741_v59 = vld [vmem:[#allocation26 + $0x44] ss:$16 sps:$4 sm:$0xff]  }
0x1289   : > { %12531 = vmatmul.mubr.msk.bf16.vlgmr.msra.gmra.mrb[40].mxu1 %vm1689_vm5, %v4171_v39  ;;  %v15737_v39 = vld [vmem:[#allocation26 + $0x20] ss:$16 sps:$4 sm:$0xff]   ;;  %17716 = vst [vmem:[#allocation76_spill] sm:$0xff] %v15741_v59 }
0x128a   : > { %12535 = vmatpush3.bf16.msra.mxu1 %v17712_v26  ;;  %12536 = vmatprep.mubr.msk.bf16.mxu1 %vm14371_vm4, %v17625_v50  ;;  %17715 = vst [vmem:[#allocation71_spill] sm:$0xff] %v15737_v39  ;;  %v3595_v26 = vrot.slane %v15643_v57, %v14960_v16 }
0x128b   : > { %v4223_v22 = vpop.permute.xlu0 %4222  ;;  %4492 = vmatprep.subr.bf16.mxu1 %v15721_v34  ;;  %v15796_v34 = vld [vmem:[#allocation26 + $0xe8] ss:$16 sps:$4 sm:$0xff]  }
0x128c   : > { %v4231_v49 = vrot.slane %v4223_v22, %v14979_v45  ;;  %v15744_v22 = vld [vmem:[#allocation26 + $0x40] ss:$16 sps:$4 sm:$0xff]   ;;  %17734 = vst [vmem:[#allocation95_spill] sm:$0xff] %v15796_v34  ;;  %v3897_v47 = vadd.f32 %v15635_v63, %v3595_v26 }
0x128d   : > { %17717 = vst [vmem:[#allocation70_spill] sm:$0xff] %v15744_v22 }
0x128e   : > { %v4232_v38 = vsel %vm1565_vm1, %v4231_v49, %v4227_v43  ;;  %v15747_v43 = vld [vmem:[#allocation26 + $0x64] ss:$16 sps:$4 sm:$0xff]   ;;  %v15750_v49 = vld [vmem:[#allocation26 + $0x60] ss:$16 sps:$4 sm:$0xff]  }
0x128f   : > { %v4233_v3 = vpack.c.b16 %v4232_v38, %v4232_v38  ;;  %17718 = vst [vmem:[#allocation77_spill] sm:$0xff] %v15747_v43  ;;  %17719 = vst [vmem:[#allocation75_spill] sm:$0xff] %v15750_v49  ;;  %v15753_v38 = vld [vmem:[#allocation26 + $0x84] ss:$16 sps:$4 sm:$0xff]  }
0x1290   : > { %17720 = vst [vmem:[#allocation80_spill] sm:$0xff] %v15753_v38 }
0x1291   : > { %12537 = vmatmul.mubr.msk.bf16.vlgmr.msra.gmra.mrb[44].mxu1 %vm1689_vm5, %v4233_v3  ;;  %v15756_v3 = vld [vmem:[#allocation26 + $0x80] ss:$16 sps:$4 sm:$0xff]  }
0x1292   : > { %4493 = vmatpush1.bf16.msra.mxu1 %v15731_v42  ;;  %4524 = vmatprep.mubr.bf16.mxu1 %v17623_v10  ;;  %17721 = vst [vmem:[#allocation74_spill] sm:$0xff] %v15756_v3  ;;  %v15794_v42 = vld [vmem:[#allocation26 + $0xe0] ss:$16 sps:$4 sm:$0xff]  }
0x1293   : > { %4494 = vmatprep.subr.bf16.mxu1 %v15733_v19  ;;  %v15786_v19 = vld [vmem:[#allocation26 + $0xc8] ss:$16 sps:$4 sm:$0xff]   ;;  %17733 = vst [vmem:[#allocation94_spill] sm:$0xff] %v15794_v42 }
0x1294   : > { %17730 = vst [vmem:[#allocation87_spill] sm:$0xff] %v15786_v19 }
0x1296   : > { %4495 = vmatpush1.bf16.msra.mxu1 %v15737_v39  ;;  %v15774_v39 = vld [vmem:[#allocation26 + $0xc4] ss:$16 sps:$4 sm:$0xff]  }
0x1297   : > { %4496 = vmatprep.subr.bf16.mxu1 %v15741_v59  ;;  %v15770_v59 = vld [vmem:[#allocation26 + $0xa8] ss:$16 sps:$4 sm:$0xff]   ;;  %17727 = vst [vmem:[#allocation83_spill] sm:$0xff] %v15774_v39 }
0x1298   : > { %17725 = vst [vmem:[#allocation79_spill] sm:$0xff] %v15770_v59 }
0x129a   : > { %4497 = vmatpush1.bf16.msra.mxu1 %v15744_v22  ;;  %v15766_v22 = vld [vmem:[#allocation26 + $0xa0] ss:$16 sps:$4 sm:$0xff]  }
0x129b   : > { %4498 = vmatprep.subr.bf16.mxu1 %v15747_v43  ;;  %17723 = vst [vmem:[#allocation78_spill] sm:$0xff] %v15766_v22  ;;  %v15768_v43 = vld [vmem:[#allocation26 + $0xa4] ss:$16 sps:$4 sm:$0xff]  }
0x129c   : > { %17724 = vst [vmem:[#allocation84_spill] sm:$0xff] %v15768_v43 }
0x129e   : > { %4499 = vmatpush1.bf16.msra.mxu1 %v15750_v49  ;;  %v15772_v49 = vld [vmem:[#allocation26 + $0xac] ss:$16 sps:$4 sm:$0xff]  }
0x129f   : > { %4500 = vmatprep.subr.bf16.mxu1 %v15753_v38  ;;  %17726 = vst [vmem:[#allocation81_spill] sm:$0xff] %v15772_v49  ;;  %4543 = vmatprep.subr.bf16.mxu0 %v15772_v49  ;;  %v15783_v38 = vld [vmem:[#allocation26 + $0xcc] ss:$16 sps:$4 sm:$0xff]  }
0x12a0   : > { %4544 = vmatpush1.bf16.msra.mxu0 %v15770_v59  ;;  %17729 = vst [vmem:[#allocation86_spill] sm:$0xff] %v15783_v38 }
0x12a1   : > { %4545 = vmatprep.subr.bf16.mxu0 %v15783_v38 }
0x12a2   : > { %4501 = vmatpush1.bf16.msra.mxu1 %v15756_v3  ;;  %v15779_v3 = vld [vmem:[#allocation26 + $0xc0] ss:$16 sps:$4 sm:$0xff]  }
0x12a3   : > { %4502 = vmatprep.subr.bf16.mxu1 %v15768_v43  ;;  %17728 = vst [vmem:[#allocation85_spill] sm:$0xff] %v15779_v3  ;;  %v15790_v43 = vld [vmem:[#allocation26 + $0xe4] ss:$16 sps:$4 sm:$0xff]  }
0x12a4   : > { %4546 = vmatpush1.bf16.msra.mxu0 %v15786_v19  ;;  %17731 = vst [vmem:[#allocation88_spill] sm:$0xff] %v15790_v43 }
0x12a6   : > { %4503 = vmatpush1.bf16.msra.mxu1 %v15766_v22  ;;  %v15792_v22 = vld [vmem:[#allocation26 + $0xec] ss:$16 sps:$4 sm:$0xff]  }
0x12a7   : > { %4504 = vmatprep.subr.bf16.mxu1 %v15774_v39  ;;  %17732 = vst [vmem:[#allocation89_spill] sm:$0xff] %v15792_v22  ;;  %4547 = vmatprep.subr.bf16.mxu0 %v15792_v22  ;;  %v15800_v39 = vld [vmem:[#allocation24 + $0x4] ss:$16 sps:$4 sm:$0xff]  }
0x12a8   : > { %17735 = vst [vmem:[#allocation96_spill] sm:$0xff] %v15800_v39  ;;  %4548 = vmatpush1.bf16.msra.mxu0 %v15796_v34 }
0x12aa   : > { %4505 = vmatpush1.bf16.msra.mxu1 %v15779_v3  ;;  %v15805_v3 = vld [vmem:[#allocation24 + $0xc] ss:$16 sps:$4 sm:$0xff]  }
0x12ab   : > { %4506 = vmatprep.subr.bf16.mxu1 %v15790_v43  ;;  %17736 = vst [vmem:[#allocation97_spill] sm:$0xff] %v15805_v3  ;;  %4658 = vmatprep.subr.bf16.mxu0 %v15805_v3  ;;  %v11864_v43 = vmul.f32 -1.442695, %v3897_v47  ;;  %v15814_v47 = vld [vmem:[#allocation24 + $0x8] ss:$16 sps:$4 sm:$0xff]  }
0x12ad   : > { %13635 = vpow2.f32 %v11864_v43 }
0x12ae   : > { %4507 = vmatpush1.bf16.msra.mxu1 %v15794_v42 }
0x12af   : > { %4617 = vmatprep.subr.bf16.mxu1 %v15800_v39 }
0x12b7   : > { %v13636_v45 = vpop.eup %13635 }
0x12b8   : > { %v4280_v46 = vadd.f32 1.0, %v13636_v45  ;;  %v15816_v45 = vld [vmem:[#allocation24 + $0x24] ss:$16 sps:$4 sm:$0xff]  }
0x12ba   : > { %13637 = vrcp.f32 %v4280_v46  ;;  %v15818_v46 = vld [vmem:[#allocation24 + $0x2c] ss:$16 sps:$4 sm:$0xff]  }
0x12c4   : > { %v13638_v59 = vpop.eup %13637 }
0x135c   : > { %v4209_v48 = vpop.f32.mrb[40].mxu1 }
0x135d   : > { %v12532_v42 = vpop.f32.mrb[41].mxu1 }
0x135e   : > { %v4212_v28 = vpop.f32.mrb[42].mxu1 }
0x135f   : > { %v12533_v34 = vpop.f32.mrb[43].mxu1  ;;  %v15821_v28 = vld [vmem:[#allocation24 + $0x20] ss:$16 sps:$4 sm:$0xff]  }
0x1364   : > { %v4271_v22 = vpop.f32.mrb[44].mxu1 }
0x1365   : > { %v4285_v39 = vrot.slane %v4271_v22, 7  ;;  %v12538_v19 = vpop.f32.mrb[45].mxu1 }
0x1366   : > { %v4274_v38 = vpop.f32.mrb[46].mxu1 }
0x1367   : > { %v4286_v3 = vsel %vm1576_vm2, %v4285_v39, %v4209_v48  ;;  %v12539_v49 = vpop.f32.mrb[47].mxu1  ;;  %v15824_v48 = vld [vmem:[#allocation24 + $0x28] ss:$16 sps:$4 sm:$0xff]  }
0x1368   : > { %v4288_v16 = vmul.f32 %v13638_v59, %v4286_v3 }
0x136a   : > { %v4299_v63 = vpack.c.bf16 %v4288_v16, %v4288_v16  ;;  %v11865_v16 = vld [vmem:[%s14878_s4 + $0x2] sm:$0x1] }
0x136c   : > { %4525 = vmatmul.mubr.bf16.vlgmr.msra.gmra.mrb[48].mxu1 %v4299_v63  ;;  %4566 = vmatmul.mubr.bf16.vlgmr.msra.gmra.mrb[32].mxu0 %v4299_v63 }
0x136d   : > { %4618 = vmatpush1.bf16.msra.mxu1 %v15812_v8  ;;  %4659 = vmatpush1.bf16.msra.mxu0 %v15814_v47 }
0x136e   : > { %4619 = vmatprep.subr.bf16.mxu1 %v15816_v45  ;;  %4660 = vmatprep.subr.bf16.mxu0 %v15818_v46 }
0x136f   : > { %4649 = vmatprep.mubr.bf16.mxu1 %v17623_v10  ;;  %4690 = vmatprep.mubr.bf16.mxu0 %v17623_v10 }
0x1371   : > { %4620 = vmatpush1.bf16.msra.mxu1 %v15821_v28  ;;  %4661 = vmatpush1.bf16.msra.mxu0 %v15824_v48 }
0x1372   : > { %5101 = vmatprep.subr.bf16.mxu1 %v15499_v31  ;;  %5142 = vmatprep.subr.bf16.mxu0 %v15503_v27  ;;  %v15860_v31 = vld [vmem:[#allocation20 + $0x94] ss:$24 sps:$4 sm:$0xff]   ;;  %v15866_v27 = vld [vmem:[#allocation20 + $0xc0] ss:$24 sps:$4 sm:$0xff]  }
0x1378   : > { %11906 = vmatmul.mubr.msk.bf16.vlgmr.msra.gmra.mrb[48].mxu1 %vm17535_vm6, %v11865_v16  ;;  %11907 = vmatmul.mubr.msk.bf16.vlgmr.msra.gmra.mrb[32].mxu0 %vm17535_vm6, %v11865_v16 }
0x1379   : > { %5102 = vmatpush1.bf16.msra.mxu1 %v15501_v11  ;;  %5143 = vmatpush1.bf16.msra.mxu0 %v15506_v23  ;;  %v15862_v11 = vld [vmem:[#allocation20 + $0x90] ss:$24 sps:$4 sm:$0xff]   ;;  %v15868_v23 = vld [vmem:[#allocation20 + $0xc4] ss:$24 sps:$4 sm:$0xff]  }
0x137a   : > { %5103 = vmatprep.subr.bf16.mxu1 %v15511_v30  ;;  %5144 = vmatprep.subr.bf16.mxu0 %v15515_v33  ;;  %v15871_v30 = vld [vmem:[#allocation20 + $0xf4] ss:$24 sps:$4 sm:$0xff]   ;;  %v15878_v33 = vld [vmem:[#allocation20 + $0x124] ss:$24 sps:$4 sm:$0xff]  }
0x137b   : > { %5133 = vmatprep.mubr.bf16.mxu1 %v17623_v10  ;;  %5174 = vmatprep.mubr.bf16.mxu0 %v17623_v10 }
0x137d   : > { %5104 = vmatpush1.bf16.msra.mxu1 %v15513_v40  ;;  %5145 = vmatpush1.bf16.msra.mxu0 %v15518_v14  ;;  %v15875_v40 = vld [vmem:[#allocation20 + $0xf0] ss:$24 sps:$4 sm:$0xff]   ;;  %v15881_v14 = vld [vmem:[#allocation20 + $0x120] ss:$24 sps:$4 sm:$0xff]  }
0x137e   : > { %5105 = vmatprep.subr.bf16.mxu1 %v15523_v0  ;;  %5146 = vmatprep.subr.bf16.mxu0 %v15527_v6  ;;  %v15884_v0 = vld [vmem:[#allocation20 + $0x154] ss:$24 sps:$4 sm:$0xff]   ;;  %v3539_v6 = vstv %s3538_s2  ;;  %s8494_s2 = sld [smem:[#allocation8 + %s8493_s19]] }
0x137f   : > { %vm15893_vm10 = vcmp.lt.s32.totalorder %v17680_v20, %v3539_v6 }
0x1381   : > { %5106 = vmatpush1.bf16.msra.mxu1 %v15525_v4  ;;  %5147 = vmatpush1.bf16.msra.mxu0 %v15530_v18  ;;  %v15887_v4 = vld [vmem:[#allocation20 + $0x150] ss:$24 sps:$4 sm:$0xff]   ;;  %v15890_v18 = vld [vmem:[#allocation20 + $0x14] ss:$24 sps:$4 sm:$0xff]  }
0x1382   : > { %5148 = vmatprep.subr.bf16.mxu0 %v15536_v25  ;;  %5107 = vmatprep.subr.bf16.mxu1 %v15860_v31  ;;  %v17737_v25 = vmov 0 }
0x1383   : > { %v17738_v25 = vsel %vm15893_vm10, 4294967295, %v17737_v25 }
0x1384   : > { %17739 = vst [vmem:[#allocation98_spill] sm:$0xff] %v17738_v25  ;;  %v17761_v25 = vld [vmem:[#allocation53_spill] sm:$0xff] }
0x1385   : > { %5149 = vmatpush1.bf16.msra.mxu0 %v15538_v13  ;;  %5108 = vmatpush1.bf16.msra.mxu1 %v15862_v11  ;;  %v11911_v13 = vsel %vm15893_vm10, 1.0, %v17625_v50 }
0x1386   : > { %5150 = vmatprep.subr.bf16.mxu0 %v15546_v2  ;;  %5109 = vmatprep.subr.bf16.mxu1 %v15868_v23  ;;  %4733 = vst.msk [vmem:[#allocation6 + $0x4] sm:$0x3] %vm2255_vm8, %v11911_v13  ;;  %v3607_v2 = vrot.slane %v15643_v57, %v17685_v1 }
0x1389   : > { %5151 = vmatpush1.bf16.msra.mxu0 %v15544_v36  ;;  %5110 = vmatpush1.bf16.msra.mxu1 %v15866_v27  ;;  %v3599_v36 = vrot.slane %v15643_v57, %v14993_v60 }
0x138a   : > { %5152 = vmatprep.subr.bf16.mxu0 %v15549_v56  ;;  %5111 = vmatprep.subr.bf16.mxu1 %v15871_v30  ;;  %v3603_v56 = vrot.slane %v15643_v57, %v17686_v29 }
0x138d   : > { %5153 = vmatpush1.bf16.msra.mxu0 %v15555_v51  ;;  %5112 = vmatpush1.bf16.msra.mxu1 %v15875_v40  ;;  %v17740_v51 = vld [vmem:[#allocation93_spill] sm:$0xff] }
0x138e   : > { %5154 = vmatprep.subr.bf16.mxu0 %v15558_v52  ;;  %5113 = vmatprep.subr.bf16.mxu1 %v15878_v33  ;;  %v3611_v52 = vrot.slane %v15643_v57, %v17740_v51 }
0x1390   : > { %v3979_v19 = vadd.f32 %v15647_v54, %v3611_v52 }
0x1391   : > { %5155 = vmatpush1.bf16.msra.mxu0 %v15563_v53  ;;  %5114 = vmatpush1.bf16.msra.mxu1 %v15881_v14  ;;  %v3899_v53 = vadd.f32 %v15639_v5, %v3599_v36 }
0x1392   : > { %5156 = vmatprep.subr.bf16.mxu0 %v15566_v41  ;;  %5115 = vmatprep.subr.bf16.mxu1 %v15884_v0  ;;  %v3940_v41 = vadd.f32 %v15641_v21, %v3607_v2 }
0x1395   : > { %5157 = vmatpush1.bf16.msra.mxu0 %v15571_v24  ;;  %5116 = vmatpush1.bf16.msra.mxu1 %v15887_v4  ;;  %v3938_v24 = vadd.f32 %v15637_v15, %v3603_v56 }
0x1396   : > { %12540 = vmatprep.subr.bf16.mxu0 %v17625_v50  ;;  %5183 = vmatprep.subr.bf16.mxu1 %v15890_v18 }
0x144b   : > { %v4651_v34 = vpop.f32.mrb[48].mxu1  ;;  %v4692_v26 = vpop.f32.mrb[32].mxu0 }
0x144c   : > { %v4699_v42 = vadd.f32 %v4651_v34, %v3899_v53  ;;  %v4701_v39 = vadd.f32 %v4692_v26, %v3940_v41  ;;  %v4653_v59 = vpop.f32.mrb[49].mxu1  ;;  %v4694_v22 = vpop.f32.mrb[33].mxu0 }
0x144d   : > { %v4700_v43 = vadd.f32 %v4653_v59, %v3938_v24  ;;  %v4702_v49 = vadd.f32 %v4694_v22, %v3979_v19  ;;  %v4655_v38 = vpop.f32.mrb[50].mxu1  ;;  %v4696_v3 = vpop.f32.mrb[34].mxu0  ;;  %v15921_v59 = vld [vmem:[#allocation20 + $0x10] ss:$24 sps:$4 sm:$0xff]  }
0x144e   : > { %v11908_v63 = vmul.f32 -1.442695, %v4699_v42  ;;  %v4656_v57 = vpop.f32.mrb[51].mxu1  ;;  %v4697_v16 = vpop.f32.mrb[35].mxu0  ;;  %v15930_v38 = vld [vmem:[#allocation20 + $0x44] ss:$24 sps:$4 sm:$0xff]  }
0x144f   : > { %v11909_v5 = vmul.f32 -1.442695, %v4700_v43  ;;  %v11910_v21 = vmul.f32 -1.442695, %v4702_v49  ;;  %v15937_v3 = vld [vmem:[#allocation20 + $0x74] ss:$24 sps:$4 sm:$0xff]  }
0x1450   : > { %13639 = vpow2.f32 %v11908_v63  ;;  %v15947_v63 = vld [vmem:[#allocation20 + $0xa4] ss:$24 sps:$4 sm:$0xff]   ;;  %v15950_v57 = vld [vmem:[#allocation20 + $0xa0] ss:$24 sps:$4 sm:$0xff]   ;;  %v15953_v16 = vld [vmem:[#allocation20 + $0xd4] ss:$24 sps:$4 sm:$0xff]  }
0x1451   : > { %13641 = vpow2.f32 %v11909_v5  ;;  %17741 = vst [vmem:[#allocation99_spill] sm:$0xff] %v15953_v16  ;;  %v15956_v5 = vld [vmem:[#allocation20 + $0xd0] ss:$24 sps:$4 sm:$0xff]  }
0x1452   : > { %13643 = vpow2.f32 %v11910_v21  ;;  %17742 = vst [vmem:[#allocation100_spill] sm:$0xff] %v15956_v5  ;;  %v15959_v21 = vld [vmem:[#allocation20 + $0x104] ss:$24 sps:$4 sm:$0xff]  }
0x1453   : > { %13645 = vtanh.f32 %v4701_v39  ;;  %17743 = vst [vmem:[#allocation101_spill] sm:$0xff] %v15959_v21 }
0x145a   : > { %v13640_v15 = vpop.eup %13639 }
0x145b   : > { %v13642_v6 = vpop.eup %13641  ;;  %v4706_v54 = vadd.f32 1.0, %v13640_v15  ;;  %v15962_v15 = vld [vmem:[#allocation20 + $0x100] ss:$24 sps:$4 sm:$0xff]  }
0x145c   : > { %v4712_v13 = vadd.f32 1.0, %v13642_v6  ;;  %v13644_v36 = vpop.eup %13643  ;;  %17744 = vst [vmem:[#allocation102_spill] sm:$0xff] %v15962_v15  ;;  %v15965_v6 = vld [vmem:[#allocation20 + $0x134] ss:$24 sps:$4 sm:$0xff]  }
0x145d   : > { %13647 = vrcp.f32 %v4706_v54  ;;  %v13646_v2 = vpop.eup %13645  ;;  %v4719_v41 = vadd.f32 1.0, %v13644_v36  ;;  %17745 = vst [vmem:[#allocation103_spill] sm:$0xff] %v15965_v6  ;;  %v15968_v54 = vld [vmem:[#allocation20 + $0x130] ss:$24 sps:$4 sm:$0xff]   ;;  %v15974_v36 = vld [vmem:[#allocation20 + $0x160] ss:$24 sps:$4 sm:$0xff]  }
0x145e   : > { %13649 = vrcp.f32 %v4712_v13  ;;  %17746 = vst [vmem:[#allocation104_spill] sm:$0xff] %v15968_v54  ;;  %v15971_v13 = vld [vmem:[#allocation20 + $0x164] ss:$24 sps:$4 sm:$0xff]   ;;  %17748 = vst [vmem:[#allocation106_spill] sm:$0xff] %v15974_v36 }
0x145f   : > { %13651 = vrcp.f32 %v4719_v41  ;;  %17747 = vst [vmem:[#allocation105_spill] sm:$0xff] %v15971_v13 }
0x1467   : > { %v13648_v56 = vpop.eup %13647 }
0x1468   : > { %v13650_v52 = vpop.eup %13649  ;;  %v4723_v53 = vmul.f32 %v13648_v56, %v13646_v2  ;;  %v17750_v2 = vld [vmem:[#allocation81_spill] sm:$0xff]  ;;  %v17752_v56 = vld [vmem:[#allocation86_spill] sm:$0xff] }
0x1469   : > { %v4722_v24 = vmul.f32 %v13650_v52, %v15605_v61  ;;  %v13652_v26 = vpop.eup %13651 }
0x146b   : > { %v4724_v19 = vadd.f32 %v4723_v53, %v4722_v24 }
0x146d   : > { %13653 = vtanh.f32 %v4724_v19  ;;  %v15919_v34 = vsel %vm15893_vm10, %v4724_v19, %v15605_v61  ;;  %v15933_v61 = vld [vmem:[#allocation20 + $0x40] ss:$24 sps:$4 sm:$0xff]  }
0x1477   : > { %v13654_v42 = vpop.eup %13653 }
0x1478   : > { %v4726_v39 = vmul.f32 %v13654_v42, %v13652_v26  ;;  %v16004_v26 = vld [vmem:[#allocation21] sm:$0x3f] }
0x1479   : > { %v17757_v42 = vld [vmem:[#allocation50_spill] sm:$0xff] }
0x147a   : > { %v4727_v22 = vpack.c.bf16 %v4726_v39, %v4726_v39  ;;  %v15926_v43 = vsel %vm15893_vm10, %v4726_v39, %v15610_v44  ;;  %v15944_v44 = vld [vmem:[#allocation20 + $0x70] ss:$24 sps:$4 sm:$0xff]   ;;  %v4854_v39 = vrot.slane %v16004_v26, %v17757_v42 }
0x147b   : > { %v4780_v49 = vpack.c.bf16 %v15926_v43, %v15926_v43 }
0x147c   : > { %4729 = vst [vmem:[#allocation5 + $0x2] sm:$0x1] %v4727_v22 }
0x147d   : > { %5134 = vmatmul.mubr.bf16.vlgmr.msra.gmra.mrb[52].mxu1 %v4780_v49  ;;  %5175 = vmatmul.mubr.bf16.vlgmr.msra.gmra.mrb[36].mxu0 %v4780_v49 }
0x147e   : > { %5184 = vmatpush1.bf16.msra.mxu1 %v15921_v59  ;;  %5215 = vmatprep.mubr.bf16.mxu1 %v17623_v10 }
0x147f   : > { %5185 = vmatprep.subr.bf16.mxu1 %v15930_v38  ;;  %12541 = vmatpush3.bf16.msra.mxu0 %v15068_v17 }
0x1480   : > { %12542 = vmatprep.mubr.msk.bf16.mxu0 %vm14371_vm4, %v17625_v50  ;;  %12546 = vmatprep.subr.bf16.mxu0 %v17625_v50 }
0x1482   : > { %5186 = vmatpush1.bf16.msra.mxu1 %v15933_v61 }
0x1483   : > { %5187 = vmatprep.subr.bf16.mxu1 %v15937_v3 }
0x1486   : > { %5188 = vmatpush1.bf16.msra.mxu1 %v15944_v44 }
0x1487   : > { %5189 = vmatprep.subr.bf16.mxu1 %v15947_v63 }
0x148a   : > { %5190 = vmatpush1.bf16.msra.mxu1 %v15950_v57 }
0x148b   : > { %5191 = vmatprep.subr.bf16.mxu1 %v15953_v16 }
0x148e   : > { %5192 = vmatpush1.bf16.msra.mxu1 %v15956_v5 }
0x148f   : > { %5193 = vmatprep.subr.bf16.mxu1 %v15959_v21 }
0x1492   : > { %5194 = vmatpush1.bf16.msra.mxu1 %v15962_v15 }
0x1493   : > { %5195 = vmatprep.subr.bf16.mxu1 %v15965_v6 }
0x1496   : > { %5196 = vmatpush1.bf16.msra.mxu1 %v15968_v54 }
0x1497   : > { %5197 = vmatprep.subr.bf16.mxu1 %v15971_v13  ;;  %v16017_v13 = vld [vmem:[#allocation23] ss:$0 sm:$0xff] }
0x1498   : > { %17762 = vst [vmem:[#allocation107_spill] sm:$0xff] %v16017_v13 }
0x149a   : > { %5198 = vmatpush1.bf16.msra.mxu1 %v15974_v36 }
0x149b   : > { %5772 = vmatprep.subr.bf16.mxu1 %v15696_v12  ;;  %v17749_v12 = vld [vmem:[#allocation82_spill] sm:$0xff] }
0x149d   : > { %5216 = vmatmul.mubr.bf16.vlgmr.msra.gmra.mrb[56].mxu1 %v4780_v49 }
0x149e   : > { %5773 = vmatpush1.bf16.msra.mxu1 %v15694_v62  ;;  %5804 = vmatprep.mubr.bf16.mxu1 %v17623_v10  ;;  %v17751_v62 = vld [vmem:[#allocation79_spill] sm:$0xff] }
0x149f   : > { %5774 = vmatprep.subr.bf16.mxu1 %v15702_v55  ;;  %v17753_v55 = vld [vmem:[#allocation87_spill] sm:$0xff] }
0x14a2   : > { %5775 = vmatpush1.bf16.msra.mxu1 %v15700_v7  ;;  %v17754_v7 = vld [vmem:[#allocation89_spill] sm:$0xff] }
0x14a3   : > { %5776 = vmatprep.subr.bf16.mxu1 %v15708_v35  ;;  %v17755_v35 = vld [vmem:[#allocation95_spill] sm:$0xff] }
0x14a6   : > { %5777 = vmatpush1.bf16.msra.mxu1 %v15706_v9  ;;  %v17756_v9 = vld [vmem:[#allocation97_spill] sm:$0xff] }
0x14a7   : > { %5778 = vmatprep.subr.bf16.mxu1 %v15714_v37 }
0x14aa   : > { %5779 = vmatpush1.bf16.msra.mxu1 %v15712_v58 }
0x14ab   : > { %5780 = vmatprep.subr.bf16.mxu1 %v15762_v32 }
0x14ae   : > { %5781 = vmatpush1.bf16.msra.mxu1 %v17749_v12 }
0x14af   : > { %5782 = vmatprep.subr.bf16.mxu1 %v17750_v2 }
0x14b2   : > { %5783 = vmatpush1.bf16.msra.mxu1 %v17751_v62 }
0x14b3   : > { %5784 = vmatprep.subr.bf16.mxu1 %v17752_v56  ;;  %v17758_v56 = vld [vmem:[#allocation51_spill] sm:$0xff] }
0x14b6   : > { %5785 = vmatpush1.bf16.msra.mxu1 %v17753_v55 }
0x14b7   : > { %5786 = vmatprep.subr.bf16.mxu1 %v17754_v7 }
0x14ba   : > { %5787 = vmatpush1.bf16.msra.mxu1 %v17755_v35 }
0x14bb   : > { %5897 = vmatprep.subr.bf16.mxu1 %v17756_v9 }
0x1550   : > { %v15996_v37 = vpop.f32.mrb[52].mxu1  ;;  %v15998_v58 = vpop.f32.mrb[36].mxu0 }
0x1551   : > { %v16000_v32 = vpop.f32.mrb[53].mxu1  ;;  %v16002_v52 = vpop.f32.mrb[37].mxu0 }
0x1552   : > { %v5139_v53 = vpop.f32.mrb[54].mxu1  ;;  %v5180_v41 = vpop.f32.mrb[38].mxu0 }
0x1553   : > { %v5140_v24 = vpop.f32.mrb[55].mxu1  ;;  %v5181_v19 = vpop.f32.mrb[39].mxu0  ;;  %v17759_v53 = vld [vmem:[#allocation52_spill] sm:$0xff] }
0x1554   : > { %v17760_v24 = vld [vmem:[#allocation54_spill] sm:$0xff] }
0x1570   : > { %v16008_v22 = vpop.f32.mrb[56].mxu1 }
0x1571   : > { %v5219_v49 = vpop.f32.mrb[57].mxu1 }
0x1572   : > { %v5220_v12 = vadd.f32 %v5219_v49, %v4854_v39  ;;  %v5221_v2 = vpop.f32.mrb[58].mxu1 }
0x1573   : > { %v5222_v62 = vpop.f32.mrb[59].mxu1  ;;  %v17763_v2 = vld [vmem:[#allocation55_spill] sm:$0xff] }
0x1574   : > { %v5231_v55 = vrot.slane %v5220_v12, %v17758_v56 }
0x1576   : > { %v5232_v7 = vcombine.high %v5231_v55, %v5231_v55  ;;  %v5239_v35 = vrot.slane %v5231_v55, %v17758_v56 }
0x1578   : > { %v5246_v9 = vrot.slane %v5232_v7, %v17758_v56  ;;  %v5250_v41 = vrot.slane %v5239_v35, %v17759_v53  ;;  %v17764_v7 = vld [vmem:[#allocation56_spill] sm:$0xff] }
0x157a   : > { %v5258_v19 = vadd.f32 %v5250_v41, %v17760_v24  ;;  %v5257_v36 = vadd.f32 %v5250_v41, %v17761_v25  ;;  %v5254_v42 = vrot.slane %v5246_v9, %v17759_v53 }
0x157c   : > { %v5262_v39 = vmax.f32 %v5258_v19, 0.0  ;;  %v5261_v49 = vmax.f32 %v5257_v36, 0.0  ;;  %v5259_v62 = vadd.f32 %v5254_v42, %v17763_v2  ;;  %v5260_v56 = vadd.f32 %v5254_v42, %v17764_v7  ;;  %v17765_v2 = vld [vmem:[#allocation57_spill] sm:$0xff] }
0x157e   : > { %v5273_v12 = vmul.f32 %v16017_v13, %v5262_v39  ;;  %v5272_v55 = vmul.f32 %v16017_v13, %v5261_v49  ;;  %v5263_v54 = vmax.f32 %v5259_v62, 0.0  ;;  %v5264_v41 = vmax.f32 %v5260_v56, 0.0  ;;  %v17766_v39 = vld [vmem:[#allocation58_spill] sm:$0xff] }
0x1580   : > { %5278 = vadd.xlane.f32.xlu1 %v5273_v12  ;;  %5276 = vadd.xlane.f32.xlu0 %v5272_v55  ;;  %v5274_v35 = vmul.f32 %v16017_v13, %v5263_v54  ;;  %v5275_v9 = vmul.f32 %v16017_v13, %v5264_v41 }
0x1584   : > { %5280 = vadd.xlane.f32.xlu1 %v5274_v35 }
0x1588   : > { %5282 = vadd.xlane.f32.xlu1 %v5275_v9 }
0x160d   : > { %v5279_v19 = vpop.xlane.xlu1 %5278  ;;  %v5277_v36 = vpop.xlane.xlu0 %5276 }
0x160e   : > { %v5295_v24 = vrot.slane %v5279_v19, %v17765_v2  ;;  %v5291_v6 = vrot.slane %v5277_v36, %v17766_v39 }
0x1610   : > { %v5296_v12 = vsel %vm1565_vm1, %v5295_v24, %v5291_v6 }
0x1611   : > { %v5281_v25 = vpop.xlane.xlu1 %5280 }
0x1612   : > { %v5300_v62 = vrot.slane %v5281_v25, %v17766_v39 }
0x1615   : > { %v5283_v49 = vpop.xlane.xlu1 %5282 }
0x1616   : > { %v5304_v42 = vrot.slane %v5283_v49, %v17765_v2 }
0x1618   : > { %v5305_v54 = vsel %vm1565_vm1, %v5304_v42, %v5300_v62 }
0x1619   : > { %v5306_v56 = vsel %vm1576_vm2, %v5305_v54, %v5296_v12 }
0x161a   : > { %v5308_v55 = vsel %vm17536_vm3, %v5306_v56, -inf }
0x161b   : > { %5309 = vmax.xlane.f32.xlu1 %v5308_v55 }
0x16a8   : > { %v5310_v35 = vpop.xlane.xlu1 %5309 }
0x16a9   : > { %v5315_v41 = vrot.slane %v5310_v35, %v17759_v53  ;;  %v5319_v9 = vrot.slane %v5310_v35, %v14993_v60 }
0x16ab   : > { %v5322_v7 = vsub.f32 %v5277_v36, %v5315_v41  ;;  %v5323_v13 = vsub.f32 %v5279_v19, %v5315_v41  ;;  %v5324_v15 = vsub.f32 %v5281_v25, %v5319_v9  ;;  %v5325_v16 = vsub.f32 %v5283_v49, %v5319_v9 }
0x16ad   : > { %v5326_v21 = vmul.f32 1.442695, %v5322_v7  ;;  %v5328_v5 = vmul.f32 1.442695, %v5323_v13  ;;  %v5330_v6 = vmul.f32 1.442695, %v5324_v15 }
0x16ae   : > { %v5332_v24 = vmul.f32 1.442695, %v5325_v16 }
0x16af   : > { %13655 = vpow2.f32 %v5326_v21 }
0x16b0   : > { %13657 = vpow2.f32 %v5328_v5 }
0x16b1   : > { %13659 = vpow2.f32 %v5330_v6 }
0x16b2   : > { %13661 = vpow2.f32 %v5332_v24 }
0x16b9   : > { %v13656_v62 = vpop.eup %13655 }
0x16ba   : > { %v13658_v42 = vpop.eup %13657  ;;  %5339 = vperm.xlu1 %12922, %v13656_v62  }
0x16bb   : > { %5342 = vperm.xlu0 %12923, %v13658_v42   ;;  %v13660_v12 = vpop.eup %13659 }
0x16bc   : > { %v13662_v54 = vpop.eup %13661 }
0x16be   : > { %5345 = vperm.xlu1 %12922, %v13660_v12  }
0x16c2   : > { %5348 = vperm.xlu1 %12922, %v13662_v54  }
0x1739   : > { %v5340_v36 = vpop.permute.xlu1 %5339 }
0x173a   : > { %v5343_v19 = vpop.permute.xlu0 %5342  ;;  %v5353_v21 = vrot.slane %v5340_v36, %v17766_v39 }
0x173b   : > { %v5357_v13 = vrot.slane %v5343_v19, %v17765_v2 }
0x173d   : > { %v5346_v25 = vpop.permute.xlu1 %5345  ;;  %v5358_v7 = vsel %vm1565_vm1, %v5357_v13, %v5353_v21 }
0x173e   : > { %v5362_v5 = vrot.slane %v5346_v25, %v17766_v39 }
0x1741   : > { %v5349_v15 = vpop.permute.xlu1 %5348 }
0x1742   : > { %v5366_v16 = vrot.slane %v5349_v15, %v17765_v2 }
0x1744   : > { %v5367_v49 = vsel %vm1565_vm1, %v5366_v16, %v5362_v5 }
0x1745   : > { %v5368_v56 = vsel %vm1576_vm2, %v5367_v49, %v5358_v7 }
0x1746   : > { %v5370_v55 = vsel %vm17536_vm3, %v5368_v56, 0.0 }
0x1747   : > { %5371 = vadd.xlane.f32.xlu0 %v5370_v55 }
0x17d4   : > { %v5372_v35 = vpop.xlane.xlu0 %5371 }
0x17d5   : > { %v5377_v41 = vrot.slane %v5372_v35, %v17759_v53  ;;  %v5381_v9 = vrot.slane %v5372_v35, %v14993_v60 }
0x17d7   : > { %13663 = vrcp.f32 %v5377_v41  ;;  %v17771_v41 = vld [vmem:[#allocation67_spill] sm:$0xff] }
0x17d8   : > { %13665 = vrcp.f32 %v5381_v9 }
0x17e1   : > { %v13664_v6 = vpop.eup %13663 }
0x17e2   : > { %v16045_v24 = vmul.f32 %v13664_v6, %v13656_v62  ;;  %v16047_v36 = vmul.f32 %v13664_v6, %v13658_v42  ;;  %v13666_v19 = vpop.eup %13665  ;;  %v17772_v6 = vld [vmem:[#allocation73_spill] sm:$0xff] }
0x17e3   : > { %v16051_v21 = vmul.f32 %v13666_v19, %v13660_v12  ;;  %v16053_v15 = vmul.f32 %v13666_v19, %v13662_v54 }
0x17e4   : > { %17767 = vst [vmem:[#allocation82_spill] sm:$0xff] %v16045_v24  ;;  %17768 = vst [vmem:[#allocation81_spill] sm:$0xff] %v16047_v36  ;;  %v5390_v25 = vpack.c.bf16 %v16047_v36, %v16045_v24 }
0x17e5   : > { %17769 = vst [vmem:[#allocation79_spill] sm:$0xff] %v16051_v21  ;;  %17770 = vst [vmem:[#allocation86_spill] sm:$0xff] %v16053_v15  ;;  %v5391_v16 = vpack.c.bf16 %v16053_v15, %v16051_v21 }
0x17e6   : > { %v5393_v13 = vunpack.c.l.b16 %v5390_v25  ;;  %v5394_v5 = vunpack.c.h.b16 %v5390_v25 }
0x17e7   : > { %v5455_v7 = vunpack.c.l.b16 %v5391_v16  ;;  %v5456_v62 = vunpack.c.h.b16 %v5391_v16  ;;  %v17773_v16 = vld [vmem:[#allocation65_spill] sm:$0xff] }
0x17e8   : > { %5396 = vperm.xlu1 %12922, %v5393_v13  }
0x17ec   : > { %5399 = vperm.xlu1 %12922, %v5394_v5  }
0x17f0   : > { %5458 = vperm.xlu1 %12922, %v5455_v7   ;;  %v17774_v7 = vld [vmem:[#allocation72_spill] sm:$0xff] }
0x17f4   : > { %5461 = vperm.xlu1 %12922, %v5456_v62   ;;  %v17775_v62 = vld [vmem:[#allocation71_spill] sm:$0xff] }
0x1867   : > { %v5397_v42 = vpop.permute.xlu1 %5396 }
0x1868   : > { %v5404_v56 = vrot.slane %v5397_v42, %v17766_v39  ;;  %v17776_v42 = vld [vmem:[#allocation76_spill] sm:$0xff] }
0x186b   : > { %v5400_v49 = vpop.permute.xlu1 %5399 }
0x186c   : > { %v5408_v55 = vrot.slane %v5400_v49, %v17765_v2  ;;  %v17777_v49 = vld [vmem:[#allocation70_spill] sm:$0xff] }
0x186e   : > { %v5409_v12 = vsel %vm1565_vm1, %v5408_v55, %v5404_v56  ;;  %v17778_v56 = vld [vmem:[#allocation77_spill] sm:$0xff]  ;;  %v17779_v55 = vld [vmem:[#allocation75_spill] sm:$0xff] }
0x186f   : > { %v5410_v54 = vpack.c.b16 %v5409_v12, %v5409_v12  ;;  %v5459_v35 = vpop.permute.xlu1 %5458  ;;  %v17780_v12 = vld [vmem:[#allocation80_spill] sm:$0xff] }
0x1870   : > { %v5466_v19 = vrot.slane %v5459_v35, %v17766_v39  ;;  %v17782_v35 = vld [vmem:[#allocation84_spill] sm:$0xff] }
0x1871   : > { %12543 = vmatmul.mubr.msk.bf16.vlgmr.msra.gmra.mrb[40].mxu0 %vm1689_vm5, %v5410_v54  ;;  %v17781_v54 = vld [vmem:[#allocation74_spill] sm:$0xff] }
0x1872   : > { %12547 = vmatpush3.bf16.msra.mxu0 %v17771_v41  ;;  %12548 = vmatprep.mubr.msk.bf16.mxu0 %vm14371_vm4, %v17625_v50 }
0x1873   : > { %v5462_v9 = vpop.permute.xlu1 %5461  ;;  %5731 = vmatprep.subr.bf16.mxu0 %v17772_v6  ;;  %v17784_v6 = vld [vmem:[#allocation83_spill] sm:$0xff] }
0x1874   : > { %v5470_v25 = vrot.slane %v5462_v9, %v17765_v2  ;;  %v17783_v9 = vld [vmem:[#allocation78_spill] sm:$0xff] }
0x1876   : > { %v5471_v13 = vsel %vm1565_vm1, %v5470_v25, %v5466_v19  ;;  %v17785_v19 = vld [vmem:[#allocation85_spill] sm:$0xff]  ;;  %v17786_v25 = vld [vmem:[#allocation88_spill] sm:$0xff] }
0x1877   : > { %v5472_v5 = vpack.c.b16 %v5471_v13, %v5471_v13  ;;  %v17787_v13 = vld [vmem:[#allocation94_spill] sm:$0xff] }
0x1879   : > { %12549 = vmatmul.mubr.msk.bf16.vlgmr.msra.gmra.mrb[44].mxu0 %vm1689_vm5, %v5472_v5  ;;  %v17788_v5 = vld [vmem:[#allocation96_spill] sm:$0xff] }
0x187a   : > { %5732 = vmatpush1.bf16.msra.mxu0 %v17773_v16  ;;  %5763 = vmatprep.mubr.bf16.mxu0 %v17623_v10  ;;  %v4834_v16 = vrot.slane %v16004_v26, %v17759_v53 }
0x187b   : > { %5733 = vmatprep.subr.bf16.mxu0 %v17774_v7 }
0x187c   : > { %v5136_v7 = vadd.f32 %v15996_v37, %v4834_v16  ;;  %v11965_v16 = vld [vmem:[%s14878_s4 + $0x3] sm:$0x1] }
0x187e   : > { %5734 = vmatpush1.bf16.msra.mxu0 %v17775_v62  ;;  %v11964_v62 = vmul.f32 -1.442695, %v5136_v7  ;;  %v16122_v7 = vld [vmem:[#allocation20 + $0x38] ss:$24 sps:$4 sm:$0xff]  }
0x187f   : > { %5735 = vmatprep.subr.bf16.mxu0 %v17776_v42 }
0x1880   : > { %13667 = vpow2.f32 %v11964_v62  ;;  %v16127_v62 = vld [vmem:[#allocation20 + $0x64] ss:$24 sps:$4 sm:$0xff]  }
0x1882   : > { %5736 = vmatpush1.bf16.msra.mxu0 %v17777_v49 }
0x1883   : > { %5737 = vmatprep.subr.bf16.mxu0 %v17778_v56 }
0x1886   : > { %5738 = vmatpush1.bf16.msra.mxu0 %v17779_v55 }
0x1887   : > { %5739 = vmatprep.subr.bf16.mxu0 %v17780_v12 }
0x188a   : > { %5740 = vmatpush1.bf16.msra.mxu0 %v17781_v54  ;;  %v13668_v42 = vpop.eup %13667 }
0x188b   : > { %5741 = vmatprep.subr.bf16.mxu0 %v17782_v35  ;;  %v5519_v49 = vadd.f32 1.0, %v13668_v42  ;;  %v16129_v42 = vld [vmem:[#allocation20 + $0x60] ss:$24 sps:$4 sm:$0xff]  }
0x188d   : > { %13669 = vrcp.f32 %v5519_v49  ;;  %v16131_v49 = vld [vmem:[#allocation20 + $0x6c] ss:$24 sps:$4 sm:$0xff]  }
0x188e   : > { %5742 = vmatpush1.bf16.msra.mxu0 %v17783_v9 }
0x188f   : > { %5743 = vmatprep.subr.bf16.mxu0 %v17784_v6 }
0x1892   : > { %5744 = vmatpush1.bf16.msra.mxu0 %v17785_v19 }
0x1893   : > { %5745 = vmatprep.subr.bf16.mxu0 %v17786_v25 }
0x1896   : > { %5746 = vmatpush1.bf16.msra.mxu0 %v17787_v13 }
0x1897   : > { %5856 = vmatprep.subr.bf16.mxu0 %v17788_v5  ;;  %v13670_v25 = vpop.eup %13669 }
0x1944   : > { %v5448_v56 = vpop.f32.mrb[40].mxu0 }
0x1945   : > { %v12544_v55 = vpop.f32.mrb[41].mxu0 }
0x1946   : > { %v5451_v12 = vpop.f32.mrb[42].mxu0  ;;  %v16140_v55 = vld [vmem:[#allocation20 + $0x9c] ss:$24 sps:$4 sm:$0xff]  }
0x1947   : > { %v12545_v54 = vpop.f32.mrb[43].mxu0  ;;  %v16142_v12 = vld [vmem:[#allocation20 + $0x98] ss:$24 sps:$4 sm:$0xff]  }
0x1948   : > { %v16148_v54 = vld [vmem:[#allocation20 + $0xc8] ss:$24 sps:$4 sm:$0xff]  }
0x194c   : > { %v5510_v35 = vpop.f32.mrb[44].mxu0 }
0x194d   : > { %v5524_v9 = vrot.slane %v5510_v35, 7  ;;  %v12550_v6 = vpop.f32.mrb[45].mxu0  ;;  %v16150_v35 = vld [vmem:[#allocation20 + $0xcc] ss:$24 sps:$4 sm:$0xff]  }
0x194e   : > { %v5513_v19 = vpop.f32.mrb[46].mxu0  ;;  %v16175_v6 = vld [vmem:[#allocation20 + $0x158] ss:$24 sps:$4 sm:$0xff]  }
0x194f   : > { %v5525_v13 = vsel %vm1576_vm2, %v5524_v9, %v5448_v56  ;;  %v12551_v5 = vpop.f32.mrb[47].mxu0  ;;  %v16134_v56 = vld [vmem:[#allocation20 + $0x68] ss:$24 sps:$4 sm:$0xff]   ;;  %v16153_v9 = vld [vmem:[#allocation20 + $0xfc] ss:$24 sps:$4 sm:$0xff]   ;;  %17789 = vst [vmem:[#allocation87_spill] sm:$0xff] %v16175_v6  ;;  %v4850_v19 = vrot.slane %v16004_v26, %v17740_v51 }
0x1950   : > { %v5527_v15 = vmul.f32 %v13670_v25, %v5525_v13 }
0x1951   : > { %v5218_v5 = vadd.f32 %v16008_v22, %v4850_v19 }
0x1952   : > { %v5538_v37 = vpack.c.bf16 %v5527_v15, %v5527_v15  ;;  %v16119_v15 = vld [vmem:[#allocation20 + $0x3c] ss:$24 sps:$4 sm:$0xff]  }
0x1954   : > { %5764 = vmatmul.mubr.bf16.vlgmr.msra.gmra.mrb[48].mxu0 %v5538_v37  ;;  %5805 = vmatmul.mubr.bf16.vlgmr.msra.gmra.mrb[60].mxu1 %v5538_v37 }
0x1955   : > { %5857 = vmatpush1.bf16.msra.mxu0 %v15812_v8  ;;  %5898 = vmatpush1.bf16.msra.mxu1 %v15814_v47  ;;  %v16103_v8 = vld [vmem:[#allocation20 + $0x4] ss:$24 sps:$4 sm:$0xff]   ;;  %v16105_v47 = vld [vmem:[#allocation20] ss:$24 sps:$4 sm:$0xff]  }
0x1956   : > { %5858 = vmatprep.subr.bf16.mxu0 %v15816_v45  ;;  %5899 = vmatprep.subr.bf16.mxu1 %v15818_v46  ;;  %v16107_v45 = vld [vmem:[#allocation20 + $0xc] ss:$24 sps:$4 sm:$0xff]   ;;  %v16110_v46 = vld [vmem:[#allocation20 + $0x8] ss:$24 sps:$4 sm:$0xff]  }
0x1957   : > { %5888 = vmatprep.mubr.bf16.mxu0 %v17623_v10  ;;  %5929 = vmatprep.mubr.bf16.mxu1 %v17623_v10 }
0x1959   : > { %5859 = vmatpush1.bf16.msra.mxu0 %v15821_v28  ;;  %5900 = vmatpush1.bf16.msra.mxu1 %v15824_v48  ;;  %v16115_v28 = vld [vmem:[#allocation20 + $0x34] ss:$24 sps:$4 sm:$0xff]   ;;  %v16117_v48 = vld [vmem:[#allocation20 + $0x30] ss:$24 sps:$4 sm:$0xff]  }
0x195a   : > { %6340 = vmatprep.subr.bf16.mxu0 %v16103_v8  ;;  %6381 = vmatprep.subr.bf16.mxu1 %v16107_v45 }
0x1960   : > { %12006 = vmatmul.mubr.msk.bf16.vlgmr.msra.gmra.mrb[48].mxu0 %vm17535_vm6, %v11965_v16  ;;  %12007 = vmatmul.mubr.msk.bf16.vlgmr.msra.gmra.mrb[60].mxu1 %vm17535_vm6, %v11965_v16 }
0x1961   : > { %6372 = vmatprep.mubr.bf16.mxu0 %v17623_v10  ;;  %6413 = vmatprep.mubr.bf16.mxu1 %v17623_v10 }
0x1962   : > { %6341 = vmatpush1.bf16.msra.mxu0 %v16105_v47  ;;  %6382 = vmatpush1.bf16.msra.mxu1 %v16110_v46 }
0x1963   : > { %6342 = vmatprep.subr.bf16.mxu0 %v16115_v28  ;;  %6383 = vmatprep.subr.bf16.mxu1 %v16119_v15 }
0x1966   : > { %6343 = vmatpush1.bf16.msra.mxu0 %v16117_v48  ;;  %6384 = vmatpush1.bf16.msra.mxu1 %v16122_v7 }
0x1967   : > { %6344 = vmatprep.subr.bf16.mxu0 %v16127_v62  ;;  %6385 = vmatprep.subr.bf16.mxu1 %v16131_v49 }
0x196a   : > { %6345 = vmatpush1.bf16.msra.mxu0 %v16129_v42  ;;  %6386 = vmatpush1.bf16.msra.mxu1 %v16134_v56 }
0x196b   : > { %6346 = vmatprep.subr.bf16.mxu0 %v15860_v31  ;;  %6387 = vmatprep.subr.bf16.mxu1 %v16140_v55  ;;  %v16159_v31 = vld [vmem:[#allocation20 + $0xf8] ss:$24 sps:$4 sm:$0xff]  }
0x196e   : > { %6347 = vmatpush1.bf16.msra.mxu0 %v15862_v11  ;;  %6388 = vmatpush1.bf16.msra.mxu1 %v16142_v12  ;;  %v16162_v11 = vld [vmem:[#allocation20 + $0x12c] ss:$24 sps:$4 sm:$0xff]  }
0x196f   : > { %6348 = vmatprep.subr.bf16.mxu0 %v15868_v23  ;;  %6389 = vmatprep.subr.bf16.mxu1 %v16150_v35  ;;  %v16167_v23 = vld [vmem:[#allocation20 + $0x128] ss:$24 sps:$4 sm:$0xff]  }
0x1972   : > { %6349 = vmatpush1.bf16.msra.mxu0 %v15866_v27  ;;  %6390 = vmatpush1.bf16.msra.mxu1 %v16148_v54  ;;  %v16170_v27 = vld [vmem:[#allocation20 + $0x15c] ss:$24 sps:$4 sm:$0xff]  }
0x1973   : > { %6350 = vmatprep.subr.bf16.mxu0 %v15871_v30  ;;  %6391 = vmatprep.subr.bf16.mxu1 %v16153_v9  ;;  %v4778_v30 = vstv %s4777_s21  ;;  %s9733_s21 = sld [smem:[#allocation8 + %s9732_s26]]  ;;  %s14372_s26 = smov [#allocation31]  }
0x1974   : > { %vm16179_vm11 = vcmp.lt.s32.totalorder %v17680_v20, %v4778_v30 }
0x1976   : > { %6351 = vmatpush1.bf16.msra.mxu0 %v15875_v40  ;;  %6392 = vmatpush1.bf16.msra.mxu1 %v16159_v31  ;;  %v17790_v40 = vmov 0 }
0x1977   : > { %6352 = vmatprep.subr.bf16.mxu0 %v15878_v33  ;;  %6393 = vmatprep.subr.bf16.mxu1 %v16162_v11  ;;  %v17791_v40 = vsel %vm16179_vm11, 4294967295, %v17790_v40  ;;  %v12011_v33 = vsel %vm16179_vm11, 1.0, %v17625_v50 }
0x1978   : > { %17792 = vst [vmem:[#allocation89_spill] sm:$0xff] %v17791_v40  ;;  %5972 = vst.msk [vmem:[#allocation6 + $0x6] sm:$0x3] %vm2255_vm8, %v12011_v33 }
0x197a   : > { %6353 = vmatpush1.bf16.msra.mxu0 %v15881_v14  ;;  %6394 = vmatpush1.bf16.msra.mxu1 %v16167_v23  ;;  %v4838_v14 = vrot.slane %v16004_v26, %v14993_v60 }
0x197b   : > { %6354 = vmatprep.subr.bf16.mxu0 %v15884_v0  ;;  %6395 = vmatprep.subr.bf16.mxu1 %v16170_v27  ;;  %v4846_v0 = vrot.slane %v16004_v26, %v17685_v1 }
0x197c   : > { %v5138_v25 = vadd.f32 %v16000_v32, %v4838_v14 }
0x197e   : > { %6355 = vmatpush1.bf16.msra.mxu0 %v15887_v4  ;;  %6396 = vmatpush1.bf16.msra.mxu1 %v16175_v6  ;;  %v4842_v4 = vrot.slane %v16004_v26, %v17686_v29 }
0x197f   : > { %6422 = vmatprep.subr.bf16.mxu0 %v15890_v18  ;;  %12552 = vmatprep.subr.bf16.mxu1 %v17625_v50  ;;  %v5179_v18 = vadd.f32 %v16002_v52, %v4846_v0 }
0x1980   : > { %v5177_v13 = vadd.f32 %v15998_v58, %v4842_v4 }
0x1a33   : > { %v5890_v37 = vpop.f32.mrb[48].mxu0  ;;  %v5931_v16 = vpop.f32.mrb[60].mxu1 }
0x1a34   : > { %v5938_v30 = vadd.f32 %v5890_v37, %v5138_v25  ;;  %v5940_v33 = vadd.f32 %v5931_v16, %v5179_v18  ;;  %v5892_v36 = vpop.f32.mrb[49].mxu0  ;;  %v5933_v21 = vpop.f32.mrb[61].mxu1  ;;  %v17797_v16 = vld [vmem:[#allocation103_spill] sm:$0xff] }
0x1a35   : > { %v5939_v24 = vadd.f32 %v5892_v36, %v5177_v13  ;;  %v5941_v1 = vadd.f32 %v5933_v21, %v5218_v5  ;;  %v5894_v29 = vpop.f32.mrb[50].mxu0  ;;  %v5935_v20 = vpop.f32.mrb[62].mxu1 }
0x1a36   : > { %v12008_v6 = vmul.f32 -1.442695, %v5938_v30  ;;  %v5895_v26 = vpop.f32.mrb[51].mxu0  ;;  %v5936_v51 = vpop.f32.mrb[63].mxu1  ;;  %v17798_v30 = vld [vmem:[#allocation104_spill] sm:$0xff] }
0x1a37   : > { %v12009_v32 = vmul.f32 -1.442695, %v5939_v24  ;;  %v12010_v52 = vmul.f32 -1.442695, %v5941_v1 }
0x1a38   : > { %13671 = vpow2.f32 %v12008_v6 }
0x1a39   : > { %13673 = vpow2.f32 %v12009_v32 }
0x1a3a   : > { %13675 = vpow2.f32 %v12010_v52 }
0x1a3b   : > { %13677 = vtanh.f32 %v5940_v33 }
0x1a42   : > { %v13672_v58 = vpop.eup %13671 }
0x1a43   : > { %v13674_v14 = vpop.eup %13673  ;;  %v5945_v22 = vadd.f32 1.0, %v13672_v58 }
0x1a44   : > { %v5951_v0 = vadd.f32 1.0, %v13674_v14  ;;  %v13676_v4 = vpop.eup %13675  ;;  %v16245_v14 = vld [vmem:[#allocation21] sm:$0x3f] }
0x1a45   : > { %13679 = vrcp.f32 %v5945_v22  ;;  %v13678_v36 = vpop.eup %13677  ;;  %v5958_v19 = vadd.f32 1.0, %v13676_v4  ;;  %v17801_v22 = vld [vmem:[#allocation50_spill] sm:$0xff] }
0x1a46   : > { %13681 = vrcp.f32 %v5951_v0  ;;  %v6093_v0 = vrot.slane %v16245_v14, %v17801_v22 }
0x1a47   : > { %13683 = vrcp.f32 %v5958_v19  ;;  %v17802_v19 = vld [vmem:[#allocation51_spill] sm:$0xff] }
0x1a4f   : > { %v13680_v21 = vpop.eup %13679 }
0x1a50   : > { %v13682_v29 = vpop.eup %13681  ;;  %v5962_v20 = vmul.f32 %v13680_v21, %v13678_v36 }
0x1a51   : > { %v5961_v51 = vmul.f32 %v13682_v29, %v15919_v34  ;;  %v13684_v6 = vpop.eup %13683 }
0x1a53   : > { %v5963_v24 = vadd.f32 %v5962_v20, %v5961_v51 }
0x1a55   : > { %13685 = vtanh.f32 %v5963_v24  ;;  %v16207_v1 = vsel %vm16179_vm11, %v5963_v24, %v15919_v34  ;;  %v17793_v34 = vld [vmem:[#allocation99_spill] sm:$0xff] }
0x1a5f   : > { %v13686_v25 = vpop.eup %13685 }
0x1a60   : > { %v5965_v18 = vmul.f32 %v13686_v25, %v13684_v6 }
0x1a62   : > { %v5966_v13 = vpack.c.bf16 %v5965_v18, %v5965_v18  ;;  %v16212_v5 = vsel %vm16179_vm11, %v5965_v18, %v15926_v43  ;;  %v17795_v43 = vld [vmem:[#allocation101_spill] sm:$0xff] }
0x1a63   : > { %v6019_v37 = vpack.c.bf16 %v16212_v5, %v16212_v5 }
0x1a64   : > { %5968 = vst [vmem:[#allocation5 + $0x3] sm:$0x1] %v5966_v13  ;;  %v17803_v13 = vld [vmem:[#allocation54_spill] sm:$0xff] }
0x1a65   : > { %6373 = vmatmul.mubr.bf16.vlgmr.msra.gmra.mrb[52].mxu0 %v6019_v37  ;;  %6414 = vmatmul.mubr.bf16.vlgmr.msra.gmra.mrb[64].mxu1 %v6019_v37 }
0x1a66   : > { %6423 = vmatpush1.bf16.msra.mxu0 %v15921_v59  ;;  %6454 = vmatprep.mubr.bf16.mxu0 %v17623_v10  ;;  %v17794_v59 = vld [vmem:[#allocation100_spill] sm:$0xff] }
0x1a67   : > { %6424 = vmatprep.subr.bf16.mxu0 %v15930_v38  ;;  %12553 = vmatpush3.bf16.msra.mxu1 %v15068_v17  ;;  %v17796_v38 = vld [vmem:[#allocation102_spill] sm:$0xff] }
0x1a68   : > { %12554 = vmatprep.mubr.msk.bf16.mxu1 %vm14371_vm4, %v17625_v50  ;;  %12558 = vmatprep.subr.bf16.mxu1 %v17625_v50 }
0x1a6a   : > { %6425 = vmatpush1.bf16.msra.mxu0 %v15933_v61  ;;  %v17799_v61 = vld [vmem:[#allocation105_spill] sm:$0xff] }
0x1a6b   : > { %6426 = vmatprep.subr.bf16.mxu0 %v15937_v3  ;;  %v17800_v3 = vld [vmem:[#allocation106_spill] sm:$0xff] }
0x1a6e   : > { %6427 = vmatpush1.bf16.msra.mxu0 %v15944_v44 }
0x1a6f   : > { %6428 = vmatprep.subr.bf16.mxu0 %v15947_v63 }
0x1a72   : > { %6429 = vmatpush1.bf16.msra.mxu0 %v15950_v57 }
0x1a73   : > { %6430 = vmatprep.subr.bf16.mxu0 %v17793_v34  ;;  %v17804_v34 = vld [vmem:[#allocation53_spill] sm:$0xff] }
0x1a76   : > { %6431 = vmatpush1.bf16.msra.mxu0 %v17794_v59 }
0x1a77   : > { %6432 = vmatprep.subr.bf16.mxu0 %v17795_v43 }
0x1a7a   : > { %6433 = vmatpush1.bf16.msra.mxu0 %v17796_v38 }
0x1a7b   : > { %6434 = vmatprep.subr.bf16.mxu0 %v17797_v16 }
0x1a7e   : > { %6435 = vmatpush1.bf16.msra.mxu0 %v17798_v30  ;;  %v17805_v30 = vld [vmem:[#allocation55_spill] sm:$0xff] }
0x1a7f   : > { %6436 = vmatprep.subr.bf16.mxu0 %v17799_v61 }
0x1a82   : > { %6437 = vmatpush1.bf16.msra.mxu0 %v17800_v3  ;;  %v17806_v3 = vld [vmem:[#allocation107_spill] sm:$0xff] }
0x1a85   : > { %6455 = vmatmul.mubr.bf16.vlgmr.msra.gmra.mrb[56].mxu0 %v6019_v37 }
0x1a86   : > { %7043 = vmatprep.mubr.bf16.mxu0 %v17623_v10 }
0x1b38   : > { %v16237_v44 = vpop.f32.mrb[52].mxu0  ;;  %v16239_v63 = vpop.f32.mrb[64].mxu1 }
0x1b39   : > { %v16241_v57 = vpop.f32.mrb[53].mxu0  ;;  %v16243_v33 = vpop.f32.mrb[65].mxu1 }
0x1b3a   : > { %v6378_v26 = vpop.f32.mrb[54].mxu0  ;;  %v6419_v32 = vpop.f32.mrb[66].mxu1 }
0x1b3b   : > { %v6379_v52 = vpop.f32.mrb[55].mxu0  ;;  %v6420_v58 = vpop.f32.mrb[67].mxu1 }
0x1b3c   : > { %v17807_v58 = vld [vmem:[#allocation56_spill] sm:$0xff] }
0x1b58   : > { %v16249_v4 = vpop.f32.mrb[56].mxu0 }
0x1b59   : > { %v6458_v36 = vpop.f32.mrb[57].mxu0 }
0x1b5a   : > { %v6459_v21 = vadd.f32 %v6458_v36, %v6093_v0  ;;  %v6460_v29 = vpop.f32.mrb[58].mxu0 }
0x1b5b   : > { %v6461_v20 = vpop.f32.mrb[59].mxu0 }
0x1b5c   : > { %v6470_v51 = vrot.slane %v6459_v21, %v17802_v19 }
0x1b5e   : > { %v6471_v24 = vcombine.high %v6470_v51, %v6470_v51  ;;  %v6478_v6 = vrot.slane %v6470_v51, %v17802_v19 }
0x1b60   : > { %v6485_v25 = vrot.slane %v6471_v24, %v17802_v19  ;;  %v6489_v18 = vrot.slane %v6478_v6, %v17759_v53 }
0x1b62   : > { %v6497_v37 = vadd.f32 %v6489_v18, %v17803_v13  ;;  %v6496_v59 = vadd.f32 %v6489_v18, %v17804_v34  ;;  %v6493_v43 = vrot.slane %v6485_v25, %v17759_v53 }
0x1b64   : > { %v6501_v38 = vmax.f32 %v6497_v37, 0.0  ;;  %v6500_v16 = vmax.f32 %v6496_v59, 0.0  ;;  %v6498_v61 = vadd.f32 %v6493_v43, %v17805_v30  ;;  %v6499_v0 = vadd.f32 %v6493_v43, %v17807_v58 }
0x1b66   : > { %v6512_v26 = vmul.f32 %v17806_v3, %v6501_v38  ;;  %v6511_v32 = vmul.f32 %v17806_v3, %v6500_v16  ;;  %v6502_v52 = vmax.f32 %v6498_v61, 0.0  ;;  %v6503_v21 = vmax.f32 %v6499_v0, 0.0 }
0x1b68   : > { %6517 = vadd.xlane.f32.xlu0 %v6512_v26  ;;  %6515 = vadd.xlane.f32.xlu1 %v6511_v32  ;;  %v6513_v36 = vmul.f32 %v17806_v3, %v6502_v52  ;;  %v6514_v29 = vmul.f32 %v17806_v3, %v6503_v21 }
0x1b6c   : > { %6519 = vadd.xlane.f32.xlu0 %v6513_v36 }
0x1b70   : > { %6521 = vadd.xlane.f32.xlu0 %v6514_v29 }
0x1bf5   : > { %v6518_v20 = vpop.xlane.xlu0 %6517  ;;  %v6516_v51 = vpop.xlane.xlu1 %6515 }
0x1bf6   : > { %v6534_v6 = vrot.slane %v6518_v20, %v17765_v2  ;;  %v6530_v25 = vrot.slane %v6516_v51, %v17766_v39 }
0x1bf8   : > { %v6535_v43 = vsel %vm1565_vm1, %v6534_v6, %v6530_v25 }
0x1bf9   : > { %v6520_v24 = vpop.xlane.xlu0 %6519 }
0x1bfa   : > { %v6539_v37 = vrot.slane %v6520_v24, %v17766_v39 }
0x1bfd   : > { %v6522_v18 = vpop.xlane.xlu0 %6521 }
0x1bfe   : > { %v6543_v59 = vrot.slane %v6522_v18, %v17765_v2 }
0x1c00   : > { %v6544_v38 = vsel %vm1565_vm1, %v6543_v59, %v6539_v37 }
0x1c01   : > { %v6545_v16 = vsel %vm1576_vm2, %v6544_v38, %v6535_v43 }
0x1c02   : > { %v6547_v61 = vsel %vm17536_vm3, %v6545_v16, -inf }
0x1c03   : > { %6548 = vmax.xlane.f32.xlu0 %v6547_v61 }
0x1c90   : > { %v6549_v3 = vpop.xlane.xlu0 %6548 }
0x1c91   : > { %v6554_v26 = vrot.slane %v6549_v3, %v17759_v53  ;;  %v6558_v32 = vrot.slane %v6549_v3, %v14993_v60 }
0x1c93   : > { %v6561_v52 = vsub.f32 %v6516_v51, %v6554_v26  ;;  %v6562_v0 = vsub.f32 %v6518_v20, %v6554_v26  ;;  %v6563_v36 = vsub.f32 %v6520_v24, %v6558_v32  ;;  %v6564_v21 = vsub.f32 %v6522_v18, %v6558_v32 }
0x1c95   : > { %v6565_v29 = vmul.f32 1.442695, %v6561_v52  ;;  %v6567_v40 = vmul.f32 1.442695, %v6562_v0  ;;  %v6569_v6 = vmul.f32 1.442695, %v6563_v36 }
0x1c96   : > { %v6571_v25 = vmul.f32 1.442695, %v6564_v21 }
0x1c97   : > { %13687 = vpow2.f32 %v6565_v29 }
0x1c98   : > { %13689 = vpow2.f32 %v6567_v40 }
0x1c99   : > { %13691 = vpow2.f32 %v6569_v6 }
0x1c9a   : > { %13693 = vpow2.f32 %v6571_v25 }
0x1ca1   : > { %v13688_v37 = vpop.eup %13687 }
0x1ca2   : > { %v13690_v59 = vpop.eup %13689  ;;  %6578 = vperm.xlu0 %12923, %v13688_v37  }
0x1ca3   : > { %6581 = vperm.xlu1 %12922, %v13690_v59   ;;  %v13692_v43 = vpop.eup %13691 }
0x1ca4   : > { %v13694_v38 = vpop.eup %13693 }
0x1ca6   : > { %6584 = vperm.xlu0 %12923, %v13692_v43  }
0x1ca7   : > { %6587 = vperm.xlu1 %12922, %v13694_v38  }
0x1d21   : > { %v6579_v51 = vpop.permute.xlu0 %6578 }
0x1d22   : > { %v6582_v20 = vpop.permute.xlu1 %6581  ;;  %v6592_v18 = vrot.slane %v6579_v51, %v17766_v39 }
0x1d23   : > { %v6596_v24 = vrot.slane %v6582_v20, %v17765_v2 }
0x1d25   : > { %v6585_v16 = vpop.permute.xlu0 %6584  ;;  %v6597_v26 = vsel %vm1565_vm1, %v6596_v24, %v6592_v18 }
0x1d26   : > { %v6588_v61 = vpop.permute.xlu1 %6587  ;;  %v6601_v40 = vrot.slane %v6585_v16, %v17766_v39 }
0x1d27   : > { %v6605_v3 = vrot.slane %v6588_v61, %v17765_v2 }
0x1d29   : > { %v6606_v32 = vsel %vm1565_vm1, %v6605_v3, %v6601_v40 }
0x1d2a   : > { %v6607_v52 = vsel %vm1576_vm2, %v6606_v32, %v6597_v26  ;;  %v16298_v32 = vld [vmem:[#allocation26 + $0xc] ss:$16 sps:$4 sm:$0xff]  }
0x1d2b   : > { %v6609_v0 = vsel %vm17536_vm3, %v6607_v52, 0.0  ;;  %7011 = vmatprep.subr.bf16.mxu0 %v16298_v32  ;;  %v16308_v52 = vld [vmem:[#allocation26 + $0x48] ss:$16 sps:$4 sm:$0xff]  }
0x1d2c   : > { %6610 = vadd.xlane.f32.xlu0 %v6609_v0  ;;  %v16310_v0 = vld [vmem:[#allocation26 + $0x4c] ss:$16 sps:$4 sm:$0xff]  }
0x1db9   : > { %v6611_v36 = vpop.xlane.xlu0 %6610 }
0x1dba   : > { %v6616_v21 = vrot.slane %v6611_v36, %v17759_v53  ;;  %v6620_v29 = vrot.slane %v6611_v36, %v14993_v60  ;;  %v16314_v36 = vld [vmem:[#allocation26 + $0x68] ss:$16 sps:$4 sm:$0xff]  }
0x1dbc   : > { %13695 = vrcp.f32 %v6616_v21  ;;  %v16316_v21 = vld [vmem:[#allocation26 + $0x6c] ss:$16 sps:$4 sm:$0xff]  }
0x1dbd   : > { %13697 = vrcp.f32 %v6620_v29 }
0x1dc6   : > { %v13696_v6 = vpop.eup %13695 }
0x1dc7   : > { %v16284_v25 = vmul.f32 %v13696_v6, %v13688_v37  ;;  %v16286_v51 = vmul.f32 %v13696_v6, %v13690_v59  ;;  %v13698_v20 = vpop.eup %13697  ;;  %v16296_v59 = vld [vmem:[#allocation26 + $0x8] ss:$16 sps:$4 sm:$0xff]  }
0x1dc8   : > { %v16290_v16 = vmul.f32 %v13698_v20, %v13692_v43  ;;  %v16292_v61 = vmul.f32 %v13698_v20, %v13694_v38  ;;  %7012 = vmatpush1.bf16.msra.mxu0 %v16296_v59  ;;  %v16302_v43 = vld [vmem:[#allocation26 + $0x28] ss:$16 sps:$4 sm:$0xff]   ;;  %v16304_v38 = vld [vmem:[#allocation26 + $0x2c] ss:$16 sps:$4 sm:$0xff]  }
0x1dc9   : > { %17808 = vst [vmem:[#allocation95_spill] sm:$0xff] %v16284_v25  ;;  %17809 = vst [vmem:[#allocation97_spill] sm:$0xff] %v16286_v51  ;;  %v6629_v24 = vpack.c.bf16 %v16286_v51, %v16284_v25  ;;  %7013 = vmatprep.subr.bf16.mxu0 %v16304_v38  ;;  %v16362_v51 = vld [vmem:[#allocation26 + $0x88] ss:$16 sps:$4 sm:$0xff]   ;;  %v16368_v25 = vld [vmem:[#allocation26 + $0xa0] ss:$16 sps:$4 sm:$0xff]  }
0x1dca   : > { %17810 = vst [vmem:[#allocation73_spill] sm:$0xff] %v16290_v16  ;;  %17811 = vst [vmem:[#allocation65_spill] sm:$0xff] %v16292_v61  ;;  %v6630_v3 = vpack.c.bf16 %v16292_v61, %v16290_v16  ;;  %v16335_v61 = vld [vmem:[#allocation26 + $0x24] ss:$16 sps:$4 sm:$0xff]   ;;  %v16364_v16 = vld [vmem:[#allocation26 + $0x8c] ss:$16 sps:$4 sm:$0xff]  }
0x1dcb   : > { %v6632_v18 = vunpack.c.l.b16 %v6629_v24  ;;  %v6633_v40 = vunpack.c.h.b16 %v6629_v24  ;;  %17814 = vst [vmem:[#allocation76_spill] sm:$0xff] %v16335_v61  ;;  %17822 = vst [vmem:[#allocation83_spill] sm:$0xff] %v16368_v25 }
0x1dcc   : > { %v6694_v26 = vunpack.c.l.b16 %v6630_v3  ;;  %v6695_v37 = vunpack.c.h.b16 %v6630_v3  ;;  %7014 = vmatpush1.bf16.msra.mxu0 %v16302_v43 }
0x1dcd   : > { %6635 = vperm.xlu1 %12922, %v6632_v18   ;;  %7015 = vmatprep.subr.bf16.mxu0 %v16310_v0 }
0x1dd0   : > { %7016 = vmatpush1.bf16.msra.mxu0 %v16308_v52 }
0x1dd1   : > { %6638 = vperm.xlu1 %12922, %v6633_v40   ;;  %7017 = vmatprep.subr.bf16.mxu0 %v16316_v21 }
0x1dd4   : > { %7018 = vmatpush1.bf16.msra.mxu0 %v16314_v36 }
0x1dd5   : > { %6697 = vperm.xlu1 %12922, %v6694_v26   ;;  %v16323_v26 = vld [vmem:[#allocation26 + $0x4] ss:$16 sps:$4 sm:$0xff]   ;;  %7019 = vmatprep.subr.bf16.mxu0 %v16364_v16 }
0x1dd6   : > { %17812 = vst [vmem:[#allocation72_spill] sm:$0xff] %v16323_v26 }
0x1dd8   : > { %7020 = vmatpush1.bf16.msra.mxu0 %v16362_v51 }
0x1dd9   : > { %6700 = vperm.xlu1 %12922, %v6695_v37  }
0x1e4c   : > { %v6636_v29 = vpop.permute.xlu1 %6635 }
0x1e4d   : > { %v6643_v20 = vrot.slane %v6636_v29, %v17766_v39 }
0x1e50   : > { %v6639_v6 = vpop.permute.xlu1 %6638 }
0x1e51   : > { %v6647_v24 = vrot.slane %v6639_v6, %v17765_v2 }
0x1e53   : > { %v6648_v18 = vsel %vm1565_vm1, %v6647_v24, %v6643_v20  ;;  %v16333_v24 = vld [vmem:[#allocation26] ss:$16 sps:$4 sm:$0xff]  }
0x1e54   : > { %v6649_v40 = vpack.c.b16 %v6648_v18, %v6648_v18  ;;  %v6698_v3 = vpop.permute.xlu1 %6697  ;;  %17813 = vst [vmem:[#allocation71_spill] sm:$0xff] %v16333_v24 }
0x1e55   : > { %v6705_v29 = vrot.slane %v6698_v3, %v17766_v39  ;;  %v16343_v3 = vld [vmem:[#allocation26 + $0x44] ss:$16 sps:$4 sm:$0xff]  }
0x1e56   : > { %12555 = vmatmul.mubr.msk.bf16.vlgmr.msra.gmra.mrb[68].mxu1 %vm1689_vm5, %v6649_v40  ;;  %v16339_v40 = vld [vmem:[#allocation26 + $0x20] ss:$16 sps:$4 sm:$0xff]   ;;  %17816 = vst [vmem:[#allocation77_spill] sm:$0xff] %v16343_v3 }
0x1e57   : > { %12559 = vmatpush3.bf16.msra.mxu1 %v17771_v41  ;;  %12560 = vmatprep.mubr.msk.bf16.mxu1 %vm14371_vm4, %v17625_v50  ;;  %17815 = vst [vmem:[#allocation70_spill] sm:$0xff] %v16339_v40 }
0x1e58   : > { %v6701_v37 = vpop.permute.xlu1 %6700  ;;  %6970 = vmatprep.subr.bf16.mxu1 %v16323_v26  ;;  %v6073_v26 = vrot.slane %v16245_v14, %v17759_v53 }
0x1e59   : > { %v6709_v6 = vrot.slane %v6701_v37, %v17765_v2  ;;  %v16346_v37 = vld [vmem:[#allocation26 + $0x40] ss:$16 sps:$4 sm:$0xff]  }
0x1e5a   : > { %17817 = vst [vmem:[#allocation75_spill] sm:$0xff] %v16346_v37  ;;  %v6375_v41 = vadd.f32 %v16237_v44, %v6073_v26 }
0x1e5b   : > { %v6710_v20 = vsel %vm1565_vm1, %v6709_v6, %v6705_v29  ;;  %v16349_v29 = vld [vmem:[#allocation26 + $0x64] ss:$16 sps:$4 sm:$0xff]   ;;  %v16352_v6 = vld [vmem:[#allocation26 + $0x60] ss:$16 sps:$4 sm:$0xff]  }
0x1e5c   : > { %v6711_v18 = vpack.c.b16 %v6710_v20, %v6710_v20  ;;  %17818 = vst [vmem:[#allocation80_spill] sm:$0xff] %v16349_v29  ;;  %17819 = vst [vmem:[#allocation74_spill] sm:$0xff] %v16352_v6  ;;  %v16355_v20 = vld [vmem:[#allocation26 + $0x84] ss:$16 sps:$4 sm:$0xff]  }
0x1e5d   : > { %17820 = vst [vmem:[#allocation84_spill] sm:$0xff] %v16355_v20 }
0x1e5e   : > { %12561 = vmatmul.mubr.msk.bf16.vlgmr.msra.gmra.mrb[72].mxu1 %vm1689_vm5, %v6711_v18  ;;  %v16358_v18 = vld [vmem:[#allocation26 + $0x80] ss:$16 sps:$4 sm:$0xff]  }
0x1e5f   : > { %6971 = vmatpush1.bf16.msra.mxu1 %v16333_v24  ;;  %7002 = vmatprep.mubr.bf16.mxu1 %v17623_v10  ;;  %17821 = vst [vmem:[#allocation78_spill] sm:$0xff] %v16358_v18  ;;  %v16398_v24 = vld [vmem:[#allocation26 + $0xe8] ss:$16 sps:$4 sm:$0xff]  }
0x1e60   : > { %6972 = vmatprep.subr.bf16.mxu1 %v16335_v61  ;;  %v16396_v61 = vld [vmem:[#allocation26 + $0xe0] ss:$16 sps:$4 sm:$0xff]   ;;  %17830 = vst [vmem:[#allocation102_spill] sm:$0xff] %v16398_v24 }
0x1e61   : > { %17829 = vst [vmem:[#allocation101_spill] sm:$0xff] %v16396_v61 }
0x1e63   : > { %6973 = vmatpush1.bf16.msra.mxu1 %v16339_v40  ;;  %v16387_v40 = vld [vmem:[#allocation26 + $0xc8] ss:$16 sps:$4 sm:$0xff]  }
0x1e64   : > { %6974 = vmatprep.subr.bf16.mxu1 %v16343_v3  ;;  %v16376_v3 = vld [vmem:[#allocation26 + $0xc4] ss:$16 sps:$4 sm:$0xff]   ;;  %17826 = vst [vmem:[#allocation96_spill] sm:$0xff] %v16387_v40 }
0x1e65   : > { %17824 = vst [vmem:[#allocation88_spill] sm:$0xff] %v16376_v3 }
0x1e67   : > { %6975 = vmatpush1.bf16.msra.mxu1 %v16346_v37  ;;  %v16372_v37 = vld [vmem:[#allocation26 + $0xa8] ss:$16 sps:$4 sm:$0xff]  }
0x1e68   : > { %6976 = vmatprep.subr.bf16.mxu1 %v16349_v29  ;;  %v16370_v29 = vld [vmem:[#allocation26 + $0xa4] ss:$16 sps:$4 sm:$0xff]  }
0x1e69   : > { %17823 = vst [vmem:[#allocation85_spill] sm:$0xff] %v16370_v29 }
0x1e6b   : > { %6977 = vmatpush1.bf16.msra.mxu1 %v16352_v6  ;;  %v16374_v6 = vld [vmem:[#allocation26 + $0xac] ss:$16 sps:$4 sm:$0xff]  }
0x1e6c   : > { %6978 = vmatprep.subr.bf16.mxu1 %v16355_v20  ;;  %7021 = vmatprep.subr.bf16.mxu0 %v16374_v6  ;;  %v16385_v20 = vld [vmem:[#allocation26 + $0xcc] ss:$16 sps:$4 sm:$0xff]  }
0x1e6d   : > { %7022 = vmatpush1.bf16.msra.mxu0 %v16372_v37 }
0x1e6e   : > { %7023 = vmatprep.subr.bf16.mxu0 %v16385_v20 }
0x1e6f   : > { %6979 = vmatpush1.bf16.msra.mxu1 %v16358_v18  ;;  %v16381_v18 = vld [vmem:[#allocation26 + $0xc0] ss:$16 sps:$4 sm:$0xff]  }
0x1e70   : > { %6980 = vmatprep.subr.bf16.mxu1 %v16370_v29  ;;  %17825 = vst [vmem:[#allocation94_spill] sm:$0xff] %v16381_v18  ;;  %v16392_v29 = vld [vmem:[#allocation26 + $0xe4] ss:$16 sps:$4 sm:$0xff]  }
0x1e71   : > { %7024 = vmatpush1.bf16.msra.mxu0 %v16387_v40  ;;  %17827 = vst [vmem:[#allocation99_spill] sm:$0xff] %v16392_v29  ;;  %v16414_v40 = vld [vmem:[#allocation24] ss:$16 sps:$4 sm:$0xff]  }
0x1e73   : > { %6981 = vmatpush1.bf16.msra.mxu1 %v16368_v25  ;;  %v16394_v25 = vld [vmem:[#allocation26 + $0xec] ss:$16 sps:$4 sm:$0xff]  }
0x1e74   : > { %6982 = vmatprep.subr.bf16.mxu1 %v16376_v3  ;;  %17828 = vst [vmem:[#allocation100_spill] sm:$0xff] %v16394_v25  ;;  %7025 = vmatprep.subr.bf16.mxu0 %v16394_v25  ;;  %v16402_v3 = vld [vmem:[#allocation24 + $0x4] ss:$16 sps:$4 sm:$0xff]  }
0x1e75   : > { %17831 = vst [vmem:[#allocation103_spill] sm:$0xff] %v16402_v3  ;;  %7026 = vmatpush1.bf16.msra.mxu0 %v16398_v24 }
0x1e77   : > { %6983 = vmatpush1.bf16.msra.mxu1 %v16381_v18  ;;  %v16407_v18 = vld [vmem:[#allocation24 + $0xc] ss:$16 sps:$4 sm:$0xff]  }
0x1e78   : > { %6984 = vmatprep.subr.bf16.mxu1 %v16392_v29  ;;  %17832 = vst [vmem:[#allocation104_spill] sm:$0xff] %v16407_v18  ;;  %7136 = vmatprep.subr.bf16.mxu0 %v16407_v18  ;;  %v12064_v29 = vmul.f32 -1.442695, %v6375_v41  ;;  %v16416_v41 = vld [vmem:[#allocation24 + $0x8] ss:$16 sps:$4 sm:$0xff]  }
0x1e7a   : > { %13699 = vpow2.f32 %v12064_v29 }
0x1e7b   : > { %6985 = vmatpush1.bf16.msra.mxu1 %v16396_v61 }
0x1e7c   : > { %7095 = vmatprep.subr.bf16.mxu1 %v16402_v3 }
0x1e84   : > { %v13700_v39 = vpop.eup %13699 }
0x1e85   : > { %v6758_v2 = vadd.f32 1.0, %v13700_v39  ;;  %v16418_v39 = vld [vmem:[#allocation24 + $0x24] ss:$16 sps:$4 sm:$0xff]  }
0x1e87   : > { %13701 = vrcp.f32 %v6758_v2  ;;  %v16420_v2 = vld [vmem:[#allocation24 + $0x2c] ss:$16 sps:$4 sm:$0xff]  }
0x1e91   : > { %v13702_v24 = vpop.eup %13701 }
0x1f29   : > { %v6687_v58 = vpop.f32.mrb[68].mxu1 }
0x1f2a   : > { %v12556_v61 = vpop.f32.mrb[69].mxu1 }
0x1f2b   : > { %v6690_v30 = vpop.f32.mrb[70].mxu1 }
0x1f2c   : > { %v12557_v34 = vpop.f32.mrb[71].mxu1 }
0x1f31   : > { %v6749_v13 = vpop.f32.mrb[72].mxu1 }
0x1f32   : > { %v6763_v3 = vrot.slane %v6749_v13, 7  ;;  %v12562_v19 = vpop.f32.mrb[73].mxu1  ;;  %v17840_v13 = vld [vmem:[#allocation93_spill] sm:$0xff] }
0x1f33   : > { %v6752_v22 = vpop.f32.mrb[74].mxu1  ;;  %v16426_v19 = vld [vmem:[#allocation24 + $0x28] ss:$16 sps:$4 sm:$0xff]   ;;  %v6089_v34 = vrot.slane %v16245_v14, %v17840_v13 }
0x1f34   : > { %v6764_v18 = vsel %vm1576_vm2, %v6763_v3, %v6687_v58  ;;  %v12563_v25 = vpop.f32.mrb[75].mxu1  ;;  %v16423_v22 = vld [vmem:[#allocation24 + $0x20] ss:$16 sps:$4 sm:$0xff]  }
0x1f35   : > { %v6766_v53 = vmul.f32 %v13702_v24, %v6764_v18  ;;  %v6457_v61 = vadd.f32 %v16249_v4, %v6089_v34 }
0x1f37   : > { %v6777_v44 = vpack.c.bf16 %v6766_v53, %v6766_v53  ;;  %v12065_v53 = vld [vmem:[%s14878_s4 + $0x4] sm:$0x1] }
0x1f39   : > { %7003 = vmatmul.mubr.bf16.vlgmr.msra.gmra.mrb[76].mxu1 %v6777_v44  ;;  %7044 = vmatmul.mubr.bf16.vlgmr.msra.gmra.mrb[60].mxu0 %v6777_v44 }
0x1f3a   : > { %7096 = vmatpush1.bf16.msra.mxu1 %v16414_v40  ;;  %7137 = vmatpush1.bf16.msra.mxu0 %v16416_v41 }
0x1f3b   : > { %7097 = vmatprep.subr.bf16.mxu1 %v16418_v39  ;;  %7138 = vmatprep.subr.bf16.mxu0 %v16420_v2 }
0x1f3c   : > { %7127 = vmatprep.mubr.bf16.mxu1 %v17623_v10  ;;  %7168 = vmatprep.mubr.bf16.mxu0 %v17623_v10 }
0x1f3e   : > { %7098 = vmatpush1.bf16.msra.mxu1 %v16423_v22  ;;  %7139 = vmatpush1.bf16.msra.mxu0 %v16426_v19 }
0x1f3f   : > { %7579 = vmatprep.subr.bf16.mxu1 %v16103_v8  ;;  %7620 = vmatprep.subr.bf16.mxu0 %v16107_v45  ;;  %v17833_v8 = vld [vmem:[#allocation87_spill] sm:$0xff] }
0x1f40   : > { %v16464_v45 = vld [vmem:[#allocation20 + $0x90] ss:$24 sps:$4 sm:$0xff]  }
0x1f45   : > { %12106 = vmatmul.mubr.msk.bf16.vlgmr.msra.gmra.mrb[76].mxu1 %vm17535_vm6, %v12065_v53  ;;  %12107 = vmatmul.mubr.msk.bf16.vlgmr.msra.gmra.mrb[60].mxu0 %vm17535_vm6, %v12065_v53 }
0x1f46   : > { %7580 = vmatpush1.bf16.msra.mxu1 %v16105_v47  ;;  %7621 = vmatpush1.bf16.msra.mxu0 %v16110_v46  ;;  %v16462_v47 = vld [vmem:[#allocation20 + $0x94] ss:$24 sps:$4 sm:$0xff]   ;;  %v16468_v46 = vld [vmem:[#allocation20 + $0xc4] ss:$24 sps:$4 sm:$0xff]  }
0x1f47   : > { %7581 = vmatprep.subr.bf16.mxu1 %v16115_v28  ;;  %7622 = vmatprep.subr.bf16.mxu0 %v16119_v15  ;;  %v16470_v28 = vld [vmem:[#allocation20 + $0xc0] ss:$24 sps:$4 sm:$0xff]   ;;  %v16477_v15 = vld [vmem:[#allocation20 + $0xf0] ss:$24 sps:$4 sm:$0xff]  }
0x1f48   : > { %7611 = vmatprep.mubr.bf16.mxu1 %v17623_v10  ;;  %7652 = vmatprep.mubr.bf16.mxu0 %v17623_v10 }
0x1f4a   : > { %7582 = vmatpush1.bf16.msra.mxu1 %v16117_v48  ;;  %7623 = vmatpush1.bf16.msra.mxu0 %v16122_v7  ;;  %v16472_v48 = vld [vmem:[#allocation20 + $0xf4] ss:$24 sps:$4 sm:$0xff]   ;;  %v16480_v7 = vld [vmem:[#allocation20 + $0x124] ss:$24 sps:$4 sm:$0xff]  }
0x1f4b   : > { %7583 = vmatprep.subr.bf16.mxu1 %v16127_v62  ;;  %7624 = vmatprep.subr.bf16.mxu0 %v16131_v49  ;;  %v16483_v62 = vld [vmem:[#allocation20 + $0x120] ss:$24 sps:$4 sm:$0xff]   ;;  %v16489_v49 = vld [vmem:[#allocation20 + $0x150] ss:$24 sps:$4 sm:$0xff]  }
0x1f4e   : > { %7584 = vmatpush1.bf16.msra.mxu1 %v16129_v42  ;;  %7625 = vmatpush1.bf16.msra.mxu0 %v16134_v56  ;;  %v16486_v42 = vld [vmem:[#allocation20 + $0x154] ss:$24 sps:$4 sm:$0xff]  }
0x1f4f   : > { %7626 = vmatprep.subr.bf16.mxu0 %v16140_v55  ;;  %7585 = vmatprep.subr.bf16.mxu1 %v16462_v47  ;;  %v16492_v56 = vld [vmem:[#allocation20 + $0x14] ss:$24 sps:$4 sm:$0xff]   ;;  %v6017_v55 = vstv %s6016_s1 }
0x1f52   : > { %7627 = vmatpush1.bf16.msra.mxu0 %v16142_v12  ;;  %7586 = vmatpush1.bf16.msra.mxu1 %v16464_v45  ;;  %v17834_v12 = vld [vmem:[#allocation49_spill] sm:$0xff] }
0x1f53   : > { %7628 = vmatprep.subr.bf16.mxu0 %v16150_v35  ;;  %7587 = vmatprep.subr.bf16.mxu1 %v16468_v46  ;;  %vm16496_vm12 = vcmp.lt.s32.totalorder %v17834_v12, %v6017_v55 }
0x1f54   : > { %v12111_v35 = vsel %vm16496_vm12, 1.0, %v17625_v50 }
0x1f55   : > { %7211 = vst.msk [vmem:[#allocation6 + $0x8] sm:$0x3] %vm2255_vm8, %v12111_v35 }
0x1f56   : > { %7629 = vmatpush1.bf16.msra.mxu0 %v16148_v54  ;;  %7588 = vmatpush1.bf16.msra.mxu1 %v16470_v28  ;;  %v17835_v54 = vmov 0 }
0x1f57   : > { %7630 = vmatprep.subr.bf16.mxu0 %v16153_v9  ;;  %7589 = vmatprep.subr.bf16.mxu1 %v16472_v48  ;;  %v17836_v54 = vsel %vm16496_vm12, 4294967295, %v17835_v54  ;;  %v6077_v9 = vrot.slane %v16245_v14, %v14993_v60 }
0x1f58   : > { %17837 = vst [vmem:[#allocation105_spill] sm:$0xff] %v17836_v54 }
0x1f59   : > { %v6377_v30 = vadd.f32 %v16241_v57, %v6077_v9 }
0x1f5a   : > { %7631 = vmatpush1.bf16.msra.mxu0 %v16159_v31  ;;  %7590 = vmatpush1.bf16.msra.mxu1 %v16477_v15  ;;  %v17838_v31 = vld [vmem:[#allocation92_spill] sm:$0xff] }
0x1f5b   : > { %7632 = vmatprep.subr.bf16.mxu0 %v16162_v11  ;;  %7591 = vmatprep.subr.bf16.mxu1 %v16480_v7  ;;  %v6085_v11 = vrot.slane %v16245_v14, %v17838_v31 }
0x1f5d   : > { %v6418_v58 = vadd.f32 %v16243_v33, %v6085_v11 }
0x1f5e   : > { %7633 = vmatpush1.bf16.msra.mxu0 %v16167_v23  ;;  %7592 = vmatpush1.bf16.msra.mxu1 %v16483_v62  ;;  %v17839_v23 = vld [vmem:[#allocation91_spill] sm:$0xff] }
0x1f5f   : > { %7634 = vmatprep.subr.bf16.mxu0 %v16170_v27  ;;  %7593 = vmatprep.subr.bf16.mxu1 %v16486_v42  ;;  %v6081_v27 = vrot.slane %v16245_v14, %v17839_v23 }
0x1f61   : > { %v6416_v25 = vadd.f32 %v16239_v63, %v6081_v27 }
0x1f62   : > { %7635 = vmatpush1.bf16.msra.mxu0 %v17833_v8  ;;  %7594 = vmatpush1.bf16.msra.mxu1 %v16489_v49 }
0x1f63   : > { %12564 = vmatprep.subr.bf16.mxu0 %v17625_v50  ;;  %7661 = vmatprep.subr.bf16.mxu1 %v16492_v56 }
0x2018   : > { %v7129_v26 = vpop.f32.mrb[76].mxu1  ;;  %v7170_v24 = vpop.f32.mrb[60].mxu0 }
0x2019   : > { %v7177_v3 = vadd.f32 %v7129_v26, %v6377_v30  ;;  %v7179_v29 = vadd.f32 %v7170_v24, %v6418_v58  ;;  %v7131_v18 = vpop.f32.mrb[77].mxu1  ;;  %v7172_v44 = vpop.f32.mrb[61].mxu0 }
0x201a   : > { %v7178_v53 = vadd.f32 %v7131_v18, %v6416_v25  ;;  %v7180_v8 = vadd.f32 %v7172_v44, %v6457_v61  ;;  %v7133_v55 = vpop.f32.mrb[78].mxu1  ;;  %v7174_v35 = vpop.f32.mrb[62].mxu0  ;;  %v16523_v18 = vld [vmem:[#allocation20 + $0x10] ss:$24 sps:$4 sm:$0xff]  }
0x201b   : > { %v12108_v23 = vmul.f32 -1.442695, %v7177_v3  ;;  %v7134_v14 = vpop.f32.mrb[79].mxu1  ;;  %v7175_v13 = vpop.f32.mrb[63].mxu0  ;;  %v16532_v55 = vld [vmem:[#allocation20 + $0x44] ss:$24 sps:$4 sm:$0xff]  }
0x201c   : > { %v12109_v57 = vmul.f32 -1.442695, %v7178_v53  ;;  %v12110_v33 = vmul.f32 -1.442695, %v7180_v8  ;;  %v16539_v35 = vld [vmem:[#allocation20 + $0x74] ss:$24 sps:$4 sm:$0xff]  }
0x201d   : > { %13703 = vpow2.f32 %v12108_v23  ;;  %v16549_v14 = vld [vmem:[#allocation20 + $0xa4] ss:$24 sps:$4 sm:$0xff]  }
0x201e   : > { %13705 = vpow2.f32 %v12109_v57  ;;  %v16552_v57 = vld [vmem:[#allocation20 + $0xa0] ss:$24 sps:$4 sm:$0xff]  }
0x201f   : > { %13707 = vpow2.f32 %v12110_v33  ;;  %v16555_v33 = vld [vmem:[#allocation20 + $0xd4] ss:$24 sps:$4 sm:$0xff]  }
0x2020   : > { %13709 = vtanh.f32 %v7179_v29 }
0x2027   : > { %v13704_v63 = vpop.eup %13703 }
0x2028   : > { %v13706_v9 = vpop.eup %13705  ;;  %v7184_v4 = vadd.f32 1.0, %v13704_v63  ;;  %v16558_v63 = vld [vmem:[#allocation20 + $0xd0] ss:$24 sps:$4 sm:$0xff]  }
0x2029   : > { %v7190_v11 = vadd.f32 1.0, %v13706_v9  ;;  %v13708_v27 = vpop.eup %13707  ;;  %v16561_v9 = vld [vmem:[#allocation20 + $0x104] ss:$24 sps:$4 sm:$0xff]  }
0x202a   : > { %13711 = vrcp.f32 %v7184_v4  ;;  %v13710_v34 = vpop.eup %13709  ;;  %v7197_v61 = vadd.f32 1.0, %v13708_v27  ;;  %17841 = vst [vmem:[#allocation106_spill] sm:$0xff] %v16561_v9  ;;  %v16564_v4 = vld [vmem:[#allocation20 + $0x100] ss:$24 sps:$4 sm:$0xff]   ;;  %v16570_v27 = vld [vmem:[#allocation20 + $0x130] ss:$24 sps:$4 sm:$0xff]  }
0x202b   : > { %13713 = vrcp.f32 %v7190_v11  ;;  %17842 = vst [vmem:[#allocation107_spill] sm:$0xff] %v16564_v4  ;;  %v16567_v11 = vld [vmem:[#allocation20 + $0x134] ss:$24 sps:$4 sm:$0xff]   ;;  %17844 = vst [vmem:[#allocation112_spill] sm:$0xff] %v16570_v27 }
0x202c   : > { %13715 = vrcp.f32 %v7197_v61  ;;  %17843 = vst [vmem:[#allocation87_spill] sm:$0xff] %v16567_v11 }
0x2034   : > { %v13712_v30 = vpop.eup %13711 }
0x2035   : > { %v13714_v58 = vpop.eup %13713  ;;  %v7201_v25 = vmul.f32 %v13712_v30, %v13710_v34  ;;  %v16573_v34 = vld [vmem:[#allocation20 + $0x164] ss:$24 sps:$4 sm:$0xff]   ;;  %v16576_v30 = vld [vmem:[#allocation20 + $0x160] ss:$24 sps:$4 sm:$0xff]  }
0x2036   : > { %v7200_v13 = vmul.f32 %v13714_v58, %v16207_v1  ;;  %v13716_v24 = vpop.eup %13715  ;;  %17845 = vst [vmem:[#allocation113_spill] sm:$0xff] %v16573_v34  ;;  %17846 = vst [vmem:[#allocation114_spill] sm:$0xff] %v16576_v30  ;;  %v17851_v58 = vld [vmem:[#allocation50_spill] sm:$0xff] }
0x2038   : > { %v7202_v26 = vadd.f32 %v7201_v25, %v7200_v13 }
0x203a   : > { %13717 = vtanh.f32 %v7202_v26  ;;  %v16521_v23 = vsel %vm16496_vm12, %v7202_v26, %v16207_v1  ;;  %v16535_v1 = vld [vmem:[#allocation20 + $0x40] ss:$24 sps:$4 sm:$0xff]  }
0x2044   : > { %v13718_v3 = vpop.eup %13717 }
0x2045   : > { %v7204_v29 = vmul.f32 %v13718_v3, %v13716_v24 }
0x2047   : > { %v7205_v44 = vpack.c.bf16 %v7204_v29, %v7204_v29  ;;  %v16528_v53 = vsel %vm16496_vm12, %v7204_v29, %v16212_v5  ;;  %v16546_v5 = vld [vmem:[#allocation20 + $0x70] ss:$24 sps:$4 sm:$0xff]  }
0x2048   : > { %v7258_v8 = vpack.c.bf16 %v16528_v53, %v16528_v53  ;;  %v17852_v29 = vld [vmem:[#allocation51_spill] sm:$0xff] }
0x2049   : > { %7207 = vst [vmem:[#allocation5 + $0x4] sm:$0x1] %v7205_v44 }
0x204a   : > { %7612 = vmatmul.mubr.bf16.vlgmr.msra.gmra.mrb[80].mxu1 %v7258_v8  ;;  %7653 = vmatmul.mubr.bf16.vlgmr.msra.gmra.mrb[64].mxu0 %v7258_v8 }
0x204b   : > { %7662 = vmatpush1.bf16.msra.mxu1 %v16523_v18  ;;  %7693 = vmatprep.mubr.bf16.mxu1 %v17623_v10 }
0x204c   : > { %7663 = vmatprep.subr.bf16.mxu1 %v16532_v55  ;;  %12565 = vmatpush3.bf16.msra.mxu0 %v15068_v17 }
0x204d   : > { %12566 = vmatprep.mubr.msk.bf16.mxu0 %vm14371_vm4, %v17625_v50  ;;  %12570 = vmatprep.subr.bf16.mxu0 %v17625_v50 }
0x204f   : > { %7664 = vmatpush1.bf16.msra.mxu1 %v16535_v1 }
0x2050   : > { %7665 = vmatprep.subr.bf16.mxu1 %v16539_v35 }
0x2053   : > { %7666 = vmatpush1.bf16.msra.mxu1 %v16546_v5 }
0x2054   : > { %7667 = vmatprep.subr.bf16.mxu1 %v16549_v14 }
0x2057   : > { %7668 = vmatpush1.bf16.msra.mxu1 %v16552_v57 }
0x2058   : > { %7669 = vmatprep.subr.bf16.mxu1 %v16555_v33 }
0x205b   : > { %7670 = vmatpush1.bf16.msra.mxu1 %v16558_v63 }
0x205c   : > { %7671 = vmatprep.subr.bf16.mxu1 %v16561_v9 }
0x205f   : > { %7672 = vmatpush1.bf16.msra.mxu1 %v16564_v4 }
0x2060   : > { %7673 = vmatprep.subr.bf16.mxu1 %v16567_v11 }
0x2063   : > { %7674 = vmatpush1.bf16.msra.mxu1 %v16570_v27 }
0x2064   : > { %7675 = vmatprep.subr.bf16.mxu1 %v16573_v34 }
0x2067   : > { %7676 = vmatpush1.bf16.msra.mxu1 %v16576_v30 }
0x2068   : > { %8250 = vmatprep.subr.bf16.mxu1 %v16298_v32  ;;  %v17848_v32 = vld [vmem:[#allocation100_spill] sm:$0xff] }
0x206a   : > { %7694 = vmatmul.mubr.bf16.vlgmr.msra.gmra.mrb[84].mxu1 %v7258_v8 }
0x206b   : > { %8251 = vmatpush1.bf16.msra.mxu1 %v16296_v59  ;;  %8282 = vmatprep.mubr.bf16.mxu1 %v17623_v10  ;;  %v17847_v59 = vld [vmem:[#allocation96_spill] sm:$0xff] }
0x206c   : > { %8252 = vmatprep.subr.bf16.mxu1 %v16304_v38  ;;  %v17850_v38 = vld [vmem:[#allocation104_spill] sm:$0xff] }
0x206f   : > { %8253 = vmatpush1.bf16.msra.mxu1 %v16302_v43  ;;  %v17849_v43 = vld [vmem:[#allocation102_spill] sm:$0xff] }
0x2070   : > { %8254 = vmatprep.subr.bf16.mxu1 %v16310_v0 }
0x2073   : > { %8255 = vmatpush1.bf16.msra.mxu1 %v16308_v52 }
0x2074   : > { %8256 = vmatprep.subr.bf16.mxu1 %v16316_v21 }
0x2077   : > { %8257 = vmatpush1.bf16.msra.mxu1 %v16314_v36 }
0x2078   : > { %8258 = vmatprep.subr.bf16.mxu1 %v16364_v16 }
0x207b   : > { %8259 = vmatpush1.bf16.msra.mxu1 %v16362_v51 }
0x207c   : > { %8260 = vmatprep.subr.bf16.mxu1 %v16374_v6 }
0x207f   : > { %8261 = vmatpush1.bf16.msra.mxu1 %v16372_v37 }
0x2080   : > { %8262 = vmatprep.subr.bf16.mxu1 %v16385_v20  ;;  %v16606_v20 = vld [vmem:[#allocation21] sm:$0x3f] }
0x2081   : > { %v7332_v25 = vrot.slane %v16606_v20, %v17851_v58  ;;  %v16619_v58 = vld [vmem:[#allocation23] ss:$0 sm:$0xff] }
0x2082   : > { %17856 = vst [vmem:[#allocation96_spill] sm:$0xff] %v16619_v58 }
0x2083   : > { %8263 = vmatpush1.bf16.msra.mxu1 %v17847_v59 }
0x2084   : > { %8264 = vmatprep.subr.bf16.mxu1 %v17848_v32 }
0x2087   : > { %8265 = vmatpush1.bf16.msra.mxu1 %v17849_v43  ;;  %v17853_v43 = vld [vmem:[#allocation52_spill] sm:$0xff] }
0x2088   : > { %8375 = vmatprep.subr.bf16.mxu1 %v17850_v38 }
0x211d   : > { %v16598_v52 = vpop.f32.mrb[80].mxu1  ;;  %v16600_v0 = vpop.f32.mrb[64].mxu0 }
0x211e   : > { %v16602_v16 = vpop.f32.mrb[81].mxu1  ;;  %v16604_v51 = vpop.f32.mrb[65].mxu0 }
0x211f   : > { %v7617_v36 = vpop.f32.mrb[82].mxu1  ;;  %v7658_v21 = vpop.f32.mrb[66].mxu0 }
0x2120   : > { %v7618_v37 = vpop.f32.mrb[83].mxu1  ;;  %v7659_v6 = vpop.f32.mrb[67].mxu0  ;;  %v17854_v36 = vld [vmem:[#allocation54_spill] sm:$0xff] }
0x2121   : > { %v17855_v37 = vld [vmem:[#allocation53_spill] sm:$0xff] }
0x213d   : > { %v16610_v61 = vpop.f32.mrb[84].mxu1 }
0x213e   : > { %v7697_v13 = vpop.f32.mrb[85].mxu1 }
0x213f   : > { %v7698_v26 = vadd.f32 %v7697_v13, %v7332_v25  ;;  %v7699_v24 = vpop.f32.mrb[86].mxu1 }
0x2140   : > { %v7700_v3 = vpop.f32.mrb[87].mxu1  ;;  %v17857_v24 = vld [vmem:[#allocation55_spill] sm:$0xff] }
0x2141   : > { %v7709_v44 = vrot.slane %v7698_v26, %v17852_v29 }
0x2143   : > { %v7710_v8 = vcombine.high %v7709_v44, %v7709_v44  ;;  %v7717_v59 = vrot.slane %v7709_v44, %v17852_v29 }
0x2145   : > { %v7724_v32 = vrot.slane %v7710_v8, %v17852_v29  ;;  %v7728_v38 = vrot.slane %v7717_v59, %v17853_v43  ;;  %v17858_v8 = vld [vmem:[#allocation56_spill] sm:$0xff] }
0x2147   : > { %v7736_v21 = vadd.f32 %v7728_v38, %v17854_v36  ;;  %v7735_v6 = vadd.f32 %v7728_v38, %v17855_v37  ;;  %v7732_v54 = vrot.slane %v7724_v32, %v17853_v43 }
0x2149   : > { %v7740_v25 = vmax.f32 %v7736_v21, 0.0  ;;  %v7739_v13 = vmax.f32 %v7735_v6, 0.0  ;;  %v7737_v3 = vadd.f32 %v7732_v54, %v17857_v24  ;;  %v7738_v29 = vadd.f32 %v7732_v54, %v17858_v8  ;;  %v17859_v24 = vld [vmem:[#allocation57_spill] sm:$0xff] }
0x214b   : > { %v7751_v26 = vmul.f32 %v16619_v58, %v7740_v25  ;;  %v7750_v44 = vmul.f32 %v16619_v58, %v7739_v13  ;;  %v7741_v30 = vmax.f32 %v7737_v3, 0.0  ;;  %v7742_v38 = vmax.f32 %v7738_v29, 0.0  ;;  %v17860_v25 = vld [vmem:[#allocation58_spill] sm:$0xff] }
0x214d   : > { %7756 = vadd.xlane.f32.xlu0 %v7751_v26  ;;  %7754 = vadd.xlane.f32.xlu1 %v7750_v44  ;;  %v7752_v59 = vmul.f32 %v16619_v58, %v7741_v30  ;;  %v7753_v32 = vmul.f32 %v16619_v58, %v7742_v38 }
0x2151   : > { %7758 = vadd.xlane.f32.xlu0 %v7752_v59 }
0x2155   : > { %7760 = vadd.xlane.f32.xlu0 %v7753_v32 }
0x21da   : > { %v7757_v21 = vpop.xlane.xlu0 %7756  ;;  %v7755_v6 = vpop.xlane.xlu1 %7754 }
0x21db   : > { %v7773_v36 = vrot.slane %v7757_v21, %v17859_v24  ;;  %v7769_v34 = vrot.slane %v7755_v6, %v17860_v25 }
0x21dd   : > { %v7774_v26 = vsel %vm1565_vm1, %v7773_v36, %v7769_v34 }
0x21de   : > { %v7759_v37 = vpop.xlane.xlu0 %7758 }
0x21df   : > { %v7778_v3 = vrot.slane %v7759_v37, %v17860_v25 }
0x21e2   : > { %v7761_v13 = vpop.xlane.xlu0 %7760 }
0x21e3   : > { %v7782_v54 = vrot.slane %v7761_v13, %v17859_v24 }
0x21e5   : > { %v7783_v30 = vsel %vm1565_vm1, %v7782_v54, %v7778_v3 }
0x21e6   : > { %v7784_v29 = vsel %vm1576_vm2, %v7783_v30, %v7774_v26 }
0x21e7   : > { %v7786_v44 = vsel %vm17536_vm3, %v7784_v29, -inf }
0x21e8   : > { %7787 = vmax.xlane.f32.xlu0 %v7786_v44 }
0x2275   : > { %v7788_v59 = vpop.xlane.xlu0 %7787 }
0x2276   : > { %v7793_v38 = vrot.slane %v7788_v59, %v17853_v43  ;;  %v7797_v32 = vrot.slane %v7788_v59, %v14993_v60 }
0x2278   : > { %v7800_v8 = vsub.f32 %v7755_v6, %v7793_v38  ;;  %v7801_v58 = vsub.f32 %v7757_v21, %v7793_v38  ;;  %v7802_v27 = vsub.f32 %v7759_v37, %v7797_v32  ;;  %v7803_v11 = vsub.f32 %v7761_v13, %v7797_v32 }
0x227a   : > { %v7804_v4 = vmul.f32 1.442695, %v7800_v8  ;;  %v7806_v9 = vmul.f32 1.442695, %v7801_v58  ;;  %v7808_v34 = vmul.f32 1.442695, %v7802_v27 }
0x227b   : > { %v7810_v36 = vmul.f32 1.442695, %v7803_v11 }
0x227c   : > { %13719 = vpow2.f32 %v7804_v4 }
0x227d   : > { %13721 = vpow2.f32 %v7806_v9 }
0x227e   : > { %13723 = vpow2.f32 %v7808_v34 }
0x227f   : > { %13725 = vpow2.f32 %v7810_v36 }
0x2286   : > { %v13720_v3 = vpop.eup %13719 }
0x2287   : > { %v13722_v54 = vpop.eup %13721  ;;  %7817 = vperm.xlu0 %12923, %v13720_v3  }
0x2288   : > { %7820 = vperm.xlu1 %12922, %v13722_v54   ;;  %v13724_v26 = vpop.eup %13723 }
0x2289   : > { %v13726_v30 = vpop.eup %13725 }
0x228b   : > { %7823 = vperm.xlu0 %12923, %v13724_v26  }
0x228c   : > { %7826 = vperm.xlu1 %12922, %v13726_v30  }
0x2306   : > { %v7818_v6 = vpop.permute.xlu0 %7817 }
0x2307   : > { %v7821_v21 = vpop.permute.xlu1 %7820  ;;  %v7831_v58 = vrot.slane %v7818_v6, %v17860_v25 }
0x2308   : > { %v7835_v37 = vrot.slane %v7821_v21, %v17859_v24 }
0x230a   : > { %v7824_v4 = vpop.permute.xlu0 %7823  ;;  %v7836_v8 = vsel %vm1565_vm1, %v7835_v37, %v7831_v58 }
0x230b   : > { %v7827_v27 = vpop.permute.xlu1 %7826  ;;  %v7840_v9 = vrot.slane %v7824_v4, %v17860_v25 }
0x230c   : > { %v7844_v11 = vrot.slane %v7827_v27, %v17859_v24 }
0x230e   : > { %v7845_v13 = vsel %vm1565_vm1, %v7844_v11, %v7840_v9 }
0x230f   : > { %v7846_v29 = vsel %vm1576_vm2, %v7845_v13, %v7836_v8 }
0x2310   : > { %v7848_v44 = vsel %vm17536_vm3, %v7846_v29, 0.0 }
0x2311   : > { %7849 = vadd.xlane.f32.xlu0 %v7848_v44 }
0x239e   : > { %v7850_v59 = vpop.xlane.xlu0 %7849 }
0x239f   : > { %v7855_v38 = vrot.slane %v7850_v59, %v17853_v43  ;;  %v7859_v32 = vrot.slane %v7850_v59, %v14993_v60 }
0x23a1   : > { %13727 = vrcp.f32 %v7855_v38  ;;  %v17865_v38 = vld [vmem:[#allocation67_spill] sm:$0xff] }
0x23a2   : > { %13729 = vrcp.f32 %v7859_v32 }
0x23ab   : > { %v13728_v34 = vpop.eup %13727 }
0x23ac   : > { %v16647_v36 = vmul.f32 %v13728_v34, %v13720_v3  ;;  %v16649_v6 = vmul.f32 %v13728_v34, %v13722_v54  ;;  %v13730_v21 = vpop.eup %13729  ;;  %v17866_v34 = vld [vmem:[#allocation72_spill] sm:$0xff] }
0x23ad   : > { %v16653_v4 = vmul.f32 %v13730_v21, %v13724_v26  ;;  %v16655_v27 = vmul.f32 %v13730_v21, %v13726_v30 }
0x23ae   : > { %17861 = vst [vmem:[#allocation100_spill] sm:$0xff] %v16647_v36  ;;  %17862 = vst [vmem:[#allocation102_spill] sm:$0xff] %v16649_v6  ;;  %v7868_v37 = vpack.c.bf16 %v16649_v6, %v16647_v36 }
0x23af   : > { %17863 = vst [vmem:[#allocation104_spill] sm:$0xff] %v16653_v4  ;;  %17864 = vst [vmem:[#allocation52_spill] sm:$0xff] %v16655_v27  ;;  %v7869_v11 = vpack.c.bf16 %v16655_v27, %v16653_v4 }
0x23b0   : > { %v7871_v58 = vunpack.c.l.b16 %v7868_v37  ;;  %v7872_v9 = vunpack.c.h.b16 %v7868_v37 }
0x23b1   : > { %v7933_v8 = vunpack.c.l.b16 %v7869_v11  ;;  %v7934_v3 = vunpack.c.h.b16 %v7869_v11  ;;  %v17867_v11 = vld [vmem:[#allocation71_spill] sm:$0xff] }
0x23b2   : > { %7874 = vperm.xlu1 %12922, %v7871_v58  }
0x23b6   : > { %7877 = vperm.xlu1 %12922, %v7872_v9  }
0x23ba   : > { %7936 = vperm.xlu1 %12922, %v7933_v8   ;;  %v17868_v8 = vld [vmem:[#allocation76_spill] sm:$0xff] }
0x23be   : > { %7939 = vperm.xlu1 %12922, %v7934_v3   ;;  %v17869_v3 = vld [vmem:[#allocation70_spill] sm:$0xff] }
0x2431   : > { %v7875_v54 = vpop.permute.xlu1 %7874 }
0x2432   : > { %v7882_v29 = vrot.slane %v7875_v54, %v17860_v25  ;;  %v17870_v54 = vld [vmem:[#allocation77_spill] sm:$0xff] }
0x2435   : > { %v7878_v13 = vpop.permute.xlu1 %7877 }
0x2436   : > { %v7886_v44 = vrot.slane %v7878_v13, %v17859_v24  ;;  %v17871_v13 = vld [vmem:[#allocation75_spill] sm:$0xff] }
0x2438   : > { %v7887_v26 = vsel %vm1565_vm1, %v7886_v44, %v7882_v29  ;;  %v17872_v29 = vld [vmem:[#allocation80_spill] sm:$0xff]  ;;  %v17873_v44 = vld [vmem:[#allocation74_spill] sm:$0xff] }
0x2439   : > { %v7888_v30 = vpack.c.b16 %v7887_v26, %v7887_v26  ;;  %v7937_v59 = vpop.permute.xlu1 %7936  ;;  %v17874_v26 = vld [vmem:[#allocation84_spill] sm:$0xff] }
0x243a   : > { %v7944_v21 = vrot.slane %v7937_v59, %v17860_v25  ;;  %v17876_v59 = vld [vmem:[#allocation85_spill] sm:$0xff] }
0x243b   : > { %12567 = vmatmul.mubr.msk.bf16.vlgmr.msra.gmra.mrb[68].mxu0 %vm1689_vm5, %v7888_v30  ;;  %v17875_v30 = vld [vmem:[#allocation78_spill] sm:$0xff] }
0x243c   : > { %12571 = vmatpush3.bf16.msra.mxu0 %v17865_v38  ;;  %12572 = vmatprep.mubr.msk.bf16.mxu0 %vm14371_vm4, %v17625_v50 }
0x243d   : > { %v7940_v32 = vpop.permute.xlu1 %7939  ;;  %8209 = vmatprep.subr.bf16.mxu0 %v17866_v34  ;;  %v17878_v34 = vld [vmem:[#allocation88_spill] sm:$0xff] }
0x243e   : > { %v7948_v37 = vrot.slane %v7940_v32, %v17859_v24  ;;  %v17877_v32 = vld [vmem:[#allocation83_spill] sm:$0xff] }
0x2440   : > { %v7949_v58 = vsel %vm1565_vm1, %v7948_v37, %v7944_v21  ;;  %v17879_v21 = vld [vmem:[#allocation94_spill] sm:$0xff]  ;;  %v17880_v37 = vld [vmem:[#allocation99_spill] sm:$0xff] }
0x2441   : > { %v7950_v9 = vpack.c.b16 %v7949_v58, %v7949_v58  ;;  %v17881_v58 = vld [vmem:[#allocation101_spill] sm:$0xff] }
0x2443   : > { %12573 = vmatmul.mubr.msk.bf16.vlgmr.msra.gmra.mrb[72].mxu0 %vm1689_vm5, %v7950_v9  ;;  %v17882_v9 = vld [vmem:[#allocation103_spill] sm:$0xff] }
0x2444   : > { %8210 = vmatpush1.bf16.msra.mxu0 %v17867_v11  ;;  %8241 = vmatprep.mubr.bf16.mxu0 %v17623_v10  ;;  %v7312_v11 = vrot.slane %v16606_v20, %v17853_v43 }
0x2445   : > { %8211 = vmatprep.subr.bf16.mxu0 %v17868_v8 }
0x2446   : > { %v7614_v8 = vadd.f32 %v16598_v52, %v7312_v11  ;;  %v12165_v11 = vld [vmem:[%s14878_s4 + $0x5] sm:$0x1] }
0x2448   : > { %8212 = vmatpush1.bf16.msra.mxu0 %v17869_v3  ;;  %v12164_v3 = vmul.f32 -1.442695, %v7614_v8  ;;  %v16724_v8 = vld [vmem:[#allocation20 + $0x38] ss:$24 sps:$4 sm:$0xff]  }
0x2449   : > { %8213 = vmatprep.subr.bf16.mxu0 %v17870_v54 }
0x244a   : > { %13731 = vpow2.f32 %v12164_v3  ;;  %v16729_v3 = vld [vmem:[#allocation20 + $0x64] ss:$24 sps:$4 sm:$0xff]  }
0x244c   : > { %8214 = vmatpush1.bf16.msra.mxu0 %v17871_v13 }
0x244d   : > { %8215 = vmatprep.subr.bf16.mxu0 %v17872_v29 }
0x2450   : > { %8216 = vmatpush1.bf16.msra.mxu0 %v17873_v44 }
0x2451   : > { %8217 = vmatprep.subr.bf16.mxu0 %v17874_v26 }
0x2454   : > { %8218 = vmatpush1.bf16.msra.mxu0 %v17875_v30  ;;  %v13732_v54 = vpop.eup %13731 }
0x2455   : > { %8219 = vmatprep.subr.bf16.mxu0 %v17876_v59  ;;  %v7997_v13 = vadd.f32 1.0, %v13732_v54  ;;  %v16731_v54 = vld [vmem:[#allocation20 + $0x60] ss:$24 sps:$4 sm:$0xff]  }
0x2457   : > { %13733 = vrcp.f32 %v7997_v13  ;;  %v16733_v13 = vld [vmem:[#allocation20 + $0x6c] ss:$24 sps:$4 sm:$0xff]  }
0x2458   : > { %8220 = vmatpush1.bf16.msra.mxu0 %v17877_v32 }
0x2459   : > { %8221 = vmatprep.subr.bf16.mxu0 %v17878_v34 }
0x245c   : > { %8222 = vmatpush1.bf16.msra.mxu0 %v17879_v21 }
0x245d   : > { %8223 = vmatprep.subr.bf16.mxu0 %v17880_v37 }
0x2460   : > { %8224 = vmatpush1.bf16.msra.mxu0 %v17881_v58 }
0x2461   : > { %8334 = vmatprep.subr.bf16.mxu0 %v17882_v9  ;;  %v13734_v37 = vpop.eup %13733 }
0x250e   : > { %v7926_v29 = vpop.f32.mrb[68].mxu0 }
0x250f   : > { %v12568_v44 = vpop.f32.mrb[69].mxu0 }
0x2510   : > { %v7929_v26 = vpop.f32.mrb[70].mxu0  ;;  %v16742_v44 = vld [vmem:[#allocation20 + $0x9c] ss:$24 sps:$4 sm:$0xff]  }
0x2511   : > { %v12569_v30 = vpop.f32.mrb[71].mxu0  ;;  %v16744_v26 = vld [vmem:[#allocation20 + $0x98] ss:$24 sps:$4 sm:$0xff]  }
0x2512   : > { %v16750_v30 = vld [vmem:[#allocation20 + $0xc8] ss:$24 sps:$4 sm:$0xff]  }
0x2516   : > { %v7988_v59 = vpop.f32.mrb[72].mxu0 }
0x2517   : > { %v8002_v32 = vrot.slane %v7988_v59, 7  ;;  %v12574_v34 = vpop.f32.mrb[73].mxu0  ;;  %v16752_v59 = vld [vmem:[#allocation20 + $0xcc] ss:$24 sps:$4 sm:$0xff]  }
0x2518   : > { %v7991_v21 = vpop.f32.mrb[74].mxu0  ;;  %v7256_v34 = vstv %s7255_s20 }
0x2519   : > { %v8003_v58 = vsel %vm1576_vm2, %v8002_v32, %v7926_v29  ;;  %v12575_v9 = vpop.f32.mrb[75].mxu0  ;;  %v16736_v29 = vld [vmem:[#allocation20 + $0x68] ss:$24 sps:$4 sm:$0xff]   ;;  %v16755_v32 = vld [vmem:[#allocation20 + $0xfc] ss:$24 sps:$4 sm:$0xff]   ;;  %vm16782_vm13 = vcmp.lt.s32.totalorder %v17834_v12, %v7256_v34 }
0x251a   : > { %v8005_v27 = vmul.f32 %v13734_v37, %v8003_v58  ;;  %v17889_v37 = vld [vmem:[#allocation93_spill] sm:$0xff] }
0x251c   : > { %v8016_v52 = vpack.c.bf16 %v8005_v27, %v8005_v27  ;;  %v16721_v27 = vld [vmem:[#allocation20 + $0x3c] ss:$24 sps:$4 sm:$0xff]  }
0x251e   : > { %8242 = vmatmul.mubr.bf16.vlgmr.msra.gmra.mrb[76].mxu0 %v8016_v52  ;;  %8283 = vmatmul.mubr.bf16.vlgmr.msra.gmra.mrb[88].mxu1 %v8016_v52 }
0x251f   : > { %8335 = vmatpush1.bf16.msra.mxu0 %v16414_v40  ;;  %8376 = vmatpush1.bf16.msra.mxu1 %v16416_v41  ;;  %v16705_v40 = vld [vmem:[#allocation20 + $0x4] ss:$24 sps:$4 sm:$0xff]   ;;  %v16707_v41 = vld [vmem:[#allocation20] ss:$24 sps:$4 sm:$0xff]  }
0x2520   : > { %8336 = vmatprep.subr.bf16.mxu0 %v16418_v39  ;;  %8377 = vmatprep.subr.bf16.mxu1 %v16420_v2  ;;  %v16709_v39 = vld [vmem:[#allocation20 + $0xc] ss:$24 sps:$4 sm:$0xff]   ;;  %v16712_v2 = vld [vmem:[#allocation20 + $0x8] ss:$24 sps:$4 sm:$0xff]  }
0x2521   : > { %8366 = vmatprep.mubr.bf16.mxu0 %v17623_v10  ;;  %8407 = vmatprep.mubr.bf16.mxu1 %v17623_v10 }
0x2523   : > { %8337 = vmatpush1.bf16.msra.mxu0 %v16423_v22  ;;  %8378 = vmatpush1.bf16.msra.mxu1 %v16426_v19  ;;  %v16717_v22 = vld [vmem:[#allocation20 + $0x34] ss:$24 sps:$4 sm:$0xff]   ;;  %v16719_v19 = vld [vmem:[#allocation20 + $0x30] ss:$24 sps:$4 sm:$0xff]  }
0x2524   : > { %8818 = vmatprep.subr.bf16.mxu0 %v16705_v40  ;;  %8859 = vmatprep.subr.bf16.mxu1 %v16709_v39 }
0x252a   : > { %12206 = vmatmul.mubr.msk.bf16.vlgmr.msra.gmra.mrb[76].mxu0 %vm17535_vm6, %v12165_v11  ;;  %12207 = vmatmul.mubr.msk.bf16.vlgmr.msra.gmra.mrb[88].mxu1 %vm17535_vm6, %v12165_v11 }
0x252b   : > { %8850 = vmatprep.mubr.bf16.mxu0 %v17623_v10  ;;  %8891 = vmatprep.mubr.bf16.mxu1 %v17623_v10 }
0x252c   : > { %8819 = vmatpush1.bf16.msra.mxu0 %v16707_v41  ;;  %8860 = vmatpush1.bf16.msra.mxu1 %v16712_v2 }
0x252d   : > { %8820 = vmatprep.subr.bf16.mxu0 %v16717_v22  ;;  %8861 = vmatprep.subr.bf16.mxu1 %v16721_v27 }
0x2530   : > { %8821 = vmatpush1.bf16.msra.mxu0 %v16719_v19  ;;  %8862 = vmatpush1.bf16.msra.mxu1 %v16724_v8 }
0x2531   : > { %8822 = vmatprep.subr.bf16.mxu0 %v16729_v3  ;;  %8863 = vmatprep.subr.bf16.mxu1 %v16733_v13 }
0x2534   : > { %8823 = vmatpush1.bf16.msra.mxu0 %v16731_v54  ;;  %8864 = vmatpush1.bf16.msra.mxu1 %v16736_v29 }
0x2535   : > { %8824 = vmatprep.subr.bf16.mxu0 %v16462_v47  ;;  %8865 = vmatprep.subr.bf16.mxu1 %v16742_v44  ;;  %v16761_v47 = vld [vmem:[#allocation20 + $0xf8] ss:$24 sps:$4 sm:$0xff]  }
0x2538   : > { %8825 = vmatpush1.bf16.msra.mxu0 %v16464_v45  ;;  %8866 = vmatpush1.bf16.msra.mxu1 %v16744_v26  ;;  %v16764_v45 = vld [vmem:[#allocation20 + $0x12c] ss:$24 sps:$4 sm:$0xff]  }
0x2539   : > { %8826 = vmatprep.subr.bf16.mxu0 %v16468_v46  ;;  %8867 = vmatprep.subr.bf16.mxu1 %v16752_v59  ;;  %v16769_v46 = vld [vmem:[#allocation20 + $0x128] ss:$24 sps:$4 sm:$0xff]  }
0x253a   : > { %17883 = vst [vmem:[#allocation57_spill] sm:$0xff] %v16769_v46 }
0x253c   : > { %8827 = vmatpush1.bf16.msra.mxu0 %v16470_v28  ;;  %8868 = vmatpush1.bf16.msra.mxu1 %v16750_v30  ;;  %v16772_v28 = vld [vmem:[#allocation20 + $0x15c] ss:$24 sps:$4 sm:$0xff]  }
0x253d   : > { %8828 = vmatprep.subr.bf16.mxu0 %v16472_v48  ;;  %8869 = vmatprep.subr.bf16.mxu1 %v16755_v32  ;;  %17884 = vst [vmem:[#allocation58_spill] sm:$0xff] %v16772_v28  ;;  %v16777_v48 = vld [vmem:[#allocation20 + $0x158] ss:$24 sps:$4 sm:$0xff]  }
0x253e   : > { %17885 = vst [vmem:[#allocation67_spill] sm:$0xff] %v16777_v48 }
0x2540   : > { %8829 = vmatpush1.bf16.msra.mxu0 %v16477_v15  ;;  %8870 = vmatpush1.bf16.msra.mxu1 %v16761_v47 }
0x2541   : > { %8830 = vmatprep.subr.bf16.mxu0 %v16480_v7  ;;  %8871 = vmatprep.subr.bf16.mxu1 %v16764_v45  ;;  %v12211_v7 = vsel %vm16782_vm13, 1.0, %v17625_v50 }
0x2542   : > { %8450 = vst.msk [vmem:[#allocation6 + $0xa] sm:$0x3] %vm2255_vm8, %v12211_v7 }
0x2544   : > { %8831 = vmatpush1.bf16.msra.mxu0 %v16483_v62  ;;  %8872 = vmatpush1.bf16.msra.mxu1 %v16769_v46  ;;  %v7316_v62 = vrot.slane %v16606_v20, %v14993_v60 }
0x2545   : > { %8832 = vmatprep.subr.bf16.mxu0 %v16486_v42  ;;  %8873 = vmatprep.subr.bf16.mxu1 %v16772_v28  ;;  %v7324_v42 = vrot.slane %v16606_v20, %v17838_v31 }
0x2546   : > { %v7616_v58 = vadd.f32 %v16602_v16, %v7316_v62 }
0x2547   : > { %v7657_v9 = vadd.f32 %v16604_v51, %v7324_v42 }
0x2548   : > { %8833 = vmatpush1.bf16.msra.mxu0 %v16489_v49  ;;  %8874 = vmatpush1.bf16.msra.mxu1 %v16777_v48  ;;  %v17888_v49 = vld [vmem:[#allocation91_spill] sm:$0xff] }
0x2549   : > { %8900 = vmatprep.subr.bf16.mxu0 %v16492_v56  ;;  %12576 = vmatprep.subr.bf16.mxu1 %v17625_v50  ;;  %v7320_v21 = vrot.slane %v16606_v20, %v17888_v49  ;;  %v7328_v56 = vrot.slane %v16606_v20, %v17889_v37 }
0x254b   : > { %v7655_v52 = vadd.f32 %v16600_v0, %v7320_v21  ;;  %v7696_v11 = vadd.f32 %v16610_v61, %v7328_v56 }
0x25fd   : > { %v8368_v34 = vpop.f32.mrb[76].mxu0  ;;  %v8409_v7 = vpop.f32.mrb[88].mxu1 }
0x25fe   : > { %v8416_v6 = vadd.f32 %v8368_v34, %v7616_v58  ;;  %v8418_v4 = vadd.f32 %v8409_v7, %v7657_v9  ;;  %v8370_v36 = vpop.f32.mrb[77].mxu0  ;;  %v8411_v31 = vpop.f32.mrb[89].mxu1 }
0x25ff   : > { %v8417_v12 = vadd.f32 %v8370_v36, %v7655_v52  ;;  %v8419_v48 = vadd.f32 %v8411_v31, %v7696_v11  ;;  %v8372_v49 = vpop.f32.mrb[78].mxu0  ;;  %v8413_v28 = vpop.f32.mrb[90].mxu1 }
0x2600   : > { %v12208_v46 = vmul.f32 -1.442695, %v8416_v6  ;;  %v8373_v20 = vpop.f32.mrb[79].mxu0  ;;  %v8414_v37 = vpop.f32.mrb[91].mxu1 }
0x2601   : > { %v12209_v16 = vmul.f32 -1.442695, %v8417_v12  ;;  %v12210_v51 = vmul.f32 -1.442695, %v8419_v48  ;;  %v16847_v20 = vld [vmem:[#allocation21] sm:$0x3f] }
0x2602   : > { %13735 = vpow2.f32 %v12208_v46 }
0x2603   : > { %13737 = vpow2.f32 %v12209_v16  ;;  %v17896_v16 = vld [vmem:[#allocation50_spill] sm:$0xff] }
0x2604   : > { %13739 = vpow2.f32 %v12210_v51  ;;  %v8571_v51 = vrot.slane %v16847_v20, %v17896_v16 }
0x2605   : > { %13741 = vtanh.f32 %v8418_v4 }
0x260c   : > { %v13736_v0 = vpop.eup %13735 }
0x260d   : > { %v13738_v62 = vpop.eup %13737  ;;  %v8423_v61 = vadd.f32 1.0, %v13736_v0 }
0x260e   : > { %v8429_v42 = vadd.f32 1.0, %v13738_v62  ;;  %v13740_v21 = vpop.eup %13739 }
0x260f   : > { %13743 = vrcp.f32 %v8423_v61  ;;  %v13742_v36 = vpop.eup %13741  ;;  %v8436_v6 = vadd.f32 1.0, %v13740_v21 }
0x2610   : > { %13745 = vrcp.f32 %v8429_v42 }
0x2611   : > { %13747 = vrcp.f32 %v8436_v6 }
0x2619   : > { %v13744_v31 = vpop.eup %13743 }
0x261a   : > { %v13746_v49 = vpop.eup %13745  ;;  %v8440_v28 = vmul.f32 %v13744_v31, %v13742_v36  ;;  %v17897_v36 = vld [vmem:[#allocation51_spill] sm:$0xff] }
0x261b   : > { %v8439_v37 = vmul.f32 %v13746_v49, %v16521_v23  ;;  %v13748_v4 = vpop.eup %13747 }
0x261d   : > { %v8441_v12 = vadd.f32 %v8440_v28, %v8439_v37 }
0x261f   : > { %13749 = vtanh.f32 %v8441_v12  ;;  %v16809_v46 = vsel %vm16782_vm13, %v8441_v12, %v16521_v23  ;;  %v17890_v23 = vld [vmem:[#allocation106_spill] sm:$0xff] }
0x2620   : > { %v17898_v12 = vld [vmem:[#allocation54_spill] sm:$0xff] }
0x2629   : > { %v13750_v48 = vpop.eup %13749 }
0x262a   : > { %v8443_v56 = vmul.f32 %v13750_v48, %v13748_v4  ;;  %v17899_v48 = vld [vmem:[#allocation53_spill] sm:$0xff] }
0x262c   : > { %v8444_v58 = vpack.c.bf16 %v8443_v56, %v8443_v56  ;;  %v16814_v9 = vsel %vm16782_vm13, %v8443_v56, %v16528_v53  ;;  %v17892_v53 = vld [vmem:[#allocation87_spill] sm:$0xff] }
0x262d   : > { %v8497_v52 = vpack.c.bf16 %v16814_v9, %v16814_v9 }
0x262e   : > { %8446 = vst [vmem:[#allocation5 + $0x5] sm:$0x1] %v8444_v58 }
0x262f   : > { %8851 = vmatmul.mubr.bf16.vlgmr.msra.gmra.mrb[80].mxu0 %v8497_v52  ;;  %8892 = vmatmul.mubr.bf16.vlgmr.msra.gmra.mrb[92].mxu1 %v8497_v52 }
0x2630   : > { %8901 = vmatpush1.bf16.msra.mxu0 %v16523_v18  ;;  %8932 = vmatprep.mubr.bf16.mxu0 %v17623_v10  ;;  %v17891_v18 = vld [vmem:[#allocation107_spill] sm:$0xff] }
0x2631   : > { %8902 = vmatprep.subr.bf16.mxu0 %v16532_v55  ;;  %12577 = vmatpush3.bf16.msra.mxu1 %v15068_v17  ;;  %v17893_v55 = vld [vmem:[#allocation112_spill] sm:$0xff] }
0x2632   : > { %12578 = vmatprep.mubr.msk.bf16.mxu1 %vm14371_vm4, %v17625_v50  ;;  %12582 = vmatprep.subr.bf16.mxu1 %v17625_v50 }
0x2634   : > { %8903 = vmatpush1.bf16.msra.mxu0 %v16535_v1  ;;  %v17894_v1 = vld [vmem:[#allocation113_spill] sm:$0xff] }
0x2635   : > { %8904 = vmatprep.subr.bf16.mxu0 %v16539_v35  ;;  %v17895_v35 = vld [vmem:[#allocation114_spill] sm:$0xff] }
0x2638   : > { %8905 = vmatpush1.bf16.msra.mxu0 %v16546_v5 }
0x2639   : > { %8906 = vmatprep.subr.bf16.mxu0 %v16549_v14 }
0x263c   : > { %8907 = vmatpush1.bf16.msra.mxu0 %v16552_v57 }
0x263d   : > { %8908 = vmatprep.subr.bf16.mxu0 %v16555_v33 }
0x2640   : > { %8909 = vmatpush1.bf16.msra.mxu0 %v16558_v63 }
0x2641   : > { %8910 = vmatprep.subr.bf16.mxu0 %v17890_v23 }
0x2644   : > { %8911 = vmatpush1.bf16.msra.mxu0 %v17891_v18  ;;  %v17900_v18 = vld [vmem:[#allocation55_spill] sm:$0xff] }
0x2645   : > { %8912 = vmatprep.subr.bf16.mxu0 %v17892_v53 }
0x2648   : > { %8913 = vmatpush1.bf16.msra.mxu0 %v17893_v55  ;;  %v17901_v55 = vld [vmem:[#allocation96_spill] sm:$0xff] }
0x2649   : > { %8914 = vmatprep.subr.bf16.mxu0 %v17894_v1 }
0x264c   : > { %8915 = vmatpush1.bf16.msra.mxu0 %v17895_v35 }
0x264f   : > { %8933 = vmatmul.mubr.bf16.vlgmr.msra.gmra.mrb[84].mxu0 %v8497_v52 }
0x2650   : > { %9521 = vmatprep.mubr.bf16.mxu0 %v17623_v10 }
0x2702   : > { %v16839_v5 = vpop.f32.mrb[80].mxu0  ;;  %v16841_v14 = vpop.f32.mrb[92].mxu1 }
0x2703   : > { %v16843_v57 = vpop.f32.mrb[81].mxu0  ;;  %v16845_v33 = vpop.f32.mrb[93].mxu1 }
0x2704   : > { %v8856_v63 = vpop.f32.mrb[82].mxu0  ;;  %v8897_v11 = vpop.f32.mrb[94].mxu1 }
0x2705   : > { %v8857_v34 = vpop.f32.mrb[83].mxu0  ;;  %v8898_v7 = vpop.f32.mrb[95].mxu1  ;;  %v17902_v11 = vld [vmem:[#allocation56_spill] sm:$0xff] }
0x2722   : > { %v16851_v0 = vpop.f32.mrb[84].mxu0 }
0x2723   : > { %v8936_v62 = vpop.f32.mrb[85].mxu0 }
0x2724   : > { %v8937_v61 = vadd.f32 %v8936_v62, %v8571_v51  ;;  %v8938_v42 = vpop.f32.mrb[86].mxu0 }
0x2725   : > { %v8939_v21 = vpop.f32.mrb[87].mxu0 }
0x2726   : > { %v8948_v31 = vrot.slane %v8937_v61, %v17897_v36 }
0x2728   : > { %v8949_v49 = vcombine.high %v8948_v31, %v8948_v31  ;;  %v8956_v28 = vrot.slane %v8948_v31, %v17897_v36 }
0x272a   : > { %v8963_v6 = vrot.slane %v8949_v49, %v17897_v36  ;;  %v8967_v37 = vrot.slane %v8956_v28, %v17853_v43 }
0x272c   : > { %v8975_v4 = vadd.f32 %v8967_v37, %v17898_v12  ;;  %v8974_v56 = vadd.f32 %v8967_v37, %v17899_v48  ;;  %v8971_v58 = vrot.slane %v8963_v6, %v17853_v43 }
0x272e   : > { %v8979_v52 = vmax.f32 %v8975_v4, 0.0  ;;  %v8978_v23 = vmax.f32 %v8974_v56, 0.0  ;;  %v8976_v53 = vadd.f32 %v8971_v58, %v17900_v18  ;;  %v8977_v34 = vadd.f32 %v8971_v58, %v17902_v11 }
0x2730   : > { %v8990_v1 = vmul.f32 %v17901_v55, %v8979_v52  ;;  %v8989_v35 = vmul.f32 %v17901_v55, %v8978_v23  ;;  %v8980_v63 = vmax.f32 %v8976_v53, 0.0  ;;  %v8981_v51 = vmax.f32 %v8977_v34, 0.0 }
0x2732   : > { %8995 = vadd.xlane.f32.xlu0 %v8990_v1  ;;  %8993 = vadd.xlane.f32.xlu1 %v8989_v35  ;;  %v8991_v7 = vmul.f32 %v17901_v55, %v8980_v63  ;;  %v8992_v62 = vmul.f32 %v17901_v55, %v8981_v51 }
0x2736   : > { %8997 = vadd.xlane.f32.xlu0 %v8991_v7 }
0x273a   : > { %8999 = vadd.xlane.f32.xlu0 %v8992_v62 }
0x27bf   : > { %v8996_v61 = vpop.xlane.xlu0 %8995  ;;  %v8994_v42 = vpop.xlane.xlu1 %8993 }
0x27c0   : > { %v9012_v31 = vrot.slane %v8996_v61, %v17859_v24  ;;  %v9008_v49 = vrot.slane %v8994_v42, %v17860_v25 }
0x27c2   : > { %v9013_v4 = vsel %vm1565_vm1, %v9012_v31, %v9008_v49 }
0x27c3   : > { %v8998_v21 = vpop.xlane.xlu0 %8997 }
0x27c4   : > { %v9017_v6 = vrot.slane %v8998_v21, %v17860_v25 }
0x27c7   : > { %v9000_v28 = vpop.xlane.xlu0 %8999 }
0x27c8   : > { %v9021_v37 = vrot.slane %v9000_v28, %v17859_v24 }
0x27ca   : > { %v9022_v56 = vsel %vm1565_vm1, %v9021_v37, %v9017_v6 }
0x27cb   : > { %v9023_v58 = vsel %vm1576_vm2, %v9022_v56, %v9013_v4 }
0x27cc   : > { %v9025_v52 = vsel %vm17536_vm3, %v9023_v58, -inf }
0x27cd   : > { %9026 = vmax.xlane.f32.xlu0 %v9025_v52 }
0x285a   : > { %v9027_v23 = vpop.xlane.xlu0 %9026 }
0x285b   : > { %v9032_v53 = vrot.slane %v9027_v23, %v17853_v43  ;;  %v9036_v55 = vrot.slane %v9027_v23, %v14993_v60 }
0x285d   : > { %v9039_v1 = vsub.f32 %v8994_v42, %v9032_v53  ;;  %v9040_v35 = vsub.f32 %v8996_v61, %v9032_v53  ;;  %v9041_v63 = vsub.f32 %v8998_v21, %v9036_v55  ;;  %v9042_v34 = vsub.f32 %v9000_v28, %v9036_v55 }
0x285f   : > { %v9043_v7 = vmul.f32 1.442695, %v9039_v1  ;;  %v9045_v51 = vmul.f32 1.442695, %v9040_v35  ;;  %v9047_v62 = vmul.f32 1.442695, %v9041_v63 }
0x2860   : > { %v9049_v31 = vmul.f32 1.442695, %v9042_v34 }
0x2861   : > { %13751 = vpow2.f32 %v9043_v7 }
0x2862   : > { %13753 = vpow2.f32 %v9045_v51 }
0x2863   : > { %13755 = vpow2.f32 %v9047_v62 }
0x2864   : > { %13757 = vpow2.f32 %v9049_v31 }
0x286b   : > { %v13752_v49 = vpop.eup %13751 }
0x286c   : > { %v13754_v6 = vpop.eup %13753  ;;  %9056 = vperm.xlu0 %12923, %v13752_v49  }
0x286d   : > { %9059 = vperm.xlu1 %12922, %v13754_v6   ;;  %v13756_v37 = vpop.eup %13755 }
0x286e   : > { %v13758_v4 = vpop.eup %13757 }
0x2870   : > { %9062 = vperm.xlu0 %12923, %v13756_v37  }
0x2871   : > { %9065 = vperm.xlu1 %12922, %v13758_v4  }
0x28eb   : > { %v9057_v42 = vpop.permute.xlu0 %9056 }
0x28ec   : > { %v9060_v61 = vpop.permute.xlu1 %9059  ;;  %v9070_v28 = vrot.slane %v9057_v42, %v17860_v25 }
0x28ed   : > { %v9074_v21 = vrot.slane %v9060_v61, %v17859_v24 }
0x28ef   : > { %v9063_v56 = vpop.permute.xlu0 %9062  ;;  %v9075_v53 = vsel %vm1565_vm1, %v9074_v21, %v9070_v28 }
0x28f0   : > { %v9066_v58 = vpop.permute.xlu1 %9065  ;;  %v9079_v52 = vrot.slane %v9063_v56, %v17860_v25 }
0x28f1   : > { %v9083_v23 = vrot.slane %v9066_v58, %v17859_v24 }
0x28f3   : > { %v9084_v55 = vsel %vm1565_vm1, %v9083_v23, %v9079_v52 }
0x28f4   : > { %v9085_v1 = vsel %vm1576_vm2, %v9084_v55, %v9075_v53  ;;  %v13397_v53 = vld [vmem:[#allocation26 + $0xc] ss:$16 sps:$4 sm:$0xff]   ;;  %v13401_v55 = vld [vmem:[#allocation26 + $0x28] ss:$16 sps:$4 sm:$0xff]  }
0x28f5   : > { %v9087_v35 = vsel %vm17536_vm3, %v9085_v1, 0.0  ;;  %9489 = vmatprep.subr.bf16.mxu0 %v13397_v53  ;;  %v13403_v1 = vld [vmem:[#allocation26 + $0x2c] ss:$16 sps:$4 sm:$0xff]  }
0x28f6   : > { %9088 = vadd.xlane.f32.xlu0 %v9087_v35  ;;  %v13413_v35 = vld [vmem:[#allocation26 + $0x68] ss:$16 sps:$4 sm:$0xff]  }
0x2983   : > { %v9089_v63 = vpop.xlane.xlu0 %9088 }
0x2984   : > { %v9094_v34 = vrot.slane %v9089_v63, %v17853_v43  ;;  %v9098_v7 = vrot.slane %v9089_v63, %v14993_v60  ;;  %v13415_v63 = vld [vmem:[#allocation26 + $0x6c] ss:$16 sps:$4 sm:$0xff]  }
0x2986   : > { %13759 = vrcp.f32 %v9094_v34 }
0x2987   : > { %13761 = vrcp.f32 %v9098_v7 }
0x2990   : > { %v13760_v51 = vpop.eup %13759 }
0x2991   : > { %v16886_v62 = vmul.f32 %v13760_v51, %v13752_v49  ;;  %v16888_v31 = vmul.f32 %v13760_v51, %v13754_v6  ;;  %v13762_v42 = vpop.eup %13761  ;;  %v13395_v6 = vld [vmem:[#allocation26 + $0x8] ss:$16 sps:$4 sm:$0xff]  }
0x2992   : > { %v16892_v28 = vmul.f32 %v13762_v42, %v13756_v37  ;;  %v16894_v56 = vmul.f32 %v13762_v42, %v13758_v4  ;;  %9490 = vmatpush1.bf16.msra.mxu0 %v13395_v6  ;;  %v13407_v37 = vld [vmem:[#allocation26 + $0x48] ss:$16 sps:$4 sm:$0xff]   ;;  %v13409_v4 = vld [vmem:[#allocation26 + $0x4c] ss:$16 sps:$4 sm:$0xff]  }
0x2993   : > { %v9107_v61 = vpack.c.bf16 %v16888_v31, %v16886_v62  ;;  %9491 = vmatprep.subr.bf16.mxu0 %v13403_v1 }
0x2994   : > { %v9108_v52 = vpack.c.bf16 %v16894_v56, %v16892_v28 }
0x2995   : > { %v9110_v21 = vunpack.c.l.b16 %v9107_v61  ;;  %v9111_v58 = vunpack.c.h.b16 %v9107_v61 }
0x2996   : > { %v9172_v23 = vunpack.c.l.b16 %v9108_v52  ;;  %v9173_v49 = vunpack.c.h.b16 %v9108_v52  ;;  %9492 = vmatpush1.bf16.msra.mxu0 %v13401_v55  ;;  %v13394_v52 = vld [vmem:[#allocation26 + $0x4] ss:$16 sps:$4 sm:$0xff]   ;;  %v13392_v55 = vld [vmem:[#allocation26] ss:$16 sps:$4 sm:$0xff]  }
0x2997   : > { %9113 = vperm.xlu1 %12922, %v9110_v21   ;;  %9493 = vmatprep.subr.bf16.mxu0 %v13409_v4  ;;  %v13398_v4 = vld [vmem:[#allocation26 + $0x20] ss:$16 sps:$4 sm:$0xff]  }
0x299a   : > { %9494 = vmatpush1.bf16.msra.mxu0 %v13407_v37  ;;  %v13400_v37 = vld [vmem:[#allocation26 + $0x24] ss:$16 sps:$4 sm:$0xff]  }
0x299b   : > { %9116 = vperm.xlu1 %12922, %v9111_v58   ;;  %9495 = vmatprep.subr.bf16.mxu0 %v13415_v63  ;;  %v13404_v63 = vld [vmem:[#allocation26 + $0x40] ss:$16 sps:$4 sm:$0xff]  }
0x299e   : > { %9496 = vmatpush1.bf16.msra.mxu0 %v13413_v35  ;;  %v13406_v35 = vld [vmem:[#allocation26 + $0x44] ss:$16 sps:$4 sm:$0xff]  }
0x299f   : > { %9175 = vperm.xlu1 %12922, %v9172_v23  }
0x29a3   : > { %9178 = vperm.xlu1 %12922, %v9173_v49  }
0x2a16   : > { %v9114_v34 = vpop.permute.xlu1 %9113 }
0x2a17   : > { %v9121_v51 = vrot.slane %v9114_v34, %v17860_v25  ;;  %v13412_v34 = vld [vmem:[#allocation26 + $0x64] ss:$16 sps:$4 sm:$0xff]  }
0x2a1a   : > { %v9117_v7 = vpop.permute.xlu1 %9116 }
0x2a1b   : > { %v9125_v42 = vrot.slane %v9117_v7, %v17859_v24  ;;  %v13410_v7 = vld [vmem:[#allocation26 + $0x60] ss:$16 sps:$4 sm:$0xff]  }
0x2a1d   : > { %v9126_v61 = vsel %vm1565_vm1, %v9125_v42, %v9121_v51  ;;  %v13418_v51 = vld [vmem:[#allocation26 + $0x84] ss:$16 sps:$4 sm:$0xff]   ;;  %v13416_v42 = vld [vmem:[#allocation26 + $0x80] ss:$16 sps:$4 sm:$0xff]  }
0x2a1e   : > { %v9127_v21 = vpack.c.b16 %v9126_v61, %v9126_v61  ;;  %v9176_v58 = vpop.permute.xlu1 %9175  ;;  %v13419_v61 = vld [vmem:[#allocation26 + $0x88] ss:$16 sps:$4 sm:$0xff]  }
0x2a1f   : > { %v9183_v49 = vrot.slane %v9176_v58, %v17860_v25  ;;  %v13422_v58 = vld [vmem:[#allocation26 + $0xa0] ss:$16 sps:$4 sm:$0xff]  }
0x2a20   : > { %12579 = vmatmul.mubr.msk.bf16.vlgmr.msra.gmra.mrb[96].mxu1 %vm1689_vm5, %v9127_v21  ;;  %v13421_v21 = vld [vmem:[#allocation26 + $0x8c] ss:$16 sps:$4 sm:$0xff]  }
0x2a21   : > { %12583 = vmatpush3.bf16.msra.mxu1 %v17865_v38  ;;  %12584 = vmatprep.mubr.msk.bf16.mxu1 %vm14371_vm4, %v17625_v50 }
0x2a22   : > { %v9179_v23 = vpop.permute.xlu1 %9178  ;;  %9448 = vmatprep.subr.bf16.mxu1 %v13394_v52  ;;  %9497 = vmatprep.subr.bf16.mxu0 %v13421_v21  ;;  %v13424_v52 = vld [vmem:[#allocation26 + $0xa4] ss:$16 sps:$4 sm:$0xff]  }
0x2a23   : > { %v9187_v6 = vrot.slane %v9179_v23, %v17859_v24  ;;  %9498 = vmatpush1.bf16.msra.mxu0 %v13419_v61  ;;  %v13425_v23 = vld [vmem:[#allocation26 + $0xa8] ss:$16 sps:$4 sm:$0xff]  }
0x2a25   : > { %v9188_v53 = vsel %vm1565_vm1, %v9187_v6, %v9183_v49  ;;  %v13427_v49 = vld [vmem:[#allocation26 + $0xac] ss:$16 sps:$4 sm:$0xff]   ;;  %v13430_v6 = vld [vmem:[#allocation26 + $0xc4] ss:$16 sps:$4 sm:$0xff]  }
0x2a26   : > { %v9189_v1 = vpack.c.b16 %v9188_v53, %v9188_v53  ;;  %9499 = vmatprep.subr.bf16.mxu0 %v13427_v49  ;;  %v13428_v53 = vld [vmem:[#allocation26 + $0xc0] ss:$16 sps:$4 sm:$0xff]  }
0x2a27   : > { %9500 = vmatpush1.bf16.msra.mxu0 %v13425_v23 }
0x2a28   : > { %12585 = vmatmul.mubr.msk.bf16.vlgmr.msra.gmra.mrb[100].mxu1 %vm1689_vm5, %v9189_v1  ;;  %v13431_v1 = vld [vmem:[#allocation26 + $0xc8] ss:$16 sps:$4 sm:$0xff]  }
0x2a29   : > { %9449 = vmatpush1.bf16.msra.mxu1 %v13392_v55  ;;  %9480 = vmatprep.mubr.bf16.mxu1 %v17623_v10  ;;  %v13433_v55 = vld [vmem:[#allocation26 + $0xcc] ss:$16 sps:$4 sm:$0xff]  }
0x2a2a   : > { %9450 = vmatprep.subr.bf16.mxu1 %v13400_v37  ;;  %9501 = vmatprep.subr.bf16.mxu0 %v13433_v55  ;;  %v13436_v37 = vld [vmem:[#allocation26 + $0xe4] ss:$16 sps:$4 sm:$0xff]  }
0x2a2b   : > { %9502 = vmatpush1.bf16.msra.mxu0 %v13431_v1 }
0x2a2d   : > { %9451 = vmatpush1.bf16.msra.mxu1 %v13398_v4  ;;  %v13439_v4 = vld [vmem:[#allocation26 + $0xec] ss:$16 sps:$4 sm:$0xff]  }
0x2a2e   : > { %9452 = vmatprep.subr.bf16.mxu1 %v13406_v35  ;;  %v13434_v35 = vld [vmem:[#allocation26 + $0xe0] ss:$16 sps:$4 sm:$0xff]   ;;  %9503 = vmatprep.subr.bf16.mxu0 %v13439_v4 }
0x2a31   : > { %9453 = vmatpush1.bf16.msra.mxu1 %v13404_v63  ;;  %v13437_v63 = vld [vmem:[#allocation26 + $0xe8] ss:$16 sps:$4 sm:$0xff]  }
0x2a32   : > { %9454 = vmatprep.subr.bf16.mxu1 %v13412_v34  ;;  %v13442_v34 = vld [vmem:[#allocation24 + $0x4] ss:$16 sps:$4 sm:$0xff]   ;;  %9504 = vmatpush1.bf16.msra.mxu0 %v13437_v63 }
0x2a35   : > { %9455 = vmatpush1.bf16.msra.mxu1 %v13410_v7  ;;  %v13445_v7 = vld [vmem:[#allocation24 + $0xc] ss:$16 sps:$4 sm:$0xff]  }
0x2a36   : > { %9456 = vmatprep.subr.bf16.mxu1 %v13418_v51  ;;  %9614 = vmatprep.subr.bf16.mxu0 %v13445_v7  ;;  %v8551_v51 = vrot.slane %v16847_v20, %v17853_v43  ;;  %v13440_v7 = vld [vmem:[#allocation24] ss:$16 sps:$4 sm:$0xff]  }
0x2a39   : > { %9457 = vmatpush1.bf16.msra.mxu1 %v13416_v42  ;;  %v8853_v42 = vadd.f32 %v16839_v5, %v8551_v51  ;;  %v13443_v5 = vld [vmem:[#allocation24 + $0x8] ss:$16 sps:$4 sm:$0xff]  }
0x2a3a   : > { %9458 = vmatprep.subr.bf16.mxu1 %v13424_v52 }
0x2a3b   : > { %v12264_v61 = vmul.f32 -1.442695, %v8853_v42  ;;  %v13448_v42 = vld [vmem:[#allocation24 + $0x24] ss:$16 sps:$4 sm:$0xff]  }
0x2a3d   : > { %9459 = vmatpush1.bf16.msra.mxu1 %v13422_v58  ;;  %13763 = vpow2.f32 %v12264_v61  ;;  %v13451_v61 = vld [vmem:[#allocation24 + $0x2c] ss:$16 sps:$4 sm:$0xff]  }
0x2a3e   : > { %9460 = vmatprep.subr.bf16.mxu1 %v13430_v6 }
0x2a41   : > { %9461 = vmatpush1.bf16.msra.mxu1 %v13428_v53 }
0x2a42   : > { %9462 = vmatprep.subr.bf16.mxu1 %v13436_v37 }
0x2a45   : > { %9463 = vmatpush1.bf16.msra.mxu1 %v13434_v35 }
0x2a46   : > { %9573 = vmatprep.subr.bf16.mxu1 %v13442_v34 }
0x2a47   : > { %v13764_v21 = vpop.eup %13763 }
0x2a48   : > { %v9236_v58 = vadd.f32 1.0, %v13764_v21  ;;  %v13446_v21 = vld [vmem:[#allocation24 + $0x20] ss:$16 sps:$4 sm:$0xff]  }
0x2a4a   : > { %13765 = vrcp.f32 %v9236_v58  ;;  %v13449_v58 = vld [vmem:[#allocation24 + $0x28] ss:$16 sps:$4 sm:$0xff]  }
0x2a54   : > { %v13766_v4 = vpop.eup %13765 }
0x2af3   : > { %v9165_v52 = vpop.f32.mrb[96].mxu1 }
0x2af4   : > { %v12580_v23 = vpop.f32.mrb[97].mxu1 }
0x2af5   : > { %v9168_v49 = vpop.f32.mrb[98].mxu1  ;;  %v17909_v23 = vld [vmem:[#allocation92_spill] sm:$0xff] }
0x2af6   : > { %v12581_v6 = vpop.f32.mrb[99].mxu1  ;;  %v8563_v49 = vrot.slane %v16847_v20, %v17909_v23 }
0x2af7   : > { %v17910_v6 = vld [vmem:[#allocation91_spill] sm:$0xff] }
0x2afb   : > { %v9227_v53 = vpop.f32.mrb[100].mxu1 }
0x2afc   : > { %v9241_v55 = vrot.slane %v9227_v53, 7  ;;  %v12586_v1 = vpop.f32.mrb[101].mxu1  ;;  %v8559_v53 = vrot.slane %v16847_v20, %v17910_v6 }
0x2afd   : > { %v9230_v37 = vpop.f32.mrb[102].mxu1 }
0x2afe   : > { %v9242_v35 = vsel %vm1576_vm2, %v9241_v55, %v9165_v52  ;;  %v12587_v63 = vpop.f32.mrb[103].mxu1  ;;  %v12265_v52 = vld [vmem:[%s14878_s4 + $0x6] sm:$0x1] }
0x2aff   : > { %v9244_v34 = vmul.f32 %v13766_v4, %v9242_v35  ;;  %v17911_v55 = vld [vmem:[#allocation93_spill] sm:$0xff]  ;;  %v8896_v4 = vadd.f32 %v16845_v33, %v8563_v49  ;;  %v8894_v35 = vadd.f32 %v16841_v14, %v8559_v53  ;;  %v13467_v49 = vld [vmem:[#allocation20 + $0x10] ss:$24 sps:$4 sm:$0xff]  }
0x2b00   : > { %v8567_v1 = vrot.slane %v16847_v20, %v17911_v55 }
0x2b01   : > { %v9255_v51 = vpack.c.bf16 %v9244_v34, %v9244_v34 }
0x2b02   : > { %v8935_v63 = vadd.f32 %v16851_v0, %v8567_v1 }
0x2b03   : > { %9481 = vmatmul.mubr.bf16.vlgmr.msra.gmra.mrb[104].mxu1 %v9255_v51  ;;  %9522 = vmatmul.mubr.bf16.vlgmr.msra.gmra.mrb[88].mxu0 %v9255_v51 }
0x2b04   : > { %9574 = vmatpush1.bf16.msra.mxu1 %v13440_v7  ;;  %9615 = vmatpush1.bf16.msra.mxu0 %v13443_v5 }
0x2b05   : > { %9575 = vmatprep.subr.bf16.mxu1 %v13448_v42  ;;  %9616 = vmatprep.subr.bf16.mxu0 %v13451_v61 }
0x2b06   : > { %9605 = vmatprep.mubr.bf16.mxu1 %v17623_v10  ;;  %9646 = vmatprep.mubr.bf16.mxu0 %v17623_v10 }
0x2b08   : > { %9576 = vmatpush1.bf16.msra.mxu1 %v13446_v21  ;;  %9617 = vmatpush1.bf16.msra.mxu0 %v13449_v58 }
0x2b09   : > { %10057 = vmatprep.subr.bf16.mxu1 %v16705_v40  ;;  %10098 = vmatprep.subr.bf16.mxu0 %v16709_v39  ;;  %v17903_v40 = vld [vmem:[#allocation57_spill] sm:$0xff]  ;;  %v17905_v39 = vld [vmem:[#allocation67_spill] sm:$0xff] }
0x2b0f   : > { %12306 = vmatmul.mubr.msk.bf16.vlgmr.msra.gmra.mrb[104].mxu1 %vm17535_vm6, %v12265_v52  ;;  %12307 = vmatmul.mubr.msk.bf16.vlgmr.msra.gmra.mrb[88].mxu0 %vm17535_vm6, %v12265_v52 }
0x2b10   : > { %10058 = vmatpush1.bf16.msra.mxu1 %v16707_v41  ;;  %10099 = vmatpush1.bf16.msra.mxu0 %v16712_v2  ;;  %v17904_v41 = vld [vmem:[#allocation58_spill] sm:$0xff]  ;;  %v13454_v2 = vld [vmem:[#allocation20 + $0x94] ss:$24 sps:$4 sm:$0xff]  }
0x2b11   : > { %10059 = vmatprep.subr.bf16.mxu1 %v16717_v22  ;;  %10100 = vmatprep.subr.bf16.mxu0 %v16721_v27  ;;  %v13452_v22 = vld [vmem:[#allocation20 + $0x90] ss:$24 sps:$4 sm:$0xff]   ;;  %v13455_v27 = vld [vmem:[#allocation20 + $0xc0] ss:$24 sps:$4 sm:$0xff]  }
0x2b12   : > { %10089 = vmatprep.mubr.bf16.mxu1 %v17623_v10  ;;  %10130 = vmatprep.mubr.bf16.mxu0 %v17623_v10 }
0x2b14   : > { %10060 = vmatpush1.bf16.msra.mxu1 %v16719_v19  ;;  %10101 = vmatpush1.bf16.msra.mxu0 %v16724_v8  ;;  %v13457_v19 = vld [vmem:[#allocation20 + $0xc4] ss:$24 sps:$4 sm:$0xff]   ;;  %v13460_v8 = vld [vmem:[#allocation20 + $0xf4] ss:$24 sps:$4 sm:$0xff]  }
0x2b15   : > { %10061 = vmatprep.subr.bf16.mxu1 %v16729_v3  ;;  %10102 = vmatprep.subr.bf16.mxu0 %v16733_v13  ;;  %v13458_v3 = vld [vmem:[#allocation20 + $0xf0] ss:$24 sps:$4 sm:$0xff]   ;;  %v13461_v13 = vld [vmem:[#allocation20 + $0x120] ss:$24 sps:$4 sm:$0xff]  }
0x2b18   : > { %10062 = vmatpush1.bf16.msra.mxu1 %v16731_v54  ;;  %10103 = vmatpush1.bf16.msra.mxu0 %v16736_v29  ;;  %v13463_v54 = vld [vmem:[#allocation20 + $0x124] ss:$24 sps:$4 sm:$0xff]   ;;  %v13466_v29 = vld [vmem:[#allocation20 + $0x154] ss:$24 sps:$4 sm:$0xff]  }
0x2b19   : > { %10104 = vmatprep.subr.bf16.mxu0 %v16742_v44  ;;  %10063 = vmatprep.subr.bf16.mxu1 %v13454_v2  ;;  %v13464_v44 = vld [vmem:[#allocation20 + $0x150] ss:$24 sps:$4 sm:$0xff]  }
0x2b1c   : > { %10105 = vmatpush1.bf16.msra.mxu0 %v16744_v26  ;;  %10064 = vmatpush1.bf16.msra.mxu1 %v13452_v22  ;;  %v13469_v26 = vld [vmem:[#allocation20 + $0x14] ss:$24 sps:$4 sm:$0xff]  }
0x2b1d   : > { %10106 = vmatprep.subr.bf16.mxu0 %v16752_v59  ;;  %10065 = vmatprep.subr.bf16.mxu1 %v13457_v19  ;;  %v17906_v59 = vld [vmem:[#allocation49_spill] sm:$0xff] }
0x2b20   : > { %10107 = vmatpush1.bf16.msra.mxu0 %v16750_v30  ;;  %10066 = vmatpush1.bf16.msra.mxu1 %v13455_v27  ;;  %v8495_v30 = vstv %s8494_s2  ;;  %s14198_s2 = scalar_lea.vmem %s17225_s14, 256 }
0x2b21   : > { %10108 = vmatprep.subr.bf16.mxu0 %v16755_v32  ;;  %10067 = vmatprep.subr.bf16.mxu1 %v13460_v8  ;;  %vm16946_vm14 = vcmp.lt.s32.totalorder %v17906_v59, %v8495_v30  ;;  %p14199_p8 = scmp.ne.s32.totalorder %s17225_s14, %s14198_s2 }
0x2b23   : > { %p14200_p13 = pnand %p14199_p8, %p17954_p12 }
0x2b24   : > { %10109 = vmatpush1.bf16.msra.mxu0 %v16761_v47  ;;  %10068 = vmatpush1.bf16.msra.mxu1 %v13458_v3  ;;  %v12311_v47 = vsel %vm16946_vm14, 1.0, %v17625_v50 }
0x2b25   : > { %10110 = vmatprep.subr.bf16.mxu0 %v16764_v45  ;;  %10069 = vmatprep.subr.bf16.mxu1 %v13463_v54  ;;  %9689 = vst.msk [vmem:[#allocation6 + $0xc] sm:$0x3] %vm2255_vm8, %v12311_v47  ;;  %v8555_v45 = vrot.slane %v16847_v20, %v14993_v60  ;;  %p14201_p1 = pneg %p14200_p13 }
0x2b27   : > { %v8855_v37 = vadd.f32 %v16843_v57, %v8555_v45 }
0x2b28   : > { %10111 = vmatpush1.bf16.msra.mxu0 %v17903_v40  ;;  %10070 = vmatpush1.bf16.msra.mxu1 %v13461_v13 }
0x2b29   : > { %10112 = vmatprep.subr.bf16.mxu0 %v17904_v41  ;;  %10071 = vmatprep.subr.bf16.mxu1 %v13466_v29 }
0x2b2c   : > { %10113 = vmatpush1.bf16.msra.mxu0 %v17905_v39  ;;  %10072 = vmatpush1.bf16.msra.mxu1 %v13464_v44 }
0x2b2d   : > { %12588 = vmatprep.subr.bf16.mxu0 %v17625_v50  ;;  %10139 = vmatprep.subr.bf16.mxu1 %v13469_v26 }
0x2be2   : > { %v9607_v34 = vpop.f32.mrb[104].mxu1  ;;  %v9648_v7 = vpop.f32.mrb[88].mxu0 }
0x2be3   : > { %v9655_v5 = vadd.f32 %v9607_v34, %v8855_v37  ;;  %v9657_v51 = vadd.f32 %v9648_v7, %v8896_v4  ;;  %v9609_v42 = vpop.f32.mrb[105].mxu1  ;;  %v9650_v61 = vpop.f32.mrb[89].mxu0  ;;  %v13472_v4 = vld [vmem:[#allocation20 + $0x44] ss:$24 sps:$4 sm:$0xff]   ;;  %v13476_v34 = vld [vmem:[#allocation20 + $0xa0] ss:$24 sps:$4 sm:$0xff]  }
0x2be4   : > { %v9656_v21 = vadd.f32 %v9609_v42, %v8894_v35  ;;  %v9658_v58 = vadd.f32 %v9650_v61, %v8935_v63  ;;  %v9611_v52 = vpop.f32.mrb[106].mxu1  ;;  %v9652_v40 = vpop.f32.mrb[90].mxu0  ;;  %v13475_v35 = vld [vmem:[#allocation20 + $0x74] ss:$24 sps:$4 sm:$0xff]   ;;  %v13478_v63 = vld [vmem:[#allocation20 + $0xa4] ss:$24 sps:$4 sm:$0xff]  }
0x2be5   : > { %v12308_v41 = vmul.f32 -1.442695, %v9655_v5  ;;  %v9612_v20 = vpop.f32.mrb[107].mxu1  ;;  %v9653_v39 = vpop.f32.mrb[91].mxu0  ;;  %v13481_v7 = vld [vmem:[#allocation20 + $0xd4] ss:$24 sps:$4 sm:$0xff]  }
0x2be6   : > { %v12309_v57 = vmul.f32 -1.442695, %v9656_v21  ;;  %v12310_v33 = vmul.f32 -1.442695, %v9658_v58  ;;  %v13479_v5 = vld [vmem:[#allocation20 + $0xd0] ss:$24 sps:$4 sm:$0xff]  }
0x2be7   : > { %13767 = vpow2.f32 %v12308_v41  ;;  %v13482_v42 = vld [vmem:[#allocation20 + $0x100] ss:$24 sps:$4 sm:$0xff]   ;;  %v13485_v61 = vld [vmem:[#allocation20 + $0x130] ss:$24 sps:$4 sm:$0xff]   ;;  %v13490_v21 = vld [vmem:[#allocation20 + $0x164] ss:$24 sps:$4 sm:$0xff]  }
0x2be8   : > { %13769 = vpow2.f32 %v12309_v57  ;;  %v13488_v58 = vld [vmem:[#allocation20 + $0x160] ss:$24 sps:$4 sm:$0xff]  }
0x2be9   : > { %13771 = vpow2.f32 %v12310_v33 }
0x2bea   : > { %13773 = vtanh.f32 %v9657_v51  ;;  %v13484_v51 = vld [vmem:[#allocation20 + $0x104] ss:$24 sps:$4 sm:$0xff]  }
0x2bf1   : > { %v13768_v14 = vpop.eup %13767 }
0x2bf2   : > { %v13770_v2 = vpop.eup %13769  ;;  %v9662_v0 = vadd.f32 1.0, %v13768_v14 }
0x2bf3   : > { %v9668_v22 = vadd.f32 1.0, %v13770_v2  ;;  %v13772_v19 = vpop.eup %13771  ;;  %v16993_v2 = vld [vmem:[#allocation21] sm:$0x3f] }
0x2bf4   : > { %13775 = vrcp.f32 %v9662_v0  ;;  %v13774_v27 = vpop.eup %13773  ;;  %v9675_v13 = vadd.f32 1.0, %v13772_v19  ;;  %v9810_v0 = vrot.slane %v16993_v2, %v17896_v16 }
0x2bf5   : > { %13777 = vrcp.f32 %v9668_v22 }
0x2bf6   : > { %13779 = vrcp.f32 %v9675_v13 }
0x2bfe   : > { %v13776_v8 = vpop.eup %13775 }
0x2bff   : > { %v13778_v3 = vpop.eup %13777  ;;  %v9679_v54 = vmul.f32 %v13776_v8, %v13774_v27 }
0x2c00   : > { %v9678_v29 = vmul.f32 %v13778_v3, %v16809_v46  ;;  %v13780_v30 = vpop.eup %13779 }
0x2c02   : > { %v9680_v44 = vadd.f32 %v9679_v54, %v9678_v29 }
0x2c04   : > { %13781 = vtanh.f32 %v9680_v44  ;;  %v16970_v26 = vsel %vm16946_vm14, %v9680_v44, %v16809_v46  ;;  %v13470_v46 = vld [vmem:[#allocation20 + $0x40] ss:$24 sps:$4 sm:$0xff]  }
0x2c0e   : > { %v13782_v47 = vpop.eup %13781 }
0x2c0f   : > { %v9682_v45 = vmul.f32 %v13782_v47, %v13780_v30 }
0x2c11   : > { %v9683_v53 = vpack.c.bf16 %v9682_v45, %v9682_v45  ;;  %v16975_v1 = vsel %vm16946_vm14, %v9682_v45, %v16814_v9  ;;  %v13473_v9 = vld [vmem:[#allocation20 + $0x70] ss:$24 sps:$4 sm:$0xff]  }
0x2c12   : > { %v9736_v37 = vpack.c.bf16 %v16975_v1, %v16975_v1 }
0x2c13   : > { %9685 = vst [vmem:[#allocation5 + $0x6] sm:$0x1] %v9683_v53 }
0x2c14   : > { %10090 = vmatmul.mubr.bf16.vlgmr.msra.gmra.mrb[108].mxu1 %v9736_v37  ;;  %10131 = vmatmul.mubr.bf16.vlgmr.msra.gmra.mrb[92].mxu0 %v9736_v37 }
0x2c15   : > { %10140 = vmatpush1.bf16.msra.mxu1 %v13467_v49  ;;  %10171 = vmatprep.mubr.bf16.mxu1 %v17623_v10  ;;  %v12361_v49 = vld [vmem:[#allocation23] ss:$0 sm:$0xff] }
0x2c16   : > { %10141 = vmatprep.subr.bf16.mxu1 %v13472_v4  ;;  %12589 = vmatpush3.bf16.msra.mxu0 %v15068_v17  ;;  %v13487_v17 = vld [vmem:[#allocation20 + $0x134] ss:$24 sps:$4 sm:$0xff]  }
0x2c17   : > { %12590 = vmatprep.mubr.msk.bf16.mxu0 %vm14371_vm4, %v17625_v50  ;;  %12594 = vmatprep.subr.bf16.mxu0 %v17625_v50 }
0x2c19   : > { %10142 = vmatpush1.bf16.msra.mxu1 %v13470_v46 }
0x2c1a   : > { %10143 = vmatprep.subr.bf16.mxu1 %v13475_v35 }
0x2c1d   : > { %10144 = vmatpush1.bf16.msra.mxu1 %v13473_v9 }
0x2c1e   : > { %10145 = vmatprep.subr.bf16.mxu1 %v13478_v63 }
0x2c21   : > { %10146 = vmatpush1.bf16.msra.mxu1 %v13476_v34 }
0x2c22   : > { %10147 = vmatprep.subr.bf16.mxu1 %v13481_v7 }
0x2c25   : > { %10148 = vmatpush1.bf16.msra.mxu1 %v13479_v5 }
0x2c26   : > { %10149 = vmatprep.subr.bf16.mxu1 %v13484_v51 }
0x2c29   : > { %10150 = vmatpush1.bf16.msra.mxu1 %v13482_v42 }
0x2c2a   : > { %10151 = vmatprep.subr.bf16.mxu1 %v13487_v17 }
0x2c2d   : > { %10152 = vmatpush1.bf16.msra.mxu1 %v13485_v61 }
0x2c2e   : > { %10153 = vmatprep.subr.bf16.mxu1 %v13490_v21 }
0x2c31   : > { %10154 = vmatpush1.bf16.msra.mxu1 %v13488_v58 }
0x2c34   : > { %10172 = vmatmul.mubr.bf16.vlgmr.msra.gmra.mrb[112].mxu1 %v9736_v37 }
0x2c35   : > { %10760 = vmatprep.mubr.bf16.mxu1 %v17623_v10 }
0x2ce7   : > { %v16985_v52 = vpop.f32.mrb[108].mxu1  ;;  %v16987_v40 = vpop.f32.mrb[92].mxu0 }
0x2ce8   : > { %v16989_v41 = vpop.f32.mrb[109].mxu1  ;;  %v16991_v20 = vpop.f32.mrb[93].mxu0 }
0x2ce9   : > { %v10095_v39 = vpop.f32.mrb[110].mxu1  ;;  %v10136_v57 = vpop.f32.mrb[94].mxu0 }
0x2cea   : > { %v10096_v33 = vpop.f32.mrb[111].mxu1  ;;  %v10137_v14 = vpop.f32.mrb[95].mxu0 }
0x2d07   : > { %v16997_v22 = vpop.f32.mrb[112].mxu1 }
0x2d08   : > { %v10175_v19 = vpop.f32.mrb[113].mxu1 }
0x2d09   : > { %v10176_v27 = vadd.f32 %v10175_v19, %v9810_v0  ;;  %v10177_v8 = vpop.f32.mrb[114].mxu1 }
0x2d0a   : > { %v10178_v3 = vpop.f32.mrb[115].mxu1 }
0x2d0b   : > { %v10187_v54 = vrot.slane %v10176_v27, %v17897_v36 }
0x2d0d   : > { %v10188_v13 = vcombine.high %v10187_v54, %v10187_v54  ;;  %v10195_v29 = vrot.slane %v10187_v54, %v17897_v36 }
0x2d0f   : > { %v10202_v44 = vrot.slane %v10188_v13, %v17897_v36  ;;  %v10206_v30 = vrot.slane %v10195_v29, %v17853_v43 }
0x2d11   : > { %v10214_v47 = vadd.f32 %v10206_v30, %v17898_v12  ;;  %v10213_v45 = vadd.f32 %v10206_v30, %v17899_v48  ;;  %v10210_v16 = vrot.slane %v10202_v44, %v17853_v43 }
0x2d13   : > { %v10218_v53 = vmax.f32 %v10214_v47, 0.0  ;;  %v10217_v37 = vmax.f32 %v10213_v45, 0.0  ;;  %v10215_v4 = vadd.f32 %v10210_v16, %v17900_v18  ;;  %v10216_v63 = vadd.f32 %v10210_v16, %v17902_v11 }
0x2d15   : > { %v10229_v46 = vmul.f32 %v12361_v49, %v10218_v53  ;;  %v10228_v35 = vmul.f32 %v12361_v49, %v10217_v37  ;;  %v10219_v9 = vmax.f32 %v10215_v4, 0.0  ;;  %v10220_v7 = vmax.f32 %v10216_v63, 0.0 }
0x2d17   : > { %10234 = vadd.xlane.f32.xlu0 %v10229_v46  ;;  %10232 = vadd.xlane.f32.xlu1 %v10228_v35  ;;  %v10230_v34 = vmul.f32 %v12361_v49, %v10219_v9  ;;  %v10231_v12 = vmul.f32 %v12361_v49, %v10220_v7 }
0x2d1b   : > { %10236 = vadd.xlane.f32.xlu0 %v10230_v34 }
0x2d1f   : > { %10238 = vadd.xlane.f32.xlu0 %v10231_v12 }
0x2da4   : > { %v10235_v48 = vpop.xlane.xlu0 %10234  ;;  %v10233_v5 = vpop.xlane.xlu1 %10232 }
0x2da5   : > { %v10251_v42 = vrot.slane %v10235_v48, %v17859_v24  ;;  %v10247_v17 = vrot.slane %v10233_v5, %v17860_v25 }
0x2da7   : > { %v10252_v11 = vsel %vm1565_vm1, %v10251_v42, %v10247_v17  ;;  %v17914_v42 = vld [vmem:[#allocation82_spill] sm:$0xff]  ;;  %v17915_v17 = vld [vmem:[#allocation79_spill] sm:$0xff] }
0x2da8   : > { %v10237_v51 = vpop.xlane.xlu0 %10236 }
0x2da9   : > { %v10256_v61 = vrot.slane %v10237_v51, %v17860_v25 }
0x2dac   : > { %v10239_v18 = vpop.xlane.xlu0 %10238 }
0x2dad   : > { %v10260_v21 = vrot.slane %v10239_v18, %v17859_v24 }
0x2daf   : > { %v10261_v58 = vsel %vm1565_vm1, %v10260_v21, %v10256_v61  ;;  %v17917_v61 = vld [vmem:[#allocation73_spill] sm:$0xff]  ;;  %v17918_v21 = vld [vmem:[#allocation100_spill] sm:$0xff] }
0x2db0   : > { %v10262_v39 = vsel %vm1576_vm2, %v10261_v58, %v10252_v11  ;;  %v17919_v11 = vld [vmem:[#allocation104_spill] sm:$0xff]  ;;  %v9734_v58 = vstv %s9733_s21  ;;  %s14202_s21 = sshll.u32 %s14372_s26, 4  ;;  %s14203_s21 = int_to_ptr.vmem [resolvable:$false] %s14202_s21 }
0x2db1   : > { %v10264_v57 = vsel %vm17536_vm3, %v10262_v39, -inf  ;;  %vm17038_vm15 = vcmp.lt.s32.totalorder %v17906_v59, %v9734_v58  ;;  %v17936_v58 = vld [vmem:[#allocation102_spill] sm:$0xff]  ;;  %p14205_p7 = scmp.lt.s32.totalorder %s17225_s14, %s14203_s21 }
0x2db2   : > { %10265 = vmax.xlane.f32.xlu0 %v10264_v57  ;;  %v12411_v57 = vsel %vm17038_vm15, 1.0, %v17625_v50 }
0x2db3   : > { %10928 = vst.msk [vmem:[#allocation6 + $0xe] sm:$0x3] %vm2255_vm8, %v12411_v57  ;;  %v17937_v57 = vld [vmem:[#allocation52_spill] sm:$0xff] }
0x2e3f   : > { %v10266_v33 = vpop.xlane.xlu0 %10265 }
0x2e40   : > { %v10271_v14 = vrot.slane %v10266_v33, %v17853_v43  ;;  %v10275_v0 = vrot.slane %v10266_v33, %v14993_v60 }
0x2e42   : > { %v10278_v19 = vsub.f32 %v10233_v5, %v10271_v14  ;;  %v10279_v27 = vsub.f32 %v10235_v48, %v10271_v14  ;;  %v10280_v8 = vsub.f32 %v10237_v51, %v10275_v0  ;;  %v10281_v3 = vsub.f32 %v10239_v18, %v10275_v0  ;;  %v17912_v5 = vld [vmem:[#allocation110_spill] sm:$0xff]  ;;  %v17913_v51 = vld [vmem:[#allocation69_spill] sm:$0xff]  ;;  %v17916_v18 = vld [vmem:[#allocation95_spill] sm:$0xff] }
0x2e44   : > { %v10282_v54 = vmul.f32 1.442695, %v10278_v19  ;;  %v10284_v13 = vmul.f32 1.442695, %v10279_v27  ;;  %v10286_v29 = vmul.f32 1.442695, %v10280_v8 }
0x2e45   : > { %v10288_v44 = vmul.f32 1.442695, %v10281_v3  ;;  %v11195_v8 = vld [vmem:[#allocation6] sm:$0x3] }
0x2e46   : > { %13783 = vpow2.f32 %v10282_v54  ;;  %vm11203_vm0 = vcmp.gt.f32.partialorder %v11195_v8, 0.0 }
0x2e47   : > { %13785 = vpow2.f32 %v10284_v13 }
0x2e48   : > { %13787 = vpow2.f32 %v10286_v29 }
0x2e49   : > { %13789 = vpow2.f32 %v10288_v44  ;;  %v11197_v44 = vld [vmem:[#allocation6 + $0x4] sm:$0x3] }
0x2e4a   : > { %vm11205_vm8 = vcmp.gt.f32.partialorder %v11197_v44, 0.0  ;;  %v13514_v44 = vld [vmem:[#allocation26 + $0x6c] ss:$16 sps:$4 sm:$0xff]  }
0x2e50   : > { %v13784_v30 = vpop.eup %13783 }
0x2e51   : > { %v13786_v47 = vpop.eup %13785  ;;  %10295 = vperm.xlu0 %12923, %v13784_v30  }
0x2e52   : > { %10298 = vperm.xlu1 %12922, %v13786_v47   ;;  %v13788_v45 = vpop.eup %13787 }
0x2e53   : > { %v13790_v16 = vpop.eup %13789 }
0x2e55   : > { %10301 = vperm.xlu0 %12923, %v13788_v45  }
0x2e56   : > { %10304 = vperm.xlu1 %12922, %v13790_v16  }
0x2ed0   : > { %v10296_v49 = vpop.permute.xlu0 %10295 }
0x2ed1   : > { %v10299_v53 = vpop.permute.xlu1 %10298  ;;  %v10309_v4 = vrot.slane %v10296_v49, %v17860_v25  ;;  %v11211_v49 = vsel %vm11203_vm0, 1, %v17623_v10 }
0x2ed2   : > { %v10313_v37 = vrot.slane %v10299_v53, %v17859_v24 }
0x2ed4   : > { %v10302_v46 = vpop.permute.xlu0 %10301  ;;  %v10314_v34 = vsel %vm1565_vm1, %v10313_v37, %v10309_v4  ;;  %v11199_v4 = vld [vmem:[#allocation6 + $0x8] sm:$0x3] }
0x2ed5   : > { %v10305_v35 = vpop.permute.xlu1 %10304  ;;  %v10318_v9 = vrot.slane %v10302_v46, %v17860_v25  ;;  %vm11207_vm6 = vcmp.gt.f32.partialorder %v11199_v4, 0.0  ;;  %v11201_v46 = vld [vmem:[#allocation6 + $0xc] sm:$0x3] }
0x2ed6   : > { %v10322_v63 = vrot.slane %v10305_v35, %v17859_v24 }
0x2ed8   : > { %v10323_v7 = vsel %vm1565_vm1, %v10322_v63, %v10318_v9  ;;  %v17922_v9 = vld [vmem:[#allocation59_spill] sm:$0xff]  ;;  %v17923_v63 = vld [vmem:[#allocation60_spill] sm:$0xff] }
0x2ed9   : > { %v10324_v12 = vsel %vm1576_vm2, %v10323_v7, %v10314_v34  ;;  %v17924_v34 = vld [vmem:[#allocation61_spill] sm:$0xff]  ;;  %v17925_v7 = vld [vmem:[#allocation62_spill] sm:$0xff] }
0x2eda   : > { %v10326_v48 = vsel %vm17536_vm3, %v10324_v12, 0.0  ;;  %vm11209_vm3 = vcmp.gt.f32.partialorder %v11201_v46, 0.0  ;;  %v17926_v12 = vld [vmem:[#allocation111_spill] sm:$0xff] }
0x2edb   : > { %10327 = vadd.xlane.f32.xlu0 %v10326_v48  ;;  %v11217_v35 = vsel %vm11209_vm3, 1, %v17623_v10  ;;  %v17927_v48 = vld [vmem:[#allocation108_spill] sm:$0xff] }
0x2ef1   : > { %3501 = vperm.xlu0 %12923, %v17912_v5   ;;  %v17928_v5 = vld [vmem:[#allocation109_spill] sm:$0xff] }
0x2ef5   : > { %4746 = vperm.xlu0 %12923, %v17913_v51   ;;  %v17929_v51 = vld [vmem:[#allocation68_spill] sm:$0xff] }
0x2ef9   : > { %5979 = vperm.xlu0 %12923, %v17914_v42   ;;  %v17930_v42 = vld [vmem:[#allocation63_spill] sm:$0xff] }
0x2efd   : > { %5985 = vperm.xlu0 %12923, %v17915_v17   ;;  %v17931_v17 = vld [vmem:[#allocation66_spill] sm:$0xff] }
0x2f01   : > { %7218 = vperm.xlu0 %12923, %v17916_v18   ;;  %v17932_v18 = vld [vmem:[#allocation81_spill] sm:$0xff] }
0x2f05   : > { %7224 = vperm.xlu0 %12923, %v17917_v61   ;;  %v17933_v61 = vld [vmem:[#allocation86_spill] sm:$0xff] }
0x2f09   : > { %8457 = vperm.xlu0 %12923, %v17918_v21   ;;  %v17934_v21 = vld [vmem:[#allocation97_spill] sm:$0xff] }
0x2f0d   : > { %8463 = vperm.xlu0 %12923, %v17919_v11   ;;  %v17935_v11 = vld [vmem:[#allocation65_spill] sm:$0xff] }
0x2f11   : > { %9696 = vperm.xlu0 %12923, %v16886_v62  }
0x2f15   : > { %9702 = vperm.xlu0 %12923, %v16892_v28  }
0x2f68   : > { %v10328_v33 = vpop.xlane.xlu0 %10327 }
0x2f69   : > { %v10333_v14 = vrot.slane %v10328_v33, %v17853_v43  ;;  %v10337_v62 = vrot.slane %v10328_v33, %v14993_v60  ;;  %v11196_v33 = vld [vmem:[#allocation6 + $0x2] sm:$0x3] }
0x2f6a   : > { %vm11204_vm3 = vcmp.gt.f32.partialorder %v11196_v33, 0.0  ;;  %v13517_v33 = vld [vmem:[#allocation26 + $0x84] ss:$16 sps:$4 sm:$0xff]  }
0x2f6b   : > { %13791 = vrcp.f32 %v10333_v14  ;;  %v11198_v14 = vld [vmem:[#allocation6 + $0x6] sm:$0x3] }
0x2f6c   : > { %13793 = vrcp.f32 %v10337_v62  ;;  %v11212_v62 = vsel %vm11204_vm3, 1, %v17623_v10 }
0x2f75   : > { %v13792_v28 = vpop.eup %13791 }
0x2f76   : > { %v10341_v0 = vmul.f32 %v13792_v28, %v13784_v30  ;;  %v10342_v19 = vmul.f32 %v13792_v28, %v13786_v47  ;;  %v13794_v27 = vpop.eup %13793  ;;  %v11213_v30 = vsel %vm11205_vm8, 1, %v17623_v10  ;;  %v11200_v28 = vld [vmem:[#allocation6 + $0xa] sm:$0x3] }
0x2f77   : > { %v10344_v54 = vmul.f32 %v13794_v27, %v13788_v45  ;;  %v10345_v29 = vmul.f32 %v13794_v27, %v13790_v16  ;;  %v11215_v45 = vsel %vm11207_vm6, 1, %v17623_v10  ;;  %vm11206_vm6 = vcmp.gt.f32.partialorder %v11198_v14, 0.0  ;;  %v11202_v27 = vld [vmem:[#allocation6 + $0xe] sm:$0x3] }
0x2f78   : > { %10935 = vperm.xlu0 %12923, %v10341_v0   ;;  %v10346_v3 = vpack.c.bf16 %v10342_v19, %v10341_v0  ;;  %v11214_v0 = vsel %vm11206_vm6, 1, %v17623_v10  ;;  %vm11208_vm0 = vcmp.gt.f32.partialorder %v11200_v28, 0.0  ;;  %vm11210_vm8 = vcmp.gt.f32.partialorder %v11202_v27, 0.0 }
0x2f79   : > { %v10347_v37 = vpack.c.bf16 %v10345_v29, %v10344_v54  ;;  %v11216_v8 = vsel %vm11208_vm0, 1, %v17623_v10 }
0x2f7a   : > { %v10349_v13 = vunpack.c.l.b16 %v10346_v3  ;;  %v10350_v53 = vunpack.c.h.b16 %v10346_v3  ;;  %v13502_v3 = vld [vmem:[#allocation26 + $0x2c] ss:$16 sps:$4 sm:$0xff]  }
0x2f7b   : > { %v10411_v47 = vunpack.c.l.b16 %v10347_v37  ;;  %v10412_v16 = vunpack.c.h.b16 %v10347_v37 }
0x2f7c   : > { %10941 = vperm.xlu0 %12923, %v10344_v54   ;;  %10352 = vperm.xlu1 %12922, %v10349_v13   ;;  %v13500_v54 = vld [vmem:[#allocation26 + $0x28] ss:$16 sps:$4 sm:$0xff]   ;;  %v13508_v13 = vld [vmem:[#allocation26 + $0x4c] ss:$16 sps:$4 sm:$0xff]  }
0x2f80   : > { %11220 = vperm.xlu0 %12923, %v11211_v49   ;;  %10355 = vperm.xlu1 %12922, %v10350_v53   ;;  %v13512_v49 = vld [vmem:[#allocation26 + $0x68] ss:$16 sps:$4 sm:$0xff]  }
0x2f84   : > { %11226 = vperm.xlu0 %12923, %v11213_v30   ;;  %10414 = vperm.xlu1 %12922, %v10411_v47  }
0x2f88   : > { %11232 = vperm.xlu0 %12923, %v11215_v45   ;;  %10417 = vperm.xlu1 %12922, %v10412_v16   ;;  %v13493_v16 = vld [vmem:[#allocation26 + $0x4] ss:$16 sps:$4 sm:$0xff]  }
0x2f8c   : > { %11238 = vperm.xlu0 %12923, %v11217_v35   ;;  %2263 = vperm.xlu1 %12922, %v17922_v9  }
0x2f90   : > { %2266 = vperm.xlu1 %12922, %v17923_v63  }
0x2f94   : > { %2269 = vperm.xlu1 %12922, %v17924_v34  }
0x2f98   : > { %2272 = vperm.xlu1 %12922, %v17925_v7   ;;  %v13491_v7 = vld [vmem:[#allocation26] ss:$16 sps:$4 sm:$0xff]  }
0x2f9c   : > { %3504 = vperm.xlu1 %12922, %v17926_v12  }
0x2fa0   : > { %3507 = vperm.xlu1 %12922, %v17927_v48  }
0x2fa4   : > { %3510 = vperm.xlu1 %12922, %v17928_v5   ;;  %v13499_v5 = vld [vmem:[#allocation26 + $0x24] ss:$16 sps:$4 sm:$0xff]  }
0x2fa8   : > { %4740 = vperm.xlu1 %12922, %v17929_v51   ;;  %v13497_v51 = vld [vmem:[#allocation26 + $0x20] ss:$16 sps:$4 sm:$0xff]  }
0x2fac   : > { %4743 = vperm.xlu1 %12922, %v17930_v42   ;;  %v13505_v42 = vld [vmem:[#allocation26 + $0x44] ss:$16 sps:$4 sm:$0xff]  }
0x2fb0   : > { %4749 = vperm.xlu1 %12922, %v17931_v17   ;;  %v13503_v17 = vld [vmem:[#allocation26 + $0x40] ss:$16 sps:$4 sm:$0xff]  }
0x2fb4   : > { %5982 = vperm.xlu1 %12922, %v17932_v18  }
0x2fb8   : > { %5988 = vperm.xlu1 %12922, %v17933_v61   ;;  %v13511_v61 = vld [vmem:[#allocation26 + $0x64] ss:$16 sps:$4 sm:$0xff]  }
0x2fbc   : > { %7221 = vperm.xlu1 %12922, %v17934_v21   ;;  %v3502_v21 = vpop.permute.xlu0 %3501 }
0x2fc0   : > { %7227 = vperm.xlu1 %12922, %v17935_v11  }
0x2fc4   : > { %8460 = vperm.xlu1 %12922, %v17936_v58   ;;  %v13509_v58 = vld [vmem:[#allocation26 + $0x60] ss:$16 sps:$4 sm:$0xff]  }
0x2fc8   : > { %8466 = vperm.xlu1 %12922, %v17937_v57  }
0x2fcc   : > { %9699 = vperm.xlu1 %12922, %v16888_v31   ;;  %v11218_v31 = vsel %vm11210_vm8, 1, %v17623_v10 }
0x2fd0   : > { %9705 = vperm.xlu1 %12922, %v16894_v56   ;;  %v13494_v56 = vld [vmem:[#allocation26 + $0x8] ss:$16 sps:$4 sm:$0xff]  }
0x2fd4   : > { %10938 = vperm.xlu1 %12922, %v10342_v19   ;;  %v13496_v19 = vld [vmem:[#allocation26 + $0xc] ss:$16 sps:$4 sm:$0xff]  }
0x2fd5   : > { %10728 = vmatprep.subr.bf16.mxu1 %v13496_v19 }
0x2fd6   : > { %10729 = vmatpush1.bf16.msra.mxu1 %v13494_v56 }
0x2fd7   : > { %10730 = vmatprep.subr.bf16.mxu1 %v13502_v3 }
0x2fd8   : > { %10944 = vperm.xlu1 %12922, %v10345_v29   ;;  %v13506_v29 = vld [vmem:[#allocation26 + $0x48] ss:$16 sps:$4 sm:$0xff]  }
0x2fda   : > { %10731 = vmatpush1.bf16.msra.mxu1 %v13500_v54 }
0x2fdb   : > { %10732 = vmatprep.subr.bf16.mxu1 %v13508_v13 }
0x2fdc   : > { %11223 = vperm.xlu1 %12922, %v11212_v62  }
0x2fde   : > { %10733 = vmatpush1.bf16.msra.mxu1 %v13506_v29 }
0x2fdf   : > { %10734 = vmatprep.subr.bf16.mxu1 %v13514_v44 }
0x2fe0   : > { %11229 = vperm.xlu1 %12922, %v11214_v0  }
0x2fe2   : > { %10735 = vmatpush1.bf16.msra.mxu1 %v13512_v49 }
0x2fe4   : > { %11235 = vperm.xlu1 %12922, %v11216_v8   ;;  %v13515_v8 = vld [vmem:[#allocation26 + $0x80] ss:$16 sps:$4 sm:$0xff]  }
0x2fe8   : > { %11241 = vperm.xlu1 %12922, %v11218_v31   ;;  %v4747_v31 = vpop.permute.xlu0 %4746 }
0x2fec   : > { %v5980_v29 = vpop.permute.xlu0 %5979 }
0x2ffb   : > { %v10353_v53 = vpop.permute.xlu1 %10352 }
0x2ffc   : > { %v10360_v4 = vrot.slane %v10353_v53, %v17860_v25  ;;  %v3515_v53 = vrot.slane %v3502_v21, %v17860_v25 }
0x2fff   : > { %v10356_v37 = vpop.permute.xlu1 %10355 }
0x3000   : > { %v10364_v30 = vrot.slane %v10356_v37, %v17859_v24 }
0x3002   : > { %v10365_v47 = vsel %vm1565_vm1, %v10364_v30, %v10360_v4 }
0x3003   : > { %v10366_v46 = vpack.c.b16 %v10365_v47, %v10365_v47  ;;  %v10415_v45 = vpop.permute.xlu1 %10414 }
0x3004   : > { %v10422_v9 = vrot.slane %v10415_v45, %v17860_v25 }
0x3005   : > { %12591 = vmatmul.mubr.msk.bf16.vlgmr.msra.gmra.mrb[96].mxu0 %vm1689_vm5, %v10366_v46  ;;  %v5986_v46 = vpop.permute.xlu0 %5985 }
0x3006   : > { %12595 = vmatpush3.bf16.msra.mxu0 %v17865_v38  ;;  %12596 = vmatprep.mubr.msk.bf16.mxu0 %vm14371_vm4, %v17625_v50 }
0x3007   : > { %v10418_v35 = vpop.permute.xlu1 %10417  ;;  %10687 = vmatprep.subr.bf16.mxu0 %v13493_v16 }
0x3008   : > { %v10426_v63 = vrot.slane %v10418_v35, %v17859_v24 }
0x300a   : > { %v10427_v34 = vsel %vm1565_vm1, %v10426_v63, %v10422_v9 }
0x300b   : > { %v10428_v12 = vpack.c.b16 %v10427_v34, %v10427_v34  ;;  %v2264_v48 = vpop.permute.xlu1 %2263  ;;  %v7219_v34 = vpop.permute.xlu0 %7218 }
0x300c   : > { %v2277_v14 = vrot.slane %v2264_v48, %v17860_v25  ;;  %v4763_v48 = vrot.slane %v4747_v31, %v17860_v25 }
0x300d   : > { %12597 = vmatmul.mubr.msk.bf16.vlgmr.msra.gmra.mrb[100].mxu0 %vm1689_vm5, %v10428_v12  ;;  %vm17939_vm5 = vcmask 123904  }
0x300e   : > { %10688 = vmatpush1.bf16.msra.mxu0 %v13491_v7  ;;  %10719 = vmatprep.mubr.bf16.mxu0 %v17623_v10 }
0x300f   : > { %v2267_v38 = vpop.permute.xlu1 %2266  ;;  %10689 = vmatprep.subr.bf16.mxu0 %v13499_v5 }
0x3010   : > { %v2281_v11 = vrot.slane %v2267_v38, %v17859_v24 }
0x3012   : > { %10690 = vmatpush1.bf16.msra.mxu0 %v13497_v51  ;;  %v2282_v0 = vsel %vm1565_vm1, %v2281_v11, %v2277_v14  ;;  %v6002_v14 = vrot.slane %v5986_v46, %v17860_v25 }
0x3013   : > { %v2270_v18 = vpop.permute.xlu1 %2269  ;;  %10691 = vmatprep.subr.bf16.mxu0 %v13505_v42 }
0x3014   : > { %v2286_v62 = vrot.slane %v2270_v18, %v17860_v25 }
0x3016   : > { %10692 = vmatpush1.bf16.msra.mxu0 %v13503_v17  ;;  %v7225_v17 = vpop.permute.xlu0 %7224 }
0x3017   : > { %v2273_v57 = vpop.permute.xlu1 %2272  ;;  %10693 = vmatprep.subr.bf16.mxu0 %v13511_v61 }
0x3018   : > { %v2290_v28 = vrot.slane %v2273_v57, %v17859_v24 }
0x301a   : > { %v2291_v27 = vsel %vm1565_vm1, %v2290_v28, %v2286_v62  ;;  %10694 = vmatpush1.bf16.msra.mxu0 %v13509_v58  ;;  %v8458_v28 = vpop.permute.xlu0 %8457 }
0x301b   : > { %v2292_v56 = vsel %vm1576_vm2, %v2291_v27, %v2282_v0  ;;  %v3505_v19 = vpop.permute.xlu1 %3504  ;;  %10695 = vmatprep.subr.bf16.mxu0 %v13517_v33  ;;  %v5993_v33 = vrot.slane %v5980_v29, %v17860_v25  ;;  %v7232_v29 = vrot.slane %v7219_v34, %v17860_v25 }
0x301c   : > { %v2294_v54 = vsel %vm15281_vm7, %v2292_v56, 0.0  ;;  %v3519_v44 = vrot.slane %v3505_v19, %v17859_v24  ;;  %vm17941_vm7 = vmmov %vm17939_vm5  ;;  %v13518_v56 = vld [vmem:[#allocation26 + $0x88] ss:$16 sps:$4 sm:$0xff]  }
0x301d   : > { %2295 = vst.msk [vmem:[%s14919_s30] sm:$0x3] %vm17939_vm5, %v2294_v54 }
0x301e   : > { %10696 = vmatpush1.bf16.msra.mxu0 %v13515_v8  ;;  %v3520_v30 = vsel %vm1565_vm1, %v3519_v44, %v3515_v53  ;;  %v8464_v54 = vpop.permute.xlu0 %8463  ;;  %v7241_v44 = vrot.slane %v7225_v17, %v17860_v25 }
0x301f   : > { %v3508_v13 = vpop.permute.xlu1 %3507 }
0x3020   : > { %v3524_v37 = vrot.slane %v3508_v13, %v17860_v25 }
0x3023   : > { %v3511_v49 = vpop.permute.xlu1 %3510 }
0x3024   : > { %v3528_v4 = vrot.slane %v3511_v49, %v17859_v24 }
0x3026   : > { %v3529_v47 = vsel %vm1565_vm1, %v3528_v4, %v3524_v37 }
0x3027   : > { %v3530_v45 = vsel %vm1576_vm2, %v3529_v47, %v3520_v30  ;;  %v4741_v16 = vpop.permute.xlu1 %4740  ;;  %v13538_v47 = vld [vmem:[#allocation26 + $0xec] ss:$16 sps:$4 sm:$0xff]  }
0x3028   : > { %v3532_v9 = vsel %vm15576_vm9, %v3530_v45, 0.0  ;;  %v4754_v5 = vrot.slane %v4741_v16, %v17860_v25  ;;  %vm17943_vm9 = vmmov %vm17939_vm5  ;;  %v9697_v45 = vpop.permute.xlu0 %9696 }
0x3029   : > { %11812 = vst.msk [vmem:[%s14919_s30 + $0x2] sm:$0x3] %vm17941_vm7, %v3532_v9  ;;  %v8471_v9 = vrot.slane %v8458_v28, %v17860_v25 }
0x302b   : > { %v4744_v63 = vpop.permute.xlu1 %4743 }
0x302c   : > { %v4758_v7 = vrot.slane %v4744_v63, %v17859_v24  ;;  %v8480_v63 = vrot.slane %v8464_v54, %v17860_v25 }
0x302e   : > { %v4759_v38 = vsel %vm1565_vm1, %v4758_v7, %v4754_v5 }
0x302f   : > { %v4750_v12 = vpop.permute.xlu1 %4749 }
0x3030   : > { %v4767_v51 = vrot.slane %v4750_v12, %v17859_v24 }
0x3032   : > { %v4768_v42 = vsel %vm1565_vm1, %v4767_v51, %v4763_v48  ;;  %v9703_v48 = vpop.permute.xlu0 %9702 }
0x3033   : > { %v4769_v18 = vsel %vm1576_vm2, %v4768_v42, %v4759_v38  ;;  %v5983_v61 = vpop.permute.xlu1 %5982  ;;  %v9719_v21 = vrot.slane %v9703_v48, %v17860_v25 }
0x3034   : > { %v4771_v11 = vsel %vm15893_vm10, %v4769_v18, 0.0  ;;  %v5997_v58 = vrot.slane %v5983_v61, %v17859_v24  ;;  %vm17945_vm10 = vmmov %vm17939_vm5  ;;  %v9710_v61 = vrot.slane %v9697_v45, %v17860_v25  ;;  %v13536_v45 = vld [vmem:[#allocation26 + $0xe8] ss:$16 sps:$4 sm:$0xff]  }
0x3035   : > { %11912 = vst.msk [vmem:[%s14919_s30 + $0x4] sm:$0x3] %vm17943_vm9, %v4771_v11 }
0x3036   : > { %v5998_v0 = vsel %vm1565_vm1, %v5997_v58, %v5993_v33  ;;  %v10936_v17 = vpop.permute.xlu0 %10935 }
0x3037   : > { %v5989_v57 = vpop.permute.xlu1 %5988 }
0x3038   : > { %v6006_v62 = vrot.slane %v5989_v57, %v17859_v24 }
0x303a   : > { %v6007_v27 = vsel %vm1565_vm1, %v6006_v62, %v6002_v14  ;;  %v10942_v62 = vpop.permute.xlu0 %10941 }
0x303b   : > { %v6008_v8 = vsel %vm1576_vm2, %v6007_v27, %v5998_v0  ;;  %v7222_v31 = vpop.permute.xlu1 %7221  ;;  %v10949_v27 = vrot.slane %v10936_v17, %v17860_v25 }
0x303c   : > { %v6010_v19 = vsel %vm16179_vm11, %v6008_v8, 0.0  ;;  %v7236_v3 = vrot.slane %v7222_v31, %v17859_v24  ;;  %vm17947_vm11 = vmmov %vm17939_vm5  ;;  %v10958_v8 = vrot.slane %v10942_v62, %v17860_v25  ;;  %v13527_v25 = vld [vmem:[#allocation26 + $0xc0] ss:$16 sps:$4 sm:$0xff]  }
0x303d   : > { %12012 = vst.msk [vmem:[%s14919_s30 + $0x6] sm:$0x3] %vm17945_vm10, %v6010_v19  ;;  %v13520_v19 = vld [vmem:[#allocation26 + $0x8c] ss:$16 sps:$4 sm:$0xff]   ;;  %v13545_v62 = vld [vmem:[#allocation24 + $0x20] ss:$16 sps:$4 sm:$0xff]  }
0x303e   : > { %v7237_v53 = vsel %vm1565_vm1, %v7236_v3, %v7232_v29  ;;  %10736 = vmatprep.subr.bf16.mxu1 %v13520_v19  ;;  %v13523_v29 = vld [vmem:[#allocation26 + $0xa4] ss:$16 sps:$4 sm:$0xff]   ;;  %v13556_v19 = vld [vmem:[#allocation27 + $0x28] sm:$0xff]  }
0x303f   : > { %v7228_v13 = vpop.permute.xlu1 %7227  ;;  %10737 = vmatpush1.bf16.msra.mxu1 %v13518_v56  ;;  %10697 = vmatprep.subr.bf16.mxu0 %v13523_v29  ;;  %v13555_v56 = vld [vmem:[#allocation27 + $0x20] sm:$0xff]   ;;  %v9798_v29 = vrot.slane %v16993_v2, %v17910_v6 }
0x3040   : > { %v7245_v49 = vrot.slane %v7228_v13, %v17859_v24  ;;  %v13521_v13 = vld [vmem:[#allocation26 + $0xa0] ss:$16 sps:$4 sm:$0xff]  }
0x3041   : > { %10698 = vmatpush1.bf16.msra.mxu0 %v13521_v13  ;;  %v9802_v13 = vrot.slane %v16993_v2, %v17909_v23 }
0x3042   : > { %v7246_v37 = vsel %vm1565_vm1, %v7245_v49, %v7241_v44  ;;  %v13524_v44 = vld [vmem:[#allocation26 + $0xa8] ss:$16 sps:$4 sm:$0xff]  }
0x3043   : > { %v7247_v4 = vsel %vm1576_vm2, %v7246_v37, %v7237_v53  ;;  %v8461_v30 = vpop.permute.xlu1 %8460  ;;  %v13526_v53 = vld [vmem:[#allocation26 + $0xac] ss:$16 sps:$4 sm:$0xff]  }
0x3044   : > { %v7249_v46 = vsel %vm16496_vm12, %v7247_v4, 0.0  ;;  %v8475_v16 = vrot.slane %v8461_v30, %v17859_v24  ;;  %vm17948_vm12 = vmmov %vm17939_vm5  ;;  %10738 = vmatprep.subr.bf16.mxu1 %v13526_v53  ;;  %v13532_v37 = vld [vmem:[#allocation26 + $0xcc] ss:$16 sps:$4 sm:$0xff]   ;;  %v13530_v4 = vld [vmem:[#allocation26 + $0xc8] ss:$16 sps:$4 sm:$0xff]   ;;  %v10135_v53 = vadd.f32 %v16991_v20, %v9802_v13 }
0x3045   : > { %12112 = vst.msk [vmem:[%s14919_s30 + $0x8] sm:$0x3] %vm17947_vm11, %v7249_v46  ;;  %10739 = vmatpush1.bf16.msra.mxu1 %v13524_v44  ;;  %v13535_v30 = vld [vmem:[#allocation26 + $0xe4] ss:$16 sps:$4 sm:$0xff]   ;;  %v13533_v46 = vld [vmem:[#allocation26 + $0xe0] ss:$16 sps:$4 sm:$0xff]   ;;  %v9806_v44 = vrot.slane %v16993_v2, %v17911_v55 }
0x3046   : > { %v8476_v7 = vsel %vm1565_vm1, %v8475_v16, %v8471_v9  ;;  %10740 = vmatprep.subr.bf16.mxu1 %v13532_v37  ;;  %v13541_v16 = vld [vmem:[#allocation24 + $0x4] ss:$16 sps:$4 sm:$0xff]   ;;  %v9790_v9 = vrot.slane %v16993_v2, %v17853_v43 }
0x3047   : > { %v8467_v35 = vpop.permute.xlu1 %8466 }
0x3048   : > { %v8484_v34 = vrot.slane %v8467_v35, %v17859_v24  ;;  %v13544_v35 = vld [vmem:[#allocation24 + $0xc] ss:$16 sps:$4 sm:$0xff]  }
0x3049   : > { %10741 = vmatpush1.bf16.msra.mxu1 %v13530_v4 }
0x304a   : > { %v8485_v12 = vsel %vm1565_vm1, %v8484_v34, %v8480_v63  ;;  %10742 = vmatprep.subr.bf16.mxu1 %v13538_v47  ;;  %v10092_v63 = vadd.f32 %v16985_v52, %v9790_v9  ;;  %v13542_v52 = vld [vmem:[#allocation24 + $0x8] ss:$16 sps:$4 sm:$0xff]  }
0x304b   : > { %v8486_v5 = vsel %vm1576_vm2, %v8485_v12, %v8476_v7  ;;  %v9700_v51 = vpop.permute.xlu1 %9699 }
0x304c   : > { %v8488_v38 = vsel %vm16782_vm13, %v8486_v5, 0.0  ;;  %v9714_v42 = vrot.slane %v9700_v51, %v17859_v24  ;;  %vm17949_vm13 = vmmov %vm17939_vm5  ;;  %v12364_v34 = vmul.f32 -1.442695, %v10092_v63 }
0x304d   : > { %12212 = vst.msk [vmem:[%s14919_s30 + $0xa] sm:$0x3] %vm17948_vm12, %v8488_v38  ;;  %10743 = vmatpush1.bf16.msra.mxu1 %v13536_v45 }
0x304e   : > { %v9715_v58 = vsel %vm1565_vm1, %v9714_v42, %v9710_v61  ;;  %10853 = vmatprep.subr.bf16.mxu1 %v13544_v35  ;;  %13795 = vpow2.f32 %v12364_v34 }
0x304f   : > { %v9706_v18 = vpop.permute.xlu1 %9705 }
0x3050   : > { %v9723_v11 = vrot.slane %v9706_v18, %v17859_v24 }
0x3052   : > { %v9724_v57 = vsel %vm1565_vm1, %v9723_v11, %v9719_v21 }
0x3053   : > { %v9725_v33 = vsel %vm1576_vm2, %v9724_v57, %v9715_v58  ;;  %v10939_v15 = vpop.permute.xlu1 %10938  ;;  %v13539_v57 = vld [vmem:[#allocation24] ss:$16 sps:$4 sm:$0xff]  }
0x3054   : > { %v9727_v14 = vsel %vm16946_vm14, %v9725_v33, 0.0  ;;  %v10953_v28 = vrot.slane %v10939_v15, %v17859_v24  ;;  %vm17950_vm14 = vmmov %vm17939_vm5  ;;  %v13547_v15 = vld [vmem:[#allocation24 + $0x24] ss:$16 sps:$4 sm:$0xff]  }
0x3055   : > { %12312 = vst.msk [vmem:[%s14919_s30 + $0xc] sm:$0x3] %vm17949_vm13, %v9727_v14  ;;  %v13550_v14 = vld [vmem:[#allocation24 + $0x2c] ss:$16 sps:$4 sm:$0xff]  }
0x3056   : > { %v10954_v3 = vsel %vm1565_vm1, %v10953_v28, %v10949_v27  ;;  %v13548_v28 = vld [vmem:[#allocation24 + $0x28] ss:$16 sps:$4 sm:$0xff]   ;;  %v13551_v27 = vld [vmem:[#allocation27] sm:$0xff]  }
0x3057   : > { %v10945_v0 = vpop.permute.xlu1 %10944 }
0x3058   : > { %v10962_v31 = vrot.slane %v10945_v0, %v17859_v24  ;;  %v13529_v24 = vld [vmem:[#allocation26 + $0xc4] ss:$16 sps:$4 sm:$0xff]   ;;  %v13796_v7 = vpop.eup %13795  ;;  %v12365_v0 = vld [vmem:[%s14878_s4 + $0x7] sm:$0x1]  ;;  %s12432_s4 = sshll.u32 %s17624_s23, 8 }
0x3059   : > { %10699 = vmatprep.subr.bf16.mxu0 %v13529_v24  ;;  %v10475_v12 = vadd.f32 1.0, %v13796_v7  ;;  %v10133_v24 = vadd.f32 %v16987_v40, %v9798_v29  ;;  %s17223_s20 = scalar_lea.hbm %s17953_s15, %s12432_s4 }
0x305a   : > { %v10963_v32 = vsel %vm1565_vm1, %v10962_v31, %v10958_v8  ;;  %10700 = vmatpush1.bf16.msra.mxu0 %v13527_v25  ;;  %vm17951_vm1 = vcmask 261120   ;;  %v13552_v8 = vld [vmem:[#allocation27 + $0x8] sm:$0xff]   ;;  %v13554_v31 = vld [vmem:[#allocation27 + $0x18] sm:$0xff]  }
0x305b   : > { %v10964_v54 = vsel %vm1576_vm2, %v10963_v32, %v10954_v3  ;;  %10701 = vmatprep.subr.bf16.mxu0 %v13535_v30  ;;  %13797 = vrcp.f32 %v10475_v12  ;;  %v13557_v3 = vld [vmem:[#allocation27 + $0x30] sm:$0xff]   ;;  %v13558_v32 = vld [vmem:[#allocation27 + $0x38] sm:$0xff]  }
0x305c   : > { %v10966_v49 = vsel %vm17038_vm15, %v10964_v54, 0.0  ;;  %v9794_v54 = vrot.slane %v16993_v2, %v14993_v60 }
0x305d   : > { %12412 = vst.msk [vmem:[%s14919_s30 + $0xe] sm:$0x3] %vm17950_vm14, %v10966_v49  ;;  %s14204_s30 = scalar_lea.vmem %s14203_s21, 512 }
0x305e   : > { %10702 = vmatpush1.bf16.msra.mxu0 %v13533_v46  ;;  %v10094_v49 = vadd.f32 %v16989_v41, %v9794_v54  ;;  %p14206_p0 = scmp.lt.s32.totalorder %s14204_s30, %s14198_s2 }
0x305f   : > { %10812 = vmatprep.subr.bf16.mxu0 %v13541_v16 }
0x3060   : > { %p14207_p11 = por %p14206_p0, %p14205_p7 }
0x3062   : > { %p14208_p10 = pnand %p14207_p11, %p14201_p1 }
0x3065   : > { %v13798_v21 = vpop.eup %13797 }
0x30d8   : > { %v10404_v48 = vpop.f32.mrb[96].mxu0 }
0x30d9   : > { %v12592_v5 = vpop.f32.mrb[97].mxu0 }
0x30da   : > { %v10407_v51 = vpop.f32.mrb[98].mxu0 }
0x30db   : > { %v12593_v38 = vpop.f32.mrb[99].mxu0 }
0x30e0   : > { %v10466_v42 = vpop.f32.mrb[100].mxu0 }
0x30e1   : > { %v10480_v17 = vrot.slane %v10466_v42, 7  ;;  %v12598_v18 = vpop.f32.mrb[101].mxu0 }
0x30e2   : > { %v10469_v61 = vpop.f32.mrb[102].mxu0 }
0x30e3   : > { %v10481_v11 = vsel %vm1576_vm2, %v10480_v17, %v10404_v48  ;;  %v12599_v58 = vpop.f32.mrb[103].mxu0  ;;  %vm17952_vm2 = vmmov %vm17951_vm1 }
0x30e4   : > { %v10483_v43 = vmul.f32 %v13798_v21, %v10481_v11  ;;  %v10976_v58 = vld [vmem:[#allocation5 + $0x3] sm:$0x1] }
0x30e6   : > { %v10494_v33 = vpack.c.bf16 %v10483_v43, %v10483_v43  ;;  %v10974_v43 = vld [vmem:[#allocation5 + $0x1] sm:$0x1] }
0x30e8   : > { %10720 = vmatmul.mubr.bf16.vlgmr.msra.gmra.mrb[104].mxu0 %v10494_v33  ;;  %10761 = vmatmul.mubr.bf16.vlgmr.msra.gmra.mrb[116].mxu1 %v10494_v33  ;;  %v10973_v33 = vld [vmem:[#allocation5] sm:$0x1] }
0x30e9   : > { %10813 = vmatpush1.bf16.msra.mxu0 %v13539_v57  ;;  %10854 = vmatpush1.bf16.msra.mxu1 %v13542_v52  ;;  %v10975_v57 = vld [vmem:[#allocation5 + $0x2] sm:$0x1] }
0x30ea   : > { %10814 = vmatprep.subr.bf16.mxu0 %v13547_v15  ;;  %10855 = vmatprep.subr.bf16.mxu1 %v13550_v14  ;;  %v11013_v52 = vcombine.low %v10975_v57, %v10976_v58  ;;  %v10978_v15 = vld [vmem:[#allocation5 + $0x5] sm:$0x1]  ;;  %v11012_v14 = vcombine.low %v10973_v33, %v10974_v43 }
0x30eb   : > { %10844 = vmatprep.mubr.bf16.mxu0 %v17623_v10  ;;  %10885 = vmatprep.mubr.bf16.mxu1 %v17623_v10  ;;  %v13553_v10 = vld [vmem:[#allocation27 + $0x10] sm:$0xff]  }
0x30ed   : > { %10815 = vmatpush1.bf16.msra.mxu0 %v13545_v62  ;;  %10856 = vmatpush1.bf16.msra.mxu1 %v13548_v28  ;;  %v11029_v28 = vrot.slane %v11013_v52, %v17897_v36 }
0x30ee   : > { %12600 = vmatprep.subr.bf16.mxu0 %v17625_v50 }
0x30f4   : > { %12406 = vmatmul.mubr.msk.bf16.vlgmr.msra.gmra.mrb[104].mxu0 %vm17951_vm1, %v12365_v0  ;;  %12407 = vmatmul.mubr.msk.bf16.vlgmr.msra.gmra.mrb[116].mxu1 %vm17952_vm2, %v12365_v0  ;;  %v10979_v0 = vld [vmem:[#allocation5 + $0x6] sm:$0x1] }
0x30f5   : > { %12616 = vmatprep.mubr.msk.bf16.mxu0 %vm14371_vm4, %v17625_v50  ;;  %12601 = vmatpush3.bf16.msra.mxu0 %v13551_v27 }
0x30f6   : > { %12602 = vmatprep.subr.bf16.mxu0 %v17625_v50 }
0x30f9   : > { %12603 = vmatpush3.bf16.msra.mxu0 %v13552_v8 }
0x30fa   : > { %12604 = vmatprep.subr.bf16.mxu0 %v17625_v50 }
0x30fd   : > { %12605 = vmatpush3.bf16.msra.mxu0 %v13553_v10 }
0x30fe   : > { %12606 = vmatprep.subr.bf16.mxu0 %v17625_v50 }
0x3101   : > { %12607 = vmatpush3.bf16.msra.mxu0 %v13554_v31 }
0x3102   : > { %12608 = vmatprep.subr.bf16.mxu0 %v17625_v50 }
0x3105   : > { %12609 = vmatpush3.bf16.msra.mxu0 %v13555_v56 }
0x3106   : > { %12610 = vmatprep.subr.bf16.mxu0 %v17625_v50 }
0x3109   : > { %12611 = vmatpush3.bf16.msra.mxu0 %v13556_v19 }
0x310a   : > { %12612 = vmatprep.subr.bf16.mxu0 %v17625_v50 }
0x310d   : > { %12613 = vmatpush3.bf16.msra.mxu0 %v13557_v3 }
0x310e   : > { %12614 = vmatprep.subr.bf16.mxu0 %v17625_v50  ;;  %v10174_v50 = vadd.f32 %v16997_v22, %v9806_v44 }
0x3111   : > { %12615 = vmatpush3.bf16.msra.mxu0 %v13558_v32 }
0x31c7   : > { %v10846_v25 = vpop.f32.mrb[104].mxu0  ;;  %v10887_v37 = vpop.f32.mrb[116].mxu1 }
0x31c8   : > { %v10894_v60 = vadd.f32 %v10846_v25, %v10094_v49  ;;  %v10896_v4 = vadd.f32 %v10887_v37, %v10135_v53  ;;  %v10848_v30 = vpop.f32.mrb[105].mxu0  ;;  %v10889_v23 = vpop.f32.mrb[117].mxu1 }
0x31c9   : > { %v10895_v47 = vadd.f32 %v10848_v30, %v10133_v24  ;;  %v10897_v46 = vadd.f32 %v10889_v23, %v10174_v50  ;;  %v10850_v6 = vpop.f32.mrb[106].mxu0  ;;  %v10891_v45 = vpop.f32.mrb[118].mxu1 }
0x31ca   : > { %v12408_v16 = vmul.f32 -1.442695, %v10894_v60  ;;  %v10851_v55 = vpop.f32.mrb[107].mxu0  ;;  %v10892_v2 = vpop.f32.mrb[119].mxu1 }
0x31cb   : > { %v12409_v41 = vmul.f32 -1.442695, %v10895_v47  ;;  %v12410_v20 = vmul.f32 -1.442695, %v10897_v46 }
0x31cc   : > { %13799 = vpow2.f32 %v12408_v16 }
0x31cd   : > { %13801 = vpow2.f32 %v12409_v41 }
0x31ce   : > { %13803 = vpow2.f32 %v12410_v20 }
0x31cf   : > { %13805 = vtanh.f32 %v10896_v4 }
0x31d6   : > { %v13800_v40 = vpop.eup %13799 }
0x31d7   : > { %v13802_v35 = vpop.eup %13801  ;;  %v10901_v22 = vadd.f32 1.0, %v13800_v40 }
0x31d8   : > { %v10907_v9 = vadd.f32 1.0, %v13802_v35  ;;  %v13804_v63 = vpop.eup %13803 }
0x31d9   : > { %13807 = vrcp.f32 %v10901_v22  ;;  %v13806_v34 = vpop.eup %13805  ;;  %v10914_v5 = vadd.f32 1.0, %v13804_v63 }
0x31da   : > { %13809 = vrcp.f32 %v10907_v9 }
0x31db   : > { %13811 = vrcp.f32 %v10914_v5 }
0x31e3   : > { %v13808_v7 = vpop.eup %13807 }
0x31e4   : > { %v13810_v12 = vpop.eup %13809  ;;  %v10918_v48 = vmul.f32 %v13808_v7, %v13806_v34 }
0x31e5   : > { %v10917_v51 = vmul.f32 %v13810_v12, %v16970_v26  ;;  %v13812_v17 = vpop.eup %13811 }
0x31e7   : > { %v10919_v38 = vadd.f32 %v10918_v48, %v10917_v51 }
0x31e9   : > { %13813 = vtanh.f32 %v10919_v38  ;;  %v10970_v42 = vsel %vm17038_vm15, %v10919_v38, %v16970_v26  ;;  %v10977_v26 = vld [vmem:[#allocation5 + $0x4] sm:$0x1] }
0x31ea   : > { %10972 = vst [vmem:[#allocation3] sm:$0x3] %v10970_v42  ;;  %v11014_v62 = vcombine.low %v10977_v26, %v10978_v15 }
0x31ec   : > { %v11036_v8 = vrot.slane %v11014_v62, %v17897_v36 }
0x31f3   : > { %v13814_v18 = vpop.eup %13813 }
0x31f4   : > { %v10921_v61 = vmul.f32 %v13814_v18, %v13812_v17 }
0x31f6   : > { %v10922_v21 = vpack.c.bf16 %v10921_v61, %v10921_v61  ;;  %v10969_v11 = vsel %vm17038_vm15, %v10921_v61, %v16975_v1  ;;  %v11022_v1 = vrot.slane %v11012_v14, %v17897_v36 }
0x31f7   : > { %10971 = vst [vmem:[#allocation2] sm:$0x3] %v10969_v11 }
0x31f8   : > { %10924 = vst [vmem:[#allocation5 + $0x7] sm:$0x1] %v10922_v21  ;;  %v11044_v31 = vcombine.low %v11022_v1, %v11029_v28 }
0x31fa   : > { %v11052_v19 = vrot.slane %v11044_v31, %v17897_v36 }
0x31ff   : > { %v10980_v27 = vld [vmem:[#allocation5 + $0x7] sm:$0x1] }
0x3200   : > { %v11015_v39 = vcombine.low %v10979_v0, %v10980_v27 }
0x3202   : > { %v11043_v10 = vrot.slane %v11015_v39, %v17897_v36 }
0x3204   : > { %v11045_v56 = vcombine.low %v11036_v8, %v11043_v10 }
0x3206   : > { %v11059_v3 = vrot.slane %v11045_v56, %v17897_v36 }
0x3208   : > { %v11060_v32 = vcombine.low %v11052_v19, %v11059_v3 }
0x320a   : > { %12617 = vmatmul.mubr.bf16.vlgmr.msra.gmra.mrb[108].mxu0 %v11060_v32 }
0x320b   : > { %14211 = shalt.err (!%p14208_p10)
}
0x320c   : > { %s14212_s4 = scalar_lea.hbm %s17223_s20, 256  ;;  %s14216_s26 = scalar_lea.hbm %s17953_s15, 512 }
0x320d   : > { %p14213_p3 = scmp.ne.s32.totalorder %s17223_s20, %s14212_s4  ;;  %p14217_p5 = scmp.lt.u32.totalorder %s17223_s20, %s17953_s15 }
0x320e   : > { %p14218_p2 = scmp.lt.u32.totalorder %s14216_s26, %s14212_s4  ;;  %p14220_p8 = scmp.lt.u32.totalorder %s14212_s4, %s17223_s20 }
0x320f   : > { %p14214_p4 = pnand %p14213_p3, %p17954_p12 }
0x3210   : > { %p14219_p6 = por %p14218_p2, %p14217_p5 }
0x3211   : > { %p14215_p9 = pneg %p14214_p4 }
0x3212   : > { %p14221_p13 = por %p14220_p8, %p14219_p6 }
0x3214   : > { %p14222_p1 = pnand %p14221_p13, %p14215_p9 }
0x3216   : > { %14225 = shalt.err (!%p14222_p1)
}
0x3217   : > { %s14373_s2 = smov 32   ;;  %s14374_s30 = smov 2   ;;  %v11221_v36 = vpop.permute.xlu0 %11220  ;;  %v11224_v13 = vpop.permute.xlu1 %11223  ;;  %v14375_v29 = vmov 1983009808   ;;  %v12413_v50 = vld [vmem:[#allocation29] ss:$0 sm:$0xff] }
0x3218   : > { %s17955_s5 = scalar_lea.sflag [#allocation32], %s14875_s27  ;;  %v11155_v44 = vunpack.c.l.s4 %v14375_v29  ;;  %vm11243_vm4 = vcmp.eq.s32.totalorder %v11221_v36, 1  ;;  %vm11244_vm0 = vcmp.eq.s32.totalorder %v11224_v13, 1  ;;  %s17956_s19 = sld [smem:[#allocation120_spill]] }
0x3219   : > { %12733 = dma.vmem_to_hbm [thread:$0]  (%p17954_p12), %s17225_s14, 256, %s17223_s20, %s17955_s5, %s14373_s2, %s14373_s2, %s14374_s30  }
0x321a   : > { %v11156_v24 = vunpack.c.0.s8 %v11155_v44  ;;  %s12431_s5 = sshll.u32 %s17624_s23, 7  ;;  %s11295_s14 = sshll.u32 %s14917_s3, 4  ;;  %s17267_s14 = int_to_ptr.vmem [resolvable:$true] %s11295_s14 }
0x321b   : > { %v11227_v54 = vpop.permute.xlu0 %11226  ;;  %v11230_v53 = vpop.permute.xlu1 %11229  ;;  %s11276_s24 = scalar_lea.sflag [#allocation11], %s14875_s27  ;;  %s14226_s1 = scalar_lea.vmem %s17267_s14, 128 }
0x321c   : > { %v11159_v25 = vsub.s32 %v11156_v24, %v17906_v59  ;;  %vm11245_vm15 = vcmp.eq.s32.totalorder %v11227_v54, 1  ;;  %vm11246_vm8 = vcmp.eq.s32.totalorder %v11230_v53, 1  ;;  %p14227_p7 = scmp.ne.s32.totalorder %s17267_s14, %s14226_s1  ;;  %s14376_s26 = smov [#allocation30]  }
0x321d   : > { %s14230_s21 = sshll.u32 %s14376_s26, 4  ;;  %s14231_s21 = int_to_ptr.vmem [resolvable:$false] %s14230_s21 }
0x321e   : > { %s17265_s4 = scalar_lea.hbm %s17956_s19, %s12431_s5  ;;  %p14228_p0 = pnand %p14227_p7, %p17954_p12 }
0x321f   : > { %v11233_v49 = vpop.permute.xlu0 %11232  ;;  %v11236_v4 = vpop.permute.xlu1 %11235  ;;  %s14232_s2 = scalar_lea.vmem %s14231_s21, 256  ;;  %p14233_p10 = scmp.lt.s32.totalorder %s17267_s14, %s14231_s21 }
0x3220   : > { %vm11247_vm3 = vcmp.eq.s32.totalorder %v11233_v49, 1  ;;  %vm11248_vm5 = vcmp.eq.s32.totalorder %v11236_v4, 1  ;;  %p14229_p11 = pneg %p14228_p0  ;;  %p14234_p3 = scmp.lt.s32.totalorder %s14232_s2, %s14226_s1 }
0x3222   : > { %p14235_p4 = por %p14234_p3, %p14233_p10 }
0x3223   : > { %v11239_v37 = vpop.permute.xlu0 %11238  ;;  %v11242_v35 = vpop.permute.xlu1 %11241 }
0x3224   : > { %vm11249_vm6 = vcmp.eq.s32.totalorder %v11239_v37, 1  ;;  %vm11250_vm7 = vcmp.eq.s32.totalorder %v11242_v35, 1  ;;  %p14236_p9 = pnand %p14235_p4, %p14229_p11 }
0x32dd   : > { %v11144_v60 = vpop.f32.mrb[108].mxu0 }
0x32de   : > { %v11145_v30 = vadd.f32 %v12413_v50, %v11144_v60  ;;  %v12618_v23 = vpop.f32.mrb[109].mxu0 }
0x32df   : > { %v11147_v47 = vpop.f32.mrb[110].mxu0 }
0x32e0   : > { %v11153_v46 = vcombine.high %v11145_v30, %v11145_v30  ;;  %v11160_v6 = vrot.slane %v11145_v30, %v11159_v25  ;;  %v11148_v45 = vadd.f32 %v12413_v50, %v11147_v47  ;;  %v12619_v16 = vpop.f32.mrb[111].mxu0 }
0x32e2   : > { %v11167_v55 = vrot.slane %v11153_v46, %v11159_v25  ;;  %v11168_v2 = vcombine.high %v11160_v6, %v11160_v6  ;;  %v11251_v41 = vsel %vm11243_vm4, %v11160_v6, 0.0  ;;  %v11170_v59 = vcombine.high %v11148_v45, %v11148_v45 }
0x32e3   : > { %v11259_v20 = vpack.c.bf16 %v11251_v41, %v11251_v41  ;;  %v11177_v40 = vrot.slane %v11148_v45, %v11159_v25 }
0x32e4   : > { %v11169_v22 = vcombine.high %v11167_v55, %v11167_v55  ;;  %v11252_v9 = vsel %vm11244_vm0, %v11168_v2, 0.0  ;;  %v11253_v63 = vsel %vm11245_vm15, %v11167_v55, 0.0  ;;  %v11184_v34 = vrot.slane %v11170_v59, %v11159_v25 }
0x32e5   : > { %v11260_v7 = vpack.c.bf16 %v11252_v9, %v11252_v9  ;;  %v11261_v12 = vpack.c.bf16 %v11253_v63, %v11253_v63  ;;  %11267 = vst [vmem:[%s14917_s3] sm:$0x1] %v11259_v20  ;;  %v11185_v48 = vcombine.high %v11177_v40, %v11177_v40  ;;  %v11255_v5 = vsel %vm11247_vm3, %v11177_v40, 0.0 }
0x32e6   : > { %v11254_v51 = vsel %vm11246_vm8, %v11169_v22, 0.0  ;;  %v11186_v38 = vcombine.high %v11184_v34, %v11184_v34  ;;  %v11257_v42 = vsel %vm11249_vm6, %v11184_v34, 0.0  ;;  %v11263_v17 = vpack.c.bf16 %v11255_v5, %v11255_v5 }
0x32e7   : > { %v11262_v18 = vpack.c.bf16 %v11254_v51, %v11254_v51  ;;  %11268 = vst [vmem:[%s14917_s3 + $0x1] sm:$0x1] %v11260_v7  ;;  %11269 = vst [vmem:[%s14917_s3 + $0x2] sm:$0x1] %v11261_v12  ;;  %v11256_v61 = vsel %vm11248_vm5, %v11185_v48, 0.0  ;;  %v11265_v21 = vpack.c.bf16 %v11257_v42, %v11257_v42 }
0x32e8   : > { %v11258_v11 = vsel %vm11250_vm7, %v11186_v38, 0.0  ;;  %v11264_v58 = vpack.c.bf16 %v11256_v61, %v11256_v61  ;;  %11271 = vst [vmem:[%s14917_s3 + $0x4] sm:$0x1] %v11263_v17 }
0x32e9   : > { %11270 = vst [vmem:[%s14917_s3 + $0x3] sm:$0x1] %v11262_v18  ;;  %v11266_v43 = vpack.c.bf16 %v11258_v11, %v11258_v11  ;;  %11273 = vst [vmem:[%s14917_s3 + $0x6] sm:$0x1] %v11265_v21 }
0x32ea   : > { %11272 = vst [vmem:[%s14917_s3 + $0x5] sm:$0x1] %v11264_v58 }
0x32eb   : > { %11274 = vst [vmem:[%s14917_s3 + $0x7] sm:$0x1] %v11266_v43 }
0x32ec   : > { %14239 = shalt.err (!%p14236_p9)
}
0x32ed   : > { %s14240_s3 = scalar_lea.hbm %s17265_s4, 128  ;;  %s14244_s23 = scalar_lea.hbm %s17956_s19, 256 }
0x32ee   : > { %p14241_p5 = scmp.ne.s32.totalorder %s17265_s4, %s14240_s3  ;;  %p14245_p8 = scmp.lt.u32.totalorder %s17265_s4, %s17956_s19 }
0x32ef   : > { %p14246_p13 = scmp.lt.u32.totalorder %s14244_s23, %s14240_s3  ;;  %p14248_p7 = scmp.lt.u32.totalorder %s14240_s3, %s17265_s4 }
0x32f0   : > { %p14242_p2 = pnand %p14241_p5, %p17954_p12 }
0x32f1   : > { %p14247_p1 = por %p14246_p13, %p14245_p8 }
0x32f2   : > { %p14243_p6 = pneg %p14242_p2 }
0x32f3   : > { %p14249_p0 = por %p14248_p7, %p14247_p1 }
0x32f5   : > { %p14250_p11 = pnand %p14249_p0, %p14243_p6 }
0x32f7   : > { %14253 = shalt.err (!%p14250_p11)
}
0x32f8   : > { %s14377_s1 = smov 16   ;;  %s14378_s21 = smov 1  }
0x32f9   : > { %12732 = dma.vmem_to_hbm [thread:$0]  (%p17954_p12), %s17267_s14, 128, %s17265_s4, %s11276_s24, %s14377_s1, %s14377_s1, %s14378_s21  }
0x32fa PF: > { %s17957_s2 = sld [smem:[#allocation44_spill]]  ;;  %p17958_p10 = scmp.ne.s32.totalorder %s17565_s18, 0 }
0x32fb   : > { %p17959_p3 = scmp.ge.s32.totalorder %s14342_s17, 2 }
0x32fd   : > { %p12778_p4 = pnand %p17959_p3, %p17958_p10 }
0x3300   : > { %s11327_s30 = sand.u32 1, %s17957_s2  }
0x3301   : > { %s11328_s3 = scalar_lea.sflag [#allocation11], %s11327_s30 }
0x3302   : > { %14313 = dma.done.wait (!%p12778_p4), %s11328_s3, 128  }
0x3303   : > { %14315 = vsyncadd (!%p12778_p4), %s11328_s3, 4294967168  ;;  %s11337_s5 = scalar_lea.sflag [#allocation32], %s11327_s30 }
0x3304   : > { %14317 = dma.done.wait (!%p12778_p4), %s11337_s5, 256  }
0x3305   : > { %14319 = vsyncadd (!%p12778_p4), %s11337_s5, 4294967040  ;;  %s45_s17 = sadd.s32 1, %s14342_s17   ;;  %s17960_s28 = sld [smem:[#allocation45_spill]] }
0x3306   : > { %p42_p9 = scmp.ge.s32.totalorder %s45_s17, 4   ;;  %s17961_s27 = smov %s17967_s29 }
0x3307   : > { %s17962_s29 = smov %s14330_s0  ;;  %s17963_s0 = smov %s14814_s25 }
0x3308   : > { %s17964_s30 = smov %s14338_s16  ;;  %s17965_s16 = smov %s17961_s27 }
0x3309   :  { %44 = sbr.rel (!%p42_p9) target bundleno = 28 (0x1c), region = 216 }
0x3310   :  { %11342 = vsyncpa [#allocation10], 1 }
0x3311   :  { %11344 = vsyncpa [#allocation10 + $0x1], 1 }
0x3312   :  { %11345 = vsyncpa [#allocation13], 1 }
0x3313   :  { %11347 = vsyncpa [#allocation13 + $0x1], 1 }
0x3314   :  { %11348 = vsyncpa [#allocation16], 1 }
0x3315   :  { %11349 = vsyncpa [#allocation19], 1 }
0x3316   :  { %11350 = vsyncpa [#allocation22], 1 }
0x3317   :  { %11351 = vsyncpa [#allocation25], 1 }
0x3318   :  { %11352 = vsyncpa [#allocation28], 1 }
0x3319   :  { %11353 = vsyncpa [#allocation11], 1 }
0x331a   :  { %11355 = vsyncpa [#allocation11 + $0x1], 1 }
0x331b   :  { %11356 = vsyncpa [#allocation32], 1 }
0x331c   :  { %11358 = vsyncpa [#allocation32 + $0x1], 1 }

</bundles_post_ra>
